<compile_context>
chip_gen: v7x
topology: tpu7x:2x2x1
jax: 0.10.0
libtpu: 0.0.40
codegen_flags: <defaults>
</compile_context>

<pallas_src>
import functools

import jax
import jax.numpy as jnp
from jax.experimental import pallas as pl
from jax.experimental.pallas import tpu as pltpu

_EPS = 1e-5


# ------------------------------ in-kernel helpers ---------------------------

def _bn_relu(acc, gamma, beta):
    """Training-mode BatchNorm2d over the (N*H*W, C) slab, folded into a single
    per-channel multiply-add, followed by ReLU."""
    mean = jnp.mean(acc, axis=0, keepdims=True)
    var = jnp.mean((acc - mean) ** 2, axis=0, keepdims=True)
    scale = gamma * jax.lax.rsqrt(var + _EPS)        # (1, C)
    bias = beta - mean * scale                       # (1, C)
    return jnp.maximum(acc * scale + bias, 0.0)


def _fill_patches(src_ref, pcol_ref, h, w, c):
    """Scatter the 9 shifted 3x3-tap windows of a zero-padded NHWC ref into the
    lane-blocked patch scratch:
        pcol[..., k*c:(k+1)*c] = src[:, dy:dy+h, dx:dx+w, :],  k = 3*dy + dx.
    Pure VMEM window loads + lane-range stores; no HBM im2col, no per-tap matmul."""
    for dy in range(3):
        for dx in range(3):
            k = 3 * dy + dx
            pcol_ref[:, :, :, k * c:(k + 1) * c] = src_ref[:, dy:dy + h, dx:dx + w, :]


# ------------------------------- fused kernels -------------------------------

def _resblock_identity_kernel(xpad_ref, w1_ref, g1_ref, b1_ref,
                              w2_ref, g2_ref, b2_ref,
                              out_ref, pcol_ref, pad2_ref):
    """same_shape=True: conv1(s=1)+bn1+relu -> conv2+bn2+relu -> +x -> relu."""
    n, hp, wp, c = xpad_ref.shape
    h, w = hp - 2, wp - 2
    m = n * h * w

    # conv1: one (m, 9c) @ (9c, c) MXU matmul (taps folded into the contraction).
    _fill_patches(xpad_ref, pcol_ref, h, w, c)
    acc1 = jnp.dot(pcol_ref[...].reshape(m, 9 * c), w1_ref[...],
                   preferred_element_type=jnp.float32)
    out1 = _bn_relu(acc1, g1_ref[...], b1_ref[...])

    # zero-pad bn1 output in VMEM scratch (never leaves VMEM).
    pad2_ref[...] = jnp.zeros(pad2_ref.shape, pad2_ref.dtype)
    pad2_ref[:, 1:h + 1, 1:w + 1, :] = out1.reshape(n, h, w, c)

    # conv2: one (m, 9c) @ (9c, c) MXU matmul fed from the VMEM-resident out1.
    _fill_patches(pad2_ref, pcol_ref, h, w, c)
    acc2 = jnp.dot(pcol_ref[...].reshape(m, 9 * c), w2_ref[...],
                   preferred_element_type=jnp.float32)
    out2 = _bn_relu(acc2, g2_ref[...], b2_ref[...])

    # identity shortcut (interior of the padded input) + final ReLU.
    res = xpad_ref[:, 1:h + 1, 1:w + 1, :].reshape(m, c)
    out_ref[...] = jnp.maximum(res + out2, 0.0).astype(out_ref.dtype)


def _resblock_projection_kernel(p1_ref, xs_ref, w1_ref, g1_ref, b1_ref,
                                w2_ref, g2_ref, b2_ref, w3_ref, b3_ref,
                                out_ref, pcol_ref, pad2_ref):
    """same_shape=False: conv1(s=2)+bn1+relu -> conv2+bn2+relu -> +conv3(x) -> relu."""
    n, hp, wp, cout = pad2_ref.shape
    h, w = hp - 2, wp - 2
    m = n * h * w

    # conv1 (stride 2): patches precomputed wrapper-side -> single MXU matmul.
    acc1 = jnp.dot(p1_ref[...], w1_ref[...], preferred_element_type=jnp.float32)
    out1 = _bn_relu(acc1, g1_ref[...], b1_ref[...])

    # zero-pad bn1 output in VMEM scratch.
    pad2_ref[...] = jnp.zeros(pad2_ref.shape, pad2_ref.dtype)
    pad2_ref[:, 1:h + 1, 1:w + 1, :] = out1.reshape(n, h, w, cout)

    # conv2: single matmul fed from VMEM-resident out1.
    _fill_patches(pad2_ref, pcol_ref, h, w, cout)
    acc2 = jnp.dot(pcol_ref[...].reshape(m, 9 * cout), w2_ref[...],
                   preferred_element_type=jnp.float32)
    out2 = _bn_relu(acc2, g2_ref[...], b2_ref[...])

    # 1x1 stride-2 projection shortcut (with bias), fused in the same kernel.
    res = jnp.dot(xs_ref[...], w3_ref[...], preferred_element_type=jnp.float32) + b3_ref[...]
    out_ref[...] = jnp.maximum(res + out2, 0.0).astype(out_ref.dtype)


# -------------------------------- call helpers -------------------------------

def _full_spec(shape):
    nd = len(shape)
    return pl.BlockSpec(shape, lambda i, _nd=nd: (0,) * _nd)


_COMPILER_PARAMS = pltpu.CompilerParams(dimension_semantics=("arbitrary",))


# -------------------------------- forward pass -------------------------------

@functools.partial(jax.jit, static_argnames=("same_shape",))
def resnet_block_forward(x, params, same_shape=True):
    n, h, w, cin = x.shape
    cout = params["w1"].shape[-1]

    w1 = params["w1"].reshape(9 * cin, cout)
    w2 = params["w2"].reshape(9 * cout, cout)
    g1 = params["gamma1"].reshape(1, cout)
    b1 = params["beta1"].reshape(1, cout)
    g2 = params["gamma2"].reshape(1, cout)
    b2 = params["beta2"].reshape(1, cout)

    xpad = jnp.pad(x, ((0, 0), (1, 1), (1, 1), (0, 0)))

    if same_shape:
        assert cin == cout, "identity shortcut requires cin == cout"
        h1, w1_sp = h, w
        m = n * h1 * w1_sp
        args = (xpad, w1, g1, b1, w2, g2, b2)
        kernel = _resblock_identity_kernel
    else:
        stride = 2
        h1 = (h - 1) // stride + 1
        w1_sp = (w - 1) // stride + 1
        m = n * h1 * w1_sp
        # Wrapper-side im2col only for the strided conv1 of downsampling blocks.
        cols = []
        for dy in range(3):
            for dx in range(3):
                patch = xpad[:, dy:dy + (h1 - 1) * stride + 1:stride,
                                dx:dx + (w1_sp - 1) * stride + 1:stride, :]
                cols.append(patch.reshape(m, cin))
        p1 = jnp.concatenate(cols, axis=-1)                     # (m, 9*cin)
        xs = x[:, ::stride, ::stride, :].reshape(m, cin)        # shortcut input
        args = (p1, xs, w1, g1, b1, w2, g2, b2,
                params["w3"], params["b3"].reshape(1, cout))
        kernel = _resblock_projection_kernel

    out = pl.pallas_call(
        kernel,
        out_shape=jax.ShapeDtypeStruct((m, cout), jnp.float32),
        grid=(1,),
        in_specs=[_full_spec(a.shape) for a in args],
        out_specs=_full_spec((m, cout)),
        scratch_shapes=[
            pltpu.VMEM((n, h1, w1_sp, 9 * cout), jnp.float32),      # patch slab
            pltpu.VMEM((n, h1 + 2, w1_sp + 2, cout), jnp.float32),  # padded out1
        ],
        compiler_params=_COMPILER_PARAMS,
    )(*args)
    return out.reshape(n, h1, w1_sp, cout)


# ----------------------------- pure-JAX reference ----------------------------

def resnet_block_reference(x, params, same_shape=True):
    stride = 1 if same_shape else 2

    def conv3x3(y, w, s):
        return jax.lax.conv_general_dilated(
            y, w, window_strides=(s, s), padding=((1, 1), (1, 1)),
            dimension_numbers=("NHWC", "HWIO", "NHWC"))

    def bn(y, gamma, beta):
        mean = jnp.mean(y, axis=(0, 1, 2))
        var = jnp.mean((y - mean) ** 2, axis=(0, 1, 2))
        return (y - mean) * jax.lax.rsqrt(var + _EPS) * gamma + beta

    out = jax.nn.relu(bn(conv3x3(x, params["w1"], stride),
                         params["gamma1"], params["beta1"]))
    out = jax.nn.relu(bn(conv3x3(out, params["w2"], 1),
                         params["gamma2"], params["beta2"]))
    if not same_shape:
        w3 = params["w3"].reshape(1, 1, *params["w3"].shape)
        x = jax.lax.conv_general_dilated(
            x, w3, window_strides=(stride, stride), padding="VALID",
            dimension_numbers=("NHWC", "HWIO", "NHWC")) + params["b3"]
    return jax.nn.relu(x + out)


# --------------------------------- parameters --------------------------------

def init_params(key, cin, cout, same_shape):
    ks = jax.random.split(key, 8)
    p = {
        "w1": 0.1 * jax.random.normal(ks[0], (3, 3, cin, cout), jnp.float32),
        "gamma1": 1.0 + 0.1 * jax.random.normal(ks[1], (cout,), jnp.float32),
        "beta1": 0.1 * jax.random.normal(ks[2], (cout,), jnp.float32),
        "w2": 0.1 * jax.random.normal(ks[3], (3, 3, cout, cout), jnp.float32),
        "gamma2": 1.0 + 0.1 * jax.random.normal(ks[4], (cout,), jnp.float32),
        "beta2": 0.1 * jax.random.normal(ks[5], (cout,), jnp.float32),
    }
    if not same_shape:
        p["w3"] = 0.1 * jax.random.normal(ks[6], (cin, cout), jnp.float32)
        p["b3"] = 0.1 * jax.random.normal(ks[7], (cout,), jnp.float32)
    return p


# ----------------------------------- main -------------------------------------

if __name__ == "__main__":
    root = jax.random.PRNGKey(0)
    kx1, kp1, kx2, kp2 = jax.random.split(root, 4)

    # Case 1: same_shape=True (stride 1, identity shortcut), 8 -> 8 channels.
    n, h, w, c = 2, 16, 16, 8
    x = jax.random.normal(kx1, (n, h, w, c), jnp.float32)
    params = init_params(kp1, c, c, same_shape=True)
    out = jax.block_until_ready(resnet_block_forward(x, params, same_shape=True))
    ref = resnet_block_reference(x, params, same_shape=True)
    assert out.shape == (n, h, w, c)
    assert jnp.allclose(out, ref, atol=2e-2, rtol=2e-2), \
        f"max abs err {float(jnp.max(jnp.abs(out - ref)))}"

    # Case 2: same_shape=False (stride 2, 1x1 projection shortcut), 8 -> 16 channels.
    cin, cout = 8, 16
    x2 = jax.random.normal(kx2, (n, h, w, cin), jnp.float32)
    params2 = init_params(kp2, cin, cout, same_shape=False)
    out2 = jax.block_until_ready(resnet_block_forward(x2, params2, same_shape=False))
    ref2 = resnet_block_reference(x2, params2, same_shape=False)
    assert out2.shape == (n, h // 2, w // 2, cout)
    assert jnp.allclose(out2, ref2, atol=2e-2, rtol=2e-2), \
        f"max abs err {float(jnp.max(jnp.abs(out2 - ref2)))}"

    print("KERNEL_OK")
</pallas_src>

<mosaic_0001>
module attributes {stable_mosaic.version = 11 : i64} {
  func.func @_resblock_identity_kernel(%arg0: i32, %arg1: memref<2x18x18x8xf32, #tpu.memory_space<vmem>>, %arg2: memref<72x8xf32, #tpu.memory_space<vmem>>, %arg3: memref<1x8xf32, #tpu.memory_space<vmem>>, %arg4: memref<1x8xf32, #tpu.memory_space<vmem>>, %arg5: memref<72x8xf32, #tpu.memory_space<vmem>>, %arg6: memref<1x8xf32, #tpu.memory_space<vmem>>, %arg7: memref<1x8xf32, #tpu.memory_space<vmem>>, %arg8: memref<512x8xf32, #tpu.memory_space<vmem>>, %arg9: memref<2x16x16x72xf32, #tpu.memory_space<vmem>>, %arg10: memref<2x18x18x8xf32, #tpu.memory_space<vmem>>) attributes {dimension_semantics = [#tpu.dimension_semantics<arbitrary>], iteration_bounds = array<i64: 1>, scalar_prefetch = 0 : i64, scratch_operands = 2 : i64, tpu.core_type = #tpu.core_type<tc>, window_params = [{pipeline_mode = #tpu.pipeline_mode<synchronous>, transform_indices = @transform_0, window_bounds = array<i64: 2, 18, 18, 8>}, {pipeline_mode = #tpu.pipeline_mode<synchronous>, transform_indices = @transform_1, window_bounds = array<i64: 72, 8>}, {pipeline_mode = #tpu.pipeline_mode<synchronous>, transform_indices = @transform_2, window_bounds = array<i64: 1, 8>}, {pipeline_mode = #tpu.pipeline_mode<synchronous>, transform_indices = @transform_3, window_bounds = array<i64: 1, 8>}, {pipeline_mode = #tpu.pipeline_mode<synchronous>, transform_indices = @transform_4, window_bounds = array<i64: 72, 8>}, {pipeline_mode = #tpu.pipeline_mode<synchronous>, transform_indices = @transform_5, window_bounds = array<i64: 1, 8>}, {pipeline_mode = #tpu.pipeline_mode<synchronous>, transform_indices = @transform_6, window_bounds = array<i64: 1, 8>}, {pipeline_mode = #tpu.pipeline_mode<synchronous>, transform_indices = @transform_7, window_bounds = array<i64: 512, 8>}]} {
    %c0 = arith.constant 0 : index
    %c0_0 = arith.constant 0 : index
    %c0_1 = arith.constant 0 : index
    %c0_2 = arith.constant 0 : index
    %0 = vector.load %arg1[%c0, %c0_0, %c0_1, %c0_2] : memref<2x18x18x8xf32, #tpu.memory_space<vmem>>, vector<2x16x16x8xf32>
    %c0_3 = arith.constant 0 : index
    %c0_4 = arith.constant 0 : index
    %c0_5 = arith.constant 0 : index
    %c0_6 = arith.constant 0 : index
    %1 = vector.load %arg9[%c0_3, %c0_4, %c0_5, %c0_6] : memref<2x16x16x72xf32, #tpu.memory_space<vmem>>, vector<2x16x16x8xf32>
    tpu.vector_store %arg9[%c0_3, %c0_4, %c0_5, %c0_6], %0 {strides = array<i32>} : memref<2x16x16x72xf32, #tpu.memory_space<vmem>>, vector<2x16x16x8xf32>,
    %c0_7 = arith.constant 0 : index
    %c0_8 = arith.constant 0 : index
    %c1 = arith.constant 1 : index
    %c0_9 = arith.constant 0 : index
    %2 = vector.load %arg1[%c0_7, %c0_8, %c1, %c0_9] : memref<2x18x18x8xf32, #tpu.memory_space<vmem>>, vector<2x16x16x8xf32>
    %c0_10 = arith.constant 0 : index
    %c0_11 = arith.constant 0 : index
    %c0_12 = arith.constant 0 : index
    %c8 = arith.constant 8 : index
    %3 = vector.load %arg9[%c0_10, %c0_11, %c0_12, %c8] : memref<2x16x16x72xf32, #tpu.memory_space<vmem>>, vector<2x16x16x8xf32>
    tpu.vector_store %arg9[%c0_10, %c0_11, %c0_12, %c8], %2 {strides = array<i32>} : memref<2x16x16x72xf32, #tpu.memory_space<vmem>>, vector<2x16x16x8xf32>,
    %c0_13 = arith.constant 0 : index
    %c0_14 = arith.constant 0 : index
    %c2 = arith.constant 2 : index
    %c0_15 = arith.constant 0 : index
    %4 = vector.load %arg1[%c0_13, %c0_14, %c2, %c0_15] : memref<2x18x18x8xf32, #tpu.memory_space<vmem>>, vector<2x16x16x8xf32>
    %c0_16 = arith.constant 0 : index
    %c0_17 = arith.constant 0 : index
    %c0_18 = arith.constant 0 : index
    %c16 = arith.constant 16 : index
    %5 = vector.load %arg9[%c0_16, %c0_17, %c0_18, %c16] : memref<2x16x16x72xf32, #tpu.memory_space<vmem>>, vector<2x16x16x8xf32>
    tpu.vector_store %arg9[%c0_16, %c0_17, %c0_18, %c16], %4 {strides = array<i32>} : memref<2x16x16x72xf32, #tpu.memory_space<vmem>>, vector<2x16x16x8xf32>,
    %c0_19 = arith.constant 0 : index
    %c1_20 = arith.constant 1 : index
    %c0_21 = arith.constant 0 : index
    %c0_22 = arith.constant 0 : index
    %6 = vector.load %arg1[%c0_19, %c1_20, %c0_21, %c0_22] : memref<2x18x18x8xf32, #tpu.memory_space<vmem>>, vector<2x16x16x8xf32>
    %c0_23 = arith.constant 0 : index
    %c0_24 = arith.constant 0 : index
    %c0_25 = arith.constant 0 : index
    %c24 = arith.constant 24 : index
    %7 = vector.load %arg9[%c0_23, %c0_24, %c0_25, %c24] : memref<2x16x16x72xf32, #tpu.memory_space<vmem>>, vector<2x16x16x8xf32>
    tpu.vector_store %arg9[%c0_23, %c0_24, %c0_25, %c24], %6 {strides = array<i32>} : memref<2x16x16x72xf32, #tpu.memory_space<vmem>>, vector<2x16x16x8xf32>,
    %c0_26 = arith.constant 0 : index
    %c1_27 = arith.constant 1 : index
    %c1_28 = arith.constant 1 : index
    %c0_29 = arith.constant 0 : index
    %8 = vector.load %arg1[%c0_26, %c1_27, %c1_28, %c0_29] : memref<2x18x18x8xf32, #tpu.memory_space<vmem>>, vector<2x16x16x8xf32>
    %c0_30 = arith.constant 0 : index
    %c0_31 = arith.constant 0 : index
    %c0_32 = arith.constant 0 : index
    %c32 = arith.constant 32 : index
    %9 = vector.load %arg9[%c0_30, %c0_31, %c0_32, %c32] : memref<2x16x16x72xf32, #tpu.memory_space<vmem>>, vector<2x16x16x8xf32>
    tpu.vector_store %arg9[%c0_30, %c0_31, %c0_32, %c32], %8 {strides = array<i32>} : memref<2x16x16x72xf32, #tpu.memory_space<vmem>>, vector<2x16x16x8xf32>,
    %c0_33 = arith.constant 0 : index
    %c1_34 = arith.constant 1 : index
    %c2_35 = arith.constant 2 : index
    %c0_36 = arith.constant 0 : index
    %10 = vector.load %arg1[%c0_33, %c1_34, %c2_35, %c0_36] : memref<2x18x18x8xf32, #tpu.memory_space<vmem>>, vector<2x16x16x8xf32>
    %c0_37 = arith.constant 0 : index
    %c0_38 = arith.constant 0 : index
    %c0_39 = arith.constant 0 : index
    %c40 = arith.constant 40 : index
    %11 = vector.load %arg9[%c0_37, %c0_38, %c0_39, %c40] : memref<2x16x16x72xf32, #tpu.memory_space<vmem>>, vector<2x16x16x8xf32>
    tpu.vector_store %arg9[%c0_37, %c0_38, %c0_39, %c40], %10 {strides = array<i32>} : memref<2x16x16x72xf32, #tpu.memory_space<vmem>>, vector<2x16x16x8xf32>,
    %c0_40 = arith.constant 0 : index
    %c2_41 = arith.constant 2 : index
    %c0_42 = arith.constant 0 : index
    %c0_43 = arith.constant 0 : index
    %12 = vector.load %arg1[%c0_40, %c2_41, %c0_42, %c0_43] : memref<2x18x18x8xf32, #tpu.memory_space<vmem>>, vector<2x16x16x8xf32>
    %c0_44 = arith.constant 0 : index
    %c0_45 = arith.constant 0 : index
    %c0_46 = arith.constant 0 : index
    %c48 = arith.constant 48 : index
    %13 = vector.load %arg9[%c0_44, %c0_45, %c0_46, %c48] : memref<2x16x16x72xf32, #tpu.memory_space<vmem>>, vector<2x16x16x8xf32>
    tpu.vector_store %arg9[%c0_44, %c0_45, %c0_46, %c48], %12 {strides = array<i32>} : memref<2x16x16x72xf32, #tpu.memory_space<vmem>>, vector<2x16x16x8xf32>,
    %c0_47 = arith.constant 0 : index
    %c2_48 = arith.constant 2 : index
    %c1_49 = arith.constant 1 : index
    %c0_50 = arith.constant 0 : index
    %14 = vector.load %arg1[%c0_47, %c2_48, %c1_49, %c0_50] : memref<2x18x18x8xf32, #tpu.memory_space<vmem>>, vector<2x16x16x8xf32>
    %c0_51 = arith.constant 0 : index
    %c0_52 = arith.constant 0 : index
    %c0_53 = arith.constant 0 : index
    %c56 = arith.constant 56 : index
    %15 = vector.load %arg9[%c0_51, %c0_52, %c0_53, %c56] : memref<2x16x16x72xf32, #tpu.memory_space<vmem>>, vector<2x16x16x8xf32>
    tpu.vector_store %arg9[%c0_51, %c0_52, %c0_53, %c56], %14 {strides = array<i32>} : memref<2x16x16x72xf32, #tpu.memory_space<vmem>>, vector<2x16x16x8xf32>,
    %c0_54 = arith.constant 0 : index
    %c2_55 = arith.constant 2 : index
    %c2_56 = arith.constant 2 : index
    %c0_57 = arith.constant 0 : index
    %16 = vector.load %arg1[%c0_54, %c2_55, %c2_56, %c0_57] : memref<2x18x18x8xf32, #tpu.memory_space<vmem>>, vector<2x16x16x8xf32>
    %c0_58 = arith.constant 0 : index
    %c0_59 = arith.constant 0 : index
    %c0_60 = arith.constant 0 : index
    %c64 = arith.constant 64 : index
    %17 = vector.load %arg9[%c0_58, %c0_59, %c0_60, %c64] : memref<2x16x16x72xf32, #tpu.memory_space<vmem>>, vector<2x16x16x8xf32>
    tpu.vector_store %arg9[%c0_58, %c0_59, %c0_60, %c64], %16 {strides = array<i32>} : memref<2x16x16x72xf32, #tpu.memory_space<vmem>>, vector<2x16x16x8xf32>,
    %c0_61 = arith.constant 0 : index
    %c0_62 = arith.constant 0 : index
    %c0_63 = arith.constant 0 : index
    %c0_64 = arith.constant 0 : index
    %18 = vector.load %arg9[%c0_61, %c0_62, %c0_63, %c0_64] : memref<2x16x16x72xf32, #tpu.memory_space<vmem>>, vector<2x16x16x72xf32>
    %19 = vector.shape_cast %18 : vector<2x16x16x72xf32> to vector<512x72xf32>
    %c0_65 = arith.constant 0 : index
    %c0_66 = arith.constant 0 : index
    %20 = vector.load %arg2[%c0_65, %c0_66] : memref<72x8xf32, #tpu.memory_space<vmem>>, vector<72x8xf32>
    %cst = arith.constant dense<0.000000e+00> : vector<512x8xf32>
    %21 = tpu.matmul %19, %20, %cst {dimension_numbers = #tpu.dot_dimension_numbers<[1], [0], [0], [1], [0, 0, 1, 1], [], []>} : vector<512x72xf32>, vector<72x8xf32>, vector<512x8xf32> -> vector<512x8xf32>
    %c0_67 = arith.constant 0 : index
    %c0_68 = arith.constant 0 : index
    %22 = vector.load %arg3[%c0_67, %c0_68] : memref<1x8xf32, #tpu.memory_space<vmem>>, vector<1x8xf32>
    %c0_69 = arith.constant 0 : index
    %c0_70 = arith.constant 0 : index
    %23 = vector.load %arg4[%c0_69, %c0_70] : memref<1x8xf32, #tpu.memory_space<vmem>>, vector<1x8xf32>
    %cst_71 = arith.constant dense<0.000000e+00> : vector<8xf32>
    %24 = vector.multi_reduction <add>, %21, %cst_71 [0] : vector<512x8xf32> to vector<8xf32>
    %25 = vector.shape_cast %24 : vector<8xf32> to vector<1x8xf32>
    %cst_72 = arith.constant 5.120000e+02 : f32
    %26 = vector.broadcast %cst_72 : f32 to vector<1x8xf32>
    %27 = arith.divf %25, %26 : vector<1x8xf32>
    %28 = vector.broadcast %27 : vector<1x8xf32> to vector<512x8xf32>
    %29 = arith.subf %21, %28 : vector<512x8xf32>
    %30 = arith.mulf %29, %29 : vector<512x8xf32>
    %cst_73 = arith.constant dense<0.000000e+00> : vector<8xf32>
    %31 = vector.multi_reduction <add>, %30, %cst_73 [0] : vector<512x8xf32> to vector<8xf32>
    %32 = vector.shape_cast %31 : vector<8xf32> to vector<1x8xf32>
    %cst_74 = arith.constant 5.120000e+02 : f32
    %33 = vector.broadcast %cst_74 : f32 to vector<1x8xf32>
    %34 = arith.divf %32, %33 : vector<1x8xf32>
    %cst_75 = arith.constant 9.99999974E-6 : f32
    %35 = vector.broadcast %cst_75 : f32 to vector<1x8xf32>
    %36 = arith.addf %34, %35 : vector<1x8xf32>
    %37 = math.rsqrt %36 : vector<1x8xf32>
    %38 = arith.mulf %22, %37 : vector<1x8xf32>
    %39 = arith.mulf %27, %38 : vector<1x8xf32>
    %40 = arith.subf %23, %39 : vector<1x8xf32>
    %41 = vector.broadcast %38 : vector<1x8xf32> to vector<512x8xf32>
    %42 = arith.mulf %21, %41 : vector<512x8xf32>
    %43 = vector.broadcast %40 : vector<1x8xf32> to vector<512x8xf32>
    %44 = arith.addf %42, %43 : vector<512x8xf32>
    %cst_76 = arith.constant 0.000000e+00 : f32
    %45 = vector.broadcast %cst_76 : f32 to vector<512x8xf32>
    %46 = arith.maximumf %44, %45 : vector<512x8xf32>
    %cst_77 = arith.constant 0.000000e+00 : f32
    %47 = vector.broadcast %cst_77 : f32 to vector<2x18x18x8xf32>
    %c0_78 = arith.constant 0 : index
    %c0_79 = arith.constant 0 : index
    %c0_80 = arith.constant 0 : index
    %c0_81 = arith.constant 0 : index
    %48 = vector.load %arg10[%c0_78, %c0_79, %c0_80, %c0_81] : memref<2x18x18x8xf32, #tpu.memory_space<vmem>>, vector<2x18x18x8xf32>
    tpu.vector_store %arg10[%c0_78, %c0_79, %c0_80, %c0_81], %47 {strides = array<i32>} : memref<2x18x18x8xf32, #tpu.memory_space<vmem>>, vector<2x18x18x8xf32>,
    %49 = vector.shape_cast %46 : vector<512x8xf32> to vector<2x16x16x8xf32>
    %c0_82 = arith.constant 0 : index
    %c1_83 = arith.constant 1 : index
    %c1_84 = arith.constant 1 : index
    %c0_85 = arith.constant 0 : index
    %50 = vector.load %arg10[%c0_82, %c1_83, %c1_84, %c0_85] : memref<2x18x18x8xf32, #tpu.memory_space<vmem>>, vector<2x16x16x8xf32>
    tpu.vector_store %arg10[%c0_82, %c1_83, %c1_84, %c0_85], %49 {strides = array<i32>} : memref<2x18x18x8xf32, #tpu.memory_space<vmem>>, vector<2x16x16x8xf32>,
    %c0_86 = arith.constant 0 : index
    %c0_87 = arith.constant 0 : index
    %c0_88 = arith.constant 0 : index
    %c0_89 = arith.constant 0 : index
    %51 = vector.load %arg10[%c0_86, %c0_87, %c0_88, %c0_89] : memref<2x18x18x8xf32, #tpu.memory_space<vmem>>, vector<2x16x16x8xf32>
    %c0_90 = arith.constant 0 : index
    %c0_91 = arith.constant 0 : index
    %c0_92 = arith.constant 0 : index
    %c0_93 = arith.constant 0 : index
    %52 = vector.load %arg9[%c0_90, %c0_91, %c0_92, %c0_93] : memref<2x16x16x72xf32, #tpu.memory_space<vmem>>, vector<2x16x16x8xf32>
    tpu.vector_store %arg9[%c0_90, %c0_91, %c0_92, %c0_93], %51 {strides = array<i32>} : memref<2x16x16x72xf32, #tpu.memory_space<vmem>>, vector<2x16x16x8xf32>,
    %c0_94 = arith.constant 0 : index
    %c0_95 = arith.constant 0 : index
    %c1_96 = arith.constant 1 : index
    %c0_97 = arith.constant 0 : index
    %53 = vector.load %arg10[%c0_94, %c0_95, %c1_96, %c0_97] : memref<2x18x18x8xf32, #tpu.memory_space<vmem>>, vector<2x16x16x8xf32>
    %c0_98 = arith.constant 0 : index
    %c0_99 = arith.constant 0 : index
    %c0_100 = arith.constant 0 : index
    %c8_101 = arith.constant 8 : index
    %54 = vector.load %arg9[%c0_98, %c0_99, %c0_100, %c8_101] : memref<2x16x16x72xf32, #tpu.memory_space<vmem>>, vector<2x16x16x8xf32>
    tpu.vector_store %arg9[%c0_98, %c0_99, %c0_100, %c8_101], %53 {strides = array<i32>} : memref<2x16x16x72xf32, #tpu.memory_space<vmem>>, vector<2x16x16x8xf32>,
    %c0_102 = arith.constant 0 : index
    %c0_103 = arith.constant 0 : index
    %c2_104 = arith.constant 2 : index
    %c0_105 = arith.constant 0 : index
    %55 = vector.load %arg10[%c0_102, %c0_103, %c2_104, %c0_105] : memref<2x18x18x8xf32, #tpu.memory_space<vmem>>, vector<2x16x16x8xf32>
    %c0_106 = arith.constant 0 : index
    %c0_107 = arith.constant 0 : index
    %c0_108 = arith.constant 0 : index
    %c16_109 = arith.constant 16 : index
    %56 = vector.load %arg9[%c0_106, %c0_107, %c0_108, %c16_109] : memref<2x16x16x72xf32, #tpu.memory_space<vmem>>, vector<2x16x16x8xf32>
    tpu.vector_store %arg9[%c0_106, %c0_107, %c0_108, %c16_109], %55 {strides = array<i32>} : memref<2x16x16x72xf32, #tpu.memory_space<vmem>>, vector<2x16x16x8xf32>,
    %c0_110 = arith.constant 0 : index
    %c1_111 = arith.constant 1 : index
    %c0_112 = arith.constant 0 : index
    %c0_113 = arith.constant 0 : index
    %57 = vector.load %arg10[%c0_110, %c1_111, %c0_112, %c0_113] : memref<2x18x18x8xf32, #tpu.memory_space<vmem>>, vector<2x16x16x8xf32>
    %c0_114 = arith.constant 0 : index
    %c0_115 = arith.constant 0 : index
    %c0_116 = arith.constant 0 : index
    %c24_117 = arith.constant 24 : index
    %58 = vector.load %arg9[%c0_114, %c0_115, %c0_116, %c24_117] : memref<2x16x16x72xf32, #tpu.memory_space<vmem>>, vector<2x16x16x8xf32>
    tpu.vector_store %arg9[%c0_114, %c0_115, %c0_116, %c24_117], %57 {strides = array<i32>} : memref<2x16x16x72xf32, #tpu.memory_space<vmem>>, vector<2x16x16x8xf32>,
    %c0_118 = arith.constant 0 : index
    %c1_119 = arith.constant 1 : index
    %c1_120 = arith.constant 1 : index
    %c0_121 = arith.constant 0 : index
    %59 = vector.load %arg10[%c0_118, %c1_119, %c1_120, %c0_121] : memref<2x18x18x8xf32, #tpu.memory_space<vmem>>, vector<2x16x16x8xf32>
    %c0_122 = arith.constant 0 : index
    %c0_123 = arith.constant 0 : index
    %c0_124 = arith.constant 0 : index
    %c32_125 = arith.constant 32 : index
    %60 = vector.load %arg9[%c0_122, %c0_123, %c0_124, %c32_125] : memref<2x16x16x72xf32, #tpu.memory_space<vmem>>, vector<2x16x16x8xf32>
    tpu.vector_store %arg9[%c0_122, %c0_123, %c0_124, %c32_125], %59 {strides = array<i32>} : memref<2x16x16x72xf32, #tpu.memory_space<vmem>>, vector<2x16x16x8xf32>,
    %c0_126 = arith.constant 0 : index
    %c1_127 = arith.constant 1 : index
    %c2_128 = arith.constant 2 : index
    %c0_129 = arith.constant 0 : index
    %61 = vector.load %arg10[%c0_126, %c1_127, %c2_128, %c0_129] : memref<2x18x18x8xf32, #tpu.memory_space<vmem>>, vector<2x16x16x8xf32>
    %c0_130 = arith.constant 0 : index
    %c0_131 = arith.constant 0 : index
    %c0_132 = arith.constant 0 : index
    %c40_133 = arith.constant 40 : index
    %62 = vector.load %arg9[%c0_130, %c0_131, %c0_132, %c40_133] : memref<2x16x16x72xf32, #tpu.memory_space<vmem>>, vector<2x16x16x8xf32>
    tpu.vector_store %arg9[%c0_130, %c0_131, %c0_132, %c40_133], %61 {strides = array<i32>} : memref<2x16x16x72xf32, #tpu.memory_space<vmem>>, vector<2x16x16x8xf32>,
    %c0_134 = arith.constant 0 : index
    %c2_135 = arith.constant 2 : index
    %c0_136 = arith.constant 0 : index
    %c0_137 = arith.constant 0 : index
    %63 = vector.load %arg10[%c0_134, %c2_135, %c0_136, %c0_137] : memref<2x18x18x8xf32, #tpu.memory_space<vmem>>, vector<2x16x16x8xf32>
    %c0_138 = arith.constant 0 : index
    %c0_139 = arith.constant 0 : index
    %c0_140 = arith.constant 0 : index
    %c48_141 = arith.constant 48 : index
    %64 = vector.load %arg9[%c0_138, %c0_139, %c0_140, %c48_141] : memref<2x16x16x72xf32, #tpu.memory_space<vmem>>, vector<2x16x16x8xf32>
    tpu.vector_store %arg9[%c0_138, %c0_139, %c0_140, %c48_141], %63 {strides = array<i32>} : memref<2x16x16x72xf32, #tpu.memory_space<vmem>>, vector<2x16x16x8xf32>,
    %c0_142 = arith.constant 0 : index
    %c2_143 = arith.constant 2 : index
    %c1_144 = arith.constant 1 : index
    %c0_145 = arith.constant 0 : index
    %65 = vector.load %arg10[%c0_142, %c2_143, %c1_144, %c0_145] : memref<2x18x18x8xf32, #tpu.memory_space<vmem>>, vector<2x16x16x8xf32>
    %c0_146 = arith.constant 0 : index
    %c0_147 = arith.constant 0 : index
    %c0_148 = arith.constant 0 : index
    %c56_149 = arith.constant 56 : index
    %66 = vector.load %arg9[%c0_146, %c0_147, %c0_148, %c56_149] : memref<2x16x16x72xf32, #tpu.memory_space<vmem>>, vector<2x16x16x8xf32>
    tpu.vector_store %arg9[%c0_146, %c0_147, %c0_148, %c56_149], %65 {strides = array<i32>} : memref<2x16x16x72xf32, #tpu.memory_space<vmem>>, vector<2x16x16x8xf32>,
    %c0_150 = arith.constant 0 : index
    %c2_151 = arith.constant 2 : index
    %c2_152 = arith.constant 2 : index
    %c0_153 = arith.constant 0 : index
    %67 = vector.load %arg10[%c0_150, %c2_151, %c2_152, %c0_153] : memref<2x18x18x8xf32, #tpu.memory_space<vmem>>, vector<2x16x16x8xf32>
    %c0_154 = arith.constant 0 : index
    %c0_155 = arith.constant 0 : index
    %c0_156 = arith.constant 0 : index
    %c64_157 = arith.constant 64 : index
    %68 = vector.load %arg9[%c0_154, %c0_155, %c0_156, %c64_157] : memref<2x16x16x72xf32, #tpu.memory_space<vmem>>, vector<2x16x16x8xf32>
    tpu.vector_store %arg9[%c0_154, %c0_155, %c0_156, %c64_157], %67 {strides = array<i32>} : memref<2x16x16x72xf32, #tpu.memory_space<vmem>>, vector<2x16x16x8xf32>,
    %c0_158 = arith.constant 0 : index
    %c0_159 = arith.constant 0 : index
    %c0_160 = arith.constant 0 : index
    %c0_161 = arith.constant 0 : index
    %69 = vector.load %arg9[%c0_158, %c0_159, %c0_160, %c0_161] : memref<2x16x16x72xf32, #tpu.memory_space<vmem>>, vector<2x16x16x72xf32>
    %70 = vector.shape_cast %69 : vector<2x16x16x72xf32> to vector<512x72xf32>
    %c0_162 = arith.constant 0 : index
    %c0_163 = arith.constant 0 : index
    %71 = vector.load %arg5[%c0_162, %c0_163] : memref<72x8xf32, #tpu.memory_space<vmem>>, vector<72x8xf32>
    %cst_164 = arith.constant dense<0.000000e+00> : vector<512x8xf32>
    %72 = tpu.matmul %70, %71, %cst_164 {dimension_numbers = #tpu.dot_dimension_numbers<[1], [0], [0], [1], [0, 0, 1, 1], [], []>} : vector<512x72xf32>, vector<72x8xf32>, vector<512x8xf32> -> vector<512x8xf32>
    %c0_165 = arith.constant 0 : index
    %c0_166 = arith.constant 0 : index
    %73 = vector.load %arg6[%c0_165, %c0_166] : memref<1x8xf32, #tpu.memory_space<vmem>>, vector<1x8xf32>
    %c0_167 = arith.constant 0 : index
    %c0_168 = arith.constant 0 : index
    %74 = vector.load %arg7[%c0_167, %c0_168] : memref<1x8xf32, #tpu.memory_space<vmem>>, vector<1x8xf32>
    %cst_169 = arith.constant dense<0.000000e+00> : vector<8xf32>
    %75 = vector.multi_reduction <add>, %72, %cst_169 [0] : vector<512x8xf32> to vector<8xf32>
    %76 = vector.shape_cast %75 : vector<8xf32> to vector<1x8xf32>
    %cst_170 = arith.constant 5.120000e+02 : f32
    %77 = vector.broadcast %cst_170 : f32 to vector<1x8xf32>
    %78 = arith.divf %76, %77 : vector<1x8xf32>
    %79 = vector.broadcast %78 : vector<1x8xf32> to vector<512x8xf32>
    %80 = arith.subf %72, %79 : vector<512x8xf32>
    %81 = arith.mulf %80, %80 : vector<512x8xf32>
    %cst_171 = arith.constant dense<0.000000e+00> : vector<8xf32>
    %82 = vector.multi_reduction <add>, %81, %cst_171 [0] : vector<512x8xf32> to vector<8xf32>
    %83 = vector.shape_cast %82 : vector<8xf32> to vector<1x8xf32>
    %cst_172 = arith.constant 5.120000e+02 : f32
    %84 = vector.broadcast %cst_172 : f32 to vector<1x8xf32>
    %85 = arith.divf %83, %84 : vector<1x8xf32>
    %cst_173 = arith.constant 9.99999974E-6 : f32
    %86 = vector.broadcast %cst_173 : f32 to vector<1x8xf32>
    %87 = arith.addf %85, %86 : vector<1x8xf32>
    %88 = math.rsqrt %87 : vector<1x8xf32>
    %89 = arith.mulf %73, %88 : vector<1x8xf32>
    %90 = arith.mulf %78, %89 : vector<1x8xf32>
    %91 = arith.subf %74, %90 : vector<1x8xf32>
    %92 = vector.broadcast %89 : vector<1x8xf32> to vector<512x8xf32>
    %93 = arith.mulf %72, %92 : vector<512x8xf32>
    %94 = vector.broadcast %91 : vector<1x8xf32> to vector<512x8xf32>
    %95 = arith.addf %93, %94 : vector<512x8xf32>
    %cst_174 = arith.constant 0.000000e+00 : f32
    %96 = vector.broadcast %cst_174 : f32 to vector<512x8xf32>
    %97 = arith.maximumf %95, %96 : vector<512x8xf32>
    %c0_175 = arith.constant 0 : index
    %c1_176 = arith.constant 1 : index
    %c1_177 = arith.constant 1 : index
    %c0_178 = arith.constant 0 : index
    %98 = vector.load %arg1[%c0_175, %c1_176, %c1_177, %c0_178] : memref<2x18x18x8xf32, #tpu.memory_space<vmem>>, vector<2x16x16x8xf32>
    %99 = vector.shape_cast %98 : vector<2x16x16x8xf32> to vector<512x8xf32>
    %100 = arith.addf %99, %97 : vector<512x8xf32>
    %cst_179 = arith.constant 0.000000e+00 : f32
    %101 = vector.broadcast %cst_179 : f32 to vector<512x8xf32>
    %102 = arith.maximumf %100, %101 : vector<512x8xf32>
    %c0_180 = arith.constant 0 : index
    %c0_181 = arith.constant 0 : index
    %103 = vector.load %arg8[%c0_180, %c0_181] : memref<512x8xf32, #tpu.memory_space<vmem>>, vector<512x8xf32>
    tpu.vector_store %arg8[%c0_180, %c0_181], %102 {strides = array<i32>} : memref<512x8xf32, #tpu.memory_space<vmem>>, vector<512x8xf32>,
    return
  }
  func.func @transform_0(%arg0: i32) -> (i32, i32, i32, i32) {
    %c0_i32 = arith.constant 0 : i32
    %c0_i32_0 = arith.constant 0 : i32
    %c0_i32_1 = arith.constant 0 : i32
    %c0_i32_2 = arith.constant 0 : i32
    %c0_i32_3 = arith.constant 0 : i32
    return %c0_i32, %c0_i32_0, %c0_i32_1, %c0_i32_2 : i32, i32, i32, i32
  }
  func.func @transform_1(%arg0: i32) -> (i32, i32) {
    %c0_i32 = arith.constant 0 : i32
    %c0_i32_0 = arith.constant 0 : i32
    %c0_i32_1 = arith.constant 0 : i32
    return %c0_i32, %c0_i32_0 : i32, i32
  }
  func.func @transform_2(%arg0: i32) -> (i32, i32) {
    %c0_i32 = arith.constant 0 : i32
    %c0_i32_0 = arith.constant 0 : i32
    %c0_i32_1 = arith.constant 0 : i32
    return %c0_i32, %c0_i32_0 : i32, i32
  }
  func.func @transform_3(%arg0: i32) -> (i32, i32) {
    %c0_i32 = arith.constant 0 : i32
    %c0_i32_0 = arith.constant 0 : i32
    %c0_i32_1 = arith.constant 0 : i32
    return %c0_i32, %c0_i32_0 : i32, i32
  }
  func.func @transform_4(%arg0: i32) -> (i32, i32) {
    %c0_i32 = arith.constant 0 : i32
    %c0_i32_0 = arith.constant 0 : i32
    %c0_i32_1 = arith.constant 0 : i32
    return %c0_i32, %c0_i32_0 : i32, i32
  }
  func.func @transform_5(%arg0: i32) -> (i32, i32) {
    %c0_i32 = arith.constant 0 : i32
    %c0_i32_0 = arith.constant 0 : i32
    %c0_i32_1 = arith.constant 0 : i32
    return %c0_i32, %c0_i32_0 : i32, i32
  }
  func.func @transform_6(%arg0: i32) -> (i32, i32) {
    %c0_i32 = arith.constant 0 : i32
    %c0_i32_0 = arith.constant 0 : i32
    %c0_i32_1 = arith.constant 0 : i32
    return %c0_i32, %c0_i32_0 : i32, i32
  }
  func.func @transform_7(%arg0: i32) -> (i32, i32) {
    %c0_i32 = arith.constant 0 : i32
    %c0_i32_0 = arith.constant 0 : i32
    %c0_i32_1 = arith.constant 0 : i32
    return %c0_i32, %c0_i32_0 : i32, i32
  }
}

</mosaic_0001>

<bundles_post_ra>
// kernel: resnet_block_forward.1
= control target key start
LH: loop header
LB: loop body
LE: loop exit
PB: predicated region body
PF: predicated region fallthrough
CT: control target
= control target key end

     0   :  { %s10383_s28 = smov 8   ;;  %vm90_vm0 = vcmask 64512   ;;  %vm475_vm1 = vcmask 130112   ;;  %s10384_s20 = smov 16   ;;  %vm860_vm2 = vcmask 195712   ;;  %vm1246_vm3 = vcmask 261312   ;;  %s18021_s0 = inlined_call_operand.vmem [shape: f32[2,18,18,8], index: 0, kind: input, shape index: {}]   ;;  %s18022_s1 = inlined_call_operand.vmem [shape: f32[72,8], index: 1, kind: input, shape index: {}]   ;;  %s18023_s2 = inlined_call_operand.vmem [shape: f32[1,8], index: 2, kind: input, shape index: {}]   ;;  %s18024_s3 = inlined_call_operand.vmem [shape: f32[1,8], index: 3, kind: input, shape index: {}]   ;;  %s18025_s4 = inlined_call_operand.vmem [shape: f32[72,8], index: 4, kind: input, shape index: {}]   ;;  %s18026_s5 = inlined_call_operand.vmem [shape: f32[1,8], index: 5, kind: input, shape index: {}]   ;;  %s18027_s6 = inlined_call_operand.vmem [shape: f32[1,8], index: 6, kind: input, shape index: {}]   ;;  %s18028_s7 = inlined_call_operand.vmem [shape: f32[512,8], index: 7, kind: output, shape index: {}]  }
   0x1   :  { %v155_v0 = vld [vmem:[%s18021_s0 + $0x1] sm:$0xff]  ;;  %v157_v1 = vld [vmem:[%s18021_s0 + $0x19] sm:$0xff]  ;;  %v156_v2 = vld [vmem:[%s18021_s0 + $0x9] sm:$0xff]  ;;  %s10385_s18 = smov 24   ;;  %s10386_s10 = smov 32   ;;  %vm1631_vm4 = vcmask 326912  }
   0x2   :  { %283 = vrot.lane.b32.xlu0 %v155_v0, %s10383_s28  ;;  %287 = vrot.lane.b32.xlu1 %v157_v1, %s10383_s28  ;;  %v158_v3 = vld [vmem:[%s18021_s0 + $0x21] sm:$0xff]  ;;  %v159_v4 = vld [vmem:[%s18021_s0 + $0x31] sm:$0xff]  ;;  %s10387_s27 = smov 40   ;;  %vm2016_vm5 = vcmask 392512   ;;  %s10388_s8 = smov 48   ;;  %vm2402_vm6 = vcmask 458112  }
   0x3   :  { %v160_v5 = vld [vmem:[%s18021_s0 + $0x39] sm:$0xff]  ;;  %v161_v6 = vld [vmem:[%s18021_s0 + $0x49] sm:$0xff]  ;;  %v162_v7 = vld [vmem:[%s18021_s0 + $0x51] sm:$0xff]  ;;  %s10389_s21 = smov 56   ;;  %s10390_s17 = smov 64   ;;  %vm2787_vm7 = vcmask 523712  }
   0x4   :  { %v163_v8 = vld [vmem:[%s18021_s0 + $0x61] sm:$0xff]  ;;  %v164_v9 = vld [vmem:[%s18021_s0 + $0x69] sm:$0xff]  ;;  %v165_v10 = vld [vmem:[%s18021_s0 + $0x79] sm:$0xff]  ;;  %vm3172_vm8 = vcmask 589312   ;;  %vm3310_vm9 = vcmask 588800   ;;  %vm4498_vm10 = vcmask 58368  }
   0x5   :  { %v166_v11 = vld [vmem:[%s18021_s0 + $0x81] sm:$0xff]  ;;  %v10486_v13 = vld [vmem:[%s18021_s0 + $0x18] sm:$0xff]  ;;  %v10511_v18 = vld [vmem:[%s18021_s0 + $0x30] sm:$0xff] }
   0x6   :  { %285 = vrot.lane.b32.xlu0 %v156_v2, %s10383_s28  ;;  %289 = vrot.lane.b32.xlu1 %v158_v3, %s10383_s28  ;;  %v26_v12 = vld [vmem:[%s18021_s0] sm:$0xff]  ;;  %v167_v14 = vld [vmem:[%s18021_s0 + $0x91] sm:$0xff]  ;;  %93 = vst.msk [vmem:[#allocation2 + $0x10] sm:$0xff] %vm90_vm0, %v10486_v13  ;;  %95 = vst.msk [vmem:[#allocation2 + $0x20] sm:$0xff] %vm90_vm0, %v10511_v18 }
   0x7   :  { %v168_v15 = vld [vmem:[%s18021_s0 + $0x99] sm:$0xff]  ;;  %91 = vst.msk [vmem:[#allocation2] sm:$0xff] %vm90_vm0, %v26_v12  ;;  %v27_v16 = vld [vmem:[%s18021_s0 + $0x8] sm:$0xff]  ;;  %v170_v22 = vld [vmem:[%s18021_s0 + $0xb1] sm:$0xff] }
   0x8   :  { %92 = vst.msk [vmem:[#allocation2 + $0x8] sm:$0xff] %vm90_vm0, %v27_v16  ;;  %v10504_v17 = vld [vmem:[%s18021_s0 + $0x20] sm:$0xff]  ;;  %v10516_v19 = vld [vmem:[%s18021_s0 + $0x38] sm:$0xff]  ;;  %v10527_v20 = vld [vmem:[%s18021_s0 + $0x48] sm:$0xff] }
   0x9   :  { %94 = vst.msk [vmem:[#allocation2 + $0x18] sm:$0xff] %vm90_vm0, %v10504_v17  ;;  %96 = vst.msk [vmem:[#allocation2 + $0x28] sm:$0xff] %vm90_vm0, %v10516_v19  ;;  %v169_v21 = vld [vmem:[%s18021_s0 + $0xa9] sm:$0xff]  ;;  %v10547_v24 = vld [vmem:[%s18021_s0 + $0x60] sm:$0xff] }
   0xa   :  { %291 = vrot.lane.b32.xlu0 %v159_v4, %s10383_s28  ;;  %293 = vrot.lane.b32.xlu1 %v160_v5, %s10383_s28  ;;  %97 = vst.msk [vmem:[#allocation2 + $0x30] sm:$0xff] %vm90_vm0, %v10527_v20  ;;  %v10540_v23 = vld [vmem:[%s18021_s0 + $0x50] sm:$0xff]  ;;  %v10552_v25 = vld [vmem:[%s18021_s0 + $0x68] sm:$0xff]  ;;  %99 = vst.msk [vmem:[#allocation2 + $0x40] sm:$0xff] %vm90_vm0, %v10547_v24 }
   0xb   :  { %98 = vst.msk [vmem:[#allocation2 + $0x38] sm:$0xff] %vm90_vm0, %v10540_v23  ;;  %100 = vst.msk [vmem:[#allocation2 + $0x48] sm:$0xff] %vm90_vm0, %v10552_v25  ;;  %v10561_v26 = vld [vmem:[%s18021_s0 + $0x78] sm:$0xff]  ;;  %v10566_v27 = vld [vmem:[%s18021_s0 + $0x80] sm:$0xff] }
   0xc   :  { %v171_v28 = vld [vmem:[%s18021_s0 + $0xc1] sm:$0xff]  ;;  %101 = vst.msk [vmem:[#allocation2 + $0x50] sm:$0xff] %vm90_vm0, %v10561_v26  ;;  %102 = vst.msk [vmem:[#allocation2 + $0x58] sm:$0xff] %vm90_vm0, %v10566_v27  ;;  %v172_v29 = vld [vmem:[%s18021_s0 + $0xc9] sm:$0xff] }
   0xd   :  { %v10583_v30 = vld [vmem:[%s18021_s0 + $0x90] sm:$0xff]  ;;  %v10588_v31 = vld [vmem:[%s18021_s0 + $0x98] sm:$0xff]  ;;  %v10597_v32 = vld [vmem:[%s18021_s0 + $0xa8] sm:$0xff] }
   0xe   :  { %295 = vrot.lane.b32.xlu0 %v161_v6, %s10383_s28  ;;  %297 = vrot.lane.b32.xlu1 %v162_v7, %s10383_s28  ;;  %103 = vst.msk [vmem:[#allocation2 + $0x60] sm:$0xff] %vm90_vm0, %v10583_v30  ;;  %104 = vst.msk [vmem:[#allocation2 + $0x68] sm:$0xff] %vm90_vm0, %v10588_v31  ;;  %v10602_v33 = vld [vmem:[%s18021_s0 + $0xb0] sm:$0xff]  ;;  %v10611_v34 = vld [vmem:[%s18021_s0 + $0xc0] sm:$0xff] }
   0xf   :  { %105 = vst.msk [vmem:[#allocation2 + $0x70] sm:$0xff] %vm90_vm0, %v10597_v32  ;;  %106 = vst.msk [vmem:[#allocation2 + $0x78] sm:$0xff] %vm90_vm0, %v10602_v33  ;;  %v173_v35 = vld [vmem:[%s18021_s0 + $0xd9] sm:$0xff]  ;;  %v10623_v36 = vld [vmem:[%s18021_s0 + $0xc8] sm:$0xff] }
  0x10   :  { %107 = vst.msk [vmem:[#allocation2 + $0x80] sm:$0xff] %vm90_vm0, %v10611_v34  ;;  %v174_v37 = vld [vmem:[%s18021_s0 + $0xe1] sm:$0xff]  ;;  %108 = vst.msk [vmem:[#allocation2 + $0x88] sm:$0xff] %vm90_vm0, %v10623_v36  ;;  %v10633_v38 = vld [vmem:[%s18021_s0 + $0xd8] sm:$0xff] }
  0x11   :  { %v10638_v39 = vld [vmem:[%s18021_s0 + $0xe0] sm:$0xff]  ;;  %109 = vst.msk [vmem:[#allocation2 + $0x90] sm:$0xff] %vm90_vm0, %v10633_v38  ;;  %v10647_v40 = vld [vmem:[%s18021_s0 + $0xf0] sm:$0xff]  ;;  %v10654_v41 = vld [vmem:[%s18021_s0 + $0xf8] sm:$0xff] }
  0x12   :  { %299 = vrot.lane.b32.xlu0 %v163_v8, %s10383_s28  ;;  %301 = vrot.lane.b32.xlu1 %v164_v9, %s10383_s28  ;;  %110 = vst.msk [vmem:[#allocation2 + $0x98] sm:$0xff] %vm90_vm0, %v10638_v39  ;;  %111 = vst.msk [vmem:[#allocation2 + $0xa0] sm:$0xff] %vm90_vm0, %v10647_v40  ;;  %v10663_v42 = vld [vmem:[%s18021_s0 + $0x108] sm:$0xff]  ;;  %v10668_v43 = vld [vmem:[%s18021_s0 + $0x110] sm:$0xff] }
  0x13   :  { %112 = vst.msk [vmem:[#allocation2 + $0xa8] sm:$0xff] %vm90_vm0, %v10654_v41  ;;  %v175_v44 = vld [vmem:[%s18021_s0 + $0xf1] sm:$0xff]  ;;  %v176_v45 = vld [vmem:[%s18021_s0 + $0xf9] sm:$0xff]  ;;  %113 = vst.msk [vmem:[#allocation2 + $0xb0] sm:$0xff] %vm90_vm0, %v10663_v42 }
  0x14   :  { %114 = vst.msk [vmem:[#allocation2 + $0xb8] sm:$0xff] %vm90_vm0, %v10668_v43  ;;  %v10683_v46 = vld [vmem:[%s18021_s0 + $0x120] sm:$0xff]  ;;  %v10690_v47 = vld [vmem:[%s18021_s0 + $0x128] sm:$0xff]  ;;  %v10697_v48 = vld [vmem:[%s18021_s0 + $0x138] sm:$0xff] }
  0x15   :  { %115 = vst.msk [vmem:[#allocation2 + $0xc0] sm:$0xff] %vm90_vm0, %v10683_v46  ;;  %116 = vst.msk [vmem:[#allocation2 + $0xc8] sm:$0xff] %vm90_vm0, %v10690_v47  ;;  %v10702_v49 = vld [vmem:[%s18021_s0 + $0x140] sm:$0xff]  ;;  %v177_v50 = vld [vmem:[%s18021_s0 + $0x109] sm:$0xff] }
  0x16   :  { %303 = vrot.lane.b32.xlu0 %v165_v10, %s10383_s28  ;;  %305 = vrot.lane.b32.xlu1 %v166_v11, %s10383_s28  ;;  %117 = vst.msk [vmem:[#allocation2 + $0xd0] sm:$0xff] %vm90_vm0, %v10697_v48  ;;  %118 = vst.msk [vmem:[#allocation2 + $0xd8] sm:$0xff] %vm90_vm0, %v10702_v49  ;;  %v178_v51 = vld [vmem:[%s18021_s0 + $0x111] sm:$0xff]  ;;  %v179_v54 = vld [vmem:[%s18021_s0 + $0x121] sm:$0xff] }
  0x17   :  { %v10719_v52 = vld [vmem:[%s18021_s0 + $0x150] sm:$0xff]  ;;  %v10726_v53 = vld [vmem:[%s18021_s0 + $0x158] sm:$0xff]  ;;  %v10741_v56 = vld [vmem:[%s18021_s0 + $0x168] sm:$0xff] }
  0x18   :  { %119 = vst.msk [vmem:[#allocation2 + $0xe0] sm:$0xff] %vm90_vm0, %v10719_v52  ;;  %120 = vst.msk [vmem:[#allocation2 + $0xe8] sm:$0xff] %vm90_vm0, %v10726_v53  ;;  %v180_v55 = vld [vmem:[%s18021_s0 + $0x129] sm:$0xff]  ;;  %v181_v58 = vld [vmem:[%s18021_s0 + $0x139] sm:$0xff] }
  0x19   :  { %121 = vst.msk [vmem:[#allocation2 + $0xf0] sm:$0xff] %vm90_vm0, %v10741_v56  ;;  %v10748_v57 = vld [vmem:[%s18021_s0 + $0x170] sm:$0xff]  ;;  %v182_v59 = vld [vmem:[%s18021_s0 + $0x141] sm:$0xff]  ;;  %v59_v61 = vld [vmem:[%s18021_s0 + $0x1b8] sm:$0xff] }
  0x1a   :  { %307 = vrot.lane.b32.xlu0 %v167_v14, %s10383_s28  ;;  %309 = vrot.lane.b32.xlu1 %v168_v15, %s10383_s28  ;;  %122 = vst.msk [vmem:[#allocation2 + $0xf8] sm:$0xff] %vm90_vm0, %v10748_v57  ;;  %v58_v60 = vld [vmem:[%s18021_s0 + $0x1b0] sm:$0xff]  ;;  %124 = vst.msk [vmem:[#allocation2 + $0x108] sm:$0xff] %vm90_vm0, %v59_v61  ;;  %v184_v63 = vld [vmem:[%s18021_s0 + $0x159] sm:$0xff] }
  0x1b   :  { %123 = vst.msk [vmem:[#allocation2 + $0x100] sm:$0xff] %vm90_vm0, %v58_v60  ;;  %v183_v62 = vld [vmem:[%s18021_s0 + $0x151] sm:$0xff]  ;;  %v10779_v0 = vld [vmem:[%s18021_s0 + $0x1c8] sm:$0xff]  ;;  %v10801_v4 = vld [vmem:[%s18021_s0 + $0x1e0] sm:$0xff] }
  0x1c   :  { %125 = vst.msk [vmem:[#allocation2 + $0x110] sm:$0xff] %vm90_vm0, %v10779_v0  ;;  %v10786_v1 = vld [vmem:[%s18021_s0 + $0x1d0] sm:$0xff]  ;;  %127 = vst.msk [vmem:[#allocation2 + $0x120] sm:$0xff] %vm90_vm0, %v10801_v4  ;;  %v10808_v5 = vld [vmem:[%s18021_s0 + $0x1e8] sm:$0xff] }
  0x1d   :  { %126 = vst.msk [vmem:[#allocation2 + $0x118] sm:$0xff] %vm90_vm0, %v10786_v1  ;;  %v185_v2 = vld [vmem:[%s18021_s0 + $0x169] sm:$0xff]  ;;  %v186_v3 = vld [vmem:[%s18021_s0 + $0x171] sm:$0xff]  ;;  %128 = vst.msk [vmem:[#allocation2 + $0x128] sm:$0xff] %vm90_vm0, %v10808_v5 }
  0x1e   :  { %311 = vrot.lane.b32.xlu0 %v169_v21, %s10383_s28  ;;  %313 = vrot.lane.b32.xlu1 %v170_v22, %s10383_s28  ;;  %v187_v6 = vld [vmem:[%s18021_s0 + $0x1b1] sm:$0xff]  ;;  %v188_v7 = vld [vmem:[%s18021_s0 + $0x1b9] sm:$0xff] }
  0x1f   :  { %v10823_v8 = vld [vmem:[%s18021_s0 + $0x1f8] sm:$0xff]  ;;  %v10830_v9 = vld [vmem:[%s18021_s0 + $0x200] sm:$0xff]  ;;  %v189_v10 = vld [vmem:[%s18021_s0 + $0x1c9] sm:$0xff] }
  0x20   :  { %129 = vst.msk [vmem:[#allocation2 + $0x130] sm:$0xff] %vm90_vm0, %v10823_v8  ;;  %130 = vst.msk [vmem:[#allocation2 + $0x138] sm:$0xff] %vm90_vm0, %v10830_v9  ;;  %v190_v11 = vld [vmem:[%s18021_s0 + $0x1d1] sm:$0xff]  ;;  %v191_v15 = vld [vmem:[%s18021_s0 + $0x1e1] sm:$0xff] }
  0x21   :  { %v10845_v12 = vld [vmem:[%s18021_s0 + $0x210] sm:$0xff]  ;;  %v10852_v14 = vld [vmem:[%s18021_s0 + $0x218] sm:$0xff]  ;;  %v10867_v21 = vld [vmem:[%s18021_s0 + $0x228] sm:$0xff] }
  0x22   :  { %315 = vrot.lane.b32.xlu0 %v171_v28, %s10383_s28  ;;  %317 = vrot.lane.b32.xlu1 %v172_v29, %s10383_s28  ;;  %131 = vst.msk [vmem:[#allocation2 + $0x140] sm:$0xff] %vm90_vm0, %v10845_v12  ;;  %132 = vst.msk [vmem:[#allocation2 + $0x148] sm:$0xff] %vm90_vm0, %v10852_v14  ;;  %v192_v16 = vld [vmem:[%s18021_s0 + $0x1e9] sm:$0xff]  ;;  %v193_v28 = vld [vmem:[%s18021_s0 + $0x1f9] sm:$0xff] }
  0x23   :  { %133 = vst.msk [vmem:[#allocation2 + $0x150] sm:$0xff] %vm90_vm0, %v10867_v21  ;;  %v10874_v22 = vld [vmem:[%s18021_s0 + $0x230] sm:$0xff]  ;;  %v194_v29 = vld [vmem:[%s18021_s0 + $0x201] sm:$0xff] }
  0x24   :  { %134 = vst.msk [vmem:[#allocation2 + $0x158] sm:$0xff] %vm90_vm0, %v10874_v22  ;;  %v199_v60 = vld [vmem:[%s18021_s0 + $0x241] sm:$0xff]  ;;  %v200_v61 = vld [vmem:[%s18021_s0 + $0x249] sm:$0xff] }
  0x26   :  { %319 = vrot.lane.b32.xlu0 %v173_v35, %s10383_s28  ;;  %321 = vrot.lane.b32.xlu1 %v174_v37, %s10383_s28  ;;  %v10889_v35 = vld [vmem:[%s18021_s0 + $0x240] sm:$0xff]  ;;  %v10896_v37 = vld [vmem:[%s18021_s0 + $0x248] sm:$0xff] }
  0x27   :  { %135 = vst.msk [vmem:[#allocation2 + $0x160] sm:$0xff] %vm90_vm0, %v10889_v35  ;;  %136 = vst.msk [vmem:[#allocation2 + $0x168] sm:$0xff] %vm90_vm0, %v10896_v37 }
  0x2a   :  { %323 = vrot.lane.b32.xlu0 %v175_v44, %s10383_s28  ;;  %325 = vrot.lane.b32.xlu1 %v176_v45, %s10383_s28  ;;  %v195_v44 = vld [vmem:[%s18021_s0 + $0x211] sm:$0xff]  ;;  %v196_v45 = vld [vmem:[%s18021_s0 + $0x219] sm:$0xff] }
  0x2e   :  { %327 = vrot.lane.b32.xlu0 %v177_v50, %s10383_s28  ;;  %329 = vrot.lane.b32.xlu1 %v178_v51, %s10383_s28  ;;  %v10911_v50 = vld [vmem:[%s18021_s0 + $0x258] sm:$0xff]  ;;  %v10918_v51 = vld [vmem:[%s18021_s0 + $0x260] sm:$0xff] }
  0x2f   :  { %137 = vst.msk [vmem:[#allocation2 + $0x170] sm:$0xff] %vm90_vm0, %v10911_v50  ;;  %138 = vst.msk [vmem:[#allocation2 + $0x178] sm:$0xff] %vm90_vm0, %v10918_v51 }
  0x32   :  { %331 = vrot.lane.b32.xlu0 %v179_v54, %s10383_s28  ;;  %333 = vrot.lane.b32.xlu1 %v180_v55, %s10383_s28  ;;  %v197_v54 = vld [vmem:[%s18021_s0 + $0x229] sm:$0xff]  ;;  %v198_v55 = vld [vmem:[%s18021_s0 + $0x231] sm:$0xff] }
  0x36   :  { %335 = vrot.lane.b32.xlu0 %v181_v58, %s10383_s28  ;;  %337 = vrot.lane.b32.xlu1 %v182_v59, %s10383_s28  ;;  %v10933_v58 = vld [vmem:[%s18021_s0 + $0x270] sm:$0xff]  ;;  %v10940_v59 = vld [vmem:[%s18021_s0 + $0x278] sm:$0xff] }
  0x37   :  { %139 = vst.msk [vmem:[#allocation2 + $0x180] sm:$0xff] %vm90_vm0, %v10933_v58  ;;  %140 = vst.msk [vmem:[#allocation2 + $0x188] sm:$0xff] %vm90_vm0, %v10940_v59 }
  0x3a   :  { %339 = vrot.lane.b32.xlu0 %v183_v62, %s10383_s28  ;;  %341 = vrot.lane.b32.xlu1 %v184_v63, %s10383_s28  ;;  %v10955_v62 = vld [vmem:[%s18021_s0 + $0x288] sm:$0xff]  ;;  %v10962_v63 = vld [vmem:[%s18021_s0 + $0x290] sm:$0xff] }
  0x3b   :  { %141 = vst.msk [vmem:[#allocation2 + $0x190] sm:$0xff] %vm90_vm0, %v10955_v62  ;;  %142 = vst.msk [vmem:[#allocation2 + $0x198] sm:$0xff] %vm90_vm0, %v10962_v63 }
  0x3e   :  { %343 = vrot.lane.b32.xlu0 %v185_v2, %s10383_s28  ;;  %345 = vrot.lane.b32.xlu1 %v186_v3, %s10383_s28  ;;  %v201_v2 = vld [vmem:[%s18021_s0 + $0x259] sm:$0xff]  ;;  %v202_v3 = vld [vmem:[%s18021_s0 + $0x261] sm:$0xff] }
  0x42   :  { %347 = vrot.lane.b32.xlu0 %v187_v6, %s10383_s28  ;;  %349 = vrot.lane.b32.xlu1 %v188_v7, %s10383_s28  ;;  %v10977_v6 = vld [vmem:[%s18021_s0 + $0x2a0] sm:$0xff]  ;;  %v10984_v7 = vld [vmem:[%s18021_s0 + $0x2a8] sm:$0xff] }
  0x43   :  { %143 = vst.msk [vmem:[#allocation2 + $0x1a0] sm:$0xff] %vm90_vm0, %v10977_v6  ;;  %144 = vst.msk [vmem:[#allocation2 + $0x1a8] sm:$0xff] %vm90_vm0, %v10984_v7 }
  0x46   :  { %351 = vrot.lane.b32.xlu0 %v189_v10, %s10383_s28  ;;  %353 = vrot.lane.b32.xlu1 %v190_v11, %s10383_s28  ;;  %v203_v10 = vld [vmem:[%s18021_s0 + $0x271] sm:$0xff]  ;;  %v204_v11 = vld [vmem:[%s18021_s0 + $0x279] sm:$0xff] }
  0x4a   :  { %355 = vrot.lane.b32.xlu0 %v191_v15, %s10383_s28  ;;  %357 = vrot.lane.b32.xlu1 %v192_v16, %s10383_s28  ;;  %v10999_v15 = vld [vmem:[%s18021_s0 + $0x2b8] sm:$0xff]  ;;  %v11006_v16 = vld [vmem:[%s18021_s0 + $0x2c0] sm:$0xff] }
  0x4b   :  { %145 = vst.msk [vmem:[#allocation2 + $0x1b0] sm:$0xff] %vm90_vm0, %v10999_v15  ;;  %146 = vst.msk [vmem:[#allocation2 + $0x1b8] sm:$0xff] %vm90_vm0, %v11006_v16 }
  0x4e   :  { %359 = vrot.lane.b32.xlu0 %v193_v28, %s10383_s28  ;;  %361 = vrot.lane.b32.xlu1 %v194_v29, %s10383_s28  ;;  %v205_v28 = vld [vmem:[%s18021_s0 + $0x289] sm:$0xff]  ;;  %v206_v29 = vld [vmem:[%s18021_s0 + $0x291] sm:$0xff] }
  0x52   :  { %363 = vrot.lane.b32.xlu0 %v195_v44, %s10383_s28  ;;  %365 = vrot.lane.b32.xlu1 %v196_v45, %s10383_s28  ;;  %v11021_v44 = vld [vmem:[%s18021_s0 + $0x2d0] sm:$0xff]  ;;  %v11028_v45 = vld [vmem:[%s18021_s0 + $0x2d8] sm:$0xff] }
  0x53   :  { %147 = vst.msk [vmem:[#allocation2 + $0x1c0] sm:$0xff] %vm90_vm0, %v11021_v44  ;;  %148 = vst.msk [vmem:[#allocation2 + $0x1c8] sm:$0xff] %vm90_vm0, %v11028_v45 }
  0x56   :  { %367 = vrot.lane.b32.xlu0 %v197_v54, %s10383_s28  ;;  %369 = vrot.lane.b32.xlu1 %v198_v55, %s10383_s28  ;;  %v207_v54 = vld [vmem:[%s18021_s0 + $0x2a1] sm:$0xff]  ;;  %v208_v55 = vld [vmem:[%s18021_s0 + $0x2a9] sm:$0xff] }
  0x5a   :  { %371 = vrot.lane.b32.xlu0 %v199_v60, %s10383_s28  ;;  %373 = vrot.lane.b32.xlu1 %v200_v61, %s10383_s28  ;;  %v11043_v60 = vld [vmem:[%s18021_s0 + $0x2e8] sm:$0xff]  ;;  %v11050_v61 = vld [vmem:[%s18021_s0 + $0x2f0] sm:$0xff] }
  0x5b   :  { %149 = vst.msk [vmem:[#allocation2 + $0x1d0] sm:$0xff] %vm90_vm0, %v11043_v60  ;;  %150 = vst.msk [vmem:[#allocation2 + $0x1d8] sm:$0xff] %vm90_vm0, %v11050_v61 }
  0x5e   :  { %375 = vrot.lane.b32.xlu0 %v201_v2, %s10383_s28  ;;  %377 = vrot.lane.b32.xlu1 %v202_v3, %s10383_s28  ;;  %v209_v2 = vld [vmem:[%s18021_s0 + $0x2b9] sm:$0xff]  ;;  %v210_v3 = vld [vmem:[%s18021_s0 + $0x2c1] sm:$0xff] }
  0x62   :  { %379 = vrot.lane.b32.xlu0 %v203_v10, %s10383_s28  ;;  %381 = vrot.lane.b32.xlu1 %v204_v11, %s10383_s28  ;;  %v11065_v10 = vld [vmem:[%s18021_s0 + $0x300] sm:$0xff]  ;;  %v11072_v11 = vld [vmem:[%s18021_s0 + $0x308] sm:$0xff] }
  0x63   :  { %18149 = vst [vmem:[#allocation4_spill] sm:$0xff] %v11065_v10  ;;  %151 = vst.msk [vmem:[#allocation2 + $0x1e0] sm:$0xff] %vm90_vm0, %v11065_v10 }
  0x64   :  { %18150 = vst [vmem:[#allocation5_spill] sm:$0xff] %v11072_v11  ;;  %152 = vst.msk [vmem:[#allocation2 + $0x1e8] sm:$0xff] %vm90_vm0, %v11072_v11 }
  0x66   :  { %383 = vrot.lane.b32.xlu0 %v205_v28, %s10383_s28  ;;  %385 = vrot.lane.b32.xlu1 %v206_v29, %s10383_s28  ;;  %v211_v28 = vld [vmem:[%s18021_s0 + $0x2d1] sm:$0xff]  ;;  %v212_v29 = vld [vmem:[%s18021_s0 + $0x2d9] sm:$0xff] }
  0x6a   :  { %387 = vrot.lane.b32.xlu0 %v207_v54, %s10383_s28  ;;  %389 = vrot.lane.b32.xlu1 %v208_v55, %s10383_s28  ;;  %v11087_v54 = vld [vmem:[%s18021_s0 + $0x318] sm:$0xff]  ;;  %v11094_v55 = vld [vmem:[%s18021_s0 + $0x320] sm:$0xff] }
  0x6b   :  { %18151 = vst [vmem:[#allocation6_spill] sm:$0xff] %v11087_v54  ;;  %153 = vst.msk [vmem:[#allocation2 + $0x1f0] sm:$0xff] %vm90_vm0, %v11087_v54 }
  0x6c   :  { %18152 = vst [vmem:[#allocation7_spill] sm:$0xff] %v11094_v55  ;;  %154 = vst.msk [vmem:[#allocation2 + $0x1f8] sm:$0xff] %vm90_vm0, %v11094_v55 }
  0x6e   :  { %391 = vrot.lane.b32.xlu0 %v209_v2, %s10383_s28  ;;  %393 = vrot.lane.b32.xlu1 %v210_v3, %s10383_s28  ;;  %v213_v2 = vld [vmem:[%s18021_s0 + $0x2e9] sm:$0xff]  ;;  %v214_v3 = vld [vmem:[%s18021_s0 + $0x2f1] sm:$0xff] }
  0x72   :  { %395 = vrot.lane.b32.xlu0 %v211_v28, %s10383_s28  ;;  %397 = vrot.lane.b32.xlu1 %v212_v29, %s10383_s28  ;;  %v215_v28 = vld [vmem:[%s18021_s0 + $0x301] sm:$0xff]  ;;  %v216_v29 = vld [vmem:[%s18021_s0 + $0x309] sm:$0xff] }
  0x74   :  { %v284_v54 = vpop.permute.xlu0 %283  ;;  %v288_v11 = vpop.permute.xlu1 %287 }
  0x75   :  { %476 = vst.msk [vmem:[#allocation2] sm:$0xff] %vm475_vm1, %v284_v54  ;;  %478 = vst.msk [vmem:[#allocation2 + $0x10] sm:$0xff] %vm475_vm1, %v288_v11  ;;  %v217_v11 = vld [vmem:[%s18021_s0 + $0x319] sm:$0xff]  ;;  %v218_v54 = vld [vmem:[%s18021_s0 + $0x321] sm:$0xff] }
  0x76   :  { %399 = vrot.lane.b32.xlu0 %v213_v2, %s10383_s28  ;;  %401 = vrot.lane.b32.xlu1 %v214_v3, %s10383_s28 }
  0x78   :  { %v286_v55 = vpop.permute.xlu0 %285  ;;  %v290_v10 = vpop.permute.xlu1 %289 }
  0x79   :  { %477 = vst.msk [vmem:[#allocation2 + $0x8] sm:$0xff] %vm475_vm1, %v286_v55  ;;  %479 = vst.msk [vmem:[#allocation2 + $0x18] sm:$0xff] %vm475_vm1, %v290_v10  ;;  %v540_v10 = vld [vmem:[%s18021_s0 + $0x2] sm:$0xff]  ;;  %v541_v55 = vld [vmem:[%s18021_s0 + $0xa] sm:$0xff] }
  0x7a   :  { %403 = vrot.lane.b32.xlu0 %v215_v28, %s10383_s28  ;;  %405 = vrot.lane.b32.xlu1 %v216_v29, %s10383_s28 }
  0x7c   :  { %v292_v2 = vpop.permute.xlu0 %291  ;;  %v294_v3 = vpop.permute.xlu1 %293 }
  0x7d   :  { %480 = vst.msk [vmem:[#allocation2 + $0x20] sm:$0xff] %vm475_vm1, %v292_v2  ;;  %481 = vst.msk [vmem:[#allocation2 + $0x28] sm:$0xff] %vm475_vm1, %v294_v3 }
  0x7e   :  { %407 = vrot.lane.b32.xlu0 %v217_v11, %s10383_s28  ;;  %409 = vrot.lane.b32.xlu1 %v218_v54, %s10383_s28  ;;  %v542_v11 = vld [vmem:[%s18021_s0 + $0x1a] sm:$0xff]  ;;  %v543_v54 = vld [vmem:[%s18021_s0 + $0x22] sm:$0xff] }
  0x80   :  { %v296_v28 = vpop.permute.xlu0 %295  ;;  %v298_v29 = vpop.permute.xlu1 %297 }
  0x81   :  { %482 = vst.msk [vmem:[#allocation2 + $0x30] sm:$0xff] %vm475_vm1, %v296_v28  ;;  %483 = vst.msk [vmem:[#allocation2 + $0x38] sm:$0xff] %vm475_vm1, %v298_v29 }
  0x82   :  { %668 = vrot.lane.b32.xlu0 %v540_v10, %s10384_s20  ;;  %670 = vrot.lane.b32.xlu1 %v541_v55, %s10384_s20  ;;  %v544_v10 = vld [vmem:[%s18021_s0 + $0x32] sm:$0xff]  ;;  %v545_v55 = vld [vmem:[%s18021_s0 + $0x3a] sm:$0xff] }
  0x84   :  { %v300_v2 = vpop.permute.xlu0 %299  ;;  %v302_v3 = vpop.permute.xlu1 %301 }
  0x85   :  { %484 = vst.msk [vmem:[#allocation2 + $0x40] sm:$0xff] %vm475_vm1, %v300_v2  ;;  %485 = vst.msk [vmem:[#allocation2 + $0x48] sm:$0xff] %vm475_vm1, %v302_v3 }
  0x86   :  { %672 = vrot.lane.b32.xlu0 %v542_v11, %s10384_s20  ;;  %674 = vrot.lane.b32.xlu1 %v543_v54, %s10384_s20  ;;  %v546_v11 = vld [vmem:[%s18021_s0 + $0x4a] sm:$0xff]  ;;  %v547_v54 = vld [vmem:[%s18021_s0 + $0x52] sm:$0xff] }
  0x88   :  { %v304_v28 = vpop.permute.xlu0 %303  ;;  %v306_v29 = vpop.permute.xlu1 %305 }
  0x89   :  { %486 = vst.msk [vmem:[#allocation2 + $0x50] sm:$0xff] %vm475_vm1, %v304_v28  ;;  %487 = vst.msk [vmem:[#allocation2 + $0x58] sm:$0xff] %vm475_vm1, %v306_v29 }
  0x8a   :  { %676 = vrot.lane.b32.xlu0 %v544_v10, %s10384_s20  ;;  %678 = vrot.lane.b32.xlu1 %v545_v55, %s10384_s20  ;;  %v548_v10 = vld [vmem:[%s18021_s0 + $0x62] sm:$0xff]  ;;  %v549_v55 = vld [vmem:[%s18021_s0 + $0x6a] sm:$0xff] }
  0x8c   :  { %v308_v2 = vpop.permute.xlu0 %307  ;;  %v310_v3 = vpop.permute.xlu1 %309 }
  0x8d   :  { %488 = vst.msk [vmem:[#allocation2 + $0x60] sm:$0xff] %vm475_vm1, %v308_v2  ;;  %489 = vst.msk [vmem:[#allocation2 + $0x68] sm:$0xff] %vm475_vm1, %v310_v3 }
  0x8e   :  { %680 = vrot.lane.b32.xlu0 %v546_v11, %s10384_s20  ;;  %682 = vrot.lane.b32.xlu1 %v547_v54, %s10384_s20  ;;  %v550_v11 = vld [vmem:[%s18021_s0 + $0x7a] sm:$0xff]  ;;  %v551_v54 = vld [vmem:[%s18021_s0 + $0x82] sm:$0xff] }
  0x90   :  { %v312_v28 = vpop.permute.xlu0 %311  ;;  %v314_v29 = vpop.permute.xlu1 %313 }
  0x91   :  { %490 = vst.msk [vmem:[#allocation2 + $0x70] sm:$0xff] %vm475_vm1, %v312_v28  ;;  %491 = vst.msk [vmem:[#allocation2 + $0x78] sm:$0xff] %vm475_vm1, %v314_v29 }
  0x92   :  { %684 = vrot.lane.b32.xlu0 %v548_v10, %s10384_s20  ;;  %686 = vrot.lane.b32.xlu1 %v549_v55, %s10384_s20  ;;  %v552_v10 = vld [vmem:[%s18021_s0 + $0x92] sm:$0xff]  ;;  %v553_v55 = vld [vmem:[%s18021_s0 + $0x9a] sm:$0xff] }
  0x94   :  { %v316_v2 = vpop.permute.xlu0 %315  ;;  %v318_v3 = vpop.permute.xlu1 %317 }
  0x95   :  { %492 = vst.msk [vmem:[#allocation2 + $0x80] sm:$0xff] %vm475_vm1, %v316_v2  ;;  %493 = vst.msk [vmem:[#allocation2 + $0x88] sm:$0xff] %vm475_vm1, %v318_v3 }
  0x96   :  { %688 = vrot.lane.b32.xlu0 %v550_v11, %s10384_s20  ;;  %690 = vrot.lane.b32.xlu1 %v551_v54, %s10384_s20  ;;  %v554_v11 = vld [vmem:[%s18021_s0 + $0xaa] sm:$0xff]  ;;  %v555_v54 = vld [vmem:[%s18021_s0 + $0xb2] sm:$0xff] }
  0x98   :  { %v320_v28 = vpop.permute.xlu0 %319  ;;  %v322_v29 = vpop.permute.xlu1 %321 }
  0x99   :  { %494 = vst.msk [vmem:[#allocation2 + $0x90] sm:$0xff] %vm475_vm1, %v320_v28  ;;  %495 = vst.msk [vmem:[#allocation2 + $0x98] sm:$0xff] %vm475_vm1, %v322_v29 }
  0x9a   :  { %692 = vrot.lane.b32.xlu0 %v552_v10, %s10384_s20  ;;  %694 = vrot.lane.b32.xlu1 %v553_v55, %s10384_s20  ;;  %v556_v10 = vld [vmem:[%s18021_s0 + $0xc2] sm:$0xff]  ;;  %v557_v55 = vld [vmem:[%s18021_s0 + $0xca] sm:$0xff] }
  0x9c   :  { %v324_v2 = vpop.permute.xlu0 %323  ;;  %v326_v3 = vpop.permute.xlu1 %325 }
  0x9d   :  { %496 = vst.msk [vmem:[#allocation2 + $0xa0] sm:$0xff] %vm475_vm1, %v324_v2  ;;  %497 = vst.msk [vmem:[#allocation2 + $0xa8] sm:$0xff] %vm475_vm1, %v326_v3 }
  0x9e   :  { %696 = vrot.lane.b32.xlu0 %v554_v11, %s10384_s20  ;;  %698 = vrot.lane.b32.xlu1 %v555_v54, %s10384_s20  ;;  %v558_v11 = vld [vmem:[%s18021_s0 + $0xda] sm:$0xff]  ;;  %v559_v54 = vld [vmem:[%s18021_s0 + $0xe2] sm:$0xff] }
  0xa0   :  { %v328_v28 = vpop.permute.xlu0 %327  ;;  %v330_v29 = vpop.permute.xlu1 %329 }
  0xa1   :  { %498 = vst.msk [vmem:[#allocation2 + $0xb0] sm:$0xff] %vm475_vm1, %v328_v28  ;;  %499 = vst.msk [vmem:[#allocation2 + $0xb8] sm:$0xff] %vm475_vm1, %v330_v29 }
  0xa2   :  { %700 = vrot.lane.b32.xlu0 %v556_v10, %s10384_s20  ;;  %702 = vrot.lane.b32.xlu1 %v557_v55, %s10384_s20  ;;  %v560_v10 = vld [vmem:[%s18021_s0 + $0xf2] sm:$0xff]  ;;  %v561_v55 = vld [vmem:[%s18021_s0 + $0xfa] sm:$0xff] }
  0xa4   :  { %v332_v2 = vpop.permute.xlu0 %331  ;;  %v334_v3 = vpop.permute.xlu1 %333 }
  0xa5   :  { %500 = vst.msk [vmem:[#allocation2 + $0xc0] sm:$0xff] %vm475_vm1, %v332_v2  ;;  %501 = vst.msk [vmem:[#allocation2 + $0xc8] sm:$0xff] %vm475_vm1, %v334_v3 }
  0xa6   :  { %704 = vrot.lane.b32.xlu0 %v558_v11, %s10384_s20  ;;  %706 = vrot.lane.b32.xlu1 %v559_v54, %s10384_s20  ;;  %v562_v11 = vld [vmem:[%s18021_s0 + $0x10a] sm:$0xff]  ;;  %v563_v54 = vld [vmem:[%s18021_s0 + $0x112] sm:$0xff] }
  0xa8   :  { %v336_v28 = vpop.permute.xlu0 %335  ;;  %v338_v29 = vpop.permute.xlu1 %337 }
  0xa9   :  { %502 = vst.msk [vmem:[#allocation2 + $0xd0] sm:$0xff] %vm475_vm1, %v336_v28  ;;  %503 = vst.msk [vmem:[#allocation2 + $0xd8] sm:$0xff] %vm475_vm1, %v338_v29 }
  0xaa   :  { %708 = vrot.lane.b32.xlu0 %v560_v10, %s10384_s20  ;;  %710 = vrot.lane.b32.xlu1 %v561_v55, %s10384_s20  ;;  %v564_v10 = vld [vmem:[%s18021_s0 + $0x122] sm:$0xff]  ;;  %v565_v55 = vld [vmem:[%s18021_s0 + $0x12a] sm:$0xff] }
  0xac   :  { %v340_v2 = vpop.permute.xlu0 %339  ;;  %v342_v3 = vpop.permute.xlu1 %341 }
  0xad   :  { %504 = vst.msk [vmem:[#allocation2 + $0xe0] sm:$0xff] %vm475_vm1, %v340_v2  ;;  %505 = vst.msk [vmem:[#allocation2 + $0xe8] sm:$0xff] %vm475_vm1, %v342_v3 }
  0xae   :  { %712 = vrot.lane.b32.xlu0 %v562_v11, %s10384_s20  ;;  %714 = vrot.lane.b32.xlu1 %v563_v54, %s10384_s20  ;;  %v566_v11 = vld [vmem:[%s18021_s0 + $0x13a] sm:$0xff]  ;;  %v567_v54 = vld [vmem:[%s18021_s0 + $0x142] sm:$0xff] }
  0xb0   :  { %v344_v28 = vpop.permute.xlu0 %343  ;;  %v346_v29 = vpop.permute.xlu1 %345 }
  0xb1   :  { %506 = vst.msk [vmem:[#allocation2 + $0xf0] sm:$0xff] %vm475_vm1, %v344_v28  ;;  %507 = vst.msk [vmem:[#allocation2 + $0xf8] sm:$0xff] %vm475_vm1, %v346_v29 }
  0xb2   :  { %716 = vrot.lane.b32.xlu0 %v564_v10, %s10384_s20  ;;  %718 = vrot.lane.b32.xlu1 %v565_v55, %s10384_s20  ;;  %v568_v10 = vld [vmem:[%s18021_s0 + $0x152] sm:$0xff]  ;;  %v569_v55 = vld [vmem:[%s18021_s0 + $0x15a] sm:$0xff] }
  0xb4   :  { %v348_v2 = vpop.permute.xlu0 %347  ;;  %v350_v3 = vpop.permute.xlu1 %349 }
  0xb5   :  { %508 = vst.msk [vmem:[#allocation2 + $0x100] sm:$0xff] %vm475_vm1, %v348_v2  ;;  %509 = vst.msk [vmem:[#allocation2 + $0x108] sm:$0xff] %vm475_vm1, %v350_v3 }
  0xb6   :  { %720 = vrot.lane.b32.xlu0 %v566_v11, %s10384_s20  ;;  %722 = vrot.lane.b32.xlu1 %v567_v54, %s10384_s20  ;;  %v570_v11 = vld [vmem:[%s18021_s0 + $0x16a] sm:$0xff]  ;;  %v571_v54 = vld [vmem:[%s18021_s0 + $0x172] sm:$0xff] }
  0xb8   :  { %v352_v28 = vpop.permute.xlu0 %351  ;;  %v354_v29 = vpop.permute.xlu1 %353 }
  0xb9   :  { %510 = vst.msk [vmem:[#allocation2 + $0x110] sm:$0xff] %vm475_vm1, %v352_v28  ;;  %511 = vst.msk [vmem:[#allocation2 + $0x118] sm:$0xff] %vm475_vm1, %v354_v29 }
  0xba   :  { %724 = vrot.lane.b32.xlu0 %v568_v10, %s10384_s20  ;;  %726 = vrot.lane.b32.xlu1 %v569_v55, %s10384_s20  ;;  %v572_v10 = vld [vmem:[%s18021_s0 + $0x1b2] sm:$0xff]  ;;  %v573_v55 = vld [vmem:[%s18021_s0 + $0x1ba] sm:$0xff] }
  0xbc   :  { %v356_v2 = vpop.permute.xlu0 %355  ;;  %v358_v3 = vpop.permute.xlu1 %357 }
  0xbd   :  { %512 = vst.msk [vmem:[#allocation2 + $0x120] sm:$0xff] %vm475_vm1, %v356_v2  ;;  %513 = vst.msk [vmem:[#allocation2 + $0x128] sm:$0xff] %vm475_vm1, %v358_v3 }
  0xbe   :  { %728 = vrot.lane.b32.xlu0 %v570_v11, %s10384_s20  ;;  %730 = vrot.lane.b32.xlu1 %v571_v54, %s10384_s20  ;;  %v574_v11 = vld [vmem:[%s18021_s0 + $0x1ca] sm:$0xff]  ;;  %v575_v54 = vld [vmem:[%s18021_s0 + $0x1d2] sm:$0xff] }
  0xc0   :  { %v360_v28 = vpop.permute.xlu0 %359  ;;  %v362_v29 = vpop.permute.xlu1 %361 }
  0xc1   :  { %514 = vst.msk [vmem:[#allocation2 + $0x130] sm:$0xff] %vm475_vm1, %v360_v28  ;;  %515 = vst.msk [vmem:[#allocation2 + $0x138] sm:$0xff] %vm475_vm1, %v362_v29 }
  0xc2   :  { %732 = vrot.lane.b32.xlu0 %v572_v10, %s10384_s20  ;;  %734 = vrot.lane.b32.xlu1 %v573_v55, %s10384_s20  ;;  %v576_v10 = vld [vmem:[%s18021_s0 + $0x1e2] sm:$0xff]  ;;  %v577_v55 = vld [vmem:[%s18021_s0 + $0x1ea] sm:$0xff] }
  0xc4   :  { %v364_v2 = vpop.permute.xlu0 %363  ;;  %v366_v3 = vpop.permute.xlu1 %365 }
  0xc5   :  { %516 = vst.msk [vmem:[#allocation2 + $0x140] sm:$0xff] %vm475_vm1, %v364_v2  ;;  %517 = vst.msk [vmem:[#allocation2 + $0x148] sm:$0xff] %vm475_vm1, %v366_v3 }
  0xc6   :  { %736 = vrot.lane.b32.xlu0 %v574_v11, %s10384_s20  ;;  %738 = vrot.lane.b32.xlu1 %v575_v54, %s10384_s20  ;;  %v578_v11 = vld [vmem:[%s18021_s0 + $0x1fa] sm:$0xff]  ;;  %v579_v54 = vld [vmem:[%s18021_s0 + $0x202] sm:$0xff] }
  0xc8   :  { %v368_v28 = vpop.permute.xlu0 %367  ;;  %v370_v29 = vpop.permute.xlu1 %369 }
  0xc9   :  { %518 = vst.msk [vmem:[#allocation2 + $0x150] sm:$0xff] %vm475_vm1, %v368_v28  ;;  %519 = vst.msk [vmem:[#allocation2 + $0x158] sm:$0xff] %vm475_vm1, %v370_v29 }
  0xca   :  { %740 = vrot.lane.b32.xlu0 %v576_v10, %s10384_s20  ;;  %742 = vrot.lane.b32.xlu1 %v577_v55, %s10384_s20  ;;  %v580_v10 = vld [vmem:[%s18021_s0 + $0x212] sm:$0xff]  ;;  %v581_v55 = vld [vmem:[%s18021_s0 + $0x21a] sm:$0xff] }
  0xcc   :  { %v372_v2 = vpop.permute.xlu0 %371  ;;  %v374_v3 = vpop.permute.xlu1 %373 }
  0xcd   :  { %520 = vst.msk [vmem:[#allocation2 + $0x160] sm:$0xff] %vm475_vm1, %v372_v2  ;;  %521 = vst.msk [vmem:[#allocation2 + $0x168] sm:$0xff] %vm475_vm1, %v374_v3 }
  0xce   :  { %744 = vrot.lane.b32.xlu0 %v578_v11, %s10384_s20  ;;  %746 = vrot.lane.b32.xlu1 %v579_v54, %s10384_s20  ;;  %v582_v11 = vld [vmem:[%s18021_s0 + $0x22a] sm:$0xff]  ;;  %v583_v54 = vld [vmem:[%s18021_s0 + $0x232] sm:$0xff] }
  0xd0   :  { %v376_v28 = vpop.permute.xlu0 %375  ;;  %v378_v29 = vpop.permute.xlu1 %377 }
  0xd1   :  { %522 = vst.msk [vmem:[#allocation2 + $0x170] sm:$0xff] %vm475_vm1, %v376_v28  ;;  %523 = vst.msk [vmem:[#allocation2 + $0x178] sm:$0xff] %vm475_vm1, %v378_v29 }
  0xd2   :  { %748 = vrot.lane.b32.xlu0 %v580_v10, %s10384_s20  ;;  %750 = vrot.lane.b32.xlu1 %v581_v55, %s10384_s20  ;;  %v584_v10 = vld [vmem:[%s18021_s0 + $0x242] sm:$0xff]  ;;  %v585_v55 = vld [vmem:[%s18021_s0 + $0x24a] sm:$0xff] }
  0xd4   :  { %v380_v2 = vpop.permute.xlu0 %379  ;;  %v382_v3 = vpop.permute.xlu1 %381 }
  0xd5   :  { %524 = vst.msk [vmem:[#allocation2 + $0x180] sm:$0xff] %vm475_vm1, %v380_v2  ;;  %525 = vst.msk [vmem:[#allocation2 + $0x188] sm:$0xff] %vm475_vm1, %v382_v3 }
  0xd6   :  { %752 = vrot.lane.b32.xlu0 %v582_v11, %s10384_s20  ;;  %754 = vrot.lane.b32.xlu1 %v583_v54, %s10384_s20  ;;  %v586_v11 = vld [vmem:[%s18021_s0 + $0x25a] sm:$0xff]  ;;  %v587_v54 = vld [vmem:[%s18021_s0 + $0x262] sm:$0xff] }
  0xd8   :  { %v384_v28 = vpop.permute.xlu0 %383  ;;  %v386_v29 = vpop.permute.xlu1 %385 }
  0xd9   :  { %526 = vst.msk [vmem:[#allocation2 + $0x190] sm:$0xff] %vm475_vm1, %v384_v28  ;;  %527 = vst.msk [vmem:[#allocation2 + $0x198] sm:$0xff] %vm475_vm1, %v386_v29 }
  0xda   :  { %756 = vrot.lane.b32.xlu0 %v584_v10, %s10384_s20  ;;  %758 = vrot.lane.b32.xlu1 %v585_v55, %s10384_s20  ;;  %v588_v10 = vld [vmem:[%s18021_s0 + $0x272] sm:$0xff]  ;;  %v589_v55 = vld [vmem:[%s18021_s0 + $0x27a] sm:$0xff] }
  0xdc   :  { %v388_v2 = vpop.permute.xlu0 %387  ;;  %v390_v3 = vpop.permute.xlu1 %389 }
  0xdd   :  { %528 = vst.msk [vmem:[#allocation2 + $0x1a0] sm:$0xff] %vm475_vm1, %v388_v2  ;;  %529 = vst.msk [vmem:[#allocation2 + $0x1a8] sm:$0xff] %vm475_vm1, %v390_v3 }
  0xde   :  { %760 = vrot.lane.b32.xlu0 %v586_v11, %s10384_s20  ;;  %762 = vrot.lane.b32.xlu1 %v587_v54, %s10384_s20  ;;  %v590_v11 = vld [vmem:[%s18021_s0 + $0x28a] sm:$0xff]  ;;  %v591_v54 = vld [vmem:[%s18021_s0 + $0x292] sm:$0xff] }
  0xe0   :  { %v392_v28 = vpop.permute.xlu0 %391  ;;  %v394_v29 = vpop.permute.xlu1 %393 }
  0xe1   :  { %530 = vst.msk [vmem:[#allocation2 + $0x1b0] sm:$0xff] %vm475_vm1, %v392_v28  ;;  %531 = vst.msk [vmem:[#allocation2 + $0x1b8] sm:$0xff] %vm475_vm1, %v394_v29 }
  0xe2   :  { %764 = vrot.lane.b32.xlu0 %v588_v10, %s10384_s20  ;;  %766 = vrot.lane.b32.xlu1 %v589_v55, %s10384_s20  ;;  %v592_v10 = vld [vmem:[%s18021_s0 + $0x2a2] sm:$0xff]  ;;  %v593_v55 = vld [vmem:[%s18021_s0 + $0x2aa] sm:$0xff] }
  0xe4   :  { %v396_v2 = vpop.permute.xlu0 %395  ;;  %v398_v3 = vpop.permute.xlu1 %397 }
  0xe5   :  { %532 = vst.msk [vmem:[#allocation2 + $0x1c0] sm:$0xff] %vm475_vm1, %v396_v2  ;;  %533 = vst.msk [vmem:[#allocation2 + $0x1c8] sm:$0xff] %vm475_vm1, %v398_v3 }
  0xe6   :  { %768 = vrot.lane.b32.xlu0 %v590_v11, %s10384_s20  ;;  %770 = vrot.lane.b32.xlu1 %v591_v54, %s10384_s20  ;;  %v594_v11 = vld [vmem:[%s18021_s0 + $0x2ba] sm:$0xff]  ;;  %v595_v54 = vld [vmem:[%s18021_s0 + $0x2c2] sm:$0xff] }
  0xe8   :  { %v400_v28 = vpop.permute.xlu0 %399  ;;  %v402_v29 = vpop.permute.xlu1 %401 }
  0xe9   :  { %534 = vst.msk [vmem:[#allocation2 + $0x1d0] sm:$0xff] %vm475_vm1, %v400_v28  ;;  %535 = vst.msk [vmem:[#allocation2 + $0x1d8] sm:$0xff] %vm475_vm1, %v402_v29 }
  0xea   :  { %772 = vrot.lane.b32.xlu0 %v592_v10, %s10384_s20  ;;  %774 = vrot.lane.b32.xlu1 %v593_v55, %s10384_s20  ;;  %v596_v10 = vld [vmem:[%s18021_s0 + $0x2d2] sm:$0xff]  ;;  %v597_v55 = vld [vmem:[%s18021_s0 + $0x2da] sm:$0xff] }
  0xec   :  { %v404_v2 = vpop.permute.xlu0 %403  ;;  %v406_v3 = vpop.permute.xlu1 %405 }
  0xed   :  { %536 = vst.msk [vmem:[#allocation2 + $0x1e0] sm:$0xff] %vm475_vm1, %v404_v2  ;;  %537 = vst.msk [vmem:[#allocation2 + $0x1e8] sm:$0xff] %vm475_vm1, %v406_v3 }
  0xee   :  { %776 = vrot.lane.b32.xlu0 %v594_v11, %s10384_s20  ;;  %778 = vrot.lane.b32.xlu1 %v595_v54, %s10384_s20  ;;  %v598_v11 = vld [vmem:[%s18021_s0 + $0x2ea] sm:$0xff]  ;;  %v599_v54 = vld [vmem:[%s18021_s0 + $0x2f2] sm:$0xff] }
  0xf0   :  { %v408_v28 = vpop.permute.xlu0 %407  ;;  %v410_v29 = vpop.permute.xlu1 %409 }
  0xf1   :  { %538 = vst.msk [vmem:[#allocation2 + $0x1f0] sm:$0xff] %vm475_vm1, %v408_v28  ;;  %539 = vst.msk [vmem:[#allocation2 + $0x1f8] sm:$0xff] %vm475_vm1, %v410_v29 }
  0xf2   :  { %780 = vrot.lane.b32.xlu0 %v596_v10, %s10384_s20  ;;  %782 = vrot.lane.b32.xlu1 %v597_v55, %s10384_s20  ;;  %v600_v10 = vld [vmem:[%s18021_s0 + $0x302] sm:$0xff]  ;;  %v601_v55 = vld [vmem:[%s18021_s0 + $0x30a] sm:$0xff] }
  0xf4   :  { %v669_v2 = vpop.permute.xlu0 %668  ;;  %v671_v3 = vpop.permute.xlu1 %670 }
  0xf5   :  { %861 = vst.msk [vmem:[#allocation2] sm:$0xff] %vm860_vm2, %v669_v2  ;;  %862 = vst.msk [vmem:[#allocation2 + $0x8] sm:$0xff] %vm860_vm2, %v671_v3 }
  0xf6   :  { %784 = vrot.lane.b32.xlu0 %v598_v11, %s10384_s20  ;;  %786 = vrot.lane.b32.xlu1 %v599_v54, %s10384_s20  ;;  %v602_v11 = vld [vmem:[%s18021_s0 + $0x31a] sm:$0xff]  ;;  %v603_v54 = vld [vmem:[%s18021_s0 + $0x322] sm:$0xff] }
  0xf8   :  { %v673_v28 = vpop.permute.xlu0 %672  ;;  %v675_v29 = vpop.permute.xlu1 %674 }
  0xf9   :  { %863 = vst.msk [vmem:[#allocation2 + $0x10] sm:$0xff] %vm860_vm2, %v673_v28  ;;  %864 = vst.msk [vmem:[#allocation2 + $0x18] sm:$0xff] %vm860_vm2, %v675_v29 }
  0xfa   :  { %788 = vrot.lane.b32.xlu0 %v600_v10, %s10384_s20  ;;  %790 = vrot.lane.b32.xlu1 %v601_v55, %s10384_s20 }
  0xfc   :  { %v677_v2 = vpop.permute.xlu0 %676  ;;  %v679_v3 = vpop.permute.xlu1 %678 }
  0xfd   :  { %865 = vst.msk [vmem:[#allocation2 + $0x20] sm:$0xff] %vm860_vm2, %v677_v2  ;;  %866 = vst.msk [vmem:[#allocation2 + $0x28] sm:$0xff] %vm860_vm2, %v679_v3 }
  0xfe   :  { %792 = vrot.lane.b32.xlu0 %v602_v11, %s10384_s20  ;;  %794 = vrot.lane.b32.xlu1 %v603_v54, %s10384_s20 }
 0x100   :  { %v681_v10 = vpop.permute.xlu0 %680  ;;  %v683_v55 = vpop.permute.xlu1 %682 }
 0x101   :  { %867 = vst.msk [vmem:[#allocation2 + $0x30] sm:$0xff] %vm860_vm2, %v681_v10  ;;  %868 = vst.msk [vmem:[#allocation2 + $0x38] sm:$0xff] %vm860_vm2, %v683_v55 }
 0x102   :  { %1054 = vrot.lane.b32.xlu0 %v10486_v13, %s10385_s18  ;;  %1056 = vrot.lane.b32.xlu1 %v10504_v17, %s10385_s18 }
 0x104   :  { %v685_v28 = vpop.permute.xlu0 %684  ;;  %v687_v29 = vpop.permute.xlu1 %686 }
 0x105   :  { %869 = vst.msk [vmem:[#allocation2 + $0x40] sm:$0xff] %vm860_vm2, %v685_v28  ;;  %870 = vst.msk [vmem:[#allocation2 + $0x48] sm:$0xff] %vm860_vm2, %v687_v29 }
 0x106   :  { %1058 = vrot.lane.b32.xlu0 %v10511_v18, %s10385_s18  ;;  %1060 = vrot.lane.b32.xlu1 %v10516_v19, %s10385_s18 }
 0x108   :  { %v689_v11 = vpop.permute.xlu0 %688  ;;  %v691_v54 = vpop.permute.xlu1 %690 }
 0x109   :  { %871 = vst.msk [vmem:[#allocation2 + $0x50] sm:$0xff] %vm860_vm2, %v689_v11  ;;  %872 = vst.msk [vmem:[#allocation2 + $0x58] sm:$0xff] %vm860_vm2, %v691_v54  ;;  %v9450_v11 = vld [vmem:[%s18021_s0 + $0x330] sm:$0xff]  ;;  %v9451_v54 = vld [vmem:[%s18021_s0 + $0x338] sm:$0xff] }
 0x10a   :  { %1062 = vrot.lane.b32.xlu0 %v10527_v20, %s10385_s18  ;;  %1064 = vrot.lane.b32.xlu1 %v10540_v23, %s10385_s18 }
 0x10c   :  { %v693_v13 = vpop.permute.xlu0 %692  ;;  %v695_v17 = vpop.permute.xlu1 %694 }
 0x10d   :  { %873 = vst.msk [vmem:[#allocation2 + $0x60] sm:$0xff] %vm860_vm2, %v693_v13  ;;  %874 = vst.msk [vmem:[#allocation2 + $0x68] sm:$0xff] %vm860_vm2, %v695_v17 }
 0x10e   :  { %1066 = vrot.lane.b32.xlu0 %v10547_v24, %s10385_s18  ;;  %1068 = vrot.lane.b32.xlu1 %v10552_v25, %s10385_s18 }
 0x110   :  { %v697_v18 = vpop.permute.xlu0 %696  ;;  %v699_v19 = vpop.permute.xlu1 %698 }
 0x111   :  { %875 = vst.msk [vmem:[#allocation2 + $0x70] sm:$0xff] %vm860_vm2, %v697_v18  ;;  %876 = vst.msk [vmem:[#allocation2 + $0x78] sm:$0xff] %vm860_vm2, %v699_v19  ;;  %v9452_v18 = vld [vmem:[%s18021_s0 + $0x19] sm:$0xff]  ;;  %v9453_v19 = vld [vmem:[%s18021_s0 + $0x21] sm:$0xff] }
 0x112   :  { %1070 = vrot.lane.b32.xlu0 %v10561_v26, %s10385_s18  ;;  %1072 = vrot.lane.b32.xlu1 %v10566_v27, %s10385_s18 }
 0x114   :  { %v701_v20 = vpop.permute.xlu0 %700  ;;  %v703_v23 = vpop.permute.xlu1 %702 }
 0x115   :  { %877 = vst.msk [vmem:[#allocation2 + $0x80] sm:$0xff] %vm860_vm2, %v701_v20  ;;  %878 = vst.msk [vmem:[#allocation2 + $0x88] sm:$0xff] %vm860_vm2, %v703_v23 }
 0x116   :  { %1074 = vrot.lane.b32.xlu0 %v10583_v30, %s10385_s18  ;;  %1076 = vrot.lane.b32.xlu1 %v10588_v31, %s10385_s18 }
 0x118   :  { %v705_v24 = vpop.permute.xlu0 %704  ;;  %v707_v25 = vpop.permute.xlu1 %706 }
 0x119   :  { %879 = vst.msk [vmem:[#allocation2 + $0x90] sm:$0xff] %vm860_vm2, %v705_v24  ;;  %880 = vst.msk [vmem:[#allocation2 + $0x98] sm:$0xff] %vm860_vm2, %v707_v25  ;;  %v9454_v24 = vld [vmem:[%s18021_s0 + $0x31] sm:$0xff]  ;;  %v9455_v25 = vld [vmem:[%s18021_s0 + $0x39] sm:$0xff] }
 0x11a   :  { %1078 = vrot.lane.b32.xlu0 %v10597_v32, %s10385_s18  ;;  %1080 = vrot.lane.b32.xlu1 %v10602_v33, %s10385_s18 }
 0x11c   :  { %v709_v26 = vpop.permute.xlu0 %708  ;;  %v711_v27 = vpop.permute.xlu1 %710 }
 0x11d   :  { %881 = vst.msk [vmem:[#allocation2 + $0xa0] sm:$0xff] %vm860_vm2, %v709_v26  ;;  %882 = vst.msk [vmem:[#allocation2 + $0xa8] sm:$0xff] %vm860_vm2, %v711_v27 }
 0x11e   :  { %1082 = vrot.lane.b32.xlu0 %v10611_v34, %s10385_s18  ;;  %1084 = vrot.lane.b32.xlu1 %v10623_v36, %s10385_s18 }
 0x120   :  { %v713_v30 = vpop.permute.xlu0 %712  ;;  %v715_v31 = vpop.permute.xlu1 %714 }
 0x121   :  { %883 = vst.msk [vmem:[#allocation2 + $0xb0] sm:$0xff] %vm860_vm2, %v713_v30  ;;  %884 = vst.msk [vmem:[#allocation2 + $0xb8] sm:$0xff] %vm860_vm2, %v715_v31  ;;  %v9456_v30 = vld [vmem:[%s18021_s0 + $0x49] sm:$0xff]  ;;  %v9457_v31 = vld [vmem:[%s18021_s0 + $0x51] sm:$0xff] }
 0x122   :  { %1086 = vrot.lane.b32.xlu0 %v10633_v38, %s10385_s18  ;;  %1088 = vrot.lane.b32.xlu1 %v10638_v39, %s10385_s18 }
 0x124   :  { %v717_v32 = vpop.permute.xlu0 %716  ;;  %v719_v33 = vpop.permute.xlu1 %718 }
 0x125   :  { %885 = vst.msk [vmem:[#allocation2 + $0xc0] sm:$0xff] %vm860_vm2, %v717_v32  ;;  %886 = vst.msk [vmem:[#allocation2 + $0xc8] sm:$0xff] %vm860_vm2, %v719_v33 }
 0x126   :  { %1090 = vrot.lane.b32.xlu0 %v10647_v40, %s10385_s18  ;;  %1092 = vrot.lane.b32.xlu1 %v10654_v41, %s10385_s18 }
 0x128   :  { %v721_v34 = vpop.permute.xlu0 %720  ;;  %v723_v36 = vpop.permute.xlu1 %722 }
 0x129   :  { %887 = vst.msk [vmem:[#allocation2 + $0xd0] sm:$0xff] %vm860_vm2, %v721_v34  ;;  %888 = vst.msk [vmem:[#allocation2 + $0xd8] sm:$0xff] %vm860_vm2, %v723_v36  ;;  %v9458_v34 = vld [vmem:[%s18021_s0 + $0x61] sm:$0xff]  ;;  %v9459_v36 = vld [vmem:[%s18021_s0 + $0x69] sm:$0xff] }
 0x12a   :  { %1094 = vrot.lane.b32.xlu0 %v10663_v42, %s10385_s18  ;;  %1096 = vrot.lane.b32.xlu1 %v10668_v43, %s10385_s18 }
 0x12c   :  { %v725_v38 = vpop.permute.xlu0 %724  ;;  %v727_v39 = vpop.permute.xlu1 %726 }
 0x12d   :  { %889 = vst.msk [vmem:[#allocation2 + $0xe0] sm:$0xff] %vm860_vm2, %v725_v38  ;;  %890 = vst.msk [vmem:[#allocation2 + $0xe8] sm:$0xff] %vm860_vm2, %v727_v39 }
 0x12e   :  { %1098 = vrot.lane.b32.xlu0 %v10683_v46, %s10385_s18  ;;  %1100 = vrot.lane.b32.xlu1 %v10690_v47, %s10385_s18 }
 0x130   :  { %v729_v40 = vpop.permute.xlu0 %728  ;;  %v731_v41 = vpop.permute.xlu1 %730 }
 0x131   :  { %891 = vst.msk [vmem:[#allocation2 + $0xf0] sm:$0xff] %vm860_vm2, %v729_v40  ;;  %892 = vst.msk [vmem:[#allocation2 + $0xf8] sm:$0xff] %vm860_vm2, %v731_v41  ;;  %v9460_v40 = vld [vmem:[%s18021_s0 + $0x79] sm:$0xff]  ;;  %v9461_v41 = vld [vmem:[%s18021_s0 + $0x81] sm:$0xff] }
 0x132   :  { %1102 = vrot.lane.b32.xlu0 %v10697_v48, %s10385_s18  ;;  %1104 = vrot.lane.b32.xlu1 %v10702_v49, %s10385_s18  ;;  %v9418_v48 = vld [vmem:[%s18021_s0 + $0x180] sm:$0xff]  ;;  %v9419_v49 = vld [vmem:[%s18021_s0 + $0x188] sm:$0xff] }
 0x134   :  { %v733_v42 = vpop.permute.xlu0 %732  ;;  %v735_v43 = vpop.permute.xlu1 %734 }
 0x135   :  { %893 = vst.msk [vmem:[#allocation2 + $0x100] sm:$0xff] %vm860_vm2, %v733_v42  ;;  %894 = vst.msk [vmem:[#allocation2 + $0x108] sm:$0xff] %vm860_vm2, %v735_v43 }
 0x136   :  { %1106 = vrot.lane.b32.xlu0 %v10719_v52, %s10385_s18  ;;  %1108 = vrot.lane.b32.xlu1 %v10726_v53, %s10385_s18 }
 0x138   :  { %v737_v46 = vpop.permute.xlu0 %736  ;;  %v739_v47 = vpop.permute.xlu1 %738 }
 0x139   :  { %895 = vst.msk [vmem:[#allocation2 + $0x110] sm:$0xff] %vm860_vm2, %v737_v46  ;;  %896 = vst.msk [vmem:[#allocation2 + $0x118] sm:$0xff] %vm860_vm2, %v739_v47  ;;  %v9462_v46 = vld [vmem:[%s18021_s0 + $0x91] sm:$0xff]  ;;  %v9463_v47 = vld [vmem:[%s18021_s0 + $0x99] sm:$0xff] }
 0x13a   :  { %1110 = vrot.lane.b32.xlu0 %v10741_v56, %s10385_s18  ;;  %1112 = vrot.lane.b32.xlu1 %v10748_v57, %s10385_s18 }
 0x13c   :  { %v741_v52 = vpop.permute.xlu0 %740  ;;  %v743_v53 = vpop.permute.xlu1 %742 }
 0x13d   :  { %897 = vst.msk [vmem:[#allocation2 + $0x120] sm:$0xff] %vm860_vm2, %v741_v52  ;;  %898 = vst.msk [vmem:[#allocation2 + $0x128] sm:$0xff] %vm860_vm2, %v743_v53  ;;  %v9464_v52 = vld [vmem:[%s18021_s0 + $0xa9] sm:$0xff]  ;;  %v9465_v53 = vld [vmem:[%s18021_s0 + $0xb1] sm:$0xff] }
 0x13e   :  { %1114 = vrot.lane.b32.xlu0 %v9418_v48, %s10385_s18  ;;  %1116 = vrot.lane.b32.xlu1 %v9419_v49, %s10385_s18 }
 0x140   :  { %v745_v56 = vpop.permute.xlu0 %744  ;;  %v747_v57 = vpop.permute.xlu1 %746 }
 0x141   :  { %899 = vst.msk [vmem:[#allocation2 + $0x130] sm:$0xff] %vm860_vm2, %v745_v56  ;;  %900 = vst.msk [vmem:[#allocation2 + $0x138] sm:$0xff] %vm860_vm2, %v747_v57 }
 0x142   :  { %1118 = vrot.lane.b32.xlu0 %v10779_v0, %s10385_s18  ;;  %1120 = vrot.lane.b32.xlu1 %v10786_v1, %s10385_s18 }
 0x144   :  { %v749_v2 = vpop.permute.xlu0 %748  ;;  %v751_v3 = vpop.permute.xlu1 %750 }
 0x145   :  { %901 = vst.msk [vmem:[#allocation2 + $0x140] sm:$0xff] %vm860_vm2, %v749_v2  ;;  %902 = vst.msk [vmem:[#allocation2 + $0x148] sm:$0xff] %vm860_vm2, %v751_v3  ;;  %v9466_v2 = vld [vmem:[%s18021_s0 + $0xc1] sm:$0xff]  ;;  %v9467_v3 = vld [vmem:[%s18021_s0 + $0xc9] sm:$0xff] }
 0x146   :  { %1122 = vrot.lane.b32.xlu0 %v10801_v4, %s10385_s18  ;;  %1124 = vrot.lane.b32.xlu1 %v10808_v5, %s10385_s18 }
 0x148   :  { %v753_v10 = vpop.permute.xlu0 %752  ;;  %v755_v55 = vpop.permute.xlu1 %754 }
 0x149   :  { %903 = vst.msk [vmem:[#allocation2 + $0x150] sm:$0xff] %vm860_vm2, %v753_v10  ;;  %904 = vst.msk [vmem:[#allocation2 + $0x158] sm:$0xff] %vm860_vm2, %v755_v55 }
 0x14a   :  { %1126 = vrot.lane.b32.xlu0 %v10823_v8, %s10385_s18  ;;  %1128 = vrot.lane.b32.xlu1 %v10830_v9, %s10385_s18 }
 0x14c   :  { %v757_v0 = vpop.permute.xlu0 %756  ;;  %v759_v1 = vpop.permute.xlu1 %758 }
 0x14d   :  { %905 = vst.msk [vmem:[#allocation2 + $0x160] sm:$0xff] %vm860_vm2, %v757_v0  ;;  %906 = vst.msk [vmem:[#allocation2 + $0x168] sm:$0xff] %vm860_vm2, %v759_v1  ;;  %v9468_v0 = vld [vmem:[%s18021_s0 + $0xd9] sm:$0xff]  ;;  %v9469_v1 = vld [vmem:[%s18021_s0 + $0xe1] sm:$0xff] }
 0x14e   :  { %1130 = vrot.lane.b32.xlu0 %v10845_v12, %s10385_s18  ;;  %1132 = vrot.lane.b32.xlu1 %v10852_v14, %s10385_s18 }
 0x150   :  { %v761_v4 = vpop.permute.xlu0 %760  ;;  %v763_v5 = vpop.permute.xlu1 %762 }
 0x151   :  { %907 = vst.msk [vmem:[#allocation2 + $0x170] sm:$0xff] %vm860_vm2, %v761_v4  ;;  %908 = vst.msk [vmem:[#allocation2 + $0x178] sm:$0xff] %vm860_vm2, %v763_v5 }
 0x152   :  { %1134 = vrot.lane.b32.xlu0 %v10867_v21, %s10385_s18  ;;  %1136 = vrot.lane.b32.xlu1 %v10874_v22, %s10385_s18 }
 0x154   :  { %v765_v8 = vpop.permute.xlu0 %764  ;;  %v767_v9 = vpop.permute.xlu1 %766 }
 0x155   :  { %909 = vst.msk [vmem:[#allocation2 + $0x180] sm:$0xff] %vm860_vm2, %v765_v8  ;;  %910 = vst.msk [vmem:[#allocation2 + $0x188] sm:$0xff] %vm860_vm2, %v767_v9  ;;  %v9470_v8 = vld [vmem:[%s18021_s0 + $0xf1] sm:$0xff]  ;;  %v9471_v9 = vld [vmem:[%s18021_s0 + $0xf9] sm:$0xff] }
 0x156   :  { %1138 = vrot.lane.b32.xlu0 %v10889_v35, %s10385_s18  ;;  %1140 = vrot.lane.b32.xlu1 %v10896_v37, %s10385_s18 }
 0x158   :  { %v769_v12 = vpop.permute.xlu0 %768  ;;  %v771_v14 = vpop.permute.xlu1 %770 }
 0x159   :  { %911 = vst.msk [vmem:[#allocation2 + $0x190] sm:$0xff] %vm860_vm2, %v769_v12  ;;  %912 = vst.msk [vmem:[#allocation2 + $0x198] sm:$0xff] %vm860_vm2, %v771_v14 }
 0x15a   :  { %1142 = vrot.lane.b32.xlu0 %v10911_v50, %s10385_s18  ;;  %1144 = vrot.lane.b32.xlu1 %v10918_v51, %s10385_s18 }
 0x15c   :  { %v773_v21 = vpop.permute.xlu0 %772  ;;  %v775_v22 = vpop.permute.xlu1 %774 }
 0x15d   :  { %913 = vst.msk [vmem:[#allocation2 + $0x1a0] sm:$0xff] %vm860_vm2, %v773_v21  ;;  %914 = vst.msk [vmem:[#allocation2 + $0x1a8] sm:$0xff] %vm860_vm2, %v775_v22  ;;  %v9472_v21 = vld [vmem:[%s18021_s0 + $0x109] sm:$0xff]  ;;  %v9473_v22 = vld [vmem:[%s18021_s0 + $0x111] sm:$0xff] }
 0x15e   :  { %1146 = vrot.lane.b32.xlu0 %v10933_v58, %s10385_s18  ;;  %1148 = vrot.lane.b32.xlu1 %v10940_v59, %s10385_s18 }
 0x160   :  { %v777_v35 = vpop.permute.xlu0 %776  ;;  %v779_v37 = vpop.permute.xlu1 %778 }
 0x161   :  { %915 = vst.msk [vmem:[#allocation2 + $0x1b0] sm:$0xff] %vm860_vm2, %v777_v35  ;;  %916 = vst.msk [vmem:[#allocation2 + $0x1b8] sm:$0xff] %vm860_vm2, %v779_v37 }
 0x162   :  { %1150 = vrot.lane.b32.xlu0 %v10955_v62, %s10385_s18  ;;  %1152 = vrot.lane.b32.xlu1 %v10962_v63, %s10385_s18 }
 0x164   :  { %v781_v50 = vpop.permute.xlu0 %780  ;;  %v783_v51 = vpop.permute.xlu1 %782 }
 0x165   :  { %917 = vst.msk [vmem:[#allocation2 + $0x1c0] sm:$0xff] %vm860_vm2, %v781_v50  ;;  %918 = vst.msk [vmem:[#allocation2 + $0x1c8] sm:$0xff] %vm860_vm2, %v783_v51  ;;  %v9474_v50 = vld [vmem:[%s18021_s0 + $0x121] sm:$0xff]  ;;  %v9475_v51 = vld [vmem:[%s18021_s0 + $0x129] sm:$0xff] }
 0x166   :  { %1154 = vrot.lane.b32.xlu0 %v10977_v6, %s10385_s18  ;;  %1156 = vrot.lane.b32.xlu1 %v10984_v7, %s10385_s18 }
 0x168   :  { %v785_v58 = vpop.permute.xlu0 %784  ;;  %v787_v59 = vpop.permute.xlu1 %786 }
 0x169   :  { %919 = vst.msk [vmem:[#allocation2 + $0x1d0] sm:$0xff] %vm860_vm2, %v785_v58  ;;  %920 = vst.msk [vmem:[#allocation2 + $0x1d8] sm:$0xff] %vm860_vm2, %v787_v59 }
 0x16a   :  { %1158 = vrot.lane.b32.xlu0 %v10999_v15, %s10385_s18  ;;  %1160 = vrot.lane.b32.xlu1 %v11006_v16, %s10385_s18 }
 0x16c   :  { %v789_v62 = vpop.permute.xlu0 %788  ;;  %v791_v63 = vpop.permute.xlu1 %790 }
 0x16d   :  { %921 = vst.msk [vmem:[#allocation2 + $0x1e0] sm:$0xff] %vm860_vm2, %v789_v62  ;;  %922 = vst.msk [vmem:[#allocation2 + $0x1e8] sm:$0xff] %vm860_vm2, %v791_v63  ;;  %v9476_v62 = vld [vmem:[%s18021_s0 + $0x139] sm:$0xff]  ;;  %v9477_v63 = vld [vmem:[%s18021_s0 + $0x141] sm:$0xff] }
 0x16e   :  { %1162 = vrot.lane.b32.xlu0 %v11021_v44, %s10385_s18  ;;  %1164 = vrot.lane.b32.xlu1 %v11028_v45, %s10385_s18  ;;  %v18153_v44 = vld [vmem:[#allocation4_spill] sm:$0xff]  ;;  %v18154_v45 = vld [vmem:[#allocation5_spill] sm:$0xff] }
 0x170   :  { %v793_v6 = vpop.permute.xlu0 %792  ;;  %v795_v7 = vpop.permute.xlu1 %794 }
 0x171   :  { %923 = vst.msk [vmem:[#allocation2 + $0x1f0] sm:$0xff] %vm860_vm2, %v793_v6  ;;  %924 = vst.msk [vmem:[#allocation2 + $0x1f8] sm:$0xff] %vm860_vm2, %v795_v7 }
 0x172   :  { %1166 = vrot.lane.b32.xlu0 %v11043_v60, %s10385_s18  ;;  %1168 = vrot.lane.b32.xlu1 %v11050_v61, %s10385_s18  ;;  %v18155_v60 = vld [vmem:[#allocation6_spill] sm:$0xff]  ;;  %v18156_v61 = vld [vmem:[#allocation7_spill] sm:$0xff] }
 0x174   :  { %v1055_v15 = vpop.permute.xlu0 %1054  ;;  %v1057_v16 = vpop.permute.xlu1 %1056 }
 0x175   :  { %1247 = vst.msk [vmem:[#allocation2] sm:$0xff] %vm1246_vm3, %v1055_v15  ;;  %1248 = vst.msk [vmem:[#allocation2 + $0x8] sm:$0xff] %vm1246_vm3, %v1057_v16  ;;  %v9478_v15 = vld [vmem:[%s18021_s0 + $0x151] sm:$0xff]  ;;  %v9479_v16 = vld [vmem:[%s18021_s0 + $0x159] sm:$0xff] }
 0x176   :  { %1170 = vrot.lane.b32.xlu0 %v18153_v44, %s10385_s18  ;;  %1172 = vrot.lane.b32.xlu1 %v18154_v45, %s10385_s18 }
 0x178   :  { %v1059_v28 = vpop.permute.xlu0 %1058  ;;  %v1061_v29 = vpop.permute.xlu1 %1060 }
 0x179   :  { %1249 = vst.msk [vmem:[#allocation2 + $0x10] sm:$0xff] %vm1246_vm3, %v1059_v28  ;;  %1250 = vst.msk [vmem:[#allocation2 + $0x18] sm:$0xff] %vm1246_vm3, %v1061_v29  ;;  %v9480_v28 = vld [vmem:[%s18021_s0 + $0x169] sm:$0xff]  ;;  %v9481_v29 = vld [vmem:[%s18021_s0 + $0x171] sm:$0xff] }
 0x17a   :  { %1174 = vrot.lane.b32.xlu0 %v18155_v60, %s10385_s18  ;;  %1176 = vrot.lane.b32.xlu1 %v18156_v61, %s10385_s18 }
 0x17c   :  { %v1063_v13 = vpop.permute.xlu0 %1062  ;;  %v1065_v17 = vpop.permute.xlu1 %1064 }
 0x17d   :  { %1251 = vst.msk [vmem:[#allocation2 + $0x20] sm:$0xff] %vm1246_vm3, %v1063_v13  ;;  %1252 = vst.msk [vmem:[#allocation2 + $0x28] sm:$0xff] %vm1246_vm3, %v1065_v17 }
 0x17e   :  { %1178 = vrot.lane.b32.xlu0 %v9450_v11, %s10385_s18  ;;  %1180 = vrot.lane.b32.xlu1 %v9451_v54, %s10385_s18  ;;  %v9482_v11 = vld [vmem:[%s18021_s0 + $0x181] sm:$0xff]  ;;  %v9483_v54 = vld [vmem:[%s18021_s0 + $0x189] sm:$0xff] }
 0x180   :  { %v1067_v20 = vpop.permute.xlu0 %1066  ;;  %v1069_v23 = vpop.permute.xlu1 %1068 }
 0x181   :  { %1253 = vst.msk [vmem:[#allocation2 + $0x30] sm:$0xff] %vm1246_vm3, %v1067_v20  ;;  %1254 = vst.msk [vmem:[#allocation2 + $0x38] sm:$0xff] %vm1246_vm3, %v1069_v23 }
 0x182   :  { %1439 = vrot.lane.b32.xlu0 %v9452_v18, %s10386_s10  ;;  %1441 = vrot.lane.b32.xlu1 %v9453_v19, %s10386_s10  ;;  %v9484_v18 = vld [vmem:[%s18021_s0 + $0x1c9] sm:$0xff]  ;;  %v9485_v19 = vld [vmem:[%s18021_s0 + $0x1d1] sm:$0xff] }
 0x184   :  { %v1071_v26 = vpop.permute.xlu0 %1070  ;;  %v1073_v27 = vpop.permute.xlu1 %1072 }
 0x185   :  { %1255 = vst.msk [vmem:[#allocation2 + $0x40] sm:$0xff] %vm1246_vm3, %v1071_v26  ;;  %1256 = vst.msk [vmem:[#allocation2 + $0x48] sm:$0xff] %vm1246_vm3, %v1073_v27 }
 0x186   :  { %1443 = vrot.lane.b32.xlu0 %v9454_v24, %s10386_s10  ;;  %1445 = vrot.lane.b32.xlu1 %v9455_v25, %s10386_s10  ;;  %v9486_v24 = vld [vmem:[%s18021_s0 + $0x1e1] sm:$0xff]  ;;  %v9487_v25 = vld [vmem:[%s18021_s0 + $0x1e9] sm:$0xff] }
 0x188   :  { %v1075_v32 = vpop.permute.xlu0 %1074  ;;  %v1077_v33 = vpop.permute.xlu1 %1076 }
 0x189   :  { %1257 = vst.msk [vmem:[#allocation2 + $0x50] sm:$0xff] %vm1246_vm3, %v1075_v32  ;;  %1258 = vst.msk [vmem:[#allocation2 + $0x58] sm:$0xff] %vm1246_vm3, %v1077_v33 }
 0x18a   :  { %1447 = vrot.lane.b32.xlu0 %v9456_v30, %s10386_s10  ;;  %1449 = vrot.lane.b32.xlu1 %v9457_v31, %s10386_s10  ;;  %v9488_v30 = vld [vmem:[%s18021_s0 + $0x1f9] sm:$0xff]  ;;  %v9489_v31 = vld [vmem:[%s18021_s0 + $0x201] sm:$0xff] }
 0x18c   :  { %v1079_v38 = vpop.permute.xlu0 %1078  ;;  %v1081_v39 = vpop.permute.xlu1 %1080 }
 0x18d   :  { %1259 = vst.msk [vmem:[#allocation2 + $0x60] sm:$0xff] %vm1246_vm3, %v1079_v38  ;;  %1260 = vst.msk [vmem:[#allocation2 + $0x68] sm:$0xff] %vm1246_vm3, %v1081_v39 }
 0x18e   :  { %1451 = vrot.lane.b32.xlu0 %v9458_v34, %s10386_s10  ;;  %1453 = vrot.lane.b32.xlu1 %v9459_v36, %s10386_s10  ;;  %v9490_v34 = vld [vmem:[%s18021_s0 + $0x211] sm:$0xff]  ;;  %v9491_v36 = vld [vmem:[%s18021_s0 + $0x219] sm:$0xff] }
 0x190   :  { %v1083_v42 = vpop.permute.xlu0 %1082  ;;  %v1085_v43 = vpop.permute.xlu1 %1084 }
 0x191   :  { %1261 = vst.msk [vmem:[#allocation2 + $0x70] sm:$0xff] %vm1246_vm3, %v1083_v42  ;;  %1262 = vst.msk [vmem:[#allocation2 + $0x78] sm:$0xff] %vm1246_vm3, %v1085_v43 }
 0x192   :  { %1455 = vrot.lane.b32.xlu0 %v9460_v40, %s10386_s10  ;;  %1457 = vrot.lane.b32.xlu1 %v9461_v41, %s10386_s10  ;;  %v9492_v40 = vld [vmem:[%s18021_s0 + $0x229] sm:$0xff]  ;;  %v9493_v41 = vld [vmem:[%s18021_s0 + $0x231] sm:$0xff] }
 0x194   :  { %v1087_v48 = vpop.permute.xlu0 %1086  ;;  %v1089_v49 = vpop.permute.xlu1 %1088 }
 0x195   :  { %1263 = vst.msk [vmem:[#allocation2 + $0x80] sm:$0xff] %vm1246_vm3, %v1087_v48  ;;  %1264 = vst.msk [vmem:[#allocation2 + $0x88] sm:$0xff] %vm1246_vm3, %v1089_v49 }
 0x196   :  { %1459 = vrot.lane.b32.xlu0 %v9462_v46, %s10386_s10  ;;  %1461 = vrot.lane.b32.xlu1 %v9463_v47, %s10386_s10  ;;  %v9494_v46 = vld [vmem:[%s18021_s0 + $0x241] sm:$0xff]  ;;  %v9495_v47 = vld [vmem:[%s18021_s0 + $0x249] sm:$0xff] }
 0x198   :  { %v1091_v56 = vpop.permute.xlu0 %1090  ;;  %v1093_v57 = vpop.permute.xlu1 %1092 }
 0x199   :  { %1265 = vst.msk [vmem:[#allocation2 + $0x90] sm:$0xff] %vm1246_vm3, %v1091_v56  ;;  %1266 = vst.msk [vmem:[#allocation2 + $0x98] sm:$0xff] %vm1246_vm3, %v1093_v57 }
 0x19a   :  { %1463 = vrot.lane.b32.xlu0 %v9464_v52, %s10386_s10  ;;  %1465 = vrot.lane.b32.xlu1 %v9465_v53, %s10386_s10  ;;  %v9496_v52 = vld [vmem:[%s18021_s0 + $0x259] sm:$0xff]  ;;  %v9497_v53 = vld [vmem:[%s18021_s0 + $0x261] sm:$0xff] }
 0x19c   :  { %v1095_v10 = vpop.permute.xlu0 %1094  ;;  %v1097_v55 = vpop.permute.xlu1 %1096 }
 0x19d   :  { %1267 = vst.msk [vmem:[#allocation2 + $0xa0] sm:$0xff] %vm1246_vm3, %v1095_v10  ;;  %1268 = vst.msk [vmem:[#allocation2 + $0xa8] sm:$0xff] %vm1246_vm3, %v1097_v55 }
 0x19e   :  { %1467 = vrot.lane.b32.xlu0 %v9466_v2, %s10386_s10  ;;  %1469 = vrot.lane.b32.xlu1 %v9467_v3, %s10386_s10  ;;  %v9498_v2 = vld [vmem:[%s18021_s0 + $0x271] sm:$0xff]  ;;  %v9499_v3 = vld [vmem:[%s18021_s0 + $0x279] sm:$0xff] }
 0x1a0   :  { %v1099_v4 = vpop.permute.xlu0 %1098  ;;  %v1101_v5 = vpop.permute.xlu1 %1100 }
 0x1a1   :  { %1269 = vst.msk [vmem:[#allocation2 + $0xb0] sm:$0xff] %vm1246_vm3, %v1099_v4  ;;  %1270 = vst.msk [vmem:[#allocation2 + $0xb8] sm:$0xff] %vm1246_vm3, %v1101_v5 }
 0x1a2   :  { %1471 = vrot.lane.b32.xlu0 %v9468_v0, %s10386_s10  ;;  %1473 = vrot.lane.b32.xlu1 %v9469_v1, %s10386_s10  ;;  %v9500_v0 = vld [vmem:[%s18021_s0 + $0x289] sm:$0xff]  ;;  %v9501_v1 = vld [vmem:[%s18021_s0 + $0x291] sm:$0xff] }
 0x1a4   :  { %v1103_v12 = vpop.permute.xlu0 %1102  ;;  %v1105_v14 = vpop.permute.xlu1 %1104 }
 0x1a5   :  { %1271 = vst.msk [vmem:[#allocation2 + $0xc0] sm:$0xff] %vm1246_vm3, %v1103_v12  ;;  %1272 = vst.msk [vmem:[#allocation2 + $0xc8] sm:$0xff] %vm1246_vm3, %v1105_v14 }
 0x1a6   :  { %1475 = vrot.lane.b32.xlu0 %v9470_v8, %s10386_s10  ;;  %1477 = vrot.lane.b32.xlu1 %v9471_v9, %s10386_s10  ;;  %v9502_v8 = vld [vmem:[%s18021_s0 + $0x2a1] sm:$0xff]  ;;  %v9503_v9 = vld [vmem:[%s18021_s0 + $0x2a9] sm:$0xff] }
 0x1a8   :  { %v1107_v35 = vpop.permute.xlu0 %1106  ;;  %v1109_v37 = vpop.permute.xlu1 %1108 }
 0x1a9   :  { %1273 = vst.msk [vmem:[#allocation2 + $0xd0] sm:$0xff] %vm1246_vm3, %v1107_v35  ;;  %1274 = vst.msk [vmem:[#allocation2 + $0xd8] sm:$0xff] %vm1246_vm3, %v1109_v37 }
 0x1aa   :  { %1479 = vrot.lane.b32.xlu0 %v9472_v21, %s10386_s10  ;;  %1481 = vrot.lane.b32.xlu1 %v9473_v22, %s10386_s10  ;;  %v9504_v21 = vld [vmem:[%s18021_s0 + $0x2b9] sm:$0xff]  ;;  %v9505_v22 = vld [vmem:[%s18021_s0 + $0x2c1] sm:$0xff] }
 0x1ac   :  { %v1111_v58 = vpop.permute.xlu0 %1110  ;;  %v1113_v59 = vpop.permute.xlu1 %1112 }
 0x1ad   :  { %1275 = vst.msk [vmem:[#allocation2 + $0xe0] sm:$0xff] %vm1246_vm3, %v1111_v58  ;;  %1276 = vst.msk [vmem:[#allocation2 + $0xe8] sm:$0xff] %vm1246_vm3, %v1113_v59 }
 0x1ae   :  { %1483 = vrot.lane.b32.xlu0 %v9474_v50, %s10386_s10  ;;  %1485 = vrot.lane.b32.xlu1 %v9475_v51, %s10386_s10  ;;  %v9506_v50 = vld [vmem:[%s18021_s0 + $0x2d1] sm:$0xff]  ;;  %v9507_v51 = vld [vmem:[%s18021_s0 + $0x2d9] sm:$0xff] }
 0x1b0   :  { %v1115_v6 = vpop.permute.xlu0 %1114  ;;  %v1117_v7 = vpop.permute.xlu1 %1116 }
 0x1b1   :  { %1277 = vst.msk [vmem:[#allocation2 + $0xf0] sm:$0xff] %vm1246_vm3, %v1115_v6  ;;  %1278 = vst.msk [vmem:[#allocation2 + $0xf8] sm:$0xff] %vm1246_vm3, %v1117_v7 }
 0x1b2   :  { %1487 = vrot.lane.b32.xlu0 %v9476_v62, %s10386_s10  ;;  %1489 = vrot.lane.b32.xlu1 %v9477_v63, %s10386_s10  ;;  %v9508_v62 = vld [vmem:[%s18021_s0 + $0x2e9] sm:$0xff]  ;;  %v9509_v63 = vld [vmem:[%s18021_s0 + $0x2f1] sm:$0xff] }
 0x1b4   :  { %v1119_v44 = vpop.permute.xlu0 %1118  ;;  %v1121_v45 = vpop.permute.xlu1 %1120 }
 0x1b5   :  { %1279 = vst.msk [vmem:[#allocation2 + $0x100] sm:$0xff] %vm1246_vm3, %v1119_v44  ;;  %1280 = vst.msk [vmem:[#allocation2 + $0x108] sm:$0xff] %vm1246_vm3, %v1121_v45 }
 0x1b6   :  { %1491 = vrot.lane.b32.xlu0 %v9478_v15, %s10386_s10  ;;  %1493 = vrot.lane.b32.xlu1 %v9479_v16, %s10386_s10  ;;  %v9510_v15 = vld [vmem:[%s18021_s0 + $0x301] sm:$0xff]  ;;  %v9511_v16 = vld [vmem:[%s18021_s0 + $0x309] sm:$0xff] }
 0x1b8   :  { %v1123_v60 = vpop.permute.xlu0 %1122  ;;  %v1125_v61 = vpop.permute.xlu1 %1124 }
 0x1b9   :  { %1281 = vst.msk [vmem:[#allocation2 + $0x110] sm:$0xff] %vm1246_vm3, %v1123_v60  ;;  %1282 = vst.msk [vmem:[#allocation2 + $0x118] sm:$0xff] %vm1246_vm3, %v1125_v61 }
 0x1ba   :  { %1495 = vrot.lane.b32.xlu0 %v9480_v28, %s10386_s10  ;;  %1497 = vrot.lane.b32.xlu1 %v9481_v29, %s10386_s10  ;;  %v9512_v28 = vld [vmem:[%s18021_s0 + $0x319] sm:$0xff]  ;;  %v9513_v29 = vld [vmem:[%s18021_s0 + $0x321] sm:$0xff] }
 0x1bc   :  { %v1127_v13 = vpop.permute.xlu0 %1126  ;;  %v1129_v17 = vpop.permute.xlu1 %1128 }
 0x1bd   :  { %1283 = vst.msk [vmem:[#allocation2 + $0x120] sm:$0xff] %vm1246_vm3, %v1127_v13  ;;  %1284 = vst.msk [vmem:[#allocation2 + $0x128] sm:$0xff] %vm1246_vm3, %v1129_v17 }
 0x1be   :  { %1499 = vrot.lane.b32.xlu0 %v9482_v11, %s10386_s10  ;;  %1501 = vrot.lane.b32.xlu1 %v9483_v54, %s10386_s10  ;;  %v9514_v11 = vld [vmem:[%s18021_s0 + $0x331] sm:$0xff]  ;;  %v9515_v54 = vld [vmem:[%s18021_s0 + $0x339] sm:$0xff] }
 0x1c0   :  { %v1131_v20 = vpop.permute.xlu0 %1130  ;;  %v1133_v23 = vpop.permute.xlu1 %1132 }
 0x1c1   :  { %1285 = vst.msk [vmem:[#allocation2 + $0x130] sm:$0xff] %vm1246_vm3, %v1131_v20  ;;  %1286 = vst.msk [vmem:[#allocation2 + $0x138] sm:$0xff] %vm1246_vm3, %v1133_v23 }
 0x1c2   :  { %1503 = vrot.lane.b32.xlu0 %v9484_v18, %s10386_s10  ;;  %1505 = vrot.lane.b32.xlu1 %v9485_v19, %s10386_s10  ;;  %v9516_v18 = vld [vmem:[%s18021_s0 + $0x1a] sm:$0xff]  ;;  %v9517_v19 = vld [vmem:[%s18021_s0 + $0x22] sm:$0xff] }
 0x1c4   :  { %v1135_v26 = vpop.permute.xlu0 %1134  ;;  %v1137_v27 = vpop.permute.xlu1 %1136 }
 0x1c5   :  { %1287 = vst.msk [vmem:[#allocation2 + $0x140] sm:$0xff] %vm1246_vm3, %v1135_v26  ;;  %1288 = vst.msk [vmem:[#allocation2 + $0x148] sm:$0xff] %vm1246_vm3, %v1137_v27 }
 0x1c6   :  { %1507 = vrot.lane.b32.xlu0 %v9486_v24, %s10386_s10  ;;  %1509 = vrot.lane.b32.xlu1 %v9487_v25, %s10386_s10  ;;  %v9518_v24 = vld [vmem:[%s18021_s0 + $0x32] sm:$0xff]  ;;  %v9519_v25 = vld [vmem:[%s18021_s0 + $0x3a] sm:$0xff] }
 0x1c8   :  { %v1139_v32 = vpop.permute.xlu0 %1138  ;;  %v1141_v33 = vpop.permute.xlu1 %1140 }
 0x1c9   :  { %1289 = vst.msk [vmem:[#allocation2 + $0x150] sm:$0xff] %vm1246_vm3, %v1139_v32  ;;  %1290 = vst.msk [vmem:[#allocation2 + $0x158] sm:$0xff] %vm1246_vm3, %v1141_v33 }
 0x1ca   :  { %1511 = vrot.lane.b32.xlu0 %v9488_v30, %s10386_s10  ;;  %1513 = vrot.lane.b32.xlu1 %v9489_v31, %s10386_s10  ;;  %v9520_v30 = vld [vmem:[%s18021_s0 + $0x4a] sm:$0xff]  ;;  %v9521_v31 = vld [vmem:[%s18021_s0 + $0x52] sm:$0xff] }
 0x1cc   :  { %v1143_v38 = vpop.permute.xlu0 %1142  ;;  %v1145_v39 = vpop.permute.xlu1 %1144 }
 0x1cd   :  { %1291 = vst.msk [vmem:[#allocation2 + $0x160] sm:$0xff] %vm1246_vm3, %v1143_v38  ;;  %1292 = vst.msk [vmem:[#allocation2 + $0x168] sm:$0xff] %vm1246_vm3, %v1145_v39 }
 0x1ce   :  { %1515 = vrot.lane.b32.xlu0 %v9490_v34, %s10386_s10  ;;  %1517 = vrot.lane.b32.xlu1 %v9491_v36, %s10386_s10  ;;  %v9522_v34 = vld [vmem:[%s18021_s0 + $0x62] sm:$0xff]  ;;  %v9523_v36 = vld [vmem:[%s18021_s0 + $0x6a] sm:$0xff] }
 0x1d0   :  { %v1147_v42 = vpop.permute.xlu0 %1146  ;;  %v1149_v43 = vpop.permute.xlu1 %1148 }
 0x1d1   :  { %1293 = vst.msk [vmem:[#allocation2 + $0x170] sm:$0xff] %vm1246_vm3, %v1147_v42  ;;  %1294 = vst.msk [vmem:[#allocation2 + $0x178] sm:$0xff] %vm1246_vm3, %v1149_v43 }
 0x1d2   :  { %1519 = vrot.lane.b32.xlu0 %v9492_v40, %s10386_s10  ;;  %1521 = vrot.lane.b32.xlu1 %v9493_v41, %s10386_s10  ;;  %v9524_v40 = vld [vmem:[%s18021_s0 + $0x7a] sm:$0xff]  ;;  %v9525_v41 = vld [vmem:[%s18021_s0 + $0x82] sm:$0xff] }
 0x1d4   :  { %v1151_v48 = vpop.permute.xlu0 %1150  ;;  %v1153_v49 = vpop.permute.xlu1 %1152 }
 0x1d5   :  { %1295 = vst.msk [vmem:[#allocation2 + $0x180] sm:$0xff] %vm1246_vm3, %v1151_v48  ;;  %1296 = vst.msk [vmem:[#allocation2 + $0x188] sm:$0xff] %vm1246_vm3, %v1153_v49 }
 0x1d6   :  { %1523 = vrot.lane.b32.xlu0 %v9494_v46, %s10386_s10  ;;  %1525 = vrot.lane.b32.xlu1 %v9495_v47, %s10386_s10  ;;  %v9526_v46 = vld [vmem:[%s18021_s0 + $0x92] sm:$0xff]  ;;  %v9527_v47 = vld [vmem:[%s18021_s0 + $0x9a] sm:$0xff] }
 0x1d8   :  { %v1155_v56 = vpop.permute.xlu0 %1154  ;;  %v1157_v57 = vpop.permute.xlu1 %1156 }
 0x1d9   :  { %1297 = vst.msk [vmem:[#allocation2 + $0x190] sm:$0xff] %vm1246_vm3, %v1155_v56  ;;  %1298 = vst.msk [vmem:[#allocation2 + $0x198] sm:$0xff] %vm1246_vm3, %v1157_v57 }
 0x1da   :  { %1527 = vrot.lane.b32.xlu0 %v9496_v52, %s10386_s10  ;;  %1529 = vrot.lane.b32.xlu1 %v9497_v53, %s10386_s10  ;;  %v9528_v52 = vld [vmem:[%s18021_s0 + $0xaa] sm:$0xff]  ;;  %v9529_v53 = vld [vmem:[%s18021_s0 + $0xb2] sm:$0xff] }
 0x1dc   :  { %v1159_v10 = vpop.permute.xlu0 %1158  ;;  %v1161_v55 = vpop.permute.xlu1 %1160 }
 0x1dd   :  { %1299 = vst.msk [vmem:[#allocation2 + $0x1a0] sm:$0xff] %vm1246_vm3, %v1159_v10  ;;  %1300 = vst.msk [vmem:[#allocation2 + $0x1a8] sm:$0xff] %vm1246_vm3, %v1161_v55 }
 0x1de   :  { %1531 = vrot.lane.b32.xlu0 %v9498_v2, %s10386_s10  ;;  %1533 = vrot.lane.b32.xlu1 %v9499_v3, %s10386_s10  ;;  %v9530_v2 = vld [vmem:[%s18021_s0 + $0xc2] sm:$0xff]  ;;  %v9531_v3 = vld [vmem:[%s18021_s0 + $0xca] sm:$0xff] }
 0x1e0   :  { %v1163_v4 = vpop.permute.xlu0 %1162  ;;  %v1165_v5 = vpop.permute.xlu1 %1164 }
 0x1e1   :  { %1301 = vst.msk [vmem:[#allocation2 + $0x1b0] sm:$0xff] %vm1246_vm3, %v1163_v4  ;;  %1302 = vst.msk [vmem:[#allocation2 + $0x1b8] sm:$0xff] %vm1246_vm3, %v1165_v5 }
 0x1e2   :  { %1535 = vrot.lane.b32.xlu0 %v9500_v0, %s10386_s10  ;;  %1537 = vrot.lane.b32.xlu1 %v9501_v1, %s10386_s10  ;;  %v9532_v0 = vld [vmem:[%s18021_s0 + $0xda] sm:$0xff]  ;;  %v9533_v1 = vld [vmem:[%s18021_s0 + $0xe2] sm:$0xff] }
 0x1e4   :  { %v1167_v12 = vpop.permute.xlu0 %1166  ;;  %v1169_v14 = vpop.permute.xlu1 %1168 }
 0x1e5   :  { %1303 = vst.msk [vmem:[#allocation2 + $0x1c0] sm:$0xff] %vm1246_vm3, %v1167_v12  ;;  %1304 = vst.msk [vmem:[#allocation2 + $0x1c8] sm:$0xff] %vm1246_vm3, %v1169_v14 }
 0x1e6   :  { %1539 = vrot.lane.b32.xlu0 %v9502_v8, %s10386_s10  ;;  %1541 = vrot.lane.b32.xlu1 %v9503_v9, %s10386_s10  ;;  %v9534_v8 = vld [vmem:[%s18021_s0 + $0xf2] sm:$0xff]  ;;  %v9535_v9 = vld [vmem:[%s18021_s0 + $0xfa] sm:$0xff] }
 0x1e8   :  { %v1171_v35 = vpop.permute.xlu0 %1170  ;;  %v1173_v37 = vpop.permute.xlu1 %1172 }
 0x1e9   :  { %1305 = vst.msk [vmem:[#allocation2 + $0x1d0] sm:$0xff] %vm1246_vm3, %v1171_v35  ;;  %1306 = vst.msk [vmem:[#allocation2 + $0x1d8] sm:$0xff] %vm1246_vm3, %v1173_v37 }
 0x1ea   :  { %1543 = vrot.lane.b32.xlu0 %v9504_v21, %s10386_s10  ;;  %1545 = vrot.lane.b32.xlu1 %v9505_v22, %s10386_s10  ;;  %v9536_v21 = vld [vmem:[%s18021_s0 + $0x10a] sm:$0xff]  ;;  %v9537_v22 = vld [vmem:[%s18021_s0 + $0x112] sm:$0xff] }
 0x1ec   :  { %v1175_v58 = vpop.permute.xlu0 %1174  ;;  %v1177_v59 = vpop.permute.xlu1 %1176 }
 0x1ed   :  { %1307 = vst.msk [vmem:[#allocation2 + $0x1e0] sm:$0xff] %vm1246_vm3, %v1175_v58  ;;  %1308 = vst.msk [vmem:[#allocation2 + $0x1e8] sm:$0xff] %vm1246_vm3, %v1177_v59 }
 0x1ee   :  { %1547 = vrot.lane.b32.xlu0 %v9506_v50, %s10386_s10  ;;  %1549 = vrot.lane.b32.xlu1 %v9507_v51, %s10386_s10  ;;  %v9538_v50 = vld [vmem:[%s18021_s0 + $0x122] sm:$0xff]  ;;  %v9539_v51 = vld [vmem:[%s18021_s0 + $0x12a] sm:$0xff] }
 0x1f0   :  { %v1179_v6 = vpop.permute.xlu0 %1178  ;;  %v1181_v7 = vpop.permute.xlu1 %1180 }
 0x1f1   :  { %1309 = vst.msk [vmem:[#allocation2 + $0x1f0] sm:$0xff] %vm1246_vm3, %v1179_v6  ;;  %1310 = vst.msk [vmem:[#allocation2 + $0x1f8] sm:$0xff] %vm1246_vm3, %v1181_v7 }
 0x1f2   :  { %1551 = vrot.lane.b32.xlu0 %v9508_v62, %s10386_s10  ;;  %1553 = vrot.lane.b32.xlu1 %v9509_v63, %s10386_s10  ;;  %v9540_v62 = vld [vmem:[%s18021_s0 + $0x13a] sm:$0xff]  ;;  %v9541_v63 = vld [vmem:[%s18021_s0 + $0x142] sm:$0xff] }
 0x1f4   :  { %v1440_v44 = vpop.permute.xlu0 %1439  ;;  %v1442_v45 = vpop.permute.xlu1 %1441 }
 0x1f5   :  { %1632 = vst.msk [vmem:[#allocation2] sm:$0xff] %vm1631_vm4, %v1440_v44  ;;  %1633 = vst.msk [vmem:[#allocation2 + $0x8] sm:$0xff] %vm1631_vm4, %v1442_v45 }
 0x1f6   :  { %1555 = vrot.lane.b32.xlu0 %v9510_v15, %s10386_s10  ;;  %1557 = vrot.lane.b32.xlu1 %v9511_v16, %s10386_s10  ;;  %v9542_v15 = vld [vmem:[%s18021_s0 + $0x152] sm:$0xff]  ;;  %v9543_v16 = vld [vmem:[%s18021_s0 + $0x15a] sm:$0xff] }
 0x1f8   :  { %v1444_v60 = vpop.permute.xlu0 %1443  ;;  %v1446_v61 = vpop.permute.xlu1 %1445 }
 0x1f9   :  { %1634 = vst.msk [vmem:[#allocation2 + $0x10] sm:$0xff] %vm1631_vm4, %v1444_v60  ;;  %1635 = vst.msk [vmem:[#allocation2 + $0x18] sm:$0xff] %vm1631_vm4, %v1446_v61 }
 0x1fa   :  { %1559 = vrot.lane.b32.xlu0 %v9512_v28, %s10386_s10  ;;  %1561 = vrot.lane.b32.xlu1 %v9513_v29, %s10386_s10  ;;  %v9544_v28 = vld [vmem:[%s18021_s0 + $0x16a] sm:$0xff]  ;;  %v9545_v29 = vld [vmem:[%s18021_s0 + $0x172] sm:$0xff] }
 0x1fc   :  { %v1448_v13 = vpop.permute.xlu0 %1447  ;;  %v1450_v17 = vpop.permute.xlu1 %1449 }
 0x1fd   :  { %1636 = vst.msk [vmem:[#allocation2 + $0x20] sm:$0xff] %vm1631_vm4, %v1448_v13  ;;  %1637 = vst.msk [vmem:[#allocation2 + $0x28] sm:$0xff] %vm1631_vm4, %v1450_v17 }
 0x1fe   :  { %1563 = vrot.lane.b32.xlu0 %v9514_v11, %s10386_s10  ;;  %1565 = vrot.lane.b32.xlu1 %v9515_v54, %s10386_s10  ;;  %v9546_v11 = vld [vmem:[%s18021_s0 + $0x182] sm:$0xff]  ;;  %v9547_v54 = vld [vmem:[%s18021_s0 + $0x18a] sm:$0xff] }
 0x200   :  { %v1452_v20 = vpop.permute.xlu0 %1451  ;;  %v1454_v23 = vpop.permute.xlu1 %1453 }
 0x201   :  { %1638 = vst.msk [vmem:[#allocation2 + $0x30] sm:$0xff] %vm1631_vm4, %v1452_v20  ;;  %1639 = vst.msk [vmem:[#allocation2 + $0x38] sm:$0xff] %vm1631_vm4, %v1454_v23 }
 0x202   :  { %1824 = vrot.lane.b32.xlu0 %v9516_v18, %s10387_s27  ;;  %1826 = vrot.lane.b32.xlu1 %v9517_v19, %s10387_s27  ;;  %v9548_v18 = vld [vmem:[%s18021_s0 + $0x1ca] sm:$0xff]  ;;  %v9549_v19 = vld [vmem:[%s18021_s0 + $0x1d2] sm:$0xff] }
 0x204   :  { %v1456_v26 = vpop.permute.xlu0 %1455  ;;  %v1458_v27 = vpop.permute.xlu1 %1457 }
 0x205   :  { %1640 = vst.msk [vmem:[#allocation2 + $0x40] sm:$0xff] %vm1631_vm4, %v1456_v26  ;;  %1641 = vst.msk [vmem:[#allocation2 + $0x48] sm:$0xff] %vm1631_vm4, %v1458_v27 }
 0x206   :  { %1828 = vrot.lane.b32.xlu0 %v9518_v24, %s10387_s27  ;;  %1830 = vrot.lane.b32.xlu1 %v9519_v25, %s10387_s27  ;;  %v9550_v24 = vld [vmem:[%s18021_s0 + $0x1e2] sm:$0xff]  ;;  %v9551_v25 = vld [vmem:[%s18021_s0 + $0x1ea] sm:$0xff] }
 0x208   :  { %v1460_v32 = vpop.permute.xlu0 %1459  ;;  %v1462_v33 = vpop.permute.xlu1 %1461 }
 0x209   :  { %1642 = vst.msk [vmem:[#allocation2 + $0x50] sm:$0xff] %vm1631_vm4, %v1460_v32  ;;  %1643 = vst.msk [vmem:[#allocation2 + $0x58] sm:$0xff] %vm1631_vm4, %v1462_v33 }
 0x20a   :  { %1832 = vrot.lane.b32.xlu0 %v9520_v30, %s10387_s27  ;;  %1834 = vrot.lane.b32.xlu1 %v9521_v31, %s10387_s27  ;;  %v9552_v30 = vld [vmem:[%s18021_s0 + $0x1fa] sm:$0xff]  ;;  %v9553_v31 = vld [vmem:[%s18021_s0 + $0x202] sm:$0xff] }
 0x20c   :  { %v1464_v38 = vpop.permute.xlu0 %1463  ;;  %v1466_v39 = vpop.permute.xlu1 %1465 }
 0x20d   :  { %1644 = vst.msk [vmem:[#allocation2 + $0x60] sm:$0xff] %vm1631_vm4, %v1464_v38  ;;  %1645 = vst.msk [vmem:[#allocation2 + $0x68] sm:$0xff] %vm1631_vm4, %v1466_v39 }
 0x20e   :  { %1836 = vrot.lane.b32.xlu0 %v9522_v34, %s10387_s27  ;;  %1838 = vrot.lane.b32.xlu1 %v9523_v36, %s10387_s27  ;;  %v9554_v34 = vld [vmem:[%s18021_s0 + $0x212] sm:$0xff]  ;;  %v9555_v36 = vld [vmem:[%s18021_s0 + $0x21a] sm:$0xff] }
 0x210   :  { %v1468_v42 = vpop.permute.xlu0 %1467  ;;  %v1470_v43 = vpop.permute.xlu1 %1469 }
 0x211   :  { %1646 = vst.msk [vmem:[#allocation2 + $0x70] sm:$0xff] %vm1631_vm4, %v1468_v42  ;;  %1647 = vst.msk [vmem:[#allocation2 + $0x78] sm:$0xff] %vm1631_vm4, %v1470_v43 }
 0x212   :  { %1840 = vrot.lane.b32.xlu0 %v9524_v40, %s10387_s27  ;;  %1842 = vrot.lane.b32.xlu1 %v9525_v41, %s10387_s27  ;;  %v9556_v40 = vld [vmem:[%s18021_s0 + $0x22a] sm:$0xff]  ;;  %v9557_v41 = vld [vmem:[%s18021_s0 + $0x232] sm:$0xff] }
 0x214   :  { %v1472_v48 = vpop.permute.xlu0 %1471  ;;  %v1474_v49 = vpop.permute.xlu1 %1473 }
 0x215   :  { %1648 = vst.msk [vmem:[#allocation2 + $0x80] sm:$0xff] %vm1631_vm4, %v1472_v48  ;;  %1649 = vst.msk [vmem:[#allocation2 + $0x88] sm:$0xff] %vm1631_vm4, %v1474_v49 }
 0x216   :  { %1844 = vrot.lane.b32.xlu0 %v9526_v46, %s10387_s27  ;;  %1846 = vrot.lane.b32.xlu1 %v9527_v47, %s10387_s27  ;;  %v9558_v46 = vld [vmem:[%s18021_s0 + $0x242] sm:$0xff]  ;;  %v9559_v47 = vld [vmem:[%s18021_s0 + $0x24a] sm:$0xff] }
 0x218   :  { %v1476_v56 = vpop.permute.xlu0 %1475  ;;  %v1478_v57 = vpop.permute.xlu1 %1477 }
 0x219   :  { %1650 = vst.msk [vmem:[#allocation2 + $0x90] sm:$0xff] %vm1631_vm4, %v1476_v56  ;;  %1651 = vst.msk [vmem:[#allocation2 + $0x98] sm:$0xff] %vm1631_vm4, %v1478_v57 }
 0x21a   :  { %1848 = vrot.lane.b32.xlu0 %v9528_v52, %s10387_s27  ;;  %1850 = vrot.lane.b32.xlu1 %v9529_v53, %s10387_s27  ;;  %v9560_v52 = vld [vmem:[%s18021_s0 + $0x25a] sm:$0xff]  ;;  %v9561_v53 = vld [vmem:[%s18021_s0 + $0x262] sm:$0xff] }
 0x21c   :  { %v1480_v10 = vpop.permute.xlu0 %1479  ;;  %v1482_v55 = vpop.permute.xlu1 %1481 }
 0x21d   :  { %1652 = vst.msk [vmem:[#allocation2 + $0xa0] sm:$0xff] %vm1631_vm4, %v1480_v10  ;;  %1653 = vst.msk [vmem:[#allocation2 + $0xa8] sm:$0xff] %vm1631_vm4, %v1482_v55 }
 0x21e   :  { %1852 = vrot.lane.b32.xlu0 %v9530_v2, %s10387_s27  ;;  %1854 = vrot.lane.b32.xlu1 %v9531_v3, %s10387_s27  ;;  %v9562_v2 = vld [vmem:[%s18021_s0 + $0x272] sm:$0xff]  ;;  %v9563_v3 = vld [vmem:[%s18021_s0 + $0x27a] sm:$0xff] }
 0x220   :  { %v1484_v4 = vpop.permute.xlu0 %1483  ;;  %v1486_v5 = vpop.permute.xlu1 %1485 }
 0x221   :  { %1654 = vst.msk [vmem:[#allocation2 + $0xb0] sm:$0xff] %vm1631_vm4, %v1484_v4  ;;  %1655 = vst.msk [vmem:[#allocation2 + $0xb8] sm:$0xff] %vm1631_vm4, %v1486_v5 }
 0x222   :  { %1856 = vrot.lane.b32.xlu0 %v9532_v0, %s10387_s27  ;;  %1858 = vrot.lane.b32.xlu1 %v9533_v1, %s10387_s27  ;;  %v9564_v0 = vld [vmem:[%s18021_s0 + $0x28a] sm:$0xff]  ;;  %v9565_v1 = vld [vmem:[%s18021_s0 + $0x292] sm:$0xff] }
 0x224   :  { %v1488_v12 = vpop.permute.xlu0 %1487  ;;  %v1490_v14 = vpop.permute.xlu1 %1489 }
 0x225   :  { %1656 = vst.msk [vmem:[#allocation2 + $0xc0] sm:$0xff] %vm1631_vm4, %v1488_v12  ;;  %1657 = vst.msk [vmem:[#allocation2 + $0xc8] sm:$0xff] %vm1631_vm4, %v1490_v14 }
 0x226   :  { %1860 = vrot.lane.b32.xlu0 %v9534_v8, %s10387_s27  ;;  %1862 = vrot.lane.b32.xlu1 %v9535_v9, %s10387_s27  ;;  %v9566_v8 = vld [vmem:[%s18021_s0 + $0x2a2] sm:$0xff]  ;;  %v9567_v9 = vld [vmem:[%s18021_s0 + $0x2aa] sm:$0xff] }
 0x228   :  { %v1492_v35 = vpop.permute.xlu0 %1491  ;;  %v1494_v37 = vpop.permute.xlu1 %1493 }
 0x229   :  { %1658 = vst.msk [vmem:[#allocation2 + $0xd0] sm:$0xff] %vm1631_vm4, %v1492_v35  ;;  %1659 = vst.msk [vmem:[#allocation2 + $0xd8] sm:$0xff] %vm1631_vm4, %v1494_v37 }
 0x22a   :  { %1864 = vrot.lane.b32.xlu0 %v9536_v21, %s10387_s27  ;;  %1866 = vrot.lane.b32.xlu1 %v9537_v22, %s10387_s27  ;;  %v9568_v21 = vld [vmem:[%s18021_s0 + $0x2ba] sm:$0xff]  ;;  %v9569_v22 = vld [vmem:[%s18021_s0 + $0x2c2] sm:$0xff] }
 0x22c   :  { %v1496_v58 = vpop.permute.xlu0 %1495  ;;  %v1498_v59 = vpop.permute.xlu1 %1497 }
 0x22d   :  { %1660 = vst.msk [vmem:[#allocation2 + $0xe0] sm:$0xff] %vm1631_vm4, %v1496_v58  ;;  %1661 = vst.msk [vmem:[#allocation2 + $0xe8] sm:$0xff] %vm1631_vm4, %v1498_v59 }
 0x22e   :  { %1868 = vrot.lane.b32.xlu0 %v9538_v50, %s10387_s27  ;;  %1870 = vrot.lane.b32.xlu1 %v9539_v51, %s10387_s27  ;;  %v9570_v50 = vld [vmem:[%s18021_s0 + $0x2d2] sm:$0xff]  ;;  %v9571_v51 = vld [vmem:[%s18021_s0 + $0x2da] sm:$0xff] }
 0x230   :  { %v1500_v6 = vpop.permute.xlu0 %1499  ;;  %v1502_v7 = vpop.permute.xlu1 %1501 }
 0x231   :  { %1662 = vst.msk [vmem:[#allocation2 + $0xf0] sm:$0xff] %vm1631_vm4, %v1500_v6  ;;  %1663 = vst.msk [vmem:[#allocation2 + $0xf8] sm:$0xff] %vm1631_vm4, %v1502_v7 }
 0x232   :  { %1872 = vrot.lane.b32.xlu0 %v9540_v62, %s10387_s27  ;;  %1874 = vrot.lane.b32.xlu1 %v9541_v63, %s10387_s27  ;;  %v9572_v62 = vld [vmem:[%s18021_s0 + $0x2ea] sm:$0xff]  ;;  %v9573_v63 = vld [vmem:[%s18021_s0 + $0x2f2] sm:$0xff] }
 0x234   :  { %v1504_v44 = vpop.permute.xlu0 %1503  ;;  %v1506_v45 = vpop.permute.xlu1 %1505 }
 0x235   :  { %1664 = vst.msk [vmem:[#allocation2 + $0x100] sm:$0xff] %vm1631_vm4, %v1504_v44  ;;  %1665 = vst.msk [vmem:[#allocation2 + $0x108] sm:$0xff] %vm1631_vm4, %v1506_v45 }
 0x236   :  { %1876 = vrot.lane.b32.xlu0 %v9542_v15, %s10387_s27  ;;  %1878 = vrot.lane.b32.xlu1 %v9543_v16, %s10387_s27  ;;  %v9574_v15 = vld [vmem:[%s18021_s0 + $0x302] sm:$0xff]  ;;  %v9575_v16 = vld [vmem:[%s18021_s0 + $0x30a] sm:$0xff] }
 0x238   :  { %v1508_v60 = vpop.permute.xlu0 %1507  ;;  %v1510_v61 = vpop.permute.xlu1 %1509 }
 0x239   :  { %1666 = vst.msk [vmem:[#allocation2 + $0x110] sm:$0xff] %vm1631_vm4, %v1508_v60  ;;  %1667 = vst.msk [vmem:[#allocation2 + $0x118] sm:$0xff] %vm1631_vm4, %v1510_v61 }
 0x23a   :  { %1880 = vrot.lane.b32.xlu0 %v9544_v28, %s10387_s27  ;;  %1882 = vrot.lane.b32.xlu1 %v9545_v29, %s10387_s27  ;;  %v9576_v28 = vld [vmem:[%s18021_s0 + $0x31a] sm:$0xff]  ;;  %v9577_v29 = vld [vmem:[%s18021_s0 + $0x322] sm:$0xff] }
 0x23c   :  { %v1512_v13 = vpop.permute.xlu0 %1511  ;;  %v1514_v17 = vpop.permute.xlu1 %1513 }
 0x23d   :  { %1668 = vst.msk [vmem:[#allocation2 + $0x120] sm:$0xff] %vm1631_vm4, %v1512_v13  ;;  %1669 = vst.msk [vmem:[#allocation2 + $0x128] sm:$0xff] %vm1631_vm4, %v1514_v17 }
 0x23e   :  { %1884 = vrot.lane.b32.xlu0 %v9546_v11, %s10387_s27  ;;  %1886 = vrot.lane.b32.xlu1 %v9547_v54, %s10387_s27  ;;  %v9578_v11 = vld [vmem:[%s18021_s0 + $0x332] sm:$0xff]  ;;  %v9579_v54 = vld [vmem:[%s18021_s0 + $0x33a] sm:$0xff] }
 0x240   :  { %v1516_v20 = vpop.permute.xlu0 %1515  ;;  %v1518_v23 = vpop.permute.xlu1 %1517 }
 0x241   :  { %1670 = vst.msk [vmem:[#allocation2 + $0x130] sm:$0xff] %vm1631_vm4, %v1516_v20  ;;  %1671 = vst.msk [vmem:[#allocation2 + $0x138] sm:$0xff] %vm1631_vm4, %v1518_v23 }
 0x242   :  { %1888 = vrot.lane.b32.xlu0 %v9548_v18, %s10387_s27  ;;  %1890 = vrot.lane.b32.xlu1 %v9549_v19, %s10387_s27  ;;  %v9580_v18 = vld [vmem:[%s18021_s0 + $0x30] sm:$0xff]  ;;  %v9581_v19 = vld [vmem:[%s18021_s0 + $0x38] sm:$0xff] }
 0x244   :  { %v1520_v26 = vpop.permute.xlu0 %1519  ;;  %v1522_v27 = vpop.permute.xlu1 %1521 }
 0x245   :  { %1672 = vst.msk [vmem:[#allocation2 + $0x140] sm:$0xff] %vm1631_vm4, %v1520_v26  ;;  %1673 = vst.msk [vmem:[#allocation2 + $0x148] sm:$0xff] %vm1631_vm4, %v1522_v27 }
 0x246   :  { %1892 = vrot.lane.b32.xlu0 %v9550_v24, %s10387_s27  ;;  %1894 = vrot.lane.b32.xlu1 %v9551_v25, %s10387_s27  ;;  %v9582_v24 = vld [vmem:[%s18021_s0 + $0x48] sm:$0xff]  ;;  %v9583_v25 = vld [vmem:[%s18021_s0 + $0x50] sm:$0xff] }
 0x248   :  { %v1524_v32 = vpop.permute.xlu0 %1523  ;;  %v1526_v33 = vpop.permute.xlu1 %1525 }
 0x249   :  { %1674 = vst.msk [vmem:[#allocation2 + $0x150] sm:$0xff] %vm1631_vm4, %v1524_v32  ;;  %1675 = vst.msk [vmem:[#allocation2 + $0x158] sm:$0xff] %vm1631_vm4, %v1526_v33 }
 0x24a   :  { %1896 = vrot.lane.b32.xlu0 %v9552_v30, %s10387_s27  ;;  %1898 = vrot.lane.b32.xlu1 %v9553_v31, %s10387_s27  ;;  %v9584_v30 = vld [vmem:[%s18021_s0 + $0x60] sm:$0xff]  ;;  %v9585_v31 = vld [vmem:[%s18021_s0 + $0x68] sm:$0xff] }
 0x24c   :  { %v1528_v38 = vpop.permute.xlu0 %1527  ;;  %v1530_v39 = vpop.permute.xlu1 %1529 }
 0x24d   :  { %1676 = vst.msk [vmem:[#allocation2 + $0x160] sm:$0xff] %vm1631_vm4, %v1528_v38  ;;  %1677 = vst.msk [vmem:[#allocation2 + $0x168] sm:$0xff] %vm1631_vm4, %v1530_v39 }
 0x24e   :  { %1900 = vrot.lane.b32.xlu0 %v9554_v34, %s10387_s27  ;;  %1902 = vrot.lane.b32.xlu1 %v9555_v36, %s10387_s27  ;;  %v9586_v34 = vld [vmem:[%s18021_s0 + $0x78] sm:$0xff]  ;;  %v9587_v36 = vld [vmem:[%s18021_s0 + $0x80] sm:$0xff] }
 0x250   :  { %v1532_v42 = vpop.permute.xlu0 %1531  ;;  %v1534_v43 = vpop.permute.xlu1 %1533 }
 0x251   :  { %1678 = vst.msk [vmem:[#allocation2 + $0x170] sm:$0xff] %vm1631_vm4, %v1532_v42  ;;  %1679 = vst.msk [vmem:[#allocation2 + $0x178] sm:$0xff] %vm1631_vm4, %v1534_v43 }
 0x252   :  { %1904 = vrot.lane.b32.xlu0 %v9556_v40, %s10387_s27  ;;  %1906 = vrot.lane.b32.xlu1 %v9557_v41, %s10387_s27  ;;  %v9588_v40 = vld [vmem:[%s18021_s0 + $0x90] sm:$0xff]  ;;  %v9589_v41 = vld [vmem:[%s18021_s0 + $0x98] sm:$0xff] }
 0x254   :  { %v1536_v48 = vpop.permute.xlu0 %1535  ;;  %v1538_v49 = vpop.permute.xlu1 %1537 }
 0x255   :  { %1680 = vst.msk [vmem:[#allocation2 + $0x180] sm:$0xff] %vm1631_vm4, %v1536_v48  ;;  %1681 = vst.msk [vmem:[#allocation2 + $0x188] sm:$0xff] %vm1631_vm4, %v1538_v49 }
 0x256   :  { %1908 = vrot.lane.b32.xlu0 %v9558_v46, %s10387_s27  ;;  %1910 = vrot.lane.b32.xlu1 %v9559_v47, %s10387_s27  ;;  %v9590_v46 = vld [vmem:[%s18021_s0 + $0xa8] sm:$0xff]  ;;  %v9591_v47 = vld [vmem:[%s18021_s0 + $0xb0] sm:$0xff] }
 0x258   :  { %v1540_v56 = vpop.permute.xlu0 %1539  ;;  %v1542_v57 = vpop.permute.xlu1 %1541 }
 0x259   :  { %1682 = vst.msk [vmem:[#allocation2 + $0x190] sm:$0xff] %vm1631_vm4, %v1540_v56  ;;  %1683 = vst.msk [vmem:[#allocation2 + $0x198] sm:$0xff] %vm1631_vm4, %v1542_v57 }
 0x25a   :  { %1912 = vrot.lane.b32.xlu0 %v9560_v52, %s10387_s27  ;;  %1914 = vrot.lane.b32.xlu1 %v9561_v53, %s10387_s27  ;;  %v9592_v52 = vld [vmem:[%s18021_s0 + $0xc0] sm:$0xff]  ;;  %v9593_v53 = vld [vmem:[%s18021_s0 + $0xc8] sm:$0xff] }
 0x25c   :  { %v1544_v10 = vpop.permute.xlu0 %1543  ;;  %v1546_v55 = vpop.permute.xlu1 %1545 }
 0x25d   :  { %1684 = vst.msk [vmem:[#allocation2 + $0x1a0] sm:$0xff] %vm1631_vm4, %v1544_v10  ;;  %1685 = vst.msk [vmem:[#allocation2 + $0x1a8] sm:$0xff] %vm1631_vm4, %v1546_v55 }
 0x25e   :  { %1916 = vrot.lane.b32.xlu0 %v9562_v2, %s10387_s27  ;;  %1918 = vrot.lane.b32.xlu1 %v9563_v3, %s10387_s27  ;;  %v9594_v2 = vld [vmem:[%s18021_s0 + $0xd8] sm:$0xff]  ;;  %v9595_v3 = vld [vmem:[%s18021_s0 + $0xe0] sm:$0xff] }
 0x260   :  { %v1548_v4 = vpop.permute.xlu0 %1547  ;;  %v1550_v5 = vpop.permute.xlu1 %1549 }
 0x261   :  { %1686 = vst.msk [vmem:[#allocation2 + $0x1b0] sm:$0xff] %vm1631_vm4, %v1548_v4  ;;  %1687 = vst.msk [vmem:[#allocation2 + $0x1b8] sm:$0xff] %vm1631_vm4, %v1550_v5 }
 0x262   :  { %1920 = vrot.lane.b32.xlu0 %v9564_v0, %s10387_s27  ;;  %1922 = vrot.lane.b32.xlu1 %v9565_v1, %s10387_s27  ;;  %v9596_v0 = vld [vmem:[%s18021_s0 + $0xf0] sm:$0xff]  ;;  %v9597_v1 = vld [vmem:[%s18021_s0 + $0xf8] sm:$0xff] }
 0x264   :  { %v1552_v12 = vpop.permute.xlu0 %1551  ;;  %v1554_v14 = vpop.permute.xlu1 %1553 }
 0x265   :  { %1688 = vst.msk [vmem:[#allocation2 + $0x1c0] sm:$0xff] %vm1631_vm4, %v1552_v12  ;;  %1689 = vst.msk [vmem:[#allocation2 + $0x1c8] sm:$0xff] %vm1631_vm4, %v1554_v14 }
 0x266   :  { %1924 = vrot.lane.b32.xlu0 %v9566_v8, %s10387_s27  ;;  %1926 = vrot.lane.b32.xlu1 %v9567_v9, %s10387_s27  ;;  %v9598_v8 = vld [vmem:[%s18021_s0 + $0x108] sm:$0xff]  ;;  %v9599_v9 = vld [vmem:[%s18021_s0 + $0x110] sm:$0xff] }
 0x268   :  { %v1556_v35 = vpop.permute.xlu0 %1555  ;;  %v1558_v37 = vpop.permute.xlu1 %1557 }
 0x269   :  { %1690 = vst.msk [vmem:[#allocation2 + $0x1d0] sm:$0xff] %vm1631_vm4, %v1556_v35  ;;  %1691 = vst.msk [vmem:[#allocation2 + $0x1d8] sm:$0xff] %vm1631_vm4, %v1558_v37 }
 0x26a   :  { %1928 = vrot.lane.b32.xlu0 %v9568_v21, %s10387_s27  ;;  %1930 = vrot.lane.b32.xlu1 %v9569_v22, %s10387_s27  ;;  %v9600_v21 = vld [vmem:[%s18021_s0 + $0x120] sm:$0xff]  ;;  %v9601_v22 = vld [vmem:[%s18021_s0 + $0x128] sm:$0xff] }
 0x26c   :  { %v1560_v58 = vpop.permute.xlu0 %1559  ;;  %v1562_v59 = vpop.permute.xlu1 %1561 }
 0x26d   :  { %1692 = vst.msk [vmem:[#allocation2 + $0x1e0] sm:$0xff] %vm1631_vm4, %v1560_v58  ;;  %1693 = vst.msk [vmem:[#allocation2 + $0x1e8] sm:$0xff] %vm1631_vm4, %v1562_v59 }
 0x26e   :  { %1932 = vrot.lane.b32.xlu0 %v9570_v50, %s10387_s27  ;;  %1934 = vrot.lane.b32.xlu1 %v9571_v51, %s10387_s27  ;;  %v9602_v50 = vld [vmem:[%s18021_s0 + $0x138] sm:$0xff]  ;;  %v9603_v51 = vld [vmem:[%s18021_s0 + $0x140] sm:$0xff] }
 0x270   :  { %v1564_v6 = vpop.permute.xlu0 %1563  ;;  %v1566_v7 = vpop.permute.xlu1 %1565 }
 0x271   :  { %1694 = vst.msk [vmem:[#allocation2 + $0x1f0] sm:$0xff] %vm1631_vm4, %v1564_v6  ;;  %1695 = vst.msk [vmem:[#allocation2 + $0x1f8] sm:$0xff] %vm1631_vm4, %v1566_v7 }
 0x272   :  { %1936 = vrot.lane.b32.xlu0 %v9572_v62, %s10387_s27  ;;  %1938 = vrot.lane.b32.xlu1 %v9573_v63, %s10387_s27  ;;  %v9604_v62 = vld [vmem:[%s18021_s0 + $0x150] sm:$0xff]  ;;  %v9605_v63 = vld [vmem:[%s18021_s0 + $0x158] sm:$0xff] }
 0x274   :  { %v1825_v44 = vpop.permute.xlu0 %1824  ;;  %v1827_v45 = vpop.permute.xlu1 %1826 }
 0x275   :  { %2017 = vst.msk [vmem:[#allocation2] sm:$0xff] %vm2016_vm5, %v1825_v44  ;;  %2018 = vst.msk [vmem:[#allocation2 + $0x8] sm:$0xff] %vm2016_vm5, %v1827_v45 }
 0x276   :  { %1940 = vrot.lane.b32.xlu0 %v9574_v15, %s10387_s27  ;;  %1942 = vrot.lane.b32.xlu1 %v9575_v16, %s10387_s27  ;;  %v9606_v15 = vld [vmem:[%s18021_s0 + $0x168] sm:$0xff]  ;;  %v9607_v16 = vld [vmem:[%s18021_s0 + $0x170] sm:$0xff] }
 0x278   :  { %v1829_v60 = vpop.permute.xlu0 %1828  ;;  %v1831_v61 = vpop.permute.xlu1 %1830 }
 0x279   :  { %2019 = vst.msk [vmem:[#allocation2 + $0x10] sm:$0xff] %vm2016_vm5, %v1829_v60  ;;  %2020 = vst.msk [vmem:[#allocation2 + $0x18] sm:$0xff] %vm2016_vm5, %v1831_v61 }
 0x27a   :  { %1944 = vrot.lane.b32.xlu0 %v9576_v28, %s10387_s27  ;;  %1946 = vrot.lane.b32.xlu1 %v9577_v29, %s10387_s27  ;;  %v9608_v28 = vld [vmem:[%s18021_s0 + $0x180] sm:$0xff]  ;;  %v9609_v29 = vld [vmem:[%s18021_s0 + $0x188] sm:$0xff] }
 0x27c   :  { %v1833_v13 = vpop.permute.xlu0 %1832  ;;  %v1835_v17 = vpop.permute.xlu1 %1834 }
 0x27d   :  { %2021 = vst.msk [vmem:[#allocation2 + $0x20] sm:$0xff] %vm2016_vm5, %v1833_v13  ;;  %2022 = vst.msk [vmem:[#allocation2 + $0x28] sm:$0xff] %vm2016_vm5, %v1835_v17 }
 0x27e   :  { %1948 = vrot.lane.b32.xlu0 %v9578_v11, %s10387_s27  ;;  %1950 = vrot.lane.b32.xlu1 %v9579_v54, %s10387_s27  ;;  %v9610_v11 = vld [vmem:[%s18021_s0 + $0x198] sm:$0xff]  ;;  %v9611_v54 = vld [vmem:[%s18021_s0 + $0x1a0] sm:$0xff] }
 0x280   :  { %v1837_v20 = vpop.permute.xlu0 %1836  ;;  %v1839_v23 = vpop.permute.xlu1 %1838 }
 0x281   :  { %2023 = vst.msk [vmem:[#allocation2 + $0x30] sm:$0xff] %vm2016_vm5, %v1837_v20  ;;  %2024 = vst.msk [vmem:[#allocation2 + $0x38] sm:$0xff] %vm2016_vm5, %v1839_v23 }
 0x282   :  { %2210 = vrot.lane.b32.xlu0 %v9580_v18, %s10388_s8  ;;  %2212 = vrot.lane.b32.xlu1 %v9581_v19, %s10388_s8  ;;  %v9612_v18 = vld [vmem:[%s18021_s0 + $0x1e0] sm:$0xff]  ;;  %v9613_v19 = vld [vmem:[%s18021_s0 + $0x1e8] sm:$0xff] }
 0x284   :  { %v1841_v26 = vpop.permute.xlu0 %1840  ;;  %v1843_v27 = vpop.permute.xlu1 %1842 }
 0x285   :  { %2025 = vst.msk [vmem:[#allocation2 + $0x40] sm:$0xff] %vm2016_vm5, %v1841_v26  ;;  %2026 = vst.msk [vmem:[#allocation2 + $0x48] sm:$0xff] %vm2016_vm5, %v1843_v27 }
 0x286   :  { %2214 = vrot.lane.b32.xlu0 %v9582_v24, %s10388_s8  ;;  %2216 = vrot.lane.b32.xlu1 %v9583_v25, %s10388_s8  ;;  %v9614_v24 = vld [vmem:[%s18021_s0 + $0x1f8] sm:$0xff]  ;;  %v9615_v25 = vld [vmem:[%s18021_s0 + $0x200] sm:$0xff] }
 0x288   :  { %v1845_v32 = vpop.permute.xlu0 %1844  ;;  %v1847_v33 = vpop.permute.xlu1 %1846 }
 0x289   :  { %2027 = vst.msk [vmem:[#allocation2 + $0x50] sm:$0xff] %vm2016_vm5, %v1845_v32  ;;  %2028 = vst.msk [vmem:[#allocation2 + $0x58] sm:$0xff] %vm2016_vm5, %v1847_v33 }
 0x28a   :  { %2218 = vrot.lane.b32.xlu0 %v9584_v30, %s10388_s8  ;;  %2220 = vrot.lane.b32.xlu1 %v9585_v31, %s10388_s8  ;;  %v9616_v30 = vld [vmem:[%s18021_s0 + $0x210] sm:$0xff]  ;;  %v9617_v31 = vld [vmem:[%s18021_s0 + $0x218] sm:$0xff] }
 0x28c   :  { %v1849_v38 = vpop.permute.xlu0 %1848  ;;  %v1851_v39 = vpop.permute.xlu1 %1850 }
 0x28d   :  { %2029 = vst.msk [vmem:[#allocation2 + $0x60] sm:$0xff] %vm2016_vm5, %v1849_v38  ;;  %2030 = vst.msk [vmem:[#allocation2 + $0x68] sm:$0xff] %vm2016_vm5, %v1851_v39 }
 0x28e   :  { %2222 = vrot.lane.b32.xlu0 %v9586_v34, %s10388_s8  ;;  %2224 = vrot.lane.b32.xlu1 %v9587_v36, %s10388_s8  ;;  %v9618_v34 = vld [vmem:[%s18021_s0 + $0x228] sm:$0xff]  ;;  %v9619_v36 = vld [vmem:[%s18021_s0 + $0x230] sm:$0xff] }
 0x290   :  { %v1853_v42 = vpop.permute.xlu0 %1852  ;;  %v1855_v43 = vpop.permute.xlu1 %1854 }
 0x291   :  { %2031 = vst.msk [vmem:[#allocation2 + $0x70] sm:$0xff] %vm2016_vm5, %v1853_v42  ;;  %2032 = vst.msk [vmem:[#allocation2 + $0x78] sm:$0xff] %vm2016_vm5, %v1855_v43 }
 0x292   :  { %2226 = vrot.lane.b32.xlu0 %v9588_v40, %s10388_s8  ;;  %2228 = vrot.lane.b32.xlu1 %v9589_v41, %s10388_s8  ;;  %v9620_v40 = vld [vmem:[%s18021_s0 + $0x240] sm:$0xff]  ;;  %v9621_v41 = vld [vmem:[%s18021_s0 + $0x248] sm:$0xff] }
 0x294   :  { %v1857_v48 = vpop.permute.xlu0 %1856  ;;  %v1859_v49 = vpop.permute.xlu1 %1858 }
 0x295   :  { %2033 = vst.msk [vmem:[#allocation2 + $0x80] sm:$0xff] %vm2016_vm5, %v1857_v48  ;;  %2034 = vst.msk [vmem:[#allocation2 + $0x88] sm:$0xff] %vm2016_vm5, %v1859_v49 }
 0x296   :  { %2230 = vrot.lane.b32.xlu0 %v9590_v46, %s10388_s8  ;;  %2232 = vrot.lane.b32.xlu1 %v9591_v47, %s10388_s8  ;;  %v9622_v46 = vld [vmem:[%s18021_s0 + $0x258] sm:$0xff]  ;;  %v9623_v47 = vld [vmem:[%s18021_s0 + $0x260] sm:$0xff] }
 0x298   :  { %v1861_v56 = vpop.permute.xlu0 %1860  ;;  %v1863_v57 = vpop.permute.xlu1 %1862 }
 0x299   :  { %2035 = vst.msk [vmem:[#allocation2 + $0x90] sm:$0xff] %vm2016_vm5, %v1861_v56  ;;  %2036 = vst.msk [vmem:[#allocation2 + $0x98] sm:$0xff] %vm2016_vm5, %v1863_v57 }
 0x29a   :  { %2234 = vrot.lane.b32.xlu0 %v9592_v52, %s10388_s8  ;;  %2236 = vrot.lane.b32.xlu1 %v9593_v53, %s10388_s8  ;;  %v9624_v52 = vld [vmem:[%s18021_s0 + $0x270] sm:$0xff]  ;;  %v9625_v53 = vld [vmem:[%s18021_s0 + $0x278] sm:$0xff] }
 0x29c   :  { %v1865_v10 = vpop.permute.xlu0 %1864  ;;  %v1867_v55 = vpop.permute.xlu1 %1866 }
 0x29d   :  { %2037 = vst.msk [vmem:[#allocation2 + $0xa0] sm:$0xff] %vm2016_vm5, %v1865_v10  ;;  %2038 = vst.msk [vmem:[#allocation2 + $0xa8] sm:$0xff] %vm2016_vm5, %v1867_v55 }
 0x29e   :  { %2238 = vrot.lane.b32.xlu0 %v9594_v2, %s10388_s8  ;;  %2240 = vrot.lane.b32.xlu1 %v9595_v3, %s10388_s8  ;;  %v9626_v2 = vld [vmem:[%s18021_s0 + $0x288] sm:$0xff]  ;;  %v9627_v3 = vld [vmem:[%s18021_s0 + $0x290] sm:$0xff] }
 0x2a0   :  { %v1869_v4 = vpop.permute.xlu0 %1868  ;;  %v1871_v5 = vpop.permute.xlu1 %1870 }
 0x2a1   :  { %2039 = vst.msk [vmem:[#allocation2 + $0xb0] sm:$0xff] %vm2016_vm5, %v1869_v4  ;;  %2040 = vst.msk [vmem:[#allocation2 + $0xb8] sm:$0xff] %vm2016_vm5, %v1871_v5 }
 0x2a2   :  { %2242 = vrot.lane.b32.xlu0 %v9596_v0, %s10388_s8  ;;  %2244 = vrot.lane.b32.xlu1 %v9597_v1, %s10388_s8  ;;  %v9628_v0 = vld [vmem:[%s18021_s0 + $0x2a0] sm:$0xff]  ;;  %v9629_v1 = vld [vmem:[%s18021_s0 + $0x2a8] sm:$0xff] }
 0x2a4   :  { %v1873_v12 = vpop.permute.xlu0 %1872  ;;  %v1875_v14 = vpop.permute.xlu1 %1874 }
 0x2a5   :  { %2041 = vst.msk [vmem:[#allocation2 + $0xc0] sm:$0xff] %vm2016_vm5, %v1873_v12  ;;  %2042 = vst.msk [vmem:[#allocation2 + $0xc8] sm:$0xff] %vm2016_vm5, %v1875_v14 }
 0x2a6   :  { %2246 = vrot.lane.b32.xlu0 %v9598_v8, %s10388_s8  ;;  %2248 = vrot.lane.b32.xlu1 %v9599_v9, %s10388_s8  ;;  %v9630_v8 = vld [vmem:[%s18021_s0 + $0x2b8] sm:$0xff]  ;;  %v9631_v9 = vld [vmem:[%s18021_s0 + $0x2c0] sm:$0xff] }
 0x2a8   :  { %v1877_v35 = vpop.permute.xlu0 %1876  ;;  %v1879_v37 = vpop.permute.xlu1 %1878 }
 0x2a9   :  { %2043 = vst.msk [vmem:[#allocation2 + $0xd0] sm:$0xff] %vm2016_vm5, %v1877_v35  ;;  %2044 = vst.msk [vmem:[#allocation2 + $0xd8] sm:$0xff] %vm2016_vm5, %v1879_v37 }
 0x2aa   :  { %2250 = vrot.lane.b32.xlu0 %v9600_v21, %s10388_s8  ;;  %2252 = vrot.lane.b32.xlu1 %v9601_v22, %s10388_s8  ;;  %v9632_v21 = vld [vmem:[%s18021_s0 + $0x2d0] sm:$0xff]  ;;  %v9633_v22 = vld [vmem:[%s18021_s0 + $0x2d8] sm:$0xff] }
 0x2ac   :  { %v1881_v58 = vpop.permute.xlu0 %1880  ;;  %v1883_v59 = vpop.permute.xlu1 %1882 }
 0x2ad   :  { %2045 = vst.msk [vmem:[#allocation2 + $0xe0] sm:$0xff] %vm2016_vm5, %v1881_v58  ;;  %2046 = vst.msk [vmem:[#allocation2 + $0xe8] sm:$0xff] %vm2016_vm5, %v1883_v59 }
 0x2ae   :  { %2254 = vrot.lane.b32.xlu0 %v9602_v50, %s10388_s8  ;;  %2256 = vrot.lane.b32.xlu1 %v9603_v51, %s10388_s8  ;;  %v9634_v50 = vld [vmem:[%s18021_s0 + $0x2e8] sm:$0xff]  ;;  %v9635_v51 = vld [vmem:[%s18021_s0 + $0x2f0] sm:$0xff] }
 0x2b0   :  { %v1885_v6 = vpop.permute.xlu0 %1884  ;;  %v1887_v7 = vpop.permute.xlu1 %1886 }
 0x2b1   :  { %2047 = vst.msk [vmem:[#allocation2 + $0xf0] sm:$0xff] %vm2016_vm5, %v1885_v6  ;;  %2048 = vst.msk [vmem:[#allocation2 + $0xf8] sm:$0xff] %vm2016_vm5, %v1887_v7 }
 0x2b2   :  { %2258 = vrot.lane.b32.xlu0 %v9604_v62, %s10388_s8  ;;  %2260 = vrot.lane.b32.xlu1 %v9605_v63, %s10388_s8  ;;  %v9636_v62 = vld [vmem:[%s18021_s0 + $0x300] sm:$0xff]  ;;  %v9637_v63 = vld [vmem:[%s18021_s0 + $0x308] sm:$0xff] }
 0x2b4   :  { %v1889_v44 = vpop.permute.xlu0 %1888  ;;  %v1891_v45 = vpop.permute.xlu1 %1890 }
 0x2b5   :  { %2049 = vst.msk [vmem:[#allocation2 + $0x100] sm:$0xff] %vm2016_vm5, %v1889_v44  ;;  %2050 = vst.msk [vmem:[#allocation2 + $0x108] sm:$0xff] %vm2016_vm5, %v1891_v45 }
 0x2b6   :  { %2262 = vrot.lane.b32.xlu0 %v9606_v15, %s10388_s8  ;;  %2264 = vrot.lane.b32.xlu1 %v9607_v16, %s10388_s8  ;;  %v9638_v15 = vld [vmem:[%s18021_s0 + $0x318] sm:$0xff]  ;;  %v9639_v16 = vld [vmem:[%s18021_s0 + $0x320] sm:$0xff] }
 0x2b8   :  { %v1893_v60 = vpop.permute.xlu0 %1892  ;;  %v1895_v61 = vpop.permute.xlu1 %1894 }
 0x2b9   :  { %2051 = vst.msk [vmem:[#allocation2 + $0x110] sm:$0xff] %vm2016_vm5, %v1893_v60  ;;  %2052 = vst.msk [vmem:[#allocation2 + $0x118] sm:$0xff] %vm2016_vm5, %v1895_v61 }
 0x2ba   :  { %2266 = vrot.lane.b32.xlu0 %v9608_v28, %s10388_s8  ;;  %2268 = vrot.lane.b32.xlu1 %v9609_v29, %s10388_s8  ;;  %v9640_v28 = vld [vmem:[%s18021_s0 + $0x330] sm:$0xff]  ;;  %v9641_v29 = vld [vmem:[%s18021_s0 + $0x338] sm:$0xff] }
 0x2bc   :  { %v1897_v13 = vpop.permute.xlu0 %1896  ;;  %v1899_v17 = vpop.permute.xlu1 %1898 }
 0x2bd   :  { %2053 = vst.msk [vmem:[#allocation2 + $0x120] sm:$0xff] %vm2016_vm5, %v1897_v13  ;;  %2054 = vst.msk [vmem:[#allocation2 + $0x128] sm:$0xff] %vm2016_vm5, %v1899_v17 }
 0x2be   :  { %2270 = vrot.lane.b32.xlu0 %v9610_v11, %s10388_s8  ;;  %2272 = vrot.lane.b32.xlu1 %v9611_v54, %s10388_s8  ;;  %v9642_v11 = vld [vmem:[%s18021_s0 + $0x348] sm:$0xff]  ;;  %v9643_v54 = vld [vmem:[%s18021_s0 + $0x350] sm:$0xff] }
 0x2c0   :  { %v1901_v20 = vpop.permute.xlu0 %1900  ;;  %v1903_v23 = vpop.permute.xlu1 %1902 }
 0x2c1   :  { %2055 = vst.msk [vmem:[#allocation2 + $0x130] sm:$0xff] %vm2016_vm5, %v1901_v20  ;;  %2056 = vst.msk [vmem:[#allocation2 + $0x138] sm:$0xff] %vm2016_vm5, %v1903_v23 }
 0x2c2   :  { %2274 = vrot.lane.b32.xlu0 %v9612_v18, %s10388_s8  ;;  %2276 = vrot.lane.b32.xlu1 %v9613_v19, %s10388_s8  ;;  %v9644_v18 = vld [vmem:[%s18021_s0 + $0x31] sm:$0xff]  ;;  %v9645_v19 = vld [vmem:[%s18021_s0 + $0x39] sm:$0xff] }
 0x2c4   :  { %v1905_v26 = vpop.permute.xlu0 %1904  ;;  %v1907_v27 = vpop.permute.xlu1 %1906 }
 0x2c5   :  { %2057 = vst.msk [vmem:[#allocation2 + $0x140] sm:$0xff] %vm2016_vm5, %v1905_v26  ;;  %2058 = vst.msk [vmem:[#allocation2 + $0x148] sm:$0xff] %vm2016_vm5, %v1907_v27 }
 0x2c6   :  { %2278 = vrot.lane.b32.xlu0 %v9614_v24, %s10388_s8  ;;  %2280 = vrot.lane.b32.xlu1 %v9615_v25, %s10388_s8  ;;  %v9646_v24 = vld [vmem:[%s18021_s0 + $0x49] sm:$0xff]  ;;  %v9647_v25 = vld [vmem:[%s18021_s0 + $0x51] sm:$0xff] }
 0x2c8   :  { %v1909_v32 = vpop.permute.xlu0 %1908  ;;  %v1911_v33 = vpop.permute.xlu1 %1910 }
 0x2c9   :  { %2059 = vst.msk [vmem:[#allocation2 + $0x150] sm:$0xff] %vm2016_vm5, %v1909_v32  ;;  %2060 = vst.msk [vmem:[#allocation2 + $0x158] sm:$0xff] %vm2016_vm5, %v1911_v33 }
 0x2ca   :  { %2282 = vrot.lane.b32.xlu0 %v9616_v30, %s10388_s8  ;;  %2284 = vrot.lane.b32.xlu1 %v9617_v31, %s10388_s8  ;;  %v9648_v30 = vld [vmem:[%s18021_s0 + $0x61] sm:$0xff]  ;;  %v9649_v31 = vld [vmem:[%s18021_s0 + $0x69] sm:$0xff] }
 0x2cc   :  { %v1913_v38 = vpop.permute.xlu0 %1912  ;;  %v1915_v39 = vpop.permute.xlu1 %1914 }
 0x2cd   :  { %2061 = vst.msk [vmem:[#allocation2 + $0x160] sm:$0xff] %vm2016_vm5, %v1913_v38  ;;  %2062 = vst.msk [vmem:[#allocation2 + $0x168] sm:$0xff] %vm2016_vm5, %v1915_v39 }
 0x2ce   :  { %2286 = vrot.lane.b32.xlu0 %v9618_v34, %s10388_s8  ;;  %2288 = vrot.lane.b32.xlu1 %v9619_v36, %s10388_s8  ;;  %v9650_v34 = vld [vmem:[%s18021_s0 + $0x79] sm:$0xff]  ;;  %v9651_v36 = vld [vmem:[%s18021_s0 + $0x81] sm:$0xff] }
 0x2d0   :  { %v1917_v42 = vpop.permute.xlu0 %1916  ;;  %v1919_v43 = vpop.permute.xlu1 %1918 }
 0x2d1   :  { %2063 = vst.msk [vmem:[#allocation2 + $0x170] sm:$0xff] %vm2016_vm5, %v1917_v42  ;;  %2064 = vst.msk [vmem:[#allocation2 + $0x178] sm:$0xff] %vm2016_vm5, %v1919_v43 }
 0x2d2   :  { %2290 = vrot.lane.b32.xlu0 %v9620_v40, %s10388_s8  ;;  %2292 = vrot.lane.b32.xlu1 %v9621_v41, %s10388_s8  ;;  %v9652_v40 = vld [vmem:[%s18021_s0 + $0x91] sm:$0xff]  ;;  %v9653_v41 = vld [vmem:[%s18021_s0 + $0x99] sm:$0xff] }
 0x2d4   :  { %v1921_v48 = vpop.permute.xlu0 %1920  ;;  %v1923_v49 = vpop.permute.xlu1 %1922 }
 0x2d5   :  { %2065 = vst.msk [vmem:[#allocation2 + $0x180] sm:$0xff] %vm2016_vm5, %v1921_v48  ;;  %2066 = vst.msk [vmem:[#allocation2 + $0x188] sm:$0xff] %vm2016_vm5, %v1923_v49 }
 0x2d6   :  { %2294 = vrot.lane.b32.xlu0 %v9622_v46, %s10388_s8  ;;  %2296 = vrot.lane.b32.xlu1 %v9623_v47, %s10388_s8  ;;  %v9654_v46 = vld [vmem:[%s18021_s0 + $0xa9] sm:$0xff]  ;;  %v9655_v47 = vld [vmem:[%s18021_s0 + $0xb1] sm:$0xff] }
 0x2d8   :  { %v1925_v56 = vpop.permute.xlu0 %1924  ;;  %v1927_v57 = vpop.permute.xlu1 %1926 }
 0x2d9   :  { %2067 = vst.msk [vmem:[#allocation2 + $0x190] sm:$0xff] %vm2016_vm5, %v1925_v56  ;;  %2068 = vst.msk [vmem:[#allocation2 + $0x198] sm:$0xff] %vm2016_vm5, %v1927_v57 }
 0x2da   :  { %2298 = vrot.lane.b32.xlu0 %v9624_v52, %s10388_s8  ;;  %2300 = vrot.lane.b32.xlu1 %v9625_v53, %s10388_s8  ;;  %v9656_v52 = vld [vmem:[%s18021_s0 + $0xc1] sm:$0xff]  ;;  %v9657_v53 = vld [vmem:[%s18021_s0 + $0xc9] sm:$0xff] }
 0x2dc   :  { %v1929_v10 = vpop.permute.xlu0 %1928  ;;  %v1931_v55 = vpop.permute.xlu1 %1930 }
 0x2dd   :  { %2069 = vst.msk [vmem:[#allocation2 + $0x1a0] sm:$0xff] %vm2016_vm5, %v1929_v10  ;;  %2070 = vst.msk [vmem:[#allocation2 + $0x1a8] sm:$0xff] %vm2016_vm5, %v1931_v55 }
 0x2de   :  { %2302 = vrot.lane.b32.xlu0 %v9626_v2, %s10388_s8  ;;  %2304 = vrot.lane.b32.xlu1 %v9627_v3, %s10388_s8  ;;  %v9658_v2 = vld [vmem:[%s18021_s0 + $0xd9] sm:$0xff]  ;;  %v9659_v3 = vld [vmem:[%s18021_s0 + $0xe1] sm:$0xff] }
 0x2e0   :  { %v1933_v4 = vpop.permute.xlu0 %1932  ;;  %v1935_v5 = vpop.permute.xlu1 %1934 }
 0x2e1   :  { %2071 = vst.msk [vmem:[#allocation2 + $0x1b0] sm:$0xff] %vm2016_vm5, %v1933_v4  ;;  %2072 = vst.msk [vmem:[#allocation2 + $0x1b8] sm:$0xff] %vm2016_vm5, %v1935_v5 }
 0x2e2   :  { %2306 = vrot.lane.b32.xlu0 %v9628_v0, %s10388_s8  ;;  %2308 = vrot.lane.b32.xlu1 %v9629_v1, %s10388_s8  ;;  %v9660_v0 = vld [vmem:[%s18021_s0 + $0xf1] sm:$0xff]  ;;  %v9661_v1 = vld [vmem:[%s18021_s0 + $0xf9] sm:$0xff] }
 0x2e4   :  { %v1937_v12 = vpop.permute.xlu0 %1936  ;;  %v1939_v14 = vpop.permute.xlu1 %1938 }
 0x2e5   :  { %2073 = vst.msk [vmem:[#allocation2 + $0x1c0] sm:$0xff] %vm2016_vm5, %v1937_v12  ;;  %2074 = vst.msk [vmem:[#allocation2 + $0x1c8] sm:$0xff] %vm2016_vm5, %v1939_v14 }
 0x2e6   :  { %2310 = vrot.lane.b32.xlu0 %v9630_v8, %s10388_s8  ;;  %2312 = vrot.lane.b32.xlu1 %v9631_v9, %s10388_s8  ;;  %v9662_v8 = vld [vmem:[%s18021_s0 + $0x109] sm:$0xff]  ;;  %v9663_v9 = vld [vmem:[%s18021_s0 + $0x111] sm:$0xff] }
 0x2e8   :  { %v1941_v35 = vpop.permute.xlu0 %1940  ;;  %v1943_v37 = vpop.permute.xlu1 %1942 }
 0x2e9   :  { %2075 = vst.msk [vmem:[#allocation2 + $0x1d0] sm:$0xff] %vm2016_vm5, %v1941_v35  ;;  %2076 = vst.msk [vmem:[#allocation2 + $0x1d8] sm:$0xff] %vm2016_vm5, %v1943_v37 }
 0x2ea   :  { %2314 = vrot.lane.b32.xlu0 %v9632_v21, %s10388_s8  ;;  %2316 = vrot.lane.b32.xlu1 %v9633_v22, %s10388_s8  ;;  %v9664_v21 = vld [vmem:[%s18021_s0 + $0x121] sm:$0xff]  ;;  %v9665_v22 = vld [vmem:[%s18021_s0 + $0x129] sm:$0xff] }
 0x2ec   :  { %v1945_v58 = vpop.permute.xlu0 %1944  ;;  %v1947_v59 = vpop.permute.xlu1 %1946 }
 0x2ed   :  { %2077 = vst.msk [vmem:[#allocation2 + $0x1e0] sm:$0xff] %vm2016_vm5, %v1945_v58  ;;  %2078 = vst.msk [vmem:[#allocation2 + $0x1e8] sm:$0xff] %vm2016_vm5, %v1947_v59 }
 0x2ee   :  { %2318 = vrot.lane.b32.xlu0 %v9634_v50, %s10388_s8  ;;  %2320 = vrot.lane.b32.xlu1 %v9635_v51, %s10388_s8  ;;  %v9666_v50 = vld [vmem:[%s18021_s0 + $0x139] sm:$0xff]  ;;  %v9667_v51 = vld [vmem:[%s18021_s0 + $0x141] sm:$0xff] }
 0x2f0   :  { %v1949_v6 = vpop.permute.xlu0 %1948  ;;  %v1951_v7 = vpop.permute.xlu1 %1950 }
 0x2f1   :  { %2079 = vst.msk [vmem:[#allocation2 + $0x1f0] sm:$0xff] %vm2016_vm5, %v1949_v6  ;;  %2080 = vst.msk [vmem:[#allocation2 + $0x1f8] sm:$0xff] %vm2016_vm5, %v1951_v7 }
 0x2f2   :  { %2322 = vrot.lane.b32.xlu0 %v9636_v62, %s10388_s8  ;;  %2324 = vrot.lane.b32.xlu1 %v9637_v63, %s10388_s8  ;;  %v9668_v62 = vld [vmem:[%s18021_s0 + $0x151] sm:$0xff]  ;;  %v9669_v63 = vld [vmem:[%s18021_s0 + $0x159] sm:$0xff] }
 0x2f4   :  { %v2211_v44 = vpop.permute.xlu0 %2210  ;;  %v2213_v45 = vpop.permute.xlu1 %2212 }
 0x2f5   :  { %2403 = vst.msk [vmem:[#allocation2] sm:$0xff] %vm2402_vm6, %v2211_v44  ;;  %2404 = vst.msk [vmem:[#allocation2 + $0x8] sm:$0xff] %vm2402_vm6, %v2213_v45 }
 0x2f6   :  { %2326 = vrot.lane.b32.xlu0 %v9638_v15, %s10388_s8  ;;  %2328 = vrot.lane.b32.xlu1 %v9639_v16, %s10388_s8  ;;  %v9670_v15 = vld [vmem:[%s18021_s0 + $0x169] sm:$0xff]  ;;  %v9671_v16 = vld [vmem:[%s18021_s0 + $0x171] sm:$0xff] }
 0x2f8   :  { %v2215_v60 = vpop.permute.xlu0 %2214  ;;  %v2217_v61 = vpop.permute.xlu1 %2216 }
 0x2f9   :  { %2405 = vst.msk [vmem:[#allocation2 + $0x10] sm:$0xff] %vm2402_vm6, %v2215_v60  ;;  %2406 = vst.msk [vmem:[#allocation2 + $0x18] sm:$0xff] %vm2402_vm6, %v2217_v61 }
 0x2fa   :  { %2330 = vrot.lane.b32.xlu0 %v9640_v28, %s10388_s8  ;;  %2332 = vrot.lane.b32.xlu1 %v9641_v29, %s10388_s8  ;;  %v9672_v28 = vld [vmem:[%s18021_s0 + $0x181] sm:$0xff]  ;;  %v9673_v29 = vld [vmem:[%s18021_s0 + $0x189] sm:$0xff] }
 0x2fc   :  { %v2219_v13 = vpop.permute.xlu0 %2218  ;;  %v2221_v17 = vpop.permute.xlu1 %2220 }
 0x2fd   :  { %2407 = vst.msk [vmem:[#allocation2 + $0x20] sm:$0xff] %vm2402_vm6, %v2219_v13  ;;  %2408 = vst.msk [vmem:[#allocation2 + $0x28] sm:$0xff] %vm2402_vm6, %v2221_v17  ;;  %v9674_v17 = vld [vmem:[%s18021_s0 + $0x199] sm:$0xff] }
 0x2fe   :  { %2334 = vrot.lane.b32.xlu0 %v9642_v11, %s10388_s8  ;;  %2336 = vrot.lane.b32.xlu1 %v9643_v54, %s10388_s8  ;;  %v3301_v11 = vld [vmem:[%s18022_s1] sm:$0xff]  ;;  %v3302_v54 = vld [vmem:[%s18022_s1 + $0x8] sm:$0xff] }
 0x2ff   :  { %v10338_v13 = vpack.c.bf16 %v3302_v54, %v3301_v11  ;;  %v9725_v54 = vld [vmem:[%s18021_s0 + $0xfa] sm:$0xff] }
 0x300   :  { %v2223_v20 = vpop.permute.xlu0 %2222  ;;  %v2225_v23 = vpop.permute.xlu1 %2224 }
 0x301   :  { %2409 = vst.msk [vmem:[#allocation2 + $0x30] sm:$0xff] %vm2402_vm6, %v2223_v20  ;;  %2410 = vst.msk [vmem:[#allocation2 + $0x38] sm:$0xff] %vm2402_vm6, %v2225_v23  ;;  %10339 = vmatprep.subr.bf16.mxu0 %v10338_v13  ;;  %v3303_v23 = vld [vmem:[%s18022_s1 + $0x10] sm:$0xff] }
 0x302   :  { %2595 = vrot.lane.b32.xlu0 %v9644_v18, %s10389_s21  ;;  %2597 = vrot.lane.b32.xlu1 %v9645_v19, %s10389_s21  ;;  %v9675_v18 = vld [vmem:[%s18021_s0 + $0x1a1] sm:$0xff] }
 0x303   :  { %10341 = vmatpush3.bf16.msra.mxu0 %v10338_v13  ;;  %v9726_v13 = vld [vmem:[%s18021_s0 + $0x10a] sm:$0xff] }
 0x304   :  { %v2227_v26 = vpop.permute.xlu0 %2226  ;;  %v2229_v27 = vpop.permute.xlu1 %2228 }
 0x305   :  { %2411 = vst.msk [vmem:[#allocation2 + $0x40] sm:$0xff] %vm2402_vm6, %v2227_v26  ;;  %2412 = vst.msk [vmem:[#allocation2 + $0x48] sm:$0xff] %vm2402_vm6, %v2229_v27  ;;  %v9676_v26 = vld [vmem:[%s18021_s0 + $0x1e1] sm:$0xff]  ;;  %v9677_v27 = vld [vmem:[%s18021_s0 + $0x1e9] sm:$0xff] }
 0x306   :  { %2599 = vrot.lane.b32.xlu0 %v9646_v24, %s10389_s21  ;;  %2601 = vrot.lane.b32.xlu1 %v9647_v25, %s10389_s21  ;;  %v3304_v24 = vld [vmem:[%s18022_s1 + $0x18] sm:$0xff] }
 0x307   :  { %v10342_v25 = vpack.c.bf16 %v3304_v24, %v3303_v23 }
 0x308   :  { %v2231_v32 = vpop.permute.xlu0 %2230  ;;  %v2233_v33 = vpop.permute.xlu1 %2232 }
 0x309   :  { %2413 = vst.msk [vmem:[#allocation2 + $0x50] sm:$0xff] %vm2402_vm6, %v2231_v32  ;;  %2414 = vst.msk [vmem:[#allocation2 + $0x58] sm:$0xff] %vm2402_vm6, %v2233_v33  ;;  %10343 = vmatprep.subr.bf16.mxu0 %v10342_v25  ;;  %v3305_v32 = vld [vmem:[%s18022_s1 + $0x20] sm:$0xff]  ;;  %v3306_v33 = vld [vmem:[%s18022_s1 + $0x28] sm:$0xff] }
 0x30a   :  { %2603 = vrot.lane.b32.xlu0 %v9648_v30, %s10389_s21  ;;  %2605 = vrot.lane.b32.xlu1 %v9649_v31, %s10389_s21 }
 0x30b   :  { %10345 = vmatpush3.bf16.msra.mxu0 %v10342_v25  ;;  %v9729_v25 = vld [vmem:[%s18021_s0 + $0x12a] sm:$0xff] }
 0x30c   :  { %v2235_v38 = vpop.permute.xlu0 %2234  ;;  %v2237_v39 = vpop.permute.xlu1 %2236 }
 0x30d   :  { %2415 = vst.msk [vmem:[#allocation2 + $0x60] sm:$0xff] %vm2402_vm6, %v2235_v38  ;;  %2416 = vst.msk [vmem:[#allocation2 + $0x68] sm:$0xff] %vm2402_vm6, %v2237_v39  ;;  %v9679_v38 = vld [vmem:[%s18021_s0 + $0x201] sm:$0xff] }
 0x30e   :  { %2607 = vrot.lane.b32.xlu0 %v9650_v34, %s10389_s21  ;;  %2609 = vrot.lane.b32.xlu1 %v9651_v36, %s10389_s21  ;;  %v10346_v34 = vpack.c.bf16 %v3306_v33, %v3305_v32  ;;  %v9678_v36 = vld [vmem:[%s18021_s0 + $0x1f9] sm:$0xff] }
 0x30f   :  { %v9732_v32 = vld [vmem:[%s18021_s0 + $0x152] sm:$0xff] }
 0x310   :  { %v2239_v42 = vpop.permute.xlu0 %2238  ;;  %v2241_v43 = vpop.permute.xlu1 %2240  ;;  %10347 = vmatprep.subr.bf16.mxu0 %v10346_v34 }
 0x311   :  { %2417 = vst.msk [vmem:[#allocation2 + $0x70] sm:$0xff] %vm2402_vm6, %v2239_v42  ;;  %2418 = vst.msk [vmem:[#allocation2 + $0x78] sm:$0xff] %vm2402_vm6, %v2241_v43  ;;  %10349 = vmatpush3.bf16.msra.mxu0 %v10346_v34  ;;  %v3308_v42 = vld [vmem:[%s18022_s1 + $0x38] sm:$0xff] }
 0x312   :  { %2611 = vrot.lane.b32.xlu0 %v9652_v40, %s10389_s21  ;;  %2613 = vrot.lane.b32.xlu1 %v9653_v41, %s10389_s21  ;;  %v3307_v41 = vld [vmem:[%s18022_s1 + $0x30] sm:$0xff] }
 0x313   :  { %v10350_v43 = vpack.c.bf16 %v3308_v42, %v3307_v41  ;;  %v9735_v41 = vld [vmem:[%s18021_s0 + $0x172] sm:$0xff]  ;;  %v9736_v42 = vld [vmem:[%s18021_s0 + $0x182] sm:$0xff] }
 0x314   :  { %v2243_v48 = vpop.permute.xlu0 %2242  ;;  %v2245_v49 = vpop.permute.xlu1 %2244 }
 0x315   :  { %2419 = vst.msk [vmem:[#allocation2 + $0x80] sm:$0xff] %vm2402_vm6, %v2243_v48  ;;  %2420 = vst.msk [vmem:[#allocation2 + $0x88] sm:$0xff] %vm2402_vm6, %v2245_v49  ;;  %10351 = vmatprep.subr.bf16.mxu0 %v10350_v43 }
 0x316   :  { %2615 = vrot.lane.b32.xlu0 %v9654_v46, %s10389_s21  ;;  %2617 = vrot.lane.b32.xlu1 %v9655_v47, %s10389_s21  ;;  %v9680_v46 = vld [vmem:[%s18021_s0 + $0x211] sm:$0xff]  ;;  %v9681_v47 = vld [vmem:[%s18021_s0 + $0x219] sm:$0xff] }
 0x317   :  { %10353 = vmatpush3.bf16.msra.mxu0 %v10350_v43 }
 0x318   :  { %v2247_v56 = vpop.permute.xlu0 %2246  ;;  %v2249_v57 = vpop.permute.xlu1 %2248 }
 0x319   :  { %2421 = vst.msk [vmem:[#allocation2 + $0x90] sm:$0xff] %vm2402_vm6, %v2247_v56  ;;  %2422 = vst.msk [vmem:[#allocation2 + $0x98] sm:$0xff] %vm2402_vm6, %v2249_v57  ;;  %v9708_v56 = vld [vmem:[%s18021_s0 + $0x32] sm:$0xff] }
 0x31a   :  { %2619 = vrot.lane.b32.xlu0 %v9656_v52, %s10389_s21  ;;  %2621 = vrot.lane.b32.xlu1 %v9657_v53, %s10389_s21  ;;  %v3309_v52 = vld [vmem:[%s18022_s1 + $0x40] sm:$0xff]  ;;  %v9682_v53 = vld [vmem:[%s18021_s0 + $0x229] sm:$0xff] }
 0x31b   :  { %10126 = vmatprep.subr.mxu0 %v3309_v52 }
 0x31c   :  { %v2251_v10 = vpop.permute.xlu0 %2250  ;;  %v2253_v55 = vpop.permute.xlu1 %2252  ;;  %10127 = vmatpush3.msra.mxu0 %v3309_v52 }
 0x31d   :  { %2423 = vst.msk [vmem:[#allocation2 + $0xa0] sm:$0xff] %vm2402_vm6, %v2251_v10  ;;  %2424 = vst.msk [vmem:[#allocation2 + $0xa8] sm:$0xff] %vm2402_vm6, %v2253_v55  ;;  %v9710_v10 = vld [vmem:[%s18021_s0 + $0x4a] sm:$0xff] }
 0x31e   :  { %2623 = vrot.lane.b32.xlu0 %v9658_v2, %s10389_s21  ;;  %2625 = vrot.lane.b32.xlu1 %v9659_v3, %s10389_s21  ;;  %v9709_v3 = vld [vmem:[%s18021_s0 + $0x3a] sm:$0xff] }
 0x320   :  { %v2255_v4 = vpop.permute.xlu0 %2254  ;;  %v2257_v5 = vpop.permute.xlu1 %2256 }
 0x321   :  { %2425 = vst.msk [vmem:[#allocation2 + $0xb0] sm:$0xff] %vm2402_vm6, %v2255_v4  ;;  %2426 = vst.msk [vmem:[#allocation2 + $0xb8] sm:$0xff] %vm2402_vm6, %v2257_v5  ;;  %v9712_v4 = vld [vmem:[%s18021_s0 + $0x62] sm:$0xff] }
 0x322   :  { %2627 = vrot.lane.b32.xlu0 %v9660_v0, %s10389_s21  ;;  %2629 = vrot.lane.b32.xlu1 %v9661_v1, %s10389_s21  ;;  %v9711_v1 = vld [vmem:[%s18021_s0 + $0x52] sm:$0xff] }
 0x324   :  { %v2259_v12 = vpop.permute.xlu0 %2258  ;;  %v2261_v14 = vpop.permute.xlu1 %2260 }
 0x325   :  { %2427 = vst.msk [vmem:[#allocation2 + $0xc0] sm:$0xff] %vm2402_vm6, %v2259_v12  ;;  %2428 = vst.msk [vmem:[#allocation2 + $0xc8] sm:$0xff] %vm2402_vm6, %v2261_v14  ;;  %v9714_v12 = vld [vmem:[%s18021_s0 + $0x7a] sm:$0xff] }
 0x326   :  { %2631 = vrot.lane.b32.xlu0 %v9662_v8, %s10389_s21  ;;  %2633 = vrot.lane.b32.xlu1 %v9663_v9, %s10389_s21  ;;  %v9713_v9 = vld [vmem:[%s18021_s0 + $0x6a] sm:$0xff] }
 0x328   :  { %v2263_v35 = vpop.permute.xlu0 %2262  ;;  %v2265_v37 = vpop.permute.xlu1 %2264 }
 0x329   :  { %2429 = vst.msk [vmem:[#allocation2 + $0xd0] sm:$0xff] %vm2402_vm6, %v2263_v35  ;;  %2430 = vst.msk [vmem:[#allocation2 + $0xd8] sm:$0xff] %vm2402_vm6, %v2265_v37  ;;  %v9716_v35 = vld [vmem:[%s18021_s0 + $0x92] sm:$0xff] }
 0x32a   :  { %2635 = vrot.lane.b32.xlu0 %v9664_v21, %s10389_s21  ;;  %2637 = vrot.lane.b32.xlu1 %v9665_v22, %s10389_s21  ;;  %v9715_v22 = vld [vmem:[%s18021_s0 + $0x82] sm:$0xff] }
 0x32c   :  { %v2267_v58 = vpop.permute.xlu0 %2266  ;;  %v2269_v59 = vpop.permute.xlu1 %2268 }
 0x32d   :  { %2431 = vst.msk [vmem:[#allocation2 + $0xe0] sm:$0xff] %vm2402_vm6, %v2267_v58  ;;  %2432 = vst.msk [vmem:[#allocation2 + $0xe8] sm:$0xff] %vm2402_vm6, %v2269_v59  ;;  %v9718_v58 = vld [vmem:[%s18021_s0 + $0xaa] sm:$0xff] }
 0x32e   :  { %2639 = vrot.lane.b32.xlu0 %v9666_v50, %s10389_s21  ;;  %2641 = vrot.lane.b32.xlu1 %v9667_v51, %s10389_s21  ;;  %v9717_v51 = vld [vmem:[%s18021_s0 + $0x9a] sm:$0xff] }
 0x330   :  { %v2271_v6 = vpop.permute.xlu0 %2270  ;;  %v2273_v7 = vpop.permute.xlu1 %2272 }
 0x331   :  { %2433 = vst.msk [vmem:[#allocation2 + $0xf0] sm:$0xff] %vm2402_vm6, %v2271_v6  ;;  %2434 = vst.msk [vmem:[#allocation2 + $0xf8] sm:$0xff] %vm2402_vm6, %v2273_v7  ;;  %v9720_v6 = vld [vmem:[%s18021_s0 + $0xc2] sm:$0xff] }
 0x332   :  { %2643 = vrot.lane.b32.xlu0 %v9668_v62, %s10389_s21  ;;  %2645 = vrot.lane.b32.xlu1 %v9669_v63, %s10389_s21  ;;  %v9719_v63 = vld [vmem:[%s18021_s0 + $0xb2] sm:$0xff] }
 0x334   :  { %v2275_v44 = vpop.permute.xlu0 %2274  ;;  %v2277_v45 = vpop.permute.xlu1 %2276 }
 0x335   :  { %2435 = vst.msk [vmem:[#allocation2 + $0x100] sm:$0xff] %vm2402_vm6, %v2275_v44  ;;  %2436 = vst.msk [vmem:[#allocation2 + $0x108] sm:$0xff] %vm2402_vm6, %v2277_v45  ;;  %v9722_v44 = vld [vmem:[%s18021_s0 + $0xda] sm:$0xff] }
 0x336   :  { %2647 = vrot.lane.b32.xlu0 %v9670_v15, %s10389_s21  ;;  %2649 = vrot.lane.b32.xlu1 %v9671_v16, %s10389_s21  ;;  %v9721_v16 = vld [vmem:[%s18021_s0 + $0xca] sm:$0xff] }
 0x338   :  { %v2279_v60 = vpop.permute.xlu0 %2278  ;;  %v2281_v61 = vpop.permute.xlu1 %2280 }
 0x339   :  { %2437 = vst.msk [vmem:[#allocation2 + $0x110] sm:$0xff] %vm2402_vm6, %v2279_v60  ;;  %2438 = vst.msk [vmem:[#allocation2 + $0x118] sm:$0xff] %vm2402_vm6, %v2281_v61  ;;  %v9724_v60 = vld [vmem:[%s18021_s0 + $0xf2] sm:$0xff] }
 0x33a   :  { %2651 = vrot.lane.b32.xlu0 %v9672_v28, %s10389_s21  ;;  %2653 = vrot.lane.b32.xlu1 %v9673_v29, %s10389_s21  ;;  %v9723_v29 = vld [vmem:[%s18021_s0 + $0xe2] sm:$0xff] }
 0x33c   :  { %v2283_v19 = vpop.permute.xlu0 %2282  ;;  %v2285_v20 = vpop.permute.xlu1 %2284 }
 0x33d   :  { %2439 = vst.msk [vmem:[#allocation2 + $0x120] sm:$0xff] %vm2402_vm6, %v2283_v19  ;;  %2440 = vst.msk [vmem:[#allocation2 + $0x128] sm:$0xff] %vm2402_vm6, %v2285_v20  ;;  %v9727_v19 = vld [vmem:[%s18021_s0 + $0x112] sm:$0xff]  ;;  %v9728_v20 = vld [vmem:[%s18021_s0 + $0x122] sm:$0xff] }
 0x33e   :  { %2655 = vrot.lane.b32.xlu0 %v9674_v17, %s10389_s21  ;;  %2657 = vrot.lane.b32.xlu1 %v9675_v18, %s10389_s21 }
 0x340   :  { %v2287_v30 = vpop.permute.xlu0 %2286  ;;  %v2289_v31 = vpop.permute.xlu1 %2288 }
 0x341   :  { %2441 = vst.msk [vmem:[#allocation2 + $0x130] sm:$0xff] %vm2402_vm6, %v2287_v30  ;;  %2442 = vst.msk [vmem:[#allocation2 + $0x138] sm:$0xff] %vm2402_vm6, %v2289_v31  ;;  %v9731_v31 = vld [vmem:[%s18021_s0 + $0x142] sm:$0xff] }
 0x342   :  { %2659 = vrot.lane.b32.xlu0 %v9676_v26, %s10389_s21  ;;  %2661 = vrot.lane.b32.xlu1 %v9677_v27, %s10389_s21  ;;  %v9730_v26 = vld [vmem:[%s18021_s0 + $0x13a] sm:$0xff] }
 0x344   :  { %v2291_v39 = vpop.permute.xlu0 %2290  ;;  %v2293_v40 = vpop.permute.xlu1 %2292 }
 0x345   :  { %2443 = vst.msk [vmem:[#allocation2 + $0x140] sm:$0xff] %vm2402_vm6, %v2291_v39  ;;  %2444 = vst.msk [vmem:[#allocation2 + $0x148] sm:$0xff] %vm2402_vm6, %v2293_v40 }
 0x346   :  { %2663 = vrot.lane.b32.xlu0 %v9678_v36, %s10389_s21  ;;  %2665 = vrot.lane.b32.xlu1 %v9679_v38, %s10389_s21  ;;  %v9733_v36 = vld [vmem:[%s18021_s0 + $0x15a] sm:$0xff]  ;;  %v9734_v38 = vld [vmem:[%s18021_s0 + $0x16a] sm:$0xff] }
 0x348   :  { %v2295_v48 = vpop.permute.xlu0 %2294  ;;  %v2297_v49 = vpop.permute.xlu1 %2296 }
 0x349   :  { %2445 = vst.msk [vmem:[#allocation2 + $0x150] sm:$0xff] %vm2402_vm6, %v2295_v48  ;;  %2446 = vst.msk [vmem:[#allocation2 + $0x158] sm:$0xff] %vm2402_vm6, %v2297_v49  ;;  %v9738_v48 = vld [vmem:[%s18021_s0 + $0x19a] sm:$0xff] }
 0x34a   :  { %2667 = vrot.lane.b32.xlu0 %v9680_v46, %s10389_s21  ;;  %2669 = vrot.lane.b32.xlu1 %v9681_v47, %s10389_s21  ;;  %v9737_v47 = vld [vmem:[%s18021_s0 + $0x18a] sm:$0xff] }
 0x34c   :  { %v2299_v57 = vpop.permute.xlu0 %2298  ;;  %v2301_v2 = vpop.permute.xlu1 %2300 }
 0x34d   :  { %2447 = vst.msk [vmem:[#allocation2 + $0x160] sm:$0xff] %vm2402_vm6, %v2299_v57  ;;  %2448 = vst.msk [vmem:[#allocation2 + $0x168] sm:$0xff] %vm2402_vm6, %v2301_v2 }
 0x34e   :  { %2671 = vrot.lane.b32.xlu0 %v9682_v53, %s10389_s21  ;;  %2980 = vrot.lane.b32.xlu1 %v9708_v56, %s10390_s17  ;;  %v9739_v53 = vld [vmem:[%s18021_s0 + $0x1a2] sm:$0xff] }
 0x34f   :  { %v9740_v56 = vld [vmem:[%s18021_s0 + $0x1e2] sm:$0xff] }
 0x350   :  { %v2303_v55 = vpop.permute.xlu0 %2302  ;;  %v2305_v0 = vpop.permute.xlu1 %2304 }
 0x351   :  { %2449 = vst.msk [vmem:[#allocation2 + $0x170] sm:$0xff] %vm2402_vm6, %v2303_v55  ;;  %2450 = vst.msk [vmem:[#allocation2 + $0x178] sm:$0xff] %vm2402_vm6, %v2305_v0 }
 0x352   :  { %2982 = vrot.lane.b32.xlu0 %v9709_v3, %s10390_s17  ;;  %2984 = vrot.lane.b32.xlu1 %v9710_v10, %s10390_s17  ;;  %v9741_v3 = vld [vmem:[%s18021_s0 + $0x1ea] sm:$0xff]  ;;  %v9742_v10 = vld [vmem:[%s18021_s0 + $0x1fa] sm:$0xff] }
 0x354   :  { %v2307_v5 = vpop.permute.xlu0 %2306  ;;  %v2309_v8 = vpop.permute.xlu1 %2308 }
 0x355   :  { %2451 = vst.msk [vmem:[#allocation2 + $0x180] sm:$0xff] %vm2402_vm6, %v2307_v5  ;;  %2452 = vst.msk [vmem:[#allocation2 + $0x188] sm:$0xff] %vm2402_vm6, %v2309_v8 }
 0x356   :  { %2986 = vrot.lane.b32.xlu0 %v9711_v1, %s10390_s17  ;;  %2988 = vrot.lane.b32.xlu1 %v9712_v4, %s10390_s17  ;;  %v9743_v1 = vld [vmem:[%s18021_s0 + $0x202] sm:$0xff]  ;;  %v9744_v4 = vld [vmem:[%s18021_s0 + $0x212] sm:$0xff] }
 0x358   :  { %v2311_v14 = vpop.permute.xlu0 %2310  ;;  %v2313_v21 = vpop.permute.xlu1 %2312 }
 0x359   :  { %2453 = vst.msk [vmem:[#allocation2 + $0x190] sm:$0xff] %vm2402_vm6, %v2311_v14  ;;  %2454 = vst.msk [vmem:[#allocation2 + $0x198] sm:$0xff] %vm2402_vm6, %v2313_v21 }
 0x35a   :  { %2990 = vrot.lane.b32.xlu0 %v9713_v9, %s10390_s17  ;;  %2992 = vrot.lane.b32.xlu1 %v9714_v12, %s10390_s17  ;;  %v9745_v9 = vld [vmem:[%s18021_s0 + $0x21a] sm:$0xff]  ;;  %v9683_v12 = vld [vmem:[%s18021_s0 + $0x231] sm:$0xff] }
 0x35c   :  { %v2315_v37 = vpop.permute.xlu0 %2314  ;;  %v2317_v50 = vpop.permute.xlu1 %2316 }
 0x35d   :  { %2455 = vst.msk [vmem:[#allocation2 + $0x1a0] sm:$0xff] %vm2402_vm6, %v2315_v37  ;;  %2456 = vst.msk [vmem:[#allocation2 + $0x1a8] sm:$0xff] %vm2402_vm6, %v2317_v50 }
 0x35e   :  { %2994 = vrot.lane.b32.xlu0 %v9715_v22, %s10390_s17  ;;  %2996 = vrot.lane.b32.xlu1 %v9716_v35, %s10390_s17  ;;  %v9746_v22 = vld [vmem:[%s18021_s0 + $0x22a] sm:$0xff]  ;;  %v9747_v35 = vld [vmem:[%s18021_s0 + $0x232] sm:$0xff] }
 0x360   :  { %v2319_v59 = vpop.permute.xlu0 %2318  ;;  %v2321_v62 = vpop.permute.xlu1 %2320 }
 0x361   :  { %2457 = vst.msk [vmem:[#allocation2 + $0x1b0] sm:$0xff] %vm2402_vm6, %v2319_v59  ;;  %2458 = vst.msk [vmem:[#allocation2 + $0x1b8] sm:$0xff] %vm2402_vm6, %v2321_v62 }
 0x362   :  { %2998 = vrot.lane.b32.xlu0 %v9717_v51, %s10390_s17  ;;  %3000 = vrot.lane.b32.xlu1 %v9718_v58, %s10390_s17  ;;  %v9684_v51 = vld [vmem:[%s18021_s0 + $0x241] sm:$0xff]  ;;  %v9685_v58 = vld [vmem:[%s18021_s0 + $0x249] sm:$0xff] }
 0x364   :  { %v2323_v7 = vpop.permute.xlu0 %2322  ;;  %v2325_v15 = vpop.permute.xlu1 %2324 }
 0x365   :  { %2459 = vst.msk [vmem:[#allocation2 + $0x1c0] sm:$0xff] %vm2402_vm6, %v2323_v7  ;;  %2460 = vst.msk [vmem:[#allocation2 + $0x1c8] sm:$0xff] %vm2402_vm6, %v2325_v15 }
 0x366   :  { %3002 = vrot.lane.b32.xlu0 %v9719_v63, %s10390_s17  ;;  %3004 = vrot.lane.b32.xlu1 %v9720_v6, %s10390_s17  ;;  %v9748_v63 = vld [vmem:[%s18021_s0 + $0x242] sm:$0xff]  ;;  %v9749_v6 = vld [vmem:[%s18021_s0 + $0x24a] sm:$0xff] }
 0x368   :  { %v2327_v45 = vpop.permute.xlu0 %2326  ;;  %v2329_v28 = vpop.permute.xlu1 %2328 }
 0x369   :  { %2461 = vst.msk [vmem:[#allocation2 + $0x1d0] sm:$0xff] %vm2402_vm6, %v2327_v45  ;;  %2462 = vst.msk [vmem:[#allocation2 + $0x1d8] sm:$0xff] %vm2402_vm6, %v2329_v28 }
 0x36a   :  { %3006 = vrot.lane.b32.xlu0 %v9721_v16, %s10390_s17  ;;  %3008 = vrot.lane.b32.xlu1 %v9722_v44, %s10390_s17  ;;  %v9686_v16 = vld [vmem:[%s18021_s0 + $0x259] sm:$0xff]  ;;  %v9687_v44 = vld [vmem:[%s18021_s0 + $0x261] sm:$0xff] }
 0x36c   :  { %v2331_v61 = vpop.permute.xlu0 %2330  ;;  %v2333_v11 = vpop.permute.xlu1 %2332 }
 0x36d   :  { %2463 = vst.msk [vmem:[#allocation2 + $0x1e0] sm:$0xff] %vm2402_vm6, %v2331_v61  ;;  %2464 = vst.msk [vmem:[#allocation2 + $0x1e8] sm:$0xff] %vm2402_vm6, %v2333_v11 }
 0x36e   :  { %3010 = vrot.lane.b32.xlu0 %v9723_v29, %s10390_s17  ;;  %3012 = vrot.lane.b32.xlu1 %v9724_v60, %s10390_s17  ;;  %v9750_v29 = vld [vmem:[%s18021_s0 + $0x25a] sm:$0xff]  ;;  %v9751_v60 = vld [vmem:[%s18021_s0 + $0x262] sm:$0xff] }
 0x370   :  { %v2335_v17 = vpop.permute.xlu0 %2334  ;;  %v2337_v18 = vpop.permute.xlu1 %2336 }
 0x371   :  { %2465 = vst.msk [vmem:[#allocation2 + $0x1f0] sm:$0xff] %vm2402_vm6, %v2335_v17  ;;  %2466 = vst.msk [vmem:[#allocation2 + $0x1f8] sm:$0xff] %vm2402_vm6, %v2337_v18 }
 0x372   :  { %3014 = vrot.lane.b32.xlu0 %v9725_v54, %s10390_s17  ;;  %3016 = vrot.lane.b32.xlu1 %v9726_v13, %s10390_s17  ;;  %v9688_v54 = vld [vmem:[%s18021_s0 + $0x271] sm:$0xff]  ;;  %v9689_v13 = vld [vmem:[%s18021_s0 + $0x279] sm:$0xff] }
 0x374   :  { %v2596_v23 = vpop.permute.xlu0 %2595  ;;  %v2598_v24 = vpop.permute.xlu1 %2597 }
 0x375   :  { %2788 = vst.msk [vmem:[#allocation2] sm:$0xff] %vm2787_vm7, %v2596_v23  ;;  %2789 = vst.msk [vmem:[#allocation2 + $0x8] sm:$0xff] %vm2787_vm7, %v2598_v24 }
 0x376   :  { %3018 = vrot.lane.b32.xlu0 %v9727_v19, %s10390_s17  ;;  %3020 = vrot.lane.b32.xlu1 %v9728_v20, %s10390_s17  ;;  %v9752_v19 = vld [vmem:[%s18021_s0 + $0x272] sm:$0xff]  ;;  %v9753_v20 = vld [vmem:[%s18021_s0 + $0x27a] sm:$0xff] }
 0x378   :  { %v2600_v27 = vpop.permute.xlu0 %2599  ;;  %v2602_v30 = vpop.permute.xlu1 %2601 }
 0x379   :  { %2790 = vst.msk [vmem:[#allocation2 + $0x10] sm:$0xff] %vm2787_vm7, %v2600_v27  ;;  %2791 = vst.msk [vmem:[#allocation2 + $0x18] sm:$0xff] %vm2787_vm7, %v2602_v30 }
 0x37a   :  { %3022 = vrot.lane.b32.xlu0 %v9729_v25, %s10390_s17  ;;  %3024 = vrot.lane.b32.xlu1 %v9730_v26, %s10390_s17  ;;  %v9690_v25 = vld [vmem:[%s18021_s0 + $0x289] sm:$0xff]  ;;  %v9691_v26 = vld [vmem:[%s18021_s0 + $0x291] sm:$0xff] }
 0x37c   :  { %v2604_v33 = vpop.permute.xlu0 %2603  ;;  %v2606_v34 = vpop.permute.xlu1 %2605 }
 0x37d   :  { %2792 = vst.msk [vmem:[#allocation2 + $0x20] sm:$0xff] %vm2787_vm7, %v2604_v33  ;;  %2793 = vst.msk [vmem:[#allocation2 + $0x28] sm:$0xff] %vm2787_vm7, %v2606_v34 }
 0x37e   :  { %3026 = vrot.lane.b32.xlu0 %v9731_v31, %s10390_s17  ;;  %3028 = vrot.lane.b32.xlu1 %v9732_v32, %s10390_s17  ;;  %v9754_v31 = vld [vmem:[%s18021_s0 + $0x28a] sm:$0xff]  ;;  %v9755_v32 = vld [vmem:[%s18021_s0 + $0x292] sm:$0xff] }
 0x380   :  { %v2608_v39 = vpop.permute.xlu0 %2607  ;;  %v2610_v40 = vpop.permute.xlu1 %2609 }
 0x381   :  { %2794 = vst.msk [vmem:[#allocation2 + $0x30] sm:$0xff] %vm2787_vm7, %v2608_v39  ;;  %2795 = vst.msk [vmem:[#allocation2 + $0x38] sm:$0xff] %vm2787_vm7, %v2610_v40 }
 0x382   :  { %3030 = vrot.lane.b32.xlu0 %v9733_v36, %s10390_s17  ;;  %3032 = vrot.lane.b32.xlu1 %v9734_v38, %s10390_s17  ;;  %v9692_v36 = vld [vmem:[%s18021_s0 + $0x2a1] sm:$0xff]  ;;  %v9693_v38 = vld [vmem:[%s18021_s0 + $0x2a9] sm:$0xff] }
 0x384   :  { %v2612_v43 = vpop.permute.xlu0 %2611  ;;  %v2614_v46 = vpop.permute.xlu1 %2613 }
 0x385   :  { %2796 = vst.msk [vmem:[#allocation2 + $0x40] sm:$0xff] %vm2787_vm7, %v2612_v43  ;;  %2797 = vst.msk [vmem:[#allocation2 + $0x48] sm:$0xff] %vm2787_vm7, %v2614_v46 }
 0x386   :  { %3034 = vrot.lane.b32.xlu0 %v9735_v41, %s10390_s17  ;;  %3036 = vrot.lane.b32.xlu1 %v9736_v42, %s10390_s17  ;;  %v9756_v41 = vld [vmem:[%s18021_s0 + $0x2a2] sm:$0xff]  ;;  %v9757_v42 = vld [vmem:[%s18021_s0 + $0x2aa] sm:$0xff] }
 0x388   :  { %v2616_v49 = vpop.permute.xlu0 %2615  ;;  %v2618_v52 = vpop.permute.xlu1 %2617 }
 0x389   :  { %2798 = vst.msk [vmem:[#allocation2 + $0x50] sm:$0xff] %vm2787_vm7, %v2616_v49  ;;  %2799 = vst.msk [vmem:[#allocation2 + $0x58] sm:$0xff] %vm2787_vm7, %v2618_v52 }
 0x38a   :  { %3038 = vrot.lane.b32.xlu0 %v9737_v47, %s10390_s17  ;;  %3040 = vrot.lane.b32.xlu1 %v9738_v48, %s10390_s17  ;;  %v9694_v47 = vld [vmem:[%s18021_s0 + $0x2b9] sm:$0xff]  ;;  %v9695_v48 = vld [vmem:[%s18021_s0 + $0x2c1] sm:$0xff] }
 0x38c   :  { %v2620_v57 = vpop.permute.xlu0 %2619  ;;  %v2622_v2 = vpop.permute.xlu1 %2621 }
 0x38d   :  { %2800 = vst.msk [vmem:[#allocation2 + $0x60] sm:$0xff] %vm2787_vm7, %v2620_v57  ;;  %2801 = vst.msk [vmem:[#allocation2 + $0x68] sm:$0xff] %vm2787_vm7, %v2622_v2 }
 0x38e   :  { %3042 = vrot.lane.b32.xlu0 %v9739_v53, %s10390_s17  ;;  %3044 = vrot.lane.b32.xlu1 %v9740_v56, %s10390_s17  ;;  %v9758_v56 = vld [vmem:[%s18021_s0 + $0x2ba] sm:$0xff] }
 0x390   :  { %v2624_v55 = vpop.permute.xlu0 %2623  ;;  %v2626_v0 = vpop.permute.xlu1 %2625 }
 0x391   :  { %2802 = vst.msk [vmem:[#allocation2 + $0x70] sm:$0xff] %vm2787_vm7, %v2624_v55  ;;  %2803 = vst.msk [vmem:[#allocation2 + $0x78] sm:$0xff] %vm2787_vm7, %v2626_v0  ;;  %v9759_v55 = vld [vmem:[%s18021_s0 + $0x2c2] sm:$0xff]  ;;  %v9696_v0 = vld [vmem:[%s18021_s0 + $0x2d1] sm:$0xff] }
 0x392   :  { %3046 = vrot.lane.b32.xlu0 %v9741_v3, %s10390_s17  ;;  %3048 = vrot.lane.b32.xlu1 %v9742_v10, %s10390_s17 }
 0x394   :  { %v2628_v5 = vpop.permute.xlu0 %2627  ;;  %v2630_v8 = vpop.permute.xlu1 %2629 }
 0x395   :  { %2804 = vst.msk [vmem:[#allocation2 + $0x80] sm:$0xff] %vm2787_vm7, %v2628_v5  ;;  %2805 = vst.msk [vmem:[#allocation2 + $0x88] sm:$0xff] %vm2787_vm7, %v2630_v8 }
 0x396   :  { %3050 = vrot.lane.b32.xlu0 %v9743_v1, %s10390_s17  ;;  %3052 = vrot.lane.b32.xlu1 %v9744_v4, %s10390_s17 }
 0x398   :  { %v2632_v14 = vpop.permute.xlu0 %2631  ;;  %v2634_v21 = vpop.permute.xlu1 %2633 }
 0x399   :  { %2806 = vst.msk [vmem:[#allocation2 + $0x90] sm:$0xff] %vm2787_vm7, %v2632_v14  ;;  %2807 = vst.msk [vmem:[#allocation2 + $0x98] sm:$0xff] %vm2787_vm7, %v2634_v21 }
 0x39a   :  { %3054 = vrot.lane.b32.xlu0 %v9745_v9, %s10390_s17  ;;  %2673 = vrot.lane.b32.xlu1 %v9683_v12, %s10389_s21  ;;  %v9697_v9 = vld [vmem:[%s18021_s0 + $0x2d9] sm:$0xff] }
 0x39b   :  { %v9760_v12 = vld [vmem:[%s18021_s0 + $0x2d2] sm:$0xff] }
 0x39c   :  { %v2636_v37 = vpop.permute.xlu0 %2635  ;;  %v2638_v50 = vpop.permute.xlu1 %2637 }
 0x39d   :  { %2808 = vst.msk [vmem:[#allocation2 + $0xa0] sm:$0xff] %vm2787_vm7, %v2636_v37  ;;  %2809 = vst.msk [vmem:[#allocation2 + $0xa8] sm:$0xff] %vm2787_vm7, %v2638_v50  ;;  %v9761_v37 = vld [vmem:[%s18021_s0 + $0x2da] sm:$0xff]  ;;  %v9698_v50 = vld [vmem:[%s18021_s0 + $0x2e9] sm:$0xff] }
 0x39e   :  { %3056 = vrot.lane.b32.xlu0 %v9746_v22, %s10390_s17  ;;  %3058 = vrot.lane.b32.xlu1 %v9747_v35, %s10390_s17 }
 0x3a0   :  { %v2640_v59 = vpop.permute.xlu0 %2639  ;;  %v2642_v62 = vpop.permute.xlu1 %2641 }
 0x3a1   :  { %2810 = vst.msk [vmem:[#allocation2 + $0xb0] sm:$0xff] %vm2787_vm7, %v2640_v59  ;;  %2811 = vst.msk [vmem:[#allocation2 + $0xb8] sm:$0xff] %vm2787_vm7, %v2642_v62 }
 0x3a2   :  { %2675 = vrot.lane.b32.xlu0 %v9684_v51, %s10389_s21  ;;  %2677 = vrot.lane.b32.xlu1 %v9685_v58, %s10389_s21 }
 0x3a4   :  { %v2644_v7 = vpop.permute.xlu0 %2643  ;;  %v2646_v15 = vpop.permute.xlu1 %2645 }
 0x3a5   :  { %2812 = vst.msk [vmem:[#allocation2 + $0xc0] sm:$0xff] %vm2787_vm7, %v2644_v7  ;;  %2813 = vst.msk [vmem:[#allocation2 + $0xc8] sm:$0xff] %vm2787_vm7, %v2646_v15 }
 0x3a6   :  { %3060 = vrot.lane.b32.xlu0 %v9748_v63, %s10390_s17  ;;  %3062 = vrot.lane.b32.xlu1 %v9749_v6, %s10390_s17  ;;  %v9699_v63 = vld [vmem:[%s18021_s0 + $0x2f1] sm:$0xff] }
 0x3a7   :  { %v9762_v6 = vld [vmem:[%s18021_s0 + $0x2ea] sm:$0xff] }
 0x3a8   :  { %v2648_v45 = vpop.permute.xlu0 %2647  ;;  %v2650_v28 = vpop.permute.xlu1 %2649 }
 0x3a9   :  { %2814 = vst.msk [vmem:[#allocation2 + $0xd0] sm:$0xff] %vm2787_vm7, %v2648_v45  ;;  %2815 = vst.msk [vmem:[#allocation2 + $0xd8] sm:$0xff] %vm2787_vm7, %v2650_v28  ;;  %v9763_v45 = vld [vmem:[%s18021_s0 + $0x2f2] sm:$0xff]  ;;  %v9700_v28 = vld [vmem:[%s18021_s0 + $0x301] sm:$0xff] }
 0x3aa   :  { %2679 = vrot.lane.b32.xlu0 %v9686_v16, %s10389_s21  ;;  %2681 = vrot.lane.b32.xlu1 %v9687_v44, %s10389_s21 }
 0x3ac   :  { %v2652_v61 = vpop.permute.xlu0 %2651  ;;  %v2654_v11 = vpop.permute.xlu1 %2653 }
 0x3ad   :  { %2816 = vst.msk [vmem:[#allocation2 + $0xe0] sm:$0xff] %vm2787_vm7, %v2652_v61  ;;  %2817 = vst.msk [vmem:[#allocation2 + $0xe8] sm:$0xff] %vm2787_vm7, %v2654_v11 }
 0x3ae   :  { %3064 = vrot.lane.b32.xlu0 %v9750_v29, %s10390_s17  ;;  %3066 = vrot.lane.b32.xlu1 %v9751_v60, %s10390_s17 }
 0x3b0   :  { %v2656_v17 = vpop.permute.xlu0 %2655  ;;  %v2658_v18 = vpop.permute.xlu1 %2657 }
 0x3b1   :  { %2818 = vst.msk [vmem:[#allocation2 + $0xf0] sm:$0xff] %vm2787_vm7, %v2656_v17  ;;  %2819 = vst.msk [vmem:[#allocation2 + $0xf8] sm:$0xff] %vm2787_vm7, %v2658_v18 }
 0x3b2   :  { %2683 = vrot.lane.b32.xlu0 %v9688_v54, %s10389_s21  ;;  %2685 = vrot.lane.b32.xlu1 %v9689_v13, %s10389_s21  ;;  %v9701_v54 = vld [vmem:[%s18021_s0 + $0x309] sm:$0xff] }
 0x3b3   :  { %v9764_v13 = vld [vmem:[%s18021_s0 + $0x302] sm:$0xff] }
 0x3b4   :  { %v2660_v23 = vpop.permute.xlu0 %2659  ;;  %v2662_v24 = vpop.permute.xlu1 %2661 }
 0x3b5   :  { %2820 = vst.msk [vmem:[#allocation2 + $0x100] sm:$0xff] %vm2787_vm7, %v2660_v23  ;;  %2821 = vst.msk [vmem:[#allocation2 + $0x108] sm:$0xff] %vm2787_vm7, %v2662_v24  ;;  %v9765_v23 = vld [vmem:[%s18021_s0 + $0x30a] sm:$0xff]  ;;  %v9702_v24 = vld [vmem:[%s18021_s0 + $0x319] sm:$0xff] }
 0x3b6   :  { %3068 = vrot.lane.b32.xlu0 %v9752_v19, %s10390_s17  ;;  %3070 = vrot.lane.b32.xlu1 %v9753_v20, %s10390_s17 }
 0x3b8   :  { %v2664_v27 = vpop.permute.xlu0 %2663  ;;  %v2666_v30 = vpop.permute.xlu1 %2665 }
 0x3b9   :  { %2822 = vst.msk [vmem:[#allocation2 + $0x110] sm:$0xff] %vm2787_vm7, %v2664_v27  ;;  %2823 = vst.msk [vmem:[#allocation2 + $0x118] sm:$0xff] %vm2787_vm7, %v2666_v30 }
 0x3ba   :  { %2687 = vrot.lane.b32.xlu0 %v9690_v25, %s10389_s21  ;;  %2689 = vrot.lane.b32.xlu1 %v9691_v26, %s10389_s21 }
 0x3bc   :  { %v2668_v33 = vpop.permute.xlu0 %2667  ;;  %v2670_v34 = vpop.permute.xlu1 %2669 }
 0x3bd   :  { %2824 = vst.msk [vmem:[#allocation2 + $0x120] sm:$0xff] %vm2787_vm7, %v2668_v33  ;;  %2825 = vst.msk [vmem:[#allocation2 + $0x128] sm:$0xff] %vm2787_vm7, %v2670_v34 }
 0x3be   :  { %3072 = vrot.lane.b32.xlu0 %v9754_v31, %s10390_s17  ;;  %3074 = vrot.lane.b32.xlu1 %v9755_v32, %s10390_s17  ;;  %v9703_v31 = vld [vmem:[%s18021_s0 + $0x321] sm:$0xff] }
 0x3bf   :  { %v9766_v32 = vld [vmem:[%s18021_s0 + $0x31a] sm:$0xff] }
 0x3c0   :  { %v2672_v39 = vpop.permute.xlu0 %2671  ;;  %v2981_v40 = vpop.permute.xlu1 %2980 }
 0x3c1   :  { %2826 = vst.msk [vmem:[#allocation2 + $0x130] sm:$0xff] %vm2787_vm7, %v2672_v39  ;;  %v9767_v39 = vld [vmem:[%s18021_s0 + $0x322] sm:$0xff] }
 0x3c2   :  { %3173 = vst.msk [vmem:[#allocation2] sm:$0xff] %vm3172_vm8, %v2981_v40  ;;  %2691 = vrot.lane.b32.xlu0 %v9692_v36, %s10389_s21  ;;  %2693 = vrot.lane.b32.xlu1 %v9693_v38, %s10389_s21  ;;  %v9704_v40 = vld [vmem:[%s18021_s0 + $0x331] sm:$0xff] }
 0x3c4   :  { %v2983_v43 = vpop.permute.xlu0 %2982  ;;  %v2985_v46 = vpop.permute.xlu1 %2984 }
 0x3c5   :  { %3174 = vst.msk [vmem:[#allocation2 + $0x8] sm:$0xff] %vm3172_vm8, %v2983_v43  ;;  %3175 = vst.msk [vmem:[#allocation2 + $0x10] sm:$0xff] %vm3172_vm8, %v2985_v46 }
 0x3c6   :  { %3076 = vrot.lane.b32.xlu0 %v9756_v41, %s10390_s17  ;;  %3078 = vrot.lane.b32.xlu1 %v9757_v42, %s10390_s17 }
 0x3c8   :  { %v2987_v49 = vpop.permute.xlu0 %2986  ;;  %v2989_v52 = vpop.permute.xlu1 %2988 }
 0x3c9   :  { %v3237_v53 = vld [vmem:[#allocation2] sm:$0xff]  ;;  %3176 = vst.msk [vmem:[#allocation2 + $0x18] sm:$0xff] %vm3172_vm8, %v2987_v49  ;;  %3177 = vst.msk [vmem:[#allocation2 + $0x20] sm:$0xff] %vm3172_vm8, %v2989_v52 }
 0x3ca   :  { %10128 = vmatprep.mubr.msk.f32.mxu0 %vm3310_vm9, %v3237_v53  ;;  %2695 = vrot.lane.b32.xlu0 %v9694_v47, %s10389_s21  ;;  %v9705_v47 = vld [vmem:[%s18021_s0 + $0x339] sm:$0xff] }
 0x3cb   :  { %2697 = vrot.lane.b32.xlu1 %v9695_v48, %s10389_s21  ;;  %v9768_v48 = vld [vmem:[%s18021_s0 + $0x332] sm:$0xff] }
 0x3cc   :  { %v2991_v57 = vpop.permute.xlu0 %2990  ;;  %v2993_v2 = vpop.permute.xlu1 %2992  ;;  %v3238_v3 = vld [vmem:[#allocation2 + $0x8] sm:$0xff]  ;;  %v3239_v10 = vld [vmem:[#allocation2 + $0x10] sm:$0xff] }
 0x3cd   :  { %3178 = vst.msk [vmem:[#allocation2 + $0x28] sm:$0xff] %vm3172_vm8, %v2991_v57  ;;  %3179 = vst.msk [vmem:[#allocation2 + $0x30] sm:$0xff] %vm3172_vm8, %v2993_v2  ;;  %10129 = vmatmul.mubr.msk.f32.vlgmr.msra.gmra.mrb[0].mxu0 %vm3310_vm9, %v3238_v3  ;;  %v9769_v57 = vld [vmem:[%s18021_s0 + $0x33a] sm:$0xff]  ;;  %v9706_v2 = vld [vmem:[%s18021_s0 + $0x349] sm:$0xff] }
 0x3ce   :  { %3080 = vrot.lane.b32.xlu0 %v9758_v56, %s10390_s17  ;;  %10131 = vmatprep.mubr.msk.f32.mxu0 %vm3310_vm9, %v3239_v10 }
 0x3cf   :  { %3082 = vrot.lane.b32.xlu1 %v9759_v55, %s10390_s17 }
 0x3d0   :  { %v2995_v1 = vpop.permute.xlu0 %2994  ;;  %v2997_v4 = vpop.permute.xlu1 %2996  ;;  %v3240_v5 = vld [vmem:[#allocation2 + $0x18] sm:$0xff]  ;;  %v3241_v8 = vld [vmem:[#allocation2 + $0x20] sm:$0xff] }
 0x3d1   :  { %3180 = vst.msk [vmem:[#allocation2 + $0x38] sm:$0xff] %vm3172_vm8, %v2995_v1  ;;  %3181 = vst.msk [vmem:[#allocation2 + $0x40] sm:$0xff] %vm3172_vm8, %v2997_v4  ;;  %10132 = vmatmul.mubr.msk.f32.gmra.mrb[2].mxu0 %vm3310_vm9, %v3240_v5  ;;  %v9707_v1 = vld [vmem:[%s18021_s0 + $0x351] sm:$0xff] }
 0x3d2   :  { %2699 = vrot.lane.b32.xlu0 %v9696_v0, %s10389_s21  ;;  %10134 = vmatprep.mubr.msk.f32.mxu0 %vm3310_vm9, %v3241_v8  ;;  %v9770_v4 = vld [vmem:[%s18021_s0 + $0x34a] sm:$0xff] }
 0x3d3   :  { %2701 = vrot.lane.b32.xlu1 %v9697_v9, %s10389_s21 }
 0x3d4   :  { %v2999_v14 = vpop.permute.xlu0 %2998  ;;  %v3001_v21 = vpop.permute.xlu1 %3000  ;;  %v3242_v22 = vld [vmem:[#allocation2 + $0x28] sm:$0xff]  ;;  %v3243_v35 = vld [vmem:[#allocation2 + $0x30] sm:$0xff] }
 0x3d5   :  { %3182 = vst.msk [vmem:[#allocation2 + $0x48] sm:$0xff] %vm3172_vm8, %v2999_v14  ;;  %3183 = vst.msk [vmem:[#allocation2 + $0x50] sm:$0xff] %vm3172_vm8, %v3001_v21  ;;  %10135 = vmatmul.mubr.msk.f32.gmra.mrb[4].mxu0 %vm3310_vm9, %v3242_v22  ;;  %v9771_v14 = vld [vmem:[%s18021_s0 + $0x352] sm:$0xff] }
 0x3d6   :  { %3084 = vrot.lane.b32.xlu0 %v9760_v12, %s10390_s17  ;;  %10137 = vmatprep.mubr.msk.f32.mxu0 %vm3310_vm9, %v3243_v35 }
 0x3d7   :  { %3086 = vrot.lane.b32.xlu1 %v9761_v37, %s10390_s17 }
 0x3d8   :  { %v3003_v51 = vpop.permute.xlu0 %3002  ;;  %v3005_v58 = vpop.permute.xlu1 %3004  ;;  %v3244_v59 = vld [vmem:[#allocation2 + $0x38] sm:$0xff]  ;;  %v3245_v62 = vld [vmem:[#allocation2 + $0x40] sm:$0xff] }
 0x3d9   :  { %3184 = vst.msk [vmem:[#allocation2 + $0x58] sm:$0xff] %vm3172_vm8, %v3003_v51  ;;  %3185 = vst.msk [vmem:[#allocation2 + $0x60] sm:$0xff] %vm3172_vm8, %v3005_v58  ;;  %10138 = vmatmul.mubr.msk.f32.gmra.mrb[6].mxu0 %vm3310_vm9, %v3244_v59 }
 0x3da   :  { %2703 = vrot.lane.b32.xlu0 %v9698_v50, %s10389_s21  ;;  %10140 = vmatprep.mubr.msk.f32.mxu0 %vm3310_vm9, %v3245_v62 }
 0x3db   :  { %2705 = vrot.lane.b32.xlu1 %v9699_v63, %s10389_s21 }
 0x3dc   :  { %v3007_v7 = vpop.permute.xlu0 %3006  ;;  %v3009_v15 = vpop.permute.xlu1 %3008  ;;  %v3246_v16 = vld [vmem:[#allocation2 + $0x48] sm:$0xff]  ;;  %v3247_v44 = vld [vmem:[#allocation2 + $0x50] sm:$0xff] }
 0x3dd   :  { %3186 = vst.msk [vmem:[#allocation2 + $0x68] sm:$0xff] %vm3172_vm8, %v3007_v7  ;;  %3187 = vst.msk [vmem:[#allocation2 + $0x70] sm:$0xff] %vm3172_vm8, %v3009_v15  ;;  %10141 = vmatmul.mubr.msk.f32.gmra.mrb[8].mxu0 %vm3310_vm9, %v3246_v16 }
 0x3de   :  { %3088 = vrot.lane.b32.xlu0 %v9762_v6, %s10390_s17  ;;  %10143 = vmatprep.mubr.msk.f32.mxu0 %vm3310_vm9, %v3247_v44 }
 0x3df   :  { %3090 = vrot.lane.b32.xlu1 %v9763_v45, %s10390_s17 }
 0x3e0   :  { %v3011_v29 = vpop.permute.xlu0 %3010  ;;  %v3013_v60 = vpop.permute.xlu1 %3012  ;;  %v3248_v61 = vld [vmem:[#allocation2 + $0x58] sm:$0xff]  ;;  %v3249_v11 = vld [vmem:[#allocation2 + $0x60] sm:$0xff] }
 0x3e1   :  { %3188 = vst.msk [vmem:[#allocation2 + $0x78] sm:$0xff] %vm3172_vm8, %v3011_v29  ;;  %3189 = vst.msk [vmem:[#allocation2 + $0x80] sm:$0xff] %vm3172_vm8, %v3013_v60  ;;  %10144 = vmatmul.mubr.msk.f32.gmra.mrb[10].mxu0 %vm3310_vm9, %v3248_v61 }
 0x3e2   :  { %2707 = vrot.lane.b32.xlu0 %v9700_v28, %s10389_s21  ;;  %10146 = vmatprep.mubr.msk.f32.mxu0 %vm3310_vm9, %v3249_v11 }
 0x3e3   :  { %2709 = vrot.lane.b32.xlu1 %v9701_v54, %s10389_s21 }
 0x3e4   :  { %v3015_v17 = vpop.permute.xlu0 %3014  ;;  %v3017_v18 = vpop.permute.xlu1 %3016  ;;  %v3250_v19 = vld [vmem:[#allocation2 + $0x68] sm:$0xff]  ;;  %v3251_v20 = vld [vmem:[#allocation2 + $0x70] sm:$0xff] }
 0x3e5   :  { %3190 = vst.msk [vmem:[#allocation2 + $0x88] sm:$0xff] %vm3172_vm8, %v3015_v17  ;;  %3191 = vst.msk [vmem:[#allocation2 + $0x90] sm:$0xff] %vm3172_vm8, %v3017_v18  ;;  %10147 = vmatmul.mubr.msk.f32.gmra.mrb[12].mxu0 %vm3310_vm9, %v3250_v19 }
 0x3e6   :  { %3092 = vrot.lane.b32.xlu0 %v9764_v13, %s10390_s17  ;;  %10149 = vmatprep.mubr.msk.f32.mxu0 %vm3310_vm9, %v3251_v20 }
 0x3e7   :  { %3094 = vrot.lane.b32.xlu1 %v9765_v23, %s10390_s17 }
 0x3e8   :  { %v3019_v25 = vpop.permute.xlu0 %3018  ;;  %v3021_v26 = vpop.permute.xlu1 %3020  ;;  %v3252_v27 = vld [vmem:[#allocation2 + $0x78] sm:$0xff]  ;;  %v3253_v30 = vld [vmem:[#allocation2 + $0x80] sm:$0xff] }
 0x3e9   :  { %3192 = vst.msk [vmem:[#allocation2 + $0x98] sm:$0xff] %vm3172_vm8, %v3019_v25  ;;  %3193 = vst.msk [vmem:[#allocation2 + $0xa0] sm:$0xff] %vm3172_vm8, %v3021_v26  ;;  %10150 = vmatmul.mubr.msk.f32.gmra.mrb[14].mxu0 %vm3310_vm9, %v3252_v27 }
 0x3ea   :  { %2711 = vrot.lane.b32.xlu0 %v9702_v24, %s10389_s21  ;;  %10152 = vmatprep.mubr.msk.f32.mxu0 %vm3310_vm9, %v3253_v30 }
 0x3eb   :  { %2713 = vrot.lane.b32.xlu1 %v9703_v31, %s10389_s21  ;;  %v10391_v31 = vmov 0.0  }
 0x3ec   :  { %v3023_v33 = vpop.permute.xlu0 %3022  ;;  %v3025_v34 = vpop.permute.xlu1 %3024  ;;  %v3254_v36 = vld [vmem:[#allocation2 + $0x88] sm:$0xff]  ;;  %v3255_v38 = vld [vmem:[#allocation2 + $0x90] sm:$0xff]  ;;  %4501 = vst.msk [vmem:[#allocation3 + $0x20] sm:$0xff] %vm90_vm0, %v10391_v31  ;;  %4496 = vst.msk [vmem:[#allocation3] sm:$0xff] %vm90_vm0, %v10391_v31 }
 0x3ed   :  { %3194 = vst.msk [vmem:[#allocation2 + $0xa8] sm:$0xff] %vm3172_vm8, %v3023_v33  ;;  %3195 = vst.msk [vmem:[#allocation2 + $0xb0] sm:$0xff] %vm3172_vm8, %v3025_v34  ;;  %10153 = vmatmul.mubr.msk.f32.gmra.mrb[16].mxu0 %vm3310_vm9, %v3254_v36 }
 0x3ee   :  { %3096 = vrot.lane.b32.xlu0 %v9766_v32, %s10390_s17  ;;  %10155 = vmatprep.mubr.msk.f32.mxu0 %vm3310_vm9, %v3255_v38  ;;  %4502 = vst.msk [vmem:[#allocation3 + $0x28] sm:$0x3] %vm4498_vm10, %v10391_v31  ;;  %4499 = vst.msk [vmem:[#allocation3 + $0x10] sm:$0x3] %vm4498_vm10, %v10391_v31 }
 0x3ef   :  { %3098 = vrot.lane.b32.xlu1 %v9767_v39, %s10390_s17  ;;  %4497 = vst.msk [vmem:[#allocation3 + $0x8] sm:$0xff] %vm90_vm0, %v10391_v31  ;;  %4500 = vst.msk [vmem:[#allocation3 + $0x18] sm:$0xff] %vm90_vm0, %v10391_v31 }
 0x3f0   :  { %v3027_v41 = vpop.permute.xlu0 %3026  ;;  %v3029_v42 = vpop.permute.xlu1 %3028  ;;  %v3256_v43 = vld [vmem:[#allocation2 + $0x98] sm:$0xff]  ;;  %v3257_v46 = vld [vmem:[#allocation2 + $0xa0] sm:$0xff]  ;;  %4503 = vst.msk [vmem:[#allocation3 + $0x30] sm:$0xff] %vm90_vm0, %v10391_v31  ;;  %4504 = vst.msk [vmem:[#allocation3 + $0x38] sm:$0xff] %vm90_vm0, %v10391_v31 }
 0x3f1   :  { %3196 = vst.msk [vmem:[#allocation2 + $0xb8] sm:$0xff] %vm3172_vm8, %v3027_v41  ;;  %3197 = vst.msk [vmem:[#allocation2 + $0xc0] sm:$0xff] %vm3172_vm8, %v3029_v42  ;;  %10156 = vmatmul.mubr.msk.f32.gmra.mrb[18].mxu0 %vm3310_vm9, %v3256_v43 }
 0x3f2   :  { %2715 = vrot.lane.b32.xlu0 %v9704_v40, %s10389_s21  ;;  %10158 = vmatprep.mubr.msk.f32.mxu0 %vm3310_vm9, %v3257_v46  ;;  %4505 = vst.msk [vmem:[#allocation3 + $0x40] sm:$0x3] %vm4498_vm10, %v10391_v31  ;;  %4508 = vst.msk [vmem:[#allocation3 + $0x58] sm:$0x3] %vm4498_vm10, %v10391_v31 }
 0x3f3   :  { %2717 = vrot.lane.b32.xlu1 %v9705_v47, %s10389_s21  ;;  %4506 = vst.msk [vmem:[#allocation3 + $0x48] sm:$0xff] %vm90_vm0, %v10391_v31  ;;  %4507 = vst.msk [vmem:[#allocation3 + $0x50] sm:$0xff] %vm90_vm0, %v10391_v31 }
 0x3f4   :  { %v3031_v49 = vpop.permute.xlu0 %3030  ;;  %v3033_v52 = vpop.permute.xlu1 %3032  ;;  %v3258_v53 = vld [vmem:[#allocation2 + $0xa8] sm:$0xff]  ;;  %v3259_v56 = vld [vmem:[#allocation2 + $0xb0] sm:$0xff]  ;;  %4509 = vst.msk [vmem:[#allocation3 + $0x60] sm:$0xff] %vm90_vm0, %v10391_v31  ;;  %4510 = vst.msk [vmem:[#allocation3 + $0x68] sm:$0xff] %vm90_vm0, %v10391_v31 }
 0x3f5   :  { %3198 = vst.msk [vmem:[#allocation2 + $0xc8] sm:$0xff] %vm3172_vm8, %v3031_v49  ;;  %3199 = vst.msk [vmem:[#allocation2 + $0xd0] sm:$0xff] %vm3172_vm8, %v3033_v52  ;;  %10159 = vmatmul.mubr.msk.f32.gmra.mrb[20].mxu0 %vm3310_vm9, %v3258_v53 }
 0x3f6   :  { %3100 = vrot.lane.b32.xlu0 %v9768_v48, %s10390_s17  ;;  %10161 = vmatprep.mubr.msk.f32.mxu0 %vm3310_vm9, %v3259_v56  ;;  %4511 = vst.msk [vmem:[#allocation3 + $0x70] sm:$0x3] %vm4498_vm10, %v10391_v31  ;;  %4514 = vst.msk [vmem:[#allocation3 + $0x88] sm:$0x3] %vm4498_vm10, %v10391_v31 }
 0x3f7   :  { %3102 = vrot.lane.b32.xlu1 %v9769_v57, %s10390_s17  ;;  %4512 = vst.msk [vmem:[#allocation3 + $0x78] sm:$0xff] %vm90_vm0, %v10391_v31  ;;  %4513 = vst.msk [vmem:[#allocation3 + $0x80] sm:$0xff] %vm90_vm0, %v10391_v31 }
 0x3f8   :  { %v3035_v3 = vpop.permute.xlu0 %3034  ;;  %v3037_v10 = vpop.permute.xlu1 %3036  ;;  %v3260_v55 = vld [vmem:[#allocation2 + $0xb8] sm:$0xff]  ;;  %v3261_v0 = vld [vmem:[#allocation2 + $0xc0] sm:$0xff]  ;;  %4515 = vst.msk [vmem:[#allocation3 + $0x90] sm:$0xff] %vm90_vm0, %v10391_v31  ;;  %4516 = vst.msk [vmem:[#allocation3 + $0x98] sm:$0xff] %vm90_vm0, %v10391_v31 }
 0x3f9   :  { %3200 = vst.msk [vmem:[#allocation2 + $0xd8] sm:$0xff] %vm3172_vm8, %v3035_v3  ;;  %3201 = vst.msk [vmem:[#allocation2 + $0xe0] sm:$0xff] %vm3172_vm8, %v3037_v10  ;;  %10162 = vmatmul.mubr.msk.f32.gmra.mrb[22].mxu0 %vm3310_vm9, %v3260_v55 }
 0x3fa   :  { %2719 = vrot.lane.b32.xlu0 %v9706_v2, %s10389_s21  ;;  %10164 = vmatprep.mubr.msk.f32.mxu0 %vm3310_vm9, %v3261_v0  ;;  %4517 = vst.msk [vmem:[#allocation3 + $0xa0] sm:$0x3] %vm4498_vm10, %v10391_v31  ;;  %4520 = vst.msk [vmem:[#allocation3 + $0xb8] sm:$0x3] %vm4498_vm10, %v10391_v31 }
 0x3fb   :  { %2721 = vrot.lane.b32.xlu1 %v9707_v1, %s10389_s21  ;;  %4518 = vst.msk [vmem:[#allocation3 + $0xa8] sm:$0xff] %vm90_vm0, %v10391_v31  ;;  %4519 = vst.msk [vmem:[#allocation3 + $0xb0] sm:$0xff] %vm90_vm0, %v10391_v31 }
 0x3fc   :  { %v3039_v5 = vpop.permute.xlu0 %3038  ;;  %v3041_v8 = vpop.permute.xlu1 %3040  ;;  %v3262_v9 = vld [vmem:[#allocation2 + $0xc8] sm:$0xff]  ;;  %v3263_v12 = vld [vmem:[#allocation2 + $0xd0] sm:$0xff]  ;;  %4521 = vst.msk [vmem:[#allocation3 + $0xc0] sm:$0xff] %vm90_vm0, %v10391_v31  ;;  %4522 = vst.msk [vmem:[#allocation3 + $0xc8] sm:$0xff] %vm90_vm0, %v10391_v31 }
 0x3fd   :  { %3202 = vst.msk [vmem:[#allocation2 + $0xe8] sm:$0xff] %vm3172_vm8, %v3039_v5  ;;  %3203 = vst.msk [vmem:[#allocation2 + $0xf0] sm:$0xff] %vm3172_vm8, %v3041_v8  ;;  %10165 = vmatmul.mubr.msk.f32.gmra.mrb[24].mxu0 %vm3310_vm9, %v3262_v9 }
 0x3fe   :  { %3104 = vrot.lane.b32.xlu0 %v9770_v4, %s10390_s17  ;;  %10167 = vmatprep.mubr.msk.f32.mxu0 %vm3310_vm9, %v3263_v12  ;;  %4523 = vst.msk [vmem:[#allocation3 + $0xd0] sm:$0x3] %vm4498_vm10, %v10391_v31  ;;  %4526 = vst.msk [vmem:[#allocation3 + $0xe8] sm:$0x3] %vm4498_vm10, %v10391_v31 }
 0x3ff   :  { %3106 = vrot.lane.b32.xlu1 %v9771_v14, %s10390_s17  ;;  %4524 = vst.msk [vmem:[#allocation3 + $0xd8] sm:$0xff] %vm90_vm0, %v10391_v31  ;;  %4525 = vst.msk [vmem:[#allocation3 + $0xe0] sm:$0xff] %vm90_vm0, %v10391_v31 }
 0x400   :  { %v3043_v21 = vpop.permute.xlu0 %3042  ;;  %v3045_v22 = vpop.permute.xlu1 %3044  ;;  %v3264_v35 = vld [vmem:[#allocation2 + $0xd8] sm:$0xff]  ;;  %v3265_v37 = vld [vmem:[#allocation2 + $0xe0] sm:$0xff]  ;;  %4527 = vst.msk [vmem:[#allocation3 + $0xf0] sm:$0xff] %vm90_vm0, %v10391_v31  ;;  %4528 = vst.msk [vmem:[#allocation3 + $0xf8] sm:$0xff] %vm90_vm0, %v10391_v31 }
 0x401   :  { %3204 = vst.msk [vmem:[#allocation2 + $0xf8] sm:$0xff] %vm3172_vm8, %v3043_v21  ;;  %3205 = vst.msk [vmem:[#allocation2 + $0x100] sm:$0xff] %vm3172_vm8, %v3045_v22  ;;  %10168 = vmatmul.mubr.msk.f32.gmra.mrb[26].mxu0 %vm3310_vm9, %v3264_v35 }
 0x402   :  { %10170 = vmatprep.mubr.msk.f32.mxu0 %vm3310_vm9, %v3265_v37  ;;  %4529 = vst.msk [vmem:[#allocation3 + $0x100] sm:$0x3] %vm4498_vm10, %v10391_v31  ;;  %4532 = vst.msk [vmem:[#allocation3 + $0x118] sm:$0x3] %vm4498_vm10, %v10391_v31 }
 0x403   :  { %4530 = vst.msk [vmem:[#allocation3 + $0x108] sm:$0xff] %vm90_vm0, %v10391_v31  ;;  %4531 = vst.msk [vmem:[#allocation3 + $0x110] sm:$0xff] %vm90_vm0, %v10391_v31 }
 0x404   :  { %v3047_v50 = vpop.permute.xlu0 %3046  ;;  %v3049_v51 = vpop.permute.xlu1 %3048  ;;  %v3266_v58 = vld [vmem:[#allocation2 + $0xe8] sm:$0xff]  ;;  %v3267_v59 = vld [vmem:[#allocation2 + $0xf0] sm:$0xff]  ;;  %4533 = vst.msk [vmem:[#allocation3 + $0x120] sm:$0xff] %vm90_vm0, %v10391_v31  ;;  %4534 = vst.msk [vmem:[#allocation3 + $0x128] sm:$0xff] %vm90_vm0, %v10391_v31 }
 0x405   :  { %3206 = vst.msk [vmem:[#allocation2 + $0x108] sm:$0xff] %vm3172_vm8, %v3047_v50  ;;  %3207 = vst.msk [vmem:[#allocation2 + $0x110] sm:$0xff] %vm3172_vm8, %v3049_v51  ;;  %10171 = vmatmul.mubr.msk.f32.gmra.mrb[28].mxu0 %vm3310_vm9, %v3266_v58 }
 0x406   :  { %10173 = vmatprep.mubr.msk.f32.mxu0 %vm3310_vm9, %v3267_v59  ;;  %4535 = vst.msk [vmem:[#allocation3 + $0x130] sm:$0x3] %vm4498_vm10, %v10391_v31  ;;  %4538 = vst.msk [vmem:[#allocation3 + $0x148] sm:$0x3] %vm4498_vm10, %v10391_v31 }
 0x407   :  { %4536 = vst.msk [vmem:[#allocation3 + $0x138] sm:$0xff] %vm90_vm0, %v10391_v31  ;;  %4537 = vst.msk [vmem:[#allocation3 + $0x140] sm:$0xff] %vm90_vm0, %v10391_v31 }
 0x408   :  { %v3051_v62 = vpop.permute.xlu0 %3050  ;;  %v3053_v63 = vpop.permute.xlu1 %3052  ;;  %v3268_v6 = vld [vmem:[#allocation2 + $0xf8] sm:$0xff]  ;;  %v3269_v7 = vld [vmem:[#allocation2 + $0x100] sm:$0xff]  ;;  %4539 = vst.msk [vmem:[#allocation3 + $0x150] sm:$0xff] %vm90_vm0, %v10391_v31  ;;  %4540 = vst.msk [vmem:[#allocation3 + $0x158] sm:$0xff] %vm90_vm0, %v10391_v31 }
 0x409   :  { %3208 = vst.msk [vmem:[#allocation2 + $0x118] sm:$0xff] %vm3172_vm8, %v3051_v62  ;;  %3209 = vst.msk [vmem:[#allocation2 + $0x120] sm:$0xff] %vm3172_vm8, %v3053_v63  ;;  %10174 = vmatmul.mubr.msk.f32.gmra.mrb[30].mxu0 %vm3310_vm9, %v3268_v6 }
 0x40a   :  { %10176 = vmatprep.mubr.msk.f32.mxu0 %vm3310_vm9, %v3269_v7  ;;  %4541 = vst.msk [vmem:[#allocation3 + $0x160] sm:$0x3] %vm4498_vm10, %v10391_v31  ;;  %4544 = vst.msk [vmem:[#allocation3 + $0x178] sm:$0x3] %vm4498_vm10, %v10391_v31 }
 0x40b   :  { %4542 = vst.msk [vmem:[#allocation3 + $0x168] sm:$0xff] %vm90_vm0, %v10391_v31  ;;  %4543 = vst.msk [vmem:[#allocation3 + $0x170] sm:$0xff] %vm90_vm0, %v10391_v31 }
 0x40c   :  { %v3055_v15 = vpop.permute.xlu0 %3054  ;;  %v2674_v16 = vpop.permute.xlu1 %2673  ;;  %v3270_v44 = vld [vmem:[#allocation2 + $0x108] sm:$0xff]  ;;  %v3271_v45 = vld [vmem:[#allocation2 + $0x110] sm:$0xff]  ;;  %4545 = vst.msk [vmem:[#allocation3 + $0x180] sm:$0xff] %vm90_vm0, %v10391_v31  ;;  %4546 = vst.msk [vmem:[#allocation3 + $0x188] sm:$0xff] %vm90_vm0, %v10391_v31 }
 0x40d   :  { %3210 = vst.msk [vmem:[#allocation2 + $0x128] sm:$0xff] %vm3172_vm8, %v3055_v15  ;;  %10177 = vmatmul.mubr.msk.f32.gmra.mrb[32].mxu0 %vm3310_vm9, %v3270_v44 }
 0x40e   :  { %2827 = vst.msk [vmem:[#allocation2 + $0x138] sm:$0xff] %vm2787_vm7, %v2674_v16  ;;  %10179 = vmatprep.mubr.msk.f32.mxu0 %vm3310_vm9, %v3271_v45 }
 0x40f   :  { %4547 = vst.msk [vmem:[#allocation3 + $0x190] sm:$0x3] %vm4498_vm10, %v10391_v31  ;;  %4550 = vst.msk [vmem:[#allocation3 + $0x1a8] sm:$0x3] %vm4498_vm10, %v10391_v31 }
 0x410   :  { %v3057_v28 = vpop.permute.xlu0 %3056  ;;  %v3059_v29 = vpop.permute.xlu1 %3058  ;;  %v3272_v60 = vld [vmem:[#allocation2 + $0x118] sm:$0xff]  ;;  %v3273_v61 = vld [vmem:[#allocation2 + $0x120] sm:$0xff]  ;;  %4548 = vst.msk [vmem:[#allocation3 + $0x198] sm:$0xff] %vm90_vm0, %v10391_v31  ;;  %4549 = vst.msk [vmem:[#allocation3 + $0x1a0] sm:$0xff] %vm90_vm0, %v10391_v31 }
 0x411   :  { %3211 = vst.msk [vmem:[#allocation2 + $0x130] sm:$0xff] %vm3172_vm8, %v3057_v28  ;;  %3212 = vst.msk [vmem:[#allocation2 + $0x138] sm:$0xff] %vm3172_vm8, %v3059_v29  ;;  %10180 = vmatmul.mubr.msk.f32.gmra.mrb[34].mxu0 %vm3310_vm9, %v3272_v60 }
 0x412   :  { %10182 = vmatprep.mubr.msk.f32.mxu0 %vm3310_vm9, %v3273_v61  ;;  %4551 = vst.msk [vmem:[#allocation3 + $0x1b0] sm:$0xff] %vm90_vm0, %v10391_v31  ;;  %4552 = vst.msk [vmem:[#allocation3 + $0x1b8] sm:$0xff] %vm90_vm0, %v10391_v31 }
 0x413   :  { %4553 = vst.msk [vmem:[#allocation3 + $0x1c0] sm:$0x3] %vm4498_vm10, %v10391_v31  ;;  %4556 = vst.msk [vmem:[#allocation3 + $0x1d8] sm:$0x3] %vm4498_vm10, %v10391_v31 }
 0x414   :  { %v2676_v11 = vpop.permute.xlu0 %2675  ;;  %v2678_v54 = vpop.permute.xlu1 %2677  ;;  %v3274_v13 = vld [vmem:[#allocation2 + $0x128] sm:$0xff]  ;;  %4554 = vst.msk [vmem:[#allocation3 + $0x1c8] sm:$0xff] %vm90_vm0, %v10391_v31  ;;  %4555 = vst.msk [vmem:[#allocation3 + $0x1d0] sm:$0xff] %vm90_vm0, %v10391_v31 }
 0x415   :  { %2828 = vst.msk [vmem:[#allocation2 + $0x140] sm:$0xff] %vm2787_vm7, %v2676_v11  ;;  %2829 = vst.msk [vmem:[#allocation2 + $0x148] sm:$0xff] %vm2787_vm7, %v2678_v54  ;;  %10183 = vmatmul.mubr.msk.f32.gmra.mrb[36].mxu0 %vm3310_vm9, %v3274_v13 }
 0x416   :  { %4557 = vst.msk [vmem:[#allocation3 + $0x1e0] sm:$0xff] %vm90_vm0, %v10391_v31  ;;  %4558 = vst.msk [vmem:[#allocation3 + $0x1e8] sm:$0xff] %vm90_vm0, %v10391_v31 }
 0x417   :  { %4559 = vst.msk [vmem:[#allocation3 + $0x1f0] sm:$0x3] %vm4498_vm10, %v10391_v31  ;;  %4562 = vst.msk [vmem:[#allocation3 + $0x208] sm:$0x3] %vm4498_vm10, %v10391_v31 }
 0x418   :  { %v3061_v17 = vpop.permute.xlu0 %3060  ;;  %v3063_v18 = vpop.permute.xlu1 %3062  ;;  %v3275_v19 = vld [vmem:[#allocation2 + $0x130] sm:$0xff]  ;;  %v3276_v20 = vld [vmem:[#allocation2 + $0x138] sm:$0xff]  ;;  %4560 = vst.msk [vmem:[#allocation3 + $0x1f8] sm:$0xff] %vm90_vm0, %v10391_v31  ;;  %4561 = vst.msk [vmem:[#allocation3 + $0x200] sm:$0xff] %vm90_vm0, %v10391_v31 }
 0x419   :  { %3213 = vst.msk [vmem:[#allocation2 + $0x140] sm:$0xff] %vm3172_vm8, %v3061_v17  ;;  %3214 = vst.msk [vmem:[#allocation2 + $0x148] sm:$0xff] %vm3172_vm8, %v3063_v18  ;;  %10185 = vmatprep.mubr.msk.f32.mxu0 %vm3310_vm9, %v3275_v19 }
 0x41a   :  { %10186 = vmatmul.mubr.msk.f32.gmra.mrb[38].mxu0 %vm3310_vm9, %v3276_v20  ;;  %4563 = vst.msk [vmem:[#allocation3 + $0x210] sm:$0xff] %vm90_vm0, %v10391_v31  ;;  %4564 = vst.msk [vmem:[#allocation3 + $0x218] sm:$0xff] %vm90_vm0, %v10391_v31 }
 0x41b   :  { %4565 = vst.msk [vmem:[#allocation3 + $0x220] sm:$0x3] %vm4498_vm10, %v10391_v31  ;;  %4568 = vst.msk [vmem:[#allocation3 + $0x238] sm:$0x3] %vm4498_vm10, %v10391_v31 }
 0x41c   :  { %v2680_v23 = vpop.permute.xlu0 %2679  ;;  %v2682_v24 = vpop.permute.xlu1 %2681  ;;  %4566 = vst.msk [vmem:[#allocation3 + $0x228] sm:$0xff] %vm90_vm0, %v10391_v31  ;;  %4567 = vst.msk [vmem:[#allocation3 + $0x230] sm:$0xff] %vm90_vm0, %v10391_v31 }
 0x41d   :  { %2830 = vst.msk [vmem:[#allocation2 + $0x150] sm:$0xff] %vm2787_vm7, %v2680_v23  ;;  %2831 = vst.msk [vmem:[#allocation2 + $0x158] sm:$0xff] %vm2787_vm7, %v2682_v24 }
 0x41e   :  { %4569 = vst.msk [vmem:[#allocation3 + $0x240] sm:$0xff] %vm90_vm0, %v10391_v31  ;;  %4570 = vst.msk [vmem:[#allocation3 + $0x248] sm:$0xff] %vm90_vm0, %v10391_v31 }
 0x41f   :  { %4571 = vst.msk [vmem:[#allocation3 + $0x250] sm:$0x3] %vm4498_vm10, %v10391_v31  ;;  %4574 = vst.msk [vmem:[#allocation3 + $0x268] sm:$0x3] %vm4498_vm10, %v10391_v31 }
 0x420   :  { %v3065_v25 = vpop.permute.xlu0 %3064  ;;  %v3067_v26 = vpop.permute.xlu1 %3066  ;;  %v3277_v27 = vld [vmem:[#allocation2 + $0x140] sm:$0xff]  ;;  %v3278_v30 = vld [vmem:[#allocation2 + $0x148] sm:$0xff]  ;;  %4572 = vst.msk [vmem:[#allocation3 + $0x258] sm:$0xff] %vm90_vm0, %v10391_v31  ;;  %4573 = vst.msk [vmem:[#allocation3 + $0x260] sm:$0xff] %vm90_vm0, %v10391_v31 }
 0x421   :  { %3215 = vst.msk [vmem:[#allocation2 + $0x150] sm:$0xff] %vm3172_vm8, %v3065_v25  ;;  %3216 = vst.msk [vmem:[#allocation2 + $0x158] sm:$0xff] %vm3172_vm8, %v3067_v26  ;;  %10188 = vmatprep.mubr.msk.f32.mxu0 %vm3310_vm9, %v3277_v27 }
 0x422   :  { %10189 = vmatmul.mubr.msk.f32.gmra.mrb[40].mxu0 %vm3310_vm9, %v3278_v30  ;;  %4575 = vst.msk [vmem:[#allocation3 + $0x270] sm:$0xff] %vm90_vm0, %v10391_v31  ;;  %4576 = vst.msk [vmem:[#allocation3 + $0x278] sm:$0xff] %vm90_vm0, %v10391_v31 }
 0x423   :  { %4577 = vst.msk [vmem:[#allocation3 + $0x280] sm:$0x3] %vm4498_vm10, %v10391_v31  ;;  %4580 = vst.msk [vmem:[#allocation3 + $0x298] sm:$0x3] %vm4498_vm10, %v10391_v31 }
 0x424   :  { %4578 = vst.msk [vmem:[#allocation3 + $0x288] sm:$0xff] %vm90_vm0, %v10391_v31  ;;  %4579 = vst.msk [vmem:[#allocation3 + $0x290] sm:$0xff] %vm90_vm0, %v10391_v31  ;;  %v2684_v32 = vpop.permute.xlu0 %2683  ;;  %v2686_v33 = vpop.permute.xlu1 %2685 }
 0x425   :  { %4581 = vst.msk [vmem:[#allocation3 + $0x2a0] sm:$0xff] %vm90_vm0, %v10391_v31  ;;  %4582 = vst.msk [vmem:[#allocation3 + $0x2a8] sm:$0xff] %vm90_vm0, %v10391_v31 }
 0x426   :  { %4583 = vst.msk [vmem:[#allocation3 + $0x2b0] sm:$0x3] %vm4498_vm10, %v10391_v31  ;;  %4586 = vst.msk [vmem:[#allocation3 + $0x2c8] sm:$0x3] %vm4498_vm10, %v10391_v31 }
 0x427   :  { %4584 = vst.msk [vmem:[#allocation3 + $0x2b8] sm:$0xff] %vm90_vm0, %v10391_v31  ;;  %4585 = vst.msk [vmem:[#allocation3 + $0x2c0] sm:$0xff] %vm90_vm0, %v10391_v31 }
 0x428   :  { %4587 = vst.msk [vmem:[#allocation3 + $0x2d0] sm:$0xff] %vm90_vm0, %v10391_v31  ;;  %4588 = vst.msk [vmem:[#allocation3 + $0x2d8] sm:$0xff] %vm90_vm0, %v10391_v31  ;;  %v3069_v34 = vpop.permute.xlu0 %3068  ;;  %v3071_v36 = vpop.permute.xlu1 %3070  ;;  %v3279_v38 = vld [vmem:[#allocation2 + $0x150] sm:$0xff]  ;;  %v3280_v39 = vld [vmem:[#allocation2 + $0x158] sm:$0xff] }
 0x429   :  { %4589 = vst.msk [vmem:[#allocation3 + $0x2e0] sm:$0x3] %vm4498_vm10, %v10391_v31  ;;  %4592 = vst.msk [vmem:[#allocation3 + $0x2f8] sm:$0x3] %vm4498_vm10, %v10391_v31  ;;  %10191 = vmatprep.mubr.msk.f32.mxu0 %vm3310_vm9, %v3279_v38 }
 0x42a   :  { %4590 = vst.msk [vmem:[#allocation3 + $0x2e8] sm:$0xff] %vm90_vm0, %v10391_v31  ;;  %4591 = vst.msk [vmem:[#allocation3 + $0x2f0] sm:$0xff] %vm90_vm0, %v10391_v31  ;;  %10192 = vmatmul.mubr.msk.f32.gmra.mrb[42].mxu0 %vm3310_vm9, %v3280_v39 }
 0x42b   :  { %4593 = vst.msk [vmem:[#allocation3 + $0x300] sm:$0xff] %vm90_vm0, %v10391_v31  ;;  %4594 = vst.msk [vmem:[#allocation3 + $0x308] sm:$0xff] %vm90_vm0, %v10391_v31 }
 0x42c   :  { %4595 = vst.msk [vmem:[#allocation3 + $0x310] sm:$0x3] %vm4498_vm10, %v10391_v31  ;;  %4598 = vst.msk [vmem:[#allocation3 + $0x328] sm:$0x3] %vm4498_vm10, %v10391_v31  ;;  %v2688_v40 = vpop.permute.xlu0 %2687  ;;  %v2690_v41 = vpop.permute.xlu1 %2689 }
 0x42d   :  { %4596 = vst.msk [vmem:[#allocation3 + $0x318] sm:$0xff] %vm90_vm0, %v10391_v31  ;;  %4597 = vst.msk [vmem:[#allocation3 + $0x320] sm:$0xff] %vm90_vm0, %v10391_v31 }
 0x42e   :  { %4599 = vst.msk [vmem:[#allocation3 + $0x330] sm:$0xff] %vm90_vm0, %v10391_v31  ;;  %4600 = vst.msk [vmem:[#allocation3 + $0x338] sm:$0xff] %vm90_vm0, %v10391_v31 }
 0x42f   :  { %4601 = vst.msk [vmem:[#allocation3 + $0x340] sm:$0x3] %vm4498_vm10, %v10391_v31  ;;  %4604 = vst.msk [vmem:[#allocation3 + $0x358] sm:$0x3] %vm4498_vm10, %v10391_v31 }
 0x430   :  { %4602 = vst.msk [vmem:[#allocation3 + $0x348] sm:$0xff] %vm90_vm0, %v10391_v31  ;;  %4603 = vst.msk [vmem:[#allocation3 + $0x350] sm:$0xff] %vm90_vm0, %v10391_v31  ;;  %v3073_v42 = vpop.permute.xlu0 %3072  ;;  %v3075_v43 = vpop.permute.xlu1 %3074 }
 0x431   :  { %2832 = vst.msk [vmem:[#allocation2 + $0x160] sm:$0xff] %vm2787_vm7, %v2684_v32  ;;  %2833 = vst.msk [vmem:[#allocation2 + $0x168] sm:$0xff] %vm2787_vm7, %v2686_v33 }
 0x432   :  { %3217 = vst.msk [vmem:[#allocation2 + $0x160] sm:$0xff] %vm3172_vm8, %v3069_v34  ;;  %3218 = vst.msk [vmem:[#allocation2 + $0x168] sm:$0xff] %vm3172_vm8, %v3071_v36 }
 0x433   :  { %2834 = vst.msk [vmem:[#allocation2 + $0x170] sm:$0xff] %vm2787_vm7, %v2688_v40  ;;  %2835 = vst.msk [vmem:[#allocation2 + $0x178] sm:$0xff] %vm2787_vm7, %v2690_v41 }
 0x434   :  { %3219 = vst.msk [vmem:[#allocation2 + $0x170] sm:$0xff] %vm3172_vm8, %v3073_v42  ;;  %3220 = vst.msk [vmem:[#allocation2 + $0x178] sm:$0xff] %vm3172_vm8, %v3075_v43  ;;  %v2692_v48 = vpop.permute.xlu0 %2691  ;;  %v2694_v49 = vpop.permute.xlu1 %2693 }
 0x435   :  { %2836 = vst.msk [vmem:[#allocation2 + $0x180] sm:$0xff] %vm2787_vm7, %v2692_v48  ;;  %2837 = vst.msk [vmem:[#allocation2 + $0x188] sm:$0xff] %vm2787_vm7, %v2694_v49 }
 0x438   :  { %v3077_v52 = vpop.permute.xlu0 %3076  ;;  %v3079_v53 = vpop.permute.xlu1 %3078 }
 0x439   :  { %v3281_v46 = vld [vmem:[#allocation2 + $0x160] sm:$0xff]  ;;  %v3282_v47 = vld [vmem:[#allocation2 + $0x168] sm:$0xff]  ;;  %3221 = vst.msk [vmem:[#allocation2 + $0x180] sm:$0xff] %vm3172_vm8, %v3077_v52  ;;  %3222 = vst.msk [vmem:[#allocation2 + $0x188] sm:$0xff] %vm3172_vm8, %v3079_v53 }
 0x43a   :  { %10194 = vmatprep.mubr.msk.f32.mxu0 %vm3310_vm9, %v3281_v46 }
 0x43b   :  { %10195 = vmatmul.mubr.msk.f32.gmra.mrb[44].mxu0 %vm3310_vm9, %v3282_v47  ;;  %v3283_v56 = vld [vmem:[#allocation2 + $0x170] sm:$0xff]  ;;  %v3284_v57 = vld [vmem:[#allocation2 + $0x178] sm:$0xff] }
 0x43c   :  { %10197 = vmatprep.mubr.msk.f32.mxu0 %vm3310_vm9, %v3283_v56  ;;  %v2696_v2 = vpop.permute.xlu0 %2695 }
 0x43d   :  { %v2698_v3 = vpop.permute.xlu1 %2697  ;;  %2838 = vst.msk [vmem:[#allocation2 + $0x190] sm:$0xff] %vm2787_vm7, %v2696_v2 }
 0x43e   :  { %2839 = vst.msk [vmem:[#allocation2 + $0x198] sm:$0xff] %vm2787_vm7, %v2698_v3 }
 0x43f   :  { %10198 = vmatmul.mubr.msk.f32.gmra.mrb[46].mxu0 %vm3310_vm9, %v3284_v57 }
 0x440   :  { %v3081_v10 = vpop.permute.xlu0 %3080  ;;  %v3285_v55 = vld [vmem:[#allocation2 + $0x180] sm:$0xff]  ;;  %v3286_v0 = vld [vmem:[#allocation2 + $0x188] sm:$0xff] }
 0x441   :  { %3223 = vst.msk [vmem:[#allocation2 + $0x190] sm:$0xff] %vm3172_vm8, %v3081_v10  ;;  %v3083_v1 = vpop.permute.xlu1 %3082  ;;  %10200 = vmatprep.mubr.msk.f32.mxu0 %vm3310_vm9, %v3285_v55 }
 0x442   :  { %3224 = vst.msk [vmem:[#allocation2 + $0x198] sm:$0xff] %vm3172_vm8, %v3083_v1 }
 0x443   :  { %10201 = vmatmul.mubr.msk.f32.gmra.mrb[48].mxu0 %vm3310_vm9, %v3286_v0 }
 0x444   :  { %v2700_v4 = vpop.permute.xlu0 %2699 }
 0x445   :  { %2840 = vst.msk [vmem:[#allocation2 + $0x1a0] sm:$0xff] %vm2787_vm7, %v2700_v4  ;;  %v2702_v5 = vpop.permute.xlu1 %2701 }
 0x446   :  { %2841 = vst.msk [vmem:[#allocation2 + $0x1a8] sm:$0xff] %vm2787_vm7, %v2702_v5 }
 0x448   :  { %v3085_v8 = vpop.permute.xlu0 %3084  ;;  %v3287_v9 = vld [vmem:[#allocation2 + $0x190] sm:$0xff] }
 0x449   :  { %3225 = vst.msk [vmem:[#allocation2 + $0x1a0] sm:$0xff] %vm3172_vm8, %v3085_v8  ;;  %v3087_v12 = vpop.permute.xlu1 %3086  ;;  %10203 = vmatprep.mubr.msk.f32.mxu0 %vm3310_vm9, %v3287_v9  ;;  %v3288_v14 = vld [vmem:[#allocation2 + $0x198] sm:$0xff] }
 0x44a   :  { %3226 = vst.msk [vmem:[#allocation2 + $0x1a8] sm:$0xff] %vm3172_vm8, %v3087_v12  ;;  %10204 = vmatmul.mubr.msk.f32.gmra.mrb[50].mxu0 %vm3310_vm9, %v3288_v14 }
 0x44c   :  { %v2704_v21 = vpop.permute.xlu0 %2703 }
 0x44d   :  { %2842 = vst.msk [vmem:[#allocation2 + $0x1b0] sm:$0xff] %vm2787_vm7, %v2704_v21  ;;  %v2706_v22 = vpop.permute.xlu1 %2705 }
 0x44e   :  { %2843 = vst.msk [vmem:[#allocation2 + $0x1b8] sm:$0xff] %vm2787_vm7, %v2706_v22 }
 0x450   :  { %v3089_v35 = vpop.permute.xlu0 %3088  ;;  %v3289_v37 = vld [vmem:[#allocation2 + $0x1a0] sm:$0xff] }
 0x451   :  { %3227 = vst.msk [vmem:[#allocation2 + $0x1b0] sm:$0xff] %vm3172_vm8, %v3089_v35  ;;  %v3091_v50 = vpop.permute.xlu1 %3090  ;;  %10206 = vmatprep.mubr.msk.f32.mxu0 %vm3310_vm9, %v3289_v37  ;;  %v3290_v51 = vld [vmem:[#allocation2 + $0x1a8] sm:$0xff] }
 0x452   :  { %3228 = vst.msk [vmem:[#allocation2 + $0x1b8] sm:$0xff] %vm3172_vm8, %v3091_v50  ;;  %10207 = vmatmul.mubr.msk.f32.gmra.mrb[52].mxu0 %vm3310_vm9, %v3290_v51 }
 0x454   :  { %v2708_v58 = vpop.permute.xlu0 %2707 }
 0x455   :  { %2844 = vst.msk [vmem:[#allocation2 + $0x1c0] sm:$0xff] %vm2787_vm7, %v2708_v58  ;;  %v2710_v59 = vpop.permute.xlu1 %2709 }
 0x456   :  { %2845 = vst.msk [vmem:[#allocation2 + $0x1c8] sm:$0xff] %vm2787_vm7, %v2710_v59 }
 0x458   :  { %v3093_v62 = vpop.permute.xlu0 %3092  ;;  %v3291_v63 = vld [vmem:[#allocation2 + $0x1b0] sm:$0xff] }
 0x459   :  { %3229 = vst.msk [vmem:[#allocation2 + $0x1c0] sm:$0xff] %vm3172_vm8, %v3093_v62  ;;  %v3095_v6 = vpop.permute.xlu1 %3094  ;;  %10209 = vmatprep.mubr.msk.f32.mxu0 %vm3310_vm9, %v3291_v63  ;;  %v3292_v7 = vld [vmem:[#allocation2 + $0x1b8] sm:$0xff] }
 0x45a   :  { %3230 = vst.msk [vmem:[#allocation2 + $0x1c8] sm:$0xff] %vm3172_vm8, %v3095_v6  ;;  %10210 = vmatmul.mubr.msk.f32.gmra.mrb[54].mxu0 %vm3310_vm9, %v3292_v7 }
 0x45c   :  { %v2712_v15 = vpop.permute.xlu0 %2711 }
 0x45d   :  { %2846 = vst.msk [vmem:[#allocation2 + $0x1d0] sm:$0xff] %vm2787_vm7, %v2712_v15  ;;  %v2714_v16 = vpop.permute.xlu1 %2713 }
 0x45e   :  { %2847 = vst.msk [vmem:[#allocation2 + $0x1d8] sm:$0xff] %vm2787_vm7, %v2714_v16 }
 0x460   :  { %v3097_v44 = vpop.permute.xlu0 %3096  ;;  %v3293_v45 = vld [vmem:[#allocation2 + $0x1c0] sm:$0xff] }
 0x461   :  { %3231 = vst.msk [vmem:[#allocation2 + $0x1d0] sm:$0xff] %vm3172_vm8, %v3097_v44  ;;  %v3099_v28 = vpop.permute.xlu1 %3098  ;;  %10212 = vmatprep.mubr.msk.f32.mxu0 %vm3310_vm9, %v3293_v45  ;;  %v3294_v29 = vld [vmem:[#allocation2 + $0x1c8] sm:$0xff] }
 0x462   :  { %3232 = vst.msk [vmem:[#allocation2 + $0x1d8] sm:$0xff] %vm3172_vm8, %v3099_v28  ;;  %10213 = vmatmul.mubr.msk.f32.gmra.mrb[56].mxu0 %vm3310_vm9, %v3294_v29 }
 0x464   :  { %v2716_v60 = vpop.permute.xlu0 %2715 }
 0x465   :  { %2848 = vst.msk [vmem:[#allocation2 + $0x1e0] sm:$0xff] %vm2787_vm7, %v2716_v60  ;;  %v2718_v61 = vpop.permute.xlu1 %2717 }
 0x466   :  { %2849 = vst.msk [vmem:[#allocation2 + $0x1e8] sm:$0xff] %vm2787_vm7, %v2718_v61 }
 0x468   :  { %v3101_v11 = vpop.permute.xlu0 %3100  ;;  %v3295_v54 = vld [vmem:[#allocation2 + $0x1d0] sm:$0xff] }
 0x469   :  { %3233 = vst.msk [vmem:[#allocation2 + $0x1e0] sm:$0xff] %vm3172_vm8, %v3101_v11  ;;  %v3103_v13 = vpop.permute.xlu1 %3102  ;;  %10215 = vmatprep.mubr.msk.f32.mxu0 %vm3310_vm9, %v3295_v54  ;;  %v3296_v17 = vld [vmem:[#allocation2 + $0x1d8] sm:$0xff] }
 0x46a   :  { %3234 = vst.msk [vmem:[#allocation2 + $0x1e8] sm:$0xff] %vm3172_vm8, %v3103_v13  ;;  %10216 = vmatmul.mubr.msk.f32.gmra.mrb[58].mxu0 %vm3310_vm9, %v3296_v17 }
 0x46c   :  { %v2720_v18 = vpop.permute.xlu0 %2719 }
 0x46d   :  { %2850 = vst.msk [vmem:[#allocation2 + $0x1f0] sm:$0xff] %vm2787_vm7, %v2720_v18  ;;  %v2722_v19 = vpop.permute.xlu1 %2721 }
 0x46e   :  { %2851 = vst.msk [vmem:[#allocation2 + $0x1f8] sm:$0xff] %vm2787_vm7, %v2722_v19 }
 0x470   :  { %v3105_v20 = vpop.permute.xlu0 %3104  ;;  %v3297_v23 = vld [vmem:[#allocation2 + $0x1e0] sm:$0xff] }
 0x471   :  { %3235 = vst.msk [vmem:[#allocation2 + $0x1f0] sm:$0xff] %vm3172_vm8, %v3105_v20  ;;  %v3107_v24 = vpop.permute.xlu1 %3106  ;;  %10218 = vmatprep.mubr.msk.f32.mxu0 %vm3310_vm9, %v3297_v23  ;;  %v3298_v25 = vld [vmem:[#allocation2 + $0x1e8] sm:$0xff] }
 0x472   :  { %3236 = vst.msk [vmem:[#allocation2 + $0x1f8] sm:$0xff] %vm3172_vm8, %v3107_v24  ;;  %10219 = vmatmul.mubr.msk.f32.gmra.mrb[60].mxu0 %vm3310_vm9, %v3298_v25 }
 0x478   :  { %v3299_v26 = vld [vmem:[#allocation2 + $0x1f0] sm:$0xff] }
 0x479   :  { %10221 = vmatprep.mubr.msk.f32.mxu0 %vm3310_vm9, %v3299_v26  ;;  %v3300_v27 = vld [vmem:[#allocation2 + $0x1f8] sm:$0xff] }
 0x47a   :  { %10222 = vmatmul.mubr.msk.f32.gmra.mrb[62].mxu0 %vm3310_vm9, %v3300_v27 }
 0x4a0   :  { %v13615_v30 = vpop.f32.mrb[0].mxu0 }
 0x4a1   :  { %18157 = vst [vmem:[#allocation4_spill] sm:$0xff] %v13615_v30  ;;  %v3891_v31 = vsel %vm90_vm0, %v13615_v30, 0.0  ;;  %v13619_v32 = vpop.f32.mrb[1].mxu0 }
 0x4a2   :  { %v3890_v33 = vsel %vm90_vm0, %v13619_v32, 0.0 }
 0x4a3   :  { %v3892_v34 = vadd.f32 %v3891_v31, %v3890_v33 }
 0x4a4   :  { %v13623_v36 = vpop.f32.mrb[2].mxu0 }
 0x4a5   :  { %18158 = vst [vmem:[#allocation5_spill] sm:$0xff] %v13623_v36  ;;  %v13625_v38 = vpop.f32.mrb[3].mxu0  ;;  %v3895_v41 = vsel %vm90_vm0, %v13623_v36, 0.0 }
 0x4a6   :  { %18159 = vst [vmem:[#allocation6_spill] sm:$0xff] %v13625_v38  ;;  %v3893_v39 = vsel %vm90_vm0, %v13625_v38, 0.0 }
 0x4a7   :  { %v3894_v40 = vadd.f32 %v3893_v39, %v3892_v34 }
 0x4a8   :  { %v13631_v42 = vpop.f32.mrb[4].mxu0 }
 0x4a9   :  { %18160 = vst [vmem:[#allocation7_spill] sm:$0xff] %v13631_v42  ;;  %v3896_v43 = vadd.f32 %v3895_v41, %v3894_v40  ;;  %v13633_v46 = vpop.f32.mrb[5].mxu0  ;;  %v3899_v49 = vsel %vm90_vm0, %v13631_v42, 0.0 }
 0x4aa   :  { %18161 = vst [vmem:[#allocation8_spill] sm:$0xff] %v13633_v46  ;;  %v3897_v47 = vsel %vm90_vm0, %v13633_v46, 0.0 }
 0x4ab   :  { %v3898_v48 = vadd.f32 %v3897_v47, %v3896_v43 }
 0x4ac   :  { %v13639_v52 = vpop.f32.mrb[6].mxu0 }
 0x4ad   :  { %v13641_v53 = vpop.f32.mrb[7].mxu0  ;;  %v3900_v56 = vadd.f32 %v3899_v49, %v3898_v48  ;;  %v3903_v3 = vsel %vm90_vm0, %v13639_v52, 0.0 }
 0x4ae   :  { %v3901_v57 = vsel %vm90_vm0, %v13641_v53, 0.0 }
 0x4af   :  { %v3902_v2 = vadd.f32 %v3901_v57, %v3900_v56 }
 0x4b0   :  { %v13647_v10 = vpop.f32.mrb[8].mxu0 }
 0x4b1   :  { %v13649_v55 = vpop.f32.mrb[9].mxu0  ;;  %v3904_v0 = vadd.f32 %v3903_v3, %v3902_v2  ;;  %v3907_v5 = vsel %vm90_vm0, %v13647_v10, 0.0 }
 0x4b2   :  { %v3905_v1 = vsel %vm90_vm0, %v13649_v55, 0.0 }
 0x4b3   :  { %v3906_v4 = vadd.f32 %v3905_v1, %v3904_v0 }
 0x4b4   :  { %v13655_v8 = vpop.f32.mrb[10].mxu0 }
 0x4b5   :  { %v13657_v9 = vpop.f32.mrb[11].mxu0  ;;  %v3908_v12 = vadd.f32 %v3907_v5, %v3906_v4  ;;  %v3911_v22 = vsel %vm90_vm0, %v13655_v8, 0.0 }
 0x4b6   :  { %v3909_v14 = vsel %vm90_vm0, %v13657_v9, 0.0 }
 0x4b7   :  { %v3910_v21 = vadd.f32 %v3909_v14, %v3908_v12 }
 0x4b8   :  { %v13663_v35 = vpop.f32.mrb[12].mxu0 }
 0x4b9   :  { %v13665_v37 = vpop.f32.mrb[13].mxu0  ;;  %v3912_v50 = vadd.f32 %v3911_v22, %v3910_v21  ;;  %v3915_v59 = vsel %vm90_vm0, %v13663_v35, 0.0 }
 0x4ba   :  { %v3913_v51 = vsel %vm90_vm0, %v13665_v37, 0.0 }
 0x4bb   :  { %v3914_v58 = vadd.f32 %v3913_v51, %v3912_v50 }
 0x4bc   :  { %v13671_v62 = vpop.f32.mrb[14].mxu0 }
 0x4bd   :  { %v13673_v63 = vpop.f32.mrb[15].mxu0  ;;  %v3916_v6 = vadd.f32 %v3915_v59, %v3914_v58  ;;  %v3919_v16 = vsel %vm90_vm0, %v13671_v62, 0.0 }
 0x4be   :  { %v3917_v7 = vsel %vm90_vm0, %v13673_v63, 0.0 }
 0x4bf   :  { %v3918_v15 = vadd.f32 %v3917_v7, %v3916_v6 }
 0x4c0   :  { %v13679_v44 = vpop.f32.mrb[16].mxu0 }
 0x4c1   :  { %v13681_v45 = vpop.f32.mrb[17].mxu0  ;;  %v3920_v28 = vadd.f32 %v3919_v16, %v3918_v15  ;;  %v3923_v61 = vsel %vm90_vm0, %v13679_v44, 0.0 }
 0x4c2   :  { %v3921_v29 = vsel %vm90_vm0, %v13681_v45, 0.0 }
 0x4c3   :  { %v3922_v60 = vadd.f32 %v3921_v29, %v3920_v28 }
 0x4c4   :  { %v13687_v11 = vpop.f32.mrb[18].mxu0 }
 0x4c5   :  { %v13689_v54 = vpop.f32.mrb[19].mxu0  ;;  %v3924_v13 = vadd.f32 %v3923_v61, %v3922_v60  ;;  %v3927_v19 = vsel %vm90_vm0, %v13687_v11, 0.0 }
 0x4c6   :  { %v3925_v17 = vsel %vm90_vm0, %v13689_v54, 0.0 }
 0x4c7   :  { %v3926_v18 = vadd.f32 %v3925_v17, %v3924_v13 }
 0x4c8   :  { %v13695_v20 = vpop.f32.mrb[20].mxu0 }
 0x4c9   :  { %v13697_v23 = vpop.f32.mrb[21].mxu0  ;;  %v3928_v24 = vadd.f32 %v3927_v19, %v3926_v18  ;;  %v3931_v27 = vsel %vm90_vm0, %v13695_v20, 0.0 }
 0x4ca   :  { %v3929_v25 = vsel %vm90_vm0, %v13697_v23, 0.0 }
 0x4cb   :  { %v3930_v26 = vadd.f32 %v3929_v25, %v3928_v24 }
 0x4cc   :  { %v13703_v31 = vpop.f32.mrb[22].mxu0 }
 0x4cd   :  { %v13705_v33 = vpop.f32.mrb[23].mxu0  ;;  %v3932_v34 = vadd.f32 %v3931_v27, %v3930_v26  ;;  %v3935_v41 = vsel %vm90_vm0, %v13703_v31, 0.0 }
 0x4ce   :  { %v3933_v39 = vsel %vm90_vm0, %v13705_v33, 0.0 }
 0x4cf   :  { %v3934_v40 = vadd.f32 %v3933_v39, %v3932_v34 }
 0x4d0   :  { %v13711_v43 = vpop.f32.mrb[24].mxu0 }
 0x4d1   :  { %v13713_v47 = vpop.f32.mrb[25].mxu0  ;;  %v3936_v48 = vadd.f32 %v3935_v41, %v3934_v40  ;;  %v3939_v57 = vsel %vm90_vm0, %v13711_v43, 0.0 }
 0x4d2   :  { %v3937_v49 = vsel %vm90_vm0, %v13713_v47, 0.0 }
 0x4d3   :  { %v3938_v56 = vadd.f32 %v3937_v49, %v3936_v48 }
 0x4d4   :  { %v13719_v2 = vpop.f32.mrb[26].mxu0 }
 0x4d5   :  { %v13721_v3 = vpop.f32.mrb[27].mxu0  ;;  %v3940_v0 = vadd.f32 %v3939_v57, %v3938_v56  ;;  %v3943_v5 = vsel %vm90_vm0, %v13719_v2, 0.0 }
 0x4d6   :  { %v3941_v1 = vsel %vm90_vm0, %v13721_v3, 0.0 }
 0x4d7   :  { %v3942_v4 = vadd.f32 %v3941_v1, %v3940_v0 }
 0x4d8   :  { %v13727_v12 = vpop.f32.mrb[28].mxu0 }
 0x4d9   :  { %v13729_v14 = vpop.f32.mrb[29].mxu0  ;;  %v3944_v21 = vadd.f32 %v3943_v5, %v3942_v4  ;;  %v3947_v51 = vsel %vm90_vm0, %v13727_v12, 0.0 }
 0x4da   :  { %v3945_v22 = vsel %vm90_vm0, %v13729_v14, 0.0 }
 0x4db   :  { %v3946_v50 = vadd.f32 %v3945_v22, %v3944_v21 }
 0x4dc   :  { %v13735_v58 = vpop.f32.mrb[30].mxu0 }
 0x4dd   :  { %v13737_v59 = vpop.f32.mrb[31].mxu0  ;;  %v3948_v6 = vadd.f32 %v3947_v51, %v3946_v50  ;;  %v3951_v16 = vsel %vm90_vm0, %v13735_v58, 0.0 }
 0x4de   :  { %v3949_v7 = vsel %vm90_vm0, %v13737_v59, 0.0 }
 0x4df   :  { %v3950_v15 = vadd.f32 %v3949_v7, %v3948_v6 }
 0x4e0   :  { %v13743_v28 = vpop.f32.mrb[32].mxu0 }
 0x4e1   :  { %v13745_v29 = vpop.f32.mrb[33].mxu0  ;;  %v3952_v60 = vadd.f32 %v3951_v16, %v3950_v15  ;;  %v3955_v17 = vsel %vm90_vm0, %v13743_v28, 0.0 }
 0x4e2   :  { %v3953_v61 = vsel %vm90_vm0, %v13745_v29, 0.0 }
 0x4e3   :  { %v3954_v13 = vadd.f32 %v3953_v61, %v3952_v60 }
 0x4e4   :  { %v13751_v18 = vpop.f32.mrb[34].mxu0 }
 0x4e5   :  { %v13753_v19 = vpop.f32.mrb[35].mxu0  ;;  %v3956_v24 = vadd.f32 %v3955_v17, %v3954_v13  ;;  %v3959_v27 = vsel %vm90_vm0, %v13751_v18, 0.0 }
 0x4e6   :  { %v3957_v25 = vsel %vm90_vm0, %v13753_v19, 0.0 }
 0x4e7   :  { %v3958_v26 = vadd.f32 %v3957_v25, %v3956_v24 }
 0x4e8   :  { %v13759_v34 = vpop.f32.mrb[36].mxu0 }
 0x4e9   :  { %v13761_v39 = vpop.f32.mrb[37].mxu0  ;;  %v3960_v40 = vadd.f32 %v3959_v27, %v3958_v26  ;;  %v3963_v49 = vsel %vm90_vm0, %v13759_v34, 0.0 }
 0x4ea   :  { %v3961_v41 = vsel %vm90_vm0, %v13761_v39, 0.0 }
 0x4eb   :  { %v3962_v48 = vadd.f32 %v3961_v41, %v3960_v40 }
 0x4ed   :  { %v13767_v56 = vpop.f32.mrb[38].mxu0  ;;  %v3964_v57 = vadd.f32 %v3963_v49, %v3962_v48 }
 0x4ee   :  { %v13769_v0 = vpop.f32.mrb[39].mxu0  ;;  %v3967_v5 = vsel %vm90_vm0, %v13767_v56, 0.0 }
 0x4ef   :  { %v3965_v1 = vsel %vm90_vm0, %v13769_v0, 0.0 }
 0x4f0   :  { %v3966_v4 = vadd.f32 %v3965_v1, %v3964_v57 }
 0x4f2   :  { %v3968_v21 = vadd.f32 %v3967_v5, %v3966_v4 }
 0x4f5   :  { %v13775_v22 = vpop.f32.mrb[40].mxu0 }
 0x4f6   :  { %v13777_v50 = vpop.f32.mrb[41].mxu0  ;;  %v3971_v7 = vsel %vm90_vm0, %v13775_v22, 0.0 }
 0x4f7   :  { %v3969_v51 = vsel %vm90_vm0, %v13777_v50, 0.0 }
 0x4f8   :  { %v3970_v6 = vadd.f32 %v3969_v51, %v3968_v21 }
 0x4fa   :  { %v3972_v15 = vadd.f32 %v3971_v7, %v3970_v6 }
 0x4fd   :  { %v13783_v16 = vpop.f32.mrb[42].mxu0 }
 0x4fe   :  { %v13785_v60 = vpop.f32.mrb[43].mxu0  ;;  %v3975_v17 = vsel %vm90_vm0, %v13783_v16, 0.0 }
 0x4ff   :  { %v3973_v61 = vsel %vm90_vm0, %v13785_v60, 0.0 }
 0x500   :  { %v3974_v13 = vadd.f32 %v3973_v61, %v3972_v15 }
 0x502   :  { %v3976_v24 = vadd.f32 %v3975_v17, %v3974_v13 }
 0x50e   :  { %v13791_v25 = vpop.f32.mrb[44].mxu0 }
 0x50f   :  { %18162 = vst [vmem:[#allocation9_spill] sm:$0xff] %v13791_v25  ;;  %v13793_v26 = vpop.f32.mrb[45].mxu0  ;;  %v3979_v41 = vsel %vm90_vm0, %v13791_v25, 0.0 }
 0x510   :  { %v3977_v27 = vsel %vm90_vm0, %v13793_v26, 0.0 }
 0x511   :  { %v3978_v40 = vadd.f32 %v3977_v27, %v3976_v24 }
 0x512   :  { %v13799_v49 = vpop.f32.mrb[46].mxu0 }
 0x513   :  { %v3980_v48 = vadd.f32 %v3979_v41, %v3978_v40  ;;  %18163 = vst [vmem:[#allocation10_spill] sm:$0xff] %v13799_v49  ;;  %v13801_v57 = vpop.f32.mrb[47].mxu0  ;;  %v3983_v5 = vsel %vm90_vm0, %v13799_v49, 0.0 }
 0x514   :  { %18164 = vst [vmem:[#allocation11_spill] sm:$0xff] %v13801_v57  ;;  %v3981_v1 = vsel %vm90_vm0, %v13801_v57, 0.0 }
 0x515   :  { %v3982_v4 = vadd.f32 %v3981_v1, %v3980_v48 }
 0x516   :  { %v13807_v51 = vpop.f32.mrb[48].mxu0 }
 0x517   :  { %v3984_v21 = vadd.f32 %v3983_v5, %v3982_v4  ;;  %18165 = vst [vmem:[#allocation12_spill] sm:$0xff] %v13807_v51  ;;  %v13809_v6 = vpop.f32.mrb[49].mxu0  ;;  %v3987_v61 = vsel %vm90_vm0, %v13807_v51, 0.0 }
 0x518   :  { %18166 = vst [vmem:[#allocation13_spill] sm:$0xff] %v13809_v6  ;;  %v3985_v7 = vsel %vm90_vm0, %v13809_v6, 0.0 }
 0x519   :  { %v3986_v15 = vadd.f32 %v3985_v7, %v3984_v21 }
 0x51b   :  { %v3988_v13 = vadd.f32 %v3987_v61, %v3986_v15 }
 0x51d   :  { %v13815_v17 = vpop.f32.mrb[50].mxu0 }
 0x51e   :  { %18167 = vst [vmem:[#allocation14_spill] sm:$0xff] %v13815_v17  ;;  %v13817_v24 = vpop.f32.mrb[51].mxu0  ;;  %v3991_v41 = vsel %vm90_vm0, %v13815_v17, 0.0 }
 0x51f   :  { %18168 = vst [vmem:[#allocation15_spill] sm:$0xff] %v13817_v24  ;;  %v3989_v27 = vsel %vm90_vm0, %v13817_v24, 0.0 }
 0x520   :  { %v3990_v40 = vadd.f32 %v3989_v27, %v3988_v13 }
 0x522   :  { %v3992_v48 = vadd.f32 %v3991_v41, %v3990_v40 }
 0x525   :  { %v13823_v1 = vpop.f32.mrb[52].mxu0 }
 0x526   :  { %18169 = vst [vmem:[#allocation16_spill] sm:$0xff] %v13823_v1  ;;  %v13825_v4 = vpop.f32.mrb[53].mxu0  ;;  %v3995_v7 = vsel %vm90_vm0, %v13823_v1, 0.0 }
 0x527   :  { %18170 = vst [vmem:[#allocation17_spill] sm:$0xff] %v13825_v4  ;;  %v3993_v5 = vsel %vm90_vm0, %v13825_v4, 0.0 }
 0x528   :  { %v3994_v21 = vadd.f32 %v3993_v5, %v3992_v48 }
 0x52a   :  { %v3996_v15 = vadd.f32 %v3995_v7, %v3994_v21 }
 0x52d   :  { %v13831_v61 = vpop.f32.mrb[54].mxu0 }
 0x52e   :  { %18171 = vst [vmem:[#allocation18_spill] sm:$0xff] %v13831_v61  ;;  %v13833_v24 = vpop.f32.mrb[55].mxu0  ;;  %v3999_v40 = vsel %vm90_vm0, %v13831_v61, 0.0 }
 0x52f   :  { %18172 = vst [vmem:[#allocation19_spill] sm:$0xff] %v13833_v24  ;;  %v3997_v13 = vsel %vm90_vm0, %v13833_v24, 0.0 }
 0x530   :  { %v3998_v27 = vadd.f32 %v3997_v13, %v3996_v15 }
 0x532   :  { %v4000_v41 = vadd.f32 %v3999_v40, %v3998_v27 }
 0x535   :  { %v13839_v17 = vpop.f32.mrb[56].mxu0 }
 0x536   :  { %18173 = vst [vmem:[#allocation20_spill] sm:$0xff] %v13839_v17  ;;  %v13841_v4 = vpop.f32.mrb[57].mxu0  ;;  %v4003_v21 = vsel %vm90_vm0, %v13839_v17, 0.0 }
 0x537   :  { %18174 = vst [vmem:[#allocation21_spill] sm:$0xff] %v13841_v4  ;;  %v4001_v48 = vsel %vm90_vm0, %v13841_v4, 0.0 }
 0x538   :  { %v4002_v5 = vadd.f32 %v4001_v48, %v4000_v41 }
 0x53a   :  { %v4004_v7 = vadd.f32 %v4003_v21, %v4002_v5 }
 0x53d   :  { %v13847_v1 = vpop.f32.mrb[58].mxu0 }
 0x53e   :  { %18175 = vst [vmem:[#allocation22_spill] sm:$0xff] %v13847_v1  ;;  %v13849_v24 = vpop.f32.mrb[59].mxu0  ;;  %v4007_v27 = vsel %vm90_vm0, %v13847_v1, 0.0 }
 0x53f   :  { %18176 = vst [vmem:[#allocation23_spill] sm:$0xff] %v13849_v24  ;;  %v4005_v15 = vsel %vm90_vm0, %v13849_v24, 0.0 }
 0x540   :  { %v4006_v13 = vadd.f32 %v4005_v15, %v4004_v7 }
 0x542   :  { %v4008_v40 = vadd.f32 %v4007_v27, %v4006_v13 }
 0x545   :  { %v13855_v61 = vpop.f32.mrb[60].mxu0 }
 0x546   :  { %18177 = vst [vmem:[#allocation24_spill] sm:$0xff] %v13855_v61  ;;  %v13857_v4 = vpop.f32.mrb[61].mxu0  ;;  %v4011_v5 = vsel %vm90_vm0, %v13855_v61, 0.0 }
 0x547   :  { %18178 = vst [vmem:[#allocation25_spill] sm:$0xff] %v13857_v4  ;;  %v4009_v41 = vsel %vm90_vm0, %v13857_v4, 0.0 }
 0x548   :  { %v4010_v48 = vadd.f32 %v4009_v41, %v4008_v40 }
 0x54a   :  { %v4012_v21 = vadd.f32 %v4011_v5, %v4010_v48 }
 0x54d   :  { %v13863_v17 = vpop.f32.mrb[62].mxu0 }
 0x54e   :  { %18179 = vst [vmem:[#allocation26_spill] sm:$0xff] %v13863_v17  ;;  %v13865_v24 = vpop.f32.mrb[63].mxu0  ;;  %v4015_v13 = vsel %vm90_vm0, %v13863_v17, 0.0 }
 0x54f   :  { %v4013_v7 = vsel %vm90_vm0, %v13865_v24, 0.0 }
 0x550   :  { %v4014_v15 = vadd.f32 %v4013_v7, %v4012_v21 }
 0x552   :  { %v4016_v27 = vadd.f32 %v4015_v13, %v4014_v15 }
 0x554   :  { %v4017_v1 = vrot.slane %v4016_v27, 4 }
 0x556   :  { %v4018_v51 = vadd.f32 %v4017_v1, %v4016_v27 }
 0x558   :  { %v4019_v4 = vrot.slane %v4018_v51, 2 }
 0x55a   :  { %v4020_v40 = vadd.f32 %v4019_v4, %v4018_v51 }
 0x55c   :  { %v4021_v41 = vrot.slane %v4020_v40, 1 }
 0x55e   :  { %v4022_v6 = vadd.f32 %v4021_v41, %v4020_v40 }
 0x560   :  { %v13871_v61 = vmul.f32 0.001953125, %v4022_v6 }
 0x562   :  { %v4025_v48 = vsub.f32 %v13619_v32, %v13871_v61  ;;  %v4026_v5 = vsub.f32 %v13615_v30, %v13871_v61  ;;  %v4027_v21 = vsub.f32 %v13625_v38, %v13871_v61  ;;  %v4028_v7 = vsub.f32 %v13623_v36, %v13871_v61 }
 0x563   :  { %v4029_v51 = vsub.f32 %v13633_v46, %v13871_v61  ;;  %v4030_v6 = vsub.f32 %v13631_v42, %v13871_v61  ;;  %v4031_v38 = vsub.f32 %v13641_v53, %v13871_v61  ;;  %v4032_v46 = vsub.f32 %v13639_v52, %v13871_v61 }
 0x564   :  { %v4089_v15 = vmul.f32 %v4025_v48, %v4025_v48  ;;  %v4090_v1 = vmul.f32 %v4026_v5, %v4026_v5  ;;  %v4091_v4 = vmul.f32 %v4027_v21, %v4027_v21  ;;  %v4092_v13 = vmul.f32 %v4028_v7, %v4028_v7 }
 0x565   :  { %v4093_v30 = vmul.f32 %v4029_v51, %v4029_v51  ;;  %v4094_v21 = vmul.f32 %v4030_v6, %v4030_v6  ;;  %v4033_v7 = vsub.f32 %v13649_v55, %v13871_v61  ;;  %v4034_v51 = vsub.f32 %v13647_v10, %v13871_v61 }
 0x566   :  { %v4153_v27 = vsel %vm90_vm0, %v4089_v15, 0.0  ;;  %v4154_v40 = vsel %vm90_vm0, %v4090_v1, 0.0  ;;  %v4156_v48 = vsel %vm90_vm0, %v4091_v4, 0.0  ;;  %v4158_v36 = vsel %vm90_vm0, %v4092_v13, 0.0 }
 0x567   :  { %v4155_v41 = vadd.f32 %v4154_v40, %v4153_v27  ;;  %v4095_v15 = vmul.f32 %v4031_v38, %v4031_v38  ;;  %v4160_v1 = vsel %vm90_vm0, %v4093_v30, 0.0  ;;  %v4096_v40 = vmul.f32 %v4032_v46, %v4032_v46 }
 0x568   :  { %v4162_v4 = vsel %vm90_vm0, %v4094_v21, 0.0  ;;  %v4035_v6 = vsub.f32 %v13657_v9, %v13871_v61  ;;  %v4036_v38 = vsub.f32 %v13655_v8, %v13871_v61  ;;  %v4037_v46 = vsub.f32 %v13665_v37, %v13871_v61 }
 0x569   :  { %v4157_v5 = vadd.f32 %v4156_v48, %v4155_v41  ;;  %v4097_v48 = vmul.f32 %v4033_v7, %v4033_v7  ;;  %v4166_v30 = vsel %vm90_vm0, %v4096_v40, 0.0  ;;  %v4038_v7 = vsub.f32 %v13663_v35, %v13871_v61 }
 0x56b   :  { %v4159_v42 = vadd.f32 %v4158_v36, %v4157_v5  ;;  %v4164_v36 = vsel %vm90_vm0, %v4095_v15, 0.0  ;;  %v4098_v5 = vmul.f32 %v4034_v51, %v4034_v51  ;;  %v4168_v21 = vsel %vm90_vm0, %v4097_v48, 0.0 }
 0x56c   :  { %v4039_v51 = vsub.f32 %v13673_v63, %v13871_v61 }
 0x56d   :  { %v4161_v27 = vadd.f32 %v4160_v1, %v4159_v42  ;;  %v4099_v1 = vmul.f32 %v4035_v6, %v4035_v6  ;;  %v4170_v15 = vsel %vm90_vm0, %v4098_v5, 0.0  ;;  %v4040_v6 = vsub.f32 %v13671_v62, %v13871_v61 }
 0x56f   :  { %v4163_v41 = vadd.f32 %v4162_v4, %v4161_v27  ;;  %v4100_v4 = vmul.f32 %v4036_v38, %v4036_v38  ;;  %v4172_v40 = vsel %vm90_vm0, %v4099_v1, 0.0  ;;  %v4041_v38 = vsub.f32 %v13681_v45, %v13871_v61 }
 0x571   :  { %v4165_v13 = vadd.f32 %v4164_v36, %v4163_v41  ;;  %v4101_v36 = vmul.f32 %v4037_v46, %v4037_v46  ;;  %v4174_v48 = vsel %vm90_vm0, %v4100_v4, 0.0  ;;  %v4042_v46 = vsub.f32 %v13679_v44, %v13871_v61 }
 0x573   :  { %v4167_v42 = vadd.f32 %v4166_v30, %v4165_v13  ;;  %v4102_v30 = vmul.f32 %v4038_v7, %v4038_v7  ;;  %v4176_v5 = vsel %vm90_vm0, %v4101_v36, 0.0  ;;  %v4043_v7 = vsub.f32 %v13689_v54, %v13871_v61 }
 0x575   :  { %v4169_v27 = vadd.f32 %v4168_v21, %v4167_v42  ;;  %v4103_v21 = vmul.f32 %v4039_v51, %v4039_v51  ;;  %v4178_v1 = vsel %vm90_vm0, %v4102_v30, 0.0  ;;  %v4044_v51 = vsub.f32 %v13687_v11, %v13871_v61 }
 0x577   :  { %v4171_v41 = vadd.f32 %v4170_v15, %v4169_v27  ;;  %v4104_v15 = vmul.f32 %v4040_v6, %v4040_v6  ;;  %v4180_v4 = vsel %vm90_vm0, %v4103_v21, 0.0  ;;  %v4045_v6 = vsub.f32 %v13697_v23, %v13871_v61 }
 0x579   :  { %v4173_v13 = vadd.f32 %v4172_v40, %v4171_v41  ;;  %v4105_v40 = vmul.f32 %v4041_v38, %v4041_v38  ;;  %v4182_v36 = vsel %vm90_vm0, %v4104_v15, 0.0  ;;  %v4046_v38 = vsub.f32 %v13695_v20, %v13871_v61 }
 0x57b   :  { %v4175_v42 = vadd.f32 %v4174_v48, %v4173_v13  ;;  %v4106_v48 = vmul.f32 %v4042_v46, %v4042_v46  ;;  %v4184_v30 = vsel %vm90_vm0, %v4105_v40, 0.0  ;;  %v4047_v46 = vsub.f32 %v13705_v33, %v13871_v61 }
 0x57d   :  { %v4177_v27 = vadd.f32 %v4176_v5, %v4175_v42  ;;  %v4107_v5 = vmul.f32 %v4043_v7, %v4043_v7  ;;  %v4186_v21 = vsel %vm90_vm0, %v4106_v48, 0.0  ;;  %v4048_v7 = vsub.f32 %v13703_v31, %v13871_v61 }
 0x57f   :  { %v4179_v41 = vadd.f32 %v4178_v1, %v4177_v27  ;;  %v4108_v1 = vmul.f32 %v4044_v51, %v4044_v51  ;;  %v4188_v15 = vsel %vm90_vm0, %v4107_v5, 0.0  ;;  %v4049_v51 = vsub.f32 %v13713_v47, %v13871_v61 }
 0x581   :  { %v4181_v13 = vadd.f32 %v4180_v4, %v4179_v41  ;;  %v4109_v4 = vmul.f32 %v4045_v6, %v4045_v6  ;;  %v4190_v40 = vsel %vm90_vm0, %v4108_v1, 0.0  ;;  %v4050_v6 = vsub.f32 %v13711_v43, %v13871_v61 }
 0x583   :  { %v4183_v42 = vadd.f32 %v4182_v36, %v4181_v13  ;;  %v4110_v36 = vmul.f32 %v4046_v38, %v4046_v38  ;;  %v4192_v48 = vsel %vm90_vm0, %v4109_v4, 0.0  ;;  %v4051_v38 = vsub.f32 %v13721_v3, %v13871_v61 }
 0x585   :  { %v4185_v27 = vadd.f32 %v4184_v30, %v4183_v42  ;;  %v4111_v30 = vmul.f32 %v4047_v46, %v4047_v46  ;;  %v4194_v5 = vsel %vm90_vm0, %v4110_v36, 0.0  ;;  %v4052_v46 = vsub.f32 %v13719_v2, %v13871_v61 }
 0x587   :  { %v4187_v41 = vadd.f32 %v4186_v21, %v4185_v27  ;;  %v4112_v21 = vmul.f32 %v4048_v7, %v4048_v7  ;;  %v4196_v1 = vsel %vm90_vm0, %v4111_v30, 0.0  ;;  %v4053_v7 = vsub.f32 %v13729_v14, %v13871_v61 }
 0x588   :  { %v4116_v30 = vmul.f32 %v4052_v46, %v4052_v46  ;;  %v4057_v46 = vsub.f32 %v13745_v29, %v13871_v61 }
 0x589   :  { %v4189_v13 = vadd.f32 %v4188_v15, %v4187_v41  ;;  %v4113_v15 = vmul.f32 %v4049_v51, %v4049_v51  ;;  %v4198_v4 = vsel %vm90_vm0, %v4112_v21, 0.0  ;;  %v4054_v51 = vsub.f32 %v13727_v12, %v13871_v61 }
 0x58a   :  { %v4055_v21 = vsub.f32 %v13737_v59, %v13871_v61 }
 0x58b   :  { %v4191_v42 = vadd.f32 %v4190_v40, %v4189_v13  ;;  %v4114_v40 = vmul.f32 %v4050_v6, %v4050_v6  ;;  %v4200_v36 = vsel %vm90_vm0, %v4113_v15, 0.0  ;;  %v4056_v15 = vsub.f32 %v13735_v58, %v13871_v61 }
 0x58d   :  { %v4193_v27 = vadd.f32 %v4192_v48, %v4191_v42  ;;  %v4115_v48 = vmul.f32 %v4051_v38, %v4051_v38 }
 0x58f   :  { %v4195_v41 = vadd.f32 %v4194_v5, %v4193_v27  ;;  %v4799_v27 = vld [vmem:[#allocation3 + $0x9] sm:$0xff] }
 0x590   :  { %4928 = vrot.lane.b32.xlu1 %v4799_v27, %s10383_s28  ;;  %v4119_v27 = vmul.f32 %v4055_v21, %v4055_v21  ;;  %v4060_v21 = vsub.f32 %v13751_v18, %v13871_v61 }
 0x591   :  { %v4197_v13 = vadd.f32 %v4196_v1, %v4195_v41  ;;  %v4202_v41 = vsel %vm90_vm0, %v4114_v40, 0.0  ;;  %v4117_v1 = vmul.f32 %v4053_v7, %v4053_v7  ;;  %v4058_v7 = vsub.f32 %v13743_v28, %v13871_v61 }
 0x593   :  { %v4199_v42 = vadd.f32 %v4198_v4, %v4197_v13  ;;  %v4204_v13 = vsel %vm90_vm0, %v4115_v48, 0.0  ;;  %v4118_v4 = vmul.f32 %v4054_v51, %v4054_v51  ;;  %v4208_v40 = vsel %vm90_vm0, %v4117_v1, 0.0 }
 0x594   :  { %v4059_v51 = vsub.f32 %v13753_v19, %v13871_v61 }
 0x595   :  { %v4201_v5 = vadd.f32 %v4200_v36, %v4199_v42  ;;  %v4206_v42 = vsel %vm90_vm0, %v4116_v30, 0.0  ;;  %v4210_v48 = vsel %vm90_vm0, %v4118_v4, 0.0  ;;  %v4212_v30 = vsel %vm90_vm0, %v4119_v27, 0.0 }
 0x596   :  { %v4124_v27 = vmul.f32 %v4060_v21, %v4060_v21  ;;  %v4065_v21 = vsub.f32 %v13777_v50, %v13871_v61 }
 0x597   :  { %v4203_v6 = vadd.f32 %v4202_v41, %v4201_v5  ;;  %v4120_v41 = vmul.f32 %v4056_v15, %v4056_v15  ;;  %v4061_v15 = vsub.f32 %v13761_v39, %v13871_v61 }
 0x599   :  { %v4205_v38 = vadd.f32 %v4204_v13, %v4203_v6  ;;  %v4121_v13 = vmul.f32 %v4057_v46, %v4057_v46  ;;  %v4214_v1 = vsel %vm90_vm0, %v4120_v41, 0.0  ;;  %v4062_v46 = vsub.f32 %v13759_v34, %v13871_v61 }
 0x59a   :  { %v4063_v41 = vsub.f32 %v13769_v0, %v13871_v61 }
 0x59b   :  { %v4207_v36 = vadd.f32 %v4206_v42, %v4205_v38  ;;  %v4122_v42 = vmul.f32 %v4058_v7, %v4058_v7  ;;  %v4216_v4 = vsel %vm90_vm0, %v4121_v13, 0.0  ;;  %v4064_v13 = vsub.f32 %v13767_v56, %v13871_v61 }
 0x59d   :  { %v4209_v5 = vadd.f32 %v4208_v40, %v4207_v36  ;;  %v4123_v40 = vmul.f32 %v4059_v51, %v4059_v51 }
 0x59f   :  { %v4211_v6 = vadd.f32 %v4210_v48, %v4209_v5  ;;  %v4798_v5 = vld [vmem:[#allocation3 + $0x1] sm:$0xff] }
 0x5a0   :  { %4926 = vrot.lane.b32.xlu0 %v4798_v5, %s10383_s28  ;;  %v4127_v5 = vmul.f32 %v4063_v41, %v4063_v41  ;;  %v4068_v41 = vsub.f32 %v13783_v16, %v13871_v61 }
 0x5a1   :  { %v4213_v38 = vadd.f32 %v4212_v30, %v4211_v6  ;;  %v4218_v6 = vsel %vm90_vm0, %v4122_v42, 0.0  ;;  %v4125_v30 = vmul.f32 %v4061_v15, %v4061_v15  ;;  %v4066_v15 = vsub.f32 %v13775_v22, %v13871_v61 }
 0x5a3   :  { %v4215_v36 = vadd.f32 %v4214_v1, %v4213_v38  ;;  %v4220_v38 = vsel %vm90_vm0, %v4123_v40, 0.0  ;;  %v4126_v1 = vmul.f32 %v4062_v46, %v4062_v46  ;;  %v4224_v42 = vsel %vm90_vm0, %v4125_v30, 0.0 }
 0x5a4   :  { %v4067_v46 = vsub.f32 %v13785_v60, %v13871_v61 }
 0x5a5   :  { %v4217_v48 = vadd.f32 %v4216_v4, %v4215_v36  ;;  %v4222_v36 = vsel %vm90_vm0, %v4124_v27, 0.0  ;;  %v4226_v40 = vsel %vm90_vm0, %v4126_v1, 0.0  ;;  %v4228_v27 = vsel %vm90_vm0, %v4127_v5, 0.0 }
 0x5a7   :  { %v4219_v7 = vadd.f32 %v4218_v6, %v4217_v48  ;;  %v4128_v6 = vmul.f32 %v4064_v13, %v4064_v13  ;;  %v4069_v13 = vsub.f32 %v13793_v26, %v13871_v61 }
 0x5a9   :  { %v4221_v51 = vadd.f32 %v4220_v38, %v4219_v7  ;;  %v4129_v38 = vmul.f32 %v4065_v21, %v4065_v21  ;;  %v4230_v30 = vsel %vm90_vm0, %v4128_v6, 0.0  ;;  %v4070_v21 = vsub.f32 %v13791_v25, %v13871_v61 }
 0x5ab   :  { %v4223_v4 = vadd.f32 %v4222_v36, %v4221_v51  ;;  %v4130_v36 = vmul.f32 %v4066_v15, %v4066_v15  ;;  %v4232_v1 = vsel %vm90_vm0, %v4129_v38, 0.0  ;;  %v4071_v15 = vsub.f32 %v13801_v57, %v13871_v61 }
 0x5ad   :  { %v4225_v48 = vadd.f32 %v4224_v42, %v4223_v4  ;;  %v4131_v42 = vmul.f32 %v4067_v46, %v4067_v46  ;;  %v4234_v5 = vsel %vm90_vm0, %v4130_v36, 0.0  ;;  %v4072_v46 = vsub.f32 %v13799_v49, %v13871_v61 }
 0x5ae   :  { %v4135_v25 = vmul.f32 %v4071_v15, %v4071_v15 }
 0x5af   :  { %v4227_v7 = vadd.f32 %v4226_v40, %v4225_v48  ;;  %v4132_v40 = vmul.f32 %v4068_v41, %v4068_v41  ;;  %v4236_v6 = vsel %vm90_vm0, %v4131_v42, 0.0  ;;  %v4136_v57 = vmul.f32 %v4072_v46, %v4072_v46 }
 0x5b1   :  { %v4229_v51 = vadd.f32 %v4228_v27, %v4227_v7  ;;  %v4133_v27 = vmul.f32 %v4069_v13, %v4069_v13  ;;  %v4238_v38 = vsel %vm90_vm0, %v4132_v40, 0.0  ;;  %v4244_v40 = vsel %vm90_vm0, %v4135_v25, 0.0 }
 0x5b3   :  { %v4231_v4 = vadd.f32 %v4230_v30, %v4229_v51  ;;  %v4134_v30 = vmul.f32 %v4070_v21, %v4070_v21  ;;  %v4240_v36 = vsel %vm90_vm0, %v4133_v27, 0.0  ;;  %v4246_v27 = vsel %vm90_vm0, %v4136_v57, 0.0 }
 0x5b5   :  { %v4233_v48 = vadd.f32 %v4232_v1, %v4231_v4  ;;  %v18180_v1 = vld [vmem:[#allocation13_spill] sm:$0xff]  ;;  %v4242_v42 = vsel %vm90_vm0, %v4134_v30, 0.0 }
 0x5b6   :  { %v4073_v41 = vsub.f32 %v18180_v1, %v13871_v61 }
 0x5b7   :  { %v4235_v7 = vadd.f32 %v4234_v5, %v4233_v48  ;;  %v18181_v5 = vld [vmem:[#allocation12_spill] sm:$0xff] }
 0x5b8   :  { %v4074_v13 = vsub.f32 %v18181_v5, %v13871_v61  ;;  %v4137_v49 = vmul.f32 %v4073_v41, %v4073_v41 }
 0x5b9   :  { %v4237_v51 = vadd.f32 %v4236_v6, %v4235_v7  ;;  %v18182_v6 = vld [vmem:[#allocation15_spill] sm:$0xff] }
 0x5ba   :  { %v4075_v21 = vsub.f32 %v18182_v6, %v13871_v61  ;;  %v4138_v1 = vmul.f32 %v4074_v13, %v4074_v13  ;;  %v4248_v30 = vsel %vm90_vm0, %v4137_v49, 0.0 }
 0x5bb   :  { %v4239_v4 = vadd.f32 %v4238_v38, %v4237_v51  ;;  %v18183_v38 = vld [vmem:[#allocation14_spill] sm:$0xff] }
 0x5bc   :  { %v4076_v15 = vsub.f32 %v18183_v38, %v13871_v61  ;;  %v4139_v5 = vmul.f32 %v4075_v21, %v4075_v21  ;;  %v4250_v25 = vsel %vm90_vm0, %v4138_v1, 0.0 }
 0x5bd   :  { %v4241_v48 = vadd.f32 %v4240_v36, %v4239_v4  ;;  %v18184_v36 = vld [vmem:[#allocation17_spill] sm:$0xff] }
 0x5be   :  { %v4077_v46 = vsub.f32 %v18184_v36, %v13871_v61  ;;  %v4140_v6 = vmul.f32 %v4076_v15, %v4076_v15  ;;  %v4252_v57 = vsel %vm90_vm0, %v4139_v5, 0.0 }
 0x5bf   :  { %v4243_v7 = vadd.f32 %v4242_v42, %v4241_v48  ;;  %v18185_v42 = vld [vmem:[#allocation16_spill] sm:$0xff] }
 0x5c0   :  { %v4078_v41 = vsub.f32 %v18185_v42, %v13871_v61  ;;  %v4141_v38 = vmul.f32 %v4077_v46, %v4077_v46  ;;  %v4254_v49 = vsel %vm90_vm0, %v4140_v6, 0.0 }
 0x5c1   :  { %v4245_v51 = vadd.f32 %v4244_v40, %v4243_v7  ;;  %v18186_v40 = vld [vmem:[#allocation19_spill] sm:$0xff] }
 0x5c2   :  { %v4079_v13 = vsub.f32 %v18186_v40, %v13871_v61  ;;  %v4142_v36 = vmul.f32 %v4078_v41, %v4078_v41  ;;  %v4256_v1 = vsel %vm90_vm0, %v4141_v38, 0.0 }
 0x5c3   :  { %v4247_v4 = vadd.f32 %v4246_v27, %v4245_v51  ;;  %v18187_v27 = vld [vmem:[#allocation18_spill] sm:$0xff] }
 0x5c4   :  { %v4080_v21 = vsub.f32 %v18187_v27, %v13871_v61  ;;  %v4143_v42 = vmul.f32 %v4079_v13, %v4079_v13  ;;  %v4258_v5 = vsel %vm90_vm0, %v4142_v36, 0.0 }
 0x5c5   :  { %v4249_v48 = vadd.f32 %v4248_v30, %v4247_v4  ;;  %v18188_v30 = vld [vmem:[#allocation21_spill] sm:$0xff] }
 0x5c6   :  { %v4081_v15 = vsub.f32 %v18188_v30, %v13871_v61  ;;  %v4144_v40 = vmul.f32 %v4080_v21, %v4080_v21  ;;  %v4260_v6 = vsel %vm90_vm0, %v4143_v42, 0.0 }
 0x5c7   :  { %v4251_v7 = vadd.f32 %v4250_v25, %v4249_v48  ;;  %v18189_v25 = vld [vmem:[#allocation20_spill] sm:$0xff] }
 0x5c8   :  { %v4082_v46 = vsub.f32 %v18189_v25, %v13871_v61  ;;  %v4145_v27 = vmul.f32 %v4081_v15, %v4081_v15  ;;  %v4262_v38 = vsel %vm90_vm0, %v4144_v40, 0.0 }
 0x5c9   :  { %v4253_v51 = vadd.f32 %v4252_v57, %v4251_v7  ;;  %v18190_v57 = vld [vmem:[#allocation23_spill] sm:$0xff] }
 0x5ca   :  { %v4083_v41 = vsub.f32 %v18190_v57, %v13871_v61  ;;  %v4146_v30 = vmul.f32 %v4082_v46, %v4082_v46  ;;  %v4264_v36 = vsel %vm90_vm0, %v4145_v27, 0.0  ;;  %v4087_v46 = vsub.f32 %v13865_v24, %v13871_v61 }
 0x5cb   :  { %v4255_v4 = vadd.f32 %v4254_v49, %v4253_v51  ;;  %v18191_v49 = vld [vmem:[#allocation22_spill] sm:$0xff] }
 0x5cc   :  { %v4084_v13 = vsub.f32 %v18191_v49, %v13871_v61  ;;  %v4147_v25 = vmul.f32 %v4083_v41, %v4083_v41  ;;  %v4266_v42 = vsel %vm90_vm0, %v4146_v30, 0.0  ;;  %v4088_v41 = vsub.f32 %v13863_v17, %v13871_v61 }
 0x5cd   :  { %v4257_v48 = vadd.f32 %v4256_v1, %v4255_v4  ;;  %v18192_v1 = vld [vmem:[#allocation25_spill] sm:$0xff] }
 0x5ce   :  { %v4085_v21 = vsub.f32 %v18192_v1, %v13871_v61  ;;  %v4148_v57 = vmul.f32 %v4084_v13, %v4084_v13  ;;  %v4268_v40 = vsel %vm90_vm0, %v4147_v25, 0.0  ;;  %v4152_v30 = vmul.f32 %v4088_v41, %v4088_v41 }
 0x5cf   :  { %v4259_v7 = vadd.f32 %v4258_v5, %v4257_v48  ;;  %v18193_v5 = vld [vmem:[#allocation24_spill] sm:$0xff] }
 0x5d0   :  { %v4086_v15 = vsub.f32 %v18193_v5, %v13871_v61  ;;  %v4270_v27 = vsel %vm90_vm0, %v4148_v57, 0.0  ;;  %v4278_v25 = vsel %vm90_vm0, %v4152_v30, 0.0 }
 0x5d1   :  { %v4261_v51 = vadd.f32 %v4260_v6, %v4259_v7  ;;  %v4149_v6 = vmul.f32 %v4085_v21, %v4085_v21 }
 0x5d3   :  { %v4263_v4 = vadd.f32 %v4262_v38, %v4261_v51  ;;  %v4150_v38 = vmul.f32 %v4086_v15, %v4086_v15  ;;  %v4272_v13 = vsel %vm90_vm0, %v4149_v6, 0.0  ;;  %v4293_v6 = vlaneseq }
 0x5d5   :  { %v4265_v48 = vadd.f32 %v4264_v36, %v4263_v4  ;;  %v4151_v36 = vmul.f32 %v4087_v46, %v4087_v46  ;;  %v4294_v41 = vshrl.u32 %v4293_v6, 7 }
 0x5d7   :  { %v4267_v7 = vadd.f32 %v4266_v42, %v4265_v48  ;;  %v4274_v48 = vsel %vm90_vm0, %v4150_v38, 0.0  ;;  %v4276_v21 = vsel %vm90_vm0, %v4151_v36, 0.0  ;;  %v14070_v38 = vsub.s32 0, %v4294_v41 }
 0x5d9   :  { %v4269_v51 = vadd.f32 %v4268_v40, %v4267_v7  ;;  %18194 = vst [vmem:[#allocation27_spill] sm:$0xff] %v14070_v38 }
 0x5db   :  { %v4271_v4 = vadd.f32 %v4270_v27, %v4269_v51 }
 0x5dd   :  { %v4273_v5 = vadd.f32 %v4272_v13, %v4271_v4 }
 0x5df   :  { %v4275_v42 = vadd.f32 %v4274_v48, %v4273_v5  ;;  %v3888_v5 = vld [vmem:[%s18023_s2] sm:$0x1] }
 0x5e1   :  { %v4277_v1 = vadd.f32 %v4276_v21, %v4275_v42  ;;  %v18195_v42 = vld [vmem:[#allocation4_spill] sm:$0xff] }
 0x5e3   :  { %v4279_v7 = vadd.f32 %v4278_v25, %v4277_v1  ;;  %v3889_v1 = vld [vmem:[%s18024_s3] sm:$0x1]  ;;  %v18196_v25 = vld [vmem:[#allocation6_spill] sm:$0xff] }
 0x5e5   :  { %v4280_v40 = vrot.slane %v4279_v7, 4 }
 0x5e7   :  { %v4281_v17 = vadd.f32 %v4280_v40, %v4279_v7 }
 0x5e9   :  { %v4282_v15 = vrot.slane %v4281_v17, 2 }
 0x5eb   :  { %v4283_v49 = vadd.f32 %v4282_v15, %v4281_v17  ;;  %v18198_v15 = vld [vmem:[#allocation8_spill] sm:$0xff] }
 0x5ed   :  { %v4284_v57 = vrot.slane %v4283_v49, 1 }
 0x5ef   :  { %v4285_v51 = vadd.f32 %v4284_v57, %v4283_v49 }
 0x5f1   :  { %v4286_v46 = vmul.f32 0.001953125, %v4285_v51 }
 0x5f3   :  { %v4287_v27 = vadd.f32 1e-05, %v4286_v46 }
 0x5f5   :  { %10379 = vrsqrt.f32 %v4287_v27 }
 0x5ff   :  { %v10380_v4 = vpop.eup %10379 }
 0x600   :  { %v4289_v36 = vmul.f32 %v10380_v4, %v3888_v5 }
 0x602   :  { %v4290_v17 = vmul.f32 %v4289_v36, %v13871_v61  ;;  %v14077_v49 = vrot.slane %v4289_v36, %v14070_v38  ;;  %v18197_v61 = vld [vmem:[#allocation5_spill] sm:$0xff] }
 0x604   :  { %v4291_v13 = vsub.f32 %v3889_v1, %v4290_v17  ;;  %v4360_v30 = vmul.f32 %v14077_v49, %v13865_v24  ;;  %v14083_v48 = vmul.f32 %v14077_v49, %v13619_v32  ;;  %v14087_v21 = vmul.f32 %v18195_v42, %v14077_v49  ;;  %v18199_v24 = vld [vmem:[#allocation7_spill] sm:$0xff]  ;;  %v18200_v1 = vld [vmem:[#allocation9_spill] sm:$0xff]  ;;  %v18204_v42 = vld [vmem:[#allocation12_spill] sm:$0xff] }
 0x605   :  { %v14091_v7 = vmul.f32 %v14077_v49, %v18196_v25  ;;  %v14095_v40 = vmul.f32 %v18197_v61, %v14077_v49  ;;  %v14099_v57 = vmul.f32 %v14077_v49, %v18198_v15  ;;  %v14103_v32 = vmul.f32 %v18199_v24, %v14077_v49  ;;  %v18201_v17 = vld [vmem:[#allocation11_spill] sm:$0xff]  ;;  %v18206_v15 = vld [vmem:[#allocation14_spill] sm:$0xff] }
 0x606   :  { %v14106_v51 = vrot.slane %v4291_v13, %v14070_v38  ;;  %v14110_v46 = vmul.f32 %v14077_v49, %v13641_v53  ;;  %v14114_v27 = vmul.f32 %v13639_v52, %v14077_v49  ;;  %v14118_v6 = vmul.f32 %v14077_v49, %v13649_v55  ;;  %v18202_v13 = vld [vmem:[#allocation10_spill] sm:$0xff]  ;;  %v18205_v25 = vld [vmem:[#allocation15_spill] sm:$0xff]  ;;  %v18216_v38 = vld [vmem:[#allocation21_spill] sm:$0xff] }
 0x607   :  { %v14122_v41 = vmul.f32 %v13647_v10, %v14077_v49  ;;  %v14126_v5 = vmul.f32 %v14077_v49, %v13657_v9  ;;  %v14130_v53 = vmul.f32 %v13655_v8, %v14077_v49  ;;  %v14134_v52 = vmul.f32 %v14077_v49, %v13665_v37 }
 0x608   :  { %v4430_v4 = vadd.f32 %v14106_v51, %v4360_v30  ;;  %v14139_v55 = vmul.f32 %v13663_v35, %v14077_v49  ;;  %v14143_v10 = vmul.f32 %v14077_v49, %v13673_v63  ;;  %v14147_v9 = vmul.f32 %v13671_v62, %v14077_v49  ;;  %v18203_v30 = vld [vmem:[#allocation13_spill] sm:$0xff] }
 0x609   :  { %v14151_v8 = vmul.f32 %v14077_v49, %v13681_v45  ;;  %v14155_v37 = vmul.f32 %v13679_v44, %v14077_v49  ;;  %v14159_v35 = vmul.f32 %v14077_v49, %v13689_v54  ;;  %v14163_v63 = vmul.f32 %v13687_v11, %v14077_v49 }
 0x60a   :  { %v4494_v36 = vmax.f32 %v4430_v4, 0.0  ;;  %v14167_v62 = vmul.f32 %v14077_v49, %v13697_v23  ;;  %v14171_v45 = vmul.f32 %v13695_v20, %v14077_v49  ;;  %v14175_v44 = vmul.f32 %v14077_v49, %v13705_v33  ;;  %v18208_v4 = vld [vmem:[#allocation17_spill] sm:$0xff] }
 0x60b   :  { %v14179_v54 = vmul.f32 %v13703_v31, %v14077_v49  ;;  %v14183_v11 = vmul.f32 %v14077_v49, %v13713_v47  ;;  %v14187_v23 = vmul.f32 %v13711_v43, %v14077_v49  ;;  %v14191_v20 = vmul.f32 %v14077_v49, %v13721_v3 }
 0x60c   :  { %4668 = vst.msk [vmem:[#allocation3 + $0x331] sm:$0xff] %vm90_vm0, %v4494_v36  ;;  %v14196_v33 = vmul.f32 %v13719_v2, %v14077_v49  ;;  %v14200_v31 = vmul.f32 %v14077_v49, %v13729_v14  ;;  %v14204_v47 = vmul.f32 %v13727_v12, %v14077_v49  ;;  %v14208_v43 = vmul.f32 %v14077_v49, %v13737_v59 }
 0x60d   :  { %v14212_v3 = vmul.f32 %v13735_v58, %v14077_v49  ;;  %v14216_v2 = vmul.f32 %v14077_v49, %v13745_v29  ;;  %v14220_v14 = vmul.f32 %v13743_v28, %v14077_v49  ;;  %v14224_v12 = vmul.f32 %v14077_v49, %v13753_v19 }
 0x60e   :  { %v14228_v59 = vmul.f32 %v13751_v18, %v14077_v49  ;;  %v14232_v58 = vmul.f32 %v14077_v49, %v13761_v39  ;;  %v14236_v29 = vmul.f32 %v13759_v34, %v14077_v49  ;;  %v14240_v28 = vmul.f32 %v14077_v49, %v13769_v0 }
 0x60f   :  { %v14244_v19 = vmul.f32 %v13767_v56, %v14077_v49  ;;  %v14248_v18 = vmul.f32 %v14077_v49, %v13777_v50  ;;  %v14252_v39 = vmul.f32 %v13775_v22, %v14077_v49  ;;  %v14256_v34 = vmul.f32 %v14077_v49, %v13785_v60 }
 0x610   :  { %v14260_v0 = vmul.f32 %v13783_v16, %v14077_v49  ;;  %v14264_v56 = vmul.f32 %v14077_v49, %v13793_v26  ;;  %v14268_v50 = vmul.f32 %v18200_v1, %v14077_v49  ;;  %v14272_v22 = vmul.f32 %v14077_v49, %v18201_v17  ;;  %v18210_v1 = vld [vmem:[#allocation16_spill] sm:$0xff] }
 0x611   :  { %v14276_v60 = vmul.f32 %v18202_v13, %v14077_v49  ;;  %v14280_v16 = vmul.f32 %v14077_v49, %v18203_v30  ;;  %v14284_v26 = vmul.f32 %v18204_v42, %v14077_v49  ;;  %v14288_v61 = vmul.f32 %v14077_v49, %v18205_v25  ;;  %v18212_v13 = vld [vmem:[#allocation19_spill] sm:$0xff]  ;;  %v18214_v42 = vld [vmem:[#allocation18_spill] sm:$0xff] }
 0x612   :  { %v14292_v24 = vmul.f32 %v18206_v15, %v14077_v49  ;;  %v14296_v36 = vmul.f32 %v14077_v49, %v18208_v4  ;;  %v14300_v17 = vmul.f32 %v18210_v1, %v14077_v49  ;;  %v14304_v30 = vmul.f32 %v14077_v49, %v18212_v13 }
 0x613   :  { %v14308_v25 = vmul.f32 %v18214_v42, %v14077_v49  ;;  %v14312_v15 = vmul.f32 %v14077_v49, %v18216_v38 }
 0x614   :  { %18207 = vst [vmem:[#allocation4_spill] sm:$0xff] %v14292_v24  ;;  %18209 = vst [vmem:[#allocation6_spill] sm:$0xff] %v14296_v36  ;;  %v18218_v24 = vld [vmem:[#allocation20_spill] sm:$0xff]  ;;  %v18219_v36 = vld [vmem:[#allocation23_spill] sm:$0xff] }
 0x615   :  { %18211 = vst [vmem:[#allocation5_spill] sm:$0xff] %v14300_v17  ;;  %18213 = vst [vmem:[#allocation8_spill] sm:$0xff] %v14304_v30  ;;  %v14316_v4 = vmul.f32 %v18218_v24, %v14077_v49  ;;  %v14320_v1 = vmul.f32 %v14077_v49, %v18219_v36  ;;  %v18220_v17 = vld [vmem:[#allocation22_spill] sm:$0xff]  ;;  %v18221_v30 = vld [vmem:[#allocation25_spill] sm:$0xff]  ;;  %v14340_v36 = vadd.f32 %v14106_v51, %v14083_v48 }
 0x616   :  { %18215 = vst [vmem:[#allocation7_spill] sm:$0xff] %v14308_v25  ;;  %18217 = vst [vmem:[#allocation9_spill] sm:$0xff] %v14312_v15  ;;  %v14324_v13 = vmul.f32 %v18220_v17, %v14077_v49  ;;  %v14328_v42 = vmul.f32 %v14077_v49, %v18221_v30  ;;  %v18222_v25 = vld [vmem:[#allocation24_spill] sm:$0xff]  ;;  %v18223_v15 = vld [vmem:[#allocation26_spill] sm:$0xff]  ;;  %v14344_v17 = vadd.f32 %v14106_v51, %v14087_v21 }
 0x617   :  { %v14332_v38 = vmul.f32 %v18222_v25, %v14077_v49  ;;  %v14336_v24 = vmul.f32 %v18223_v15, %v14077_v49  ;;  %v14348_v30 = vadd.f32 %v14106_v51, %v14091_v7  ;;  %v14352_v25 = vadd.f32 %v14106_v51, %v14095_v40  ;;  %v4671_v15 = vld [vmem:[#allocation3 + $0x8] sm:$0xff] }
 0x618   :  { %v14356_v49 = vadd.f32 %v14106_v51, %v14099_v57  ;;  %v14360_v48 = vadd.f32 %v14106_v51, %v14103_v32  ;;  %v14364_v21 = vadd.f32 %v14106_v51, %v14110_v46  ;;  %v14368_v7 = vadd.f32 %v14106_v51, %v14114_v27  ;;  %4735 = vst.msk [vmem:[#allocation2 + $0x8] sm:$0xff] %vm90_vm0, %v4671_v15 }
 0x619   :  { %v14372_v40 = vadd.f32 %v14106_v51, %v14118_v6  ;;  %v14376_v57 = vadd.f32 %v14106_v51, %v14122_v41  ;;  %v14380_v32 = vadd.f32 %v14106_v51, %v14126_v5  ;;  %v14384_v46 = vadd.f32 %v14106_v51, %v14130_v53 }
 0x61a   :  { %v14388_v27 = vadd.f32 %v14106_v51, %v14134_v52  ;;  %v14392_v6 = vadd.f32 %v14106_v51, %v14139_v55  ;;  %v14396_v41 = vadd.f32 %v14106_v51, %v14143_v10  ;;  %v14400_v5 = vadd.f32 %v14106_v51, %v14147_v9 }
 0x61b   :  { %v14404_v53 = vadd.f32 %v14106_v51, %v14151_v8  ;;  %v14408_v52 = vadd.f32 %v14106_v51, %v14155_v37  ;;  %v14412_v55 = vadd.f32 %v14106_v51, %v14159_v35  ;;  %v14416_v10 = vadd.f32 %v14106_v51, %v14163_v63  ;;  %v18230_v15 = vld [vmem:[#allocation6_spill] sm:$0xff] }
 0x61c   :  { %v14420_v9 = vadd.f32 %v14106_v51, %v14167_v62  ;;  %v14424_v8 = vadd.f32 %v14106_v51, %v14171_v45  ;;  %v14428_v37 = vadd.f32 %v14106_v51, %v14175_v44  ;;  %v14432_v35 = vadd.f32 %v14106_v51, %v14179_v54  ;;  %v4670_v54 = vld [vmem:[#allocation3] sm:$0xff] }
 0x61d   :  { %v14436_v63 = vadd.f32 %v14106_v51, %v14183_v11  ;;  %v14440_v62 = vadd.f32 %v14106_v51, %v14187_v23  ;;  %v14444_v45 = vadd.f32 %v14106_v51, %v14191_v20  ;;  %v14448_v44 = vadd.f32 %v14106_v51, %v14196_v33  ;;  %4734 = vst.msk [vmem:[#allocation2] sm:$0xff] %vm90_vm0, %v4670_v54  ;;  %v18231_v54 = vld [vmem:[#allocation5_spill] sm:$0xff] }
 0x61e   :  { %18224 = vst [vmem:[#allocation11_spill] sm:$0xff] %v14428_v37  ;;  %18225 = vst [vmem:[#allocation10_spill] sm:$0xff] %v14432_v35  ;;  %v4929_v37 = vpop.permute.xlu1 %4928  ;;  %v4927_v35 = vpop.permute.xlu0 %4926  ;;  %v14452_v11 = vadd.f32 %v14106_v51, %v14200_v31  ;;  %v14456_v23 = vadd.f32 %v14106_v51, %v14204_v47  ;;  %v14460_v20 = vadd.f32 %v14106_v51, %v14208_v43 }
 0x61f   :  { %v14464_v33 = vadd.f32 %v14106_v51, %v14212_v3  ;;  %v14470_v31 = vadd.f32 %v14106_v51, %v14216_v2  ;;  %v14474_v47 = vadd.f32 %v14106_v51, %v14220_v14  ;;  %v14478_v43 = vadd.f32 %v14106_v51, %v14224_v12  ;;  %5119 = vst.msk [vmem:[#allocation2 + $0x8] sm:$0xff] %vm475_vm1, %v4929_v37 }
 0x620   :  { %v14482_v3 = vadd.f32 %v14106_v51, %v14228_v59  ;;  %5118 = vst.msk [vmem:[#allocation2] sm:$0xff] %vm475_vm1, %v4927_v35  ;;  %v14488_v2 = vadd.f32 %v14106_v51, %v14232_v58  ;;  %v14492_v14 = vadd.f32 %v14106_v51, %v14236_v29  ;;  %v14496_v12 = vadd.f32 %v14106_v51, %v14240_v28  ;;  %v18229_v35 = vld [vmem:[#allocation4_spill] sm:$0xff] }
 0x621   :  { %v14500_v59 = vadd.f32 %v14106_v51, %v14244_v19  ;;  %v14504_v37 = vadd.f32 %v14106_v51, %v14248_v18  ;;  %v14508_v58 = vadd.f32 %v14106_v51, %v14252_v39  ;;  %v14512_v29 = vadd.f32 %v14106_v51, %v14256_v34 }
 0x622   :  { %v14516_v28 = vadd.f32 %v14106_v51, %v14260_v0  ;;  %v14520_v19 = vadd.f32 %v14106_v51, %v14264_v56  ;;  %v14524_v18 = vadd.f32 %v14106_v51, %v14268_v50  ;;  %v14528_v39 = vadd.f32 %v14106_v51, %v14272_v22 }
 0x623   :  { %v14532_v34 = vadd.f32 %v14106_v51, %v14276_v60  ;;  %v14536_v0 = vadd.f32 %v14106_v51, %v14280_v16  ;;  %v14540_v56 = vadd.f32 %v14106_v51, %v14284_v26  ;;  %v14544_v50 = vadd.f32 %v14106_v51, %v14288_v61 }
 0x624   :  { %v14548_v22 = vadd.f32 %v14106_v51, %v18229_v35  ;;  %v14552_v60 = vadd.f32 %v14106_v51, %v18230_v15  ;;  %v14556_v16 = vadd.f32 %v14106_v51, %v18231_v54  ;;  %v14572_v15 = vadd.f32 %v14106_v51, %v14316_v4 }
 0x625   :  { %18226 = vst [vmem:[#allocation13_spill] sm:$0xff] %v14536_v0  ;;  %18227 = vst [vmem:[#allocation12_spill] sm:$0xff] %v14540_v56  ;;  %v18232_v0 = vld [vmem:[#allocation8_spill] sm:$0xff]  ;;  %v18233_v56 = vld [vmem:[#allocation7_spill] sm:$0xff]  ;;  %v14576_v54 = vadd.f32 %v14106_v51, %v14320_v1  ;;  %v14592_v4 = vadd.f32 %v14106_v51, %v14336_v24  ;;  %v4433_v1 = vmax.f32 %v14344_v17, 0.0  ;;  %v4442_v24 = vmax.f32 %v14380_v32, 0.0 }
 0x626   :  { %18228 = vst [vmem:[#allocation15_spill] sm:$0xff] %v14544_v50  ;;  %v14560_v26 = vadd.f32 %v14106_v51, %v18232_v0  ;;  %v14564_v61 = vadd.f32 %v14106_v51, %v18233_v56  ;;  %v18234_v50 = vld [vmem:[#allocation9_spill] sm:$0xff]  ;;  %18235 = vst [vmem:[#allocation14_spill] sm:$0xff] %v14572_v15  ;;  %v14580_v0 = vadd.f32 %v14106_v51, %v14324_v13  ;;  %v4432_v15 = vmax.f32 %v14340_v36, 0.0 }
 0x627   :  { %v14568_v35 = vadd.f32 %v14106_v51, %v18234_v50  ;;  %18236 = vst [vmem:[#allocation17_spill] sm:$0xff] %v14576_v54  ;;  %v14584_v56 = vadd.f32 %v14106_v51, %v14328_v42  ;;  %v14588_v50 = vadd.f32 %v14106_v51, %v14332_v38  ;;  %v4434_v54 = vmax.f32 %v14348_v30, 0.0  ;;  %4607 = vst.msk [vmem:[#allocation3 + $0x21] sm:$0xff] %vm90_vm0, %v4433_v1 }
 0x628   :  { %18237 = vst [vmem:[#allocation16_spill] sm:$0xff] %v14580_v0  ;;  %v4435_v13 = vmax.f32 %v14352_v25, 0.0  ;;  %v4436_v0 = vmax.f32 %v14356_v49, 0.0  ;;  %v4437_v42 = vmax.f32 %v14360_v48, 0.0  ;;  %v4439_v38 = vmax.f32 %v14368_v7, 0.0  ;;  %4606 = vst.msk [vmem:[#allocation3 + $0x19] sm:$0xff] %vm90_vm0, %v4432_v15 }
 0x629   :  { %18238 = vst [vmem:[#allocation19_spill] sm:$0xff] %v14584_v56  ;;  %18239 = vst [vmem:[#allocation18_spill] sm:$0xff] %v14588_v50  ;;  %v4438_v56 = vmax.f32 %v14364_v21, 0.0  ;;  %v4440_v50 = vmax.f32 %v14372_v40, 0.0  ;;  %v4441_v51 = vmax.f32 %v14376_v57, 0.0  ;;  %v4443_v36 = vmax.f32 %v14384_v46, 0.0 }
 0x62a   :  { %v4444_v17 = vmax.f32 %v14388_v27, 0.0  ;;  %4608 = vst.msk [vmem:[#allocation3 + $0x31] sm:$0xff] %vm90_vm0, %v4434_v54  ;;  %4609 = vst.msk [vmem:[#allocation3 + $0x39] sm:$0xff] %vm90_vm0, %v4435_v13  ;;  %v4445_v30 = vmax.f32 %v14392_v6, 0.0  ;;  %v4446_v25 = vmax.f32 %v14396_v41, 0.0  ;;  %v4447_v49 = vmax.f32 %v14400_v5, 0.0 }
 0x62b   :  { %4610 = vst.msk [vmem:[#allocation3 + $0x49] sm:$0xff] %vm90_vm0, %v4436_v0  ;;  %v4448_v48 = vmax.f32 %v14404_v53, 0.0  ;;  %4611 = vst.msk [vmem:[#allocation3 + $0x51] sm:$0xff] %vm90_vm0, %v4437_v42  ;;  %v4449_v21 = vmax.f32 %v14408_v52, 0.0  ;;  %v4450_v7 = vmax.f32 %v14412_v55, 0.0  ;;  %v4451_v40 = vmax.f32 %v14416_v10, 0.0 }
 0x62c   :  { %4612 = vst.msk [vmem:[#allocation3 + $0x61] sm:$0xff] %vm90_vm0, %v4438_v56  ;;  %4613 = vst.msk [vmem:[#allocation3 + $0x69] sm:$0xff] %vm90_vm0, %v4439_v38  ;;  %v4452_v57 = vmax.f32 %v14420_v9, 0.0  ;;  %v4453_v32 = vmax.f32 %v14424_v8, 0.0  ;;  %v18240_v46 = vld [vmem:[#allocation11_spill] sm:$0xff]  ;;  %v18241_v6 = vld [vmem:[#allocation10_spill] sm:$0xff] }
 0x62d   :  { %4614 = vst.msk [vmem:[#allocation3 + $0x79] sm:$0xff] %vm90_vm0, %v4440_v50  ;;  %4615 = vst.msk [vmem:[#allocation3 + $0x81] sm:$0xff] %vm90_vm0, %v4441_v51  ;;  %v4454_v27 = vmax.f32 %v18240_v46, 0.0  ;;  %v4455_v41 = vmax.f32 %v18241_v6, 0.0  ;;  %v4456_v5 = vmax.f32 %v14436_v63, 0.0  ;;  %v4457_v53 = vmax.f32 %v14440_v62, 0.0 }
 0x62e   :  { %4616 = vst.msk [vmem:[#allocation3 + $0x91] sm:$0xff] %vm90_vm0, %v4442_v24  ;;  %4617 = vst.msk [vmem:[#allocation3 + $0x99] sm:$0xff] %vm90_vm0, %v4443_v36  ;;  %v4458_v52 = vmax.f32 %v14444_v45, 0.0  ;;  %v4459_v55 = vmax.f32 %v14448_v44, 0.0  ;;  %v4460_v10 = vmax.f32 %v14452_v11, 0.0  ;;  %v4461_v9 = vmax.f32 %v14456_v23, 0.0 }
 0x62f   :  { %4618 = vst.msk [vmem:[#allocation3 + $0xa9] sm:$0xff] %vm90_vm0, %v4444_v17  ;;  %4619 = vst.msk [vmem:[#allocation3 + $0xb1] sm:$0xff] %vm90_vm0, %v4445_v30  ;;  %v4462_v8 = vmax.f32 %v14460_v20, 0.0  ;;  %v4463_v63 = vmax.f32 %v14464_v33, 0.0  ;;  %v4464_v62 = vmax.f32 %v14470_v31, 0.0  ;;  %v4465_v45 = vmax.f32 %v14474_v47, 0.0 }
 0x630   :  { %4620 = vst.msk [vmem:[#allocation3 + $0xc1] sm:$0xff] %vm90_vm0, %v4446_v25  ;;  %4621 = vst.msk [vmem:[#allocation3 + $0xc9] sm:$0xff] %vm90_vm0, %v4447_v49  ;;  %v4466_v44 = vmax.f32 %v14478_v43, 0.0  ;;  %v4467_v11 = vmax.f32 %v14482_v3, 0.0  ;;  %v4468_v23 = vmax.f32 %v14488_v2, 0.0  ;;  %v4800_v20 = vld [vmem:[#allocation3 + $0x19] sm:$0xff] }
 0x631   :  { %4622 = vst.msk [vmem:[#allocation3 + $0xd9] sm:$0xff] %vm90_vm0, %v4448_v48  ;;  %4623 = vst.msk [vmem:[#allocation3 + $0xe1] sm:$0xff] %vm90_vm0, %v4449_v21  ;;  %v14660_v33 = vld [vmem:[#allocation3 + $0x18] sm:$0xff]  ;;  %v4469_v31 = vmax.f32 %v14492_v14, 0.0  ;;  %v4470_v47 = vmax.f32 %v14496_v12, 0.0  ;;  %v4471_v43 = vmax.f32 %v14500_v59, 0.0  ;;  %4930 = vrot.lane.b32.xlu0 %v4800_v20, %s10383_s28 }
 0x632   :  { %4624 = vst.msk [vmem:[#allocation3 + $0xf1] sm:$0xff] %vm90_vm0, %v4450_v7  ;;  %4625 = vst.msk [vmem:[#allocation3 + $0xf9] sm:$0xff] %vm90_vm0, %v4451_v40  ;;  %v4472_v3 = vmax.f32 %v14504_v37, 0.0  ;;  %v4801_v2 = vld [vmem:[#allocation3 + $0x21] sm:$0xff]  ;;  %v4473_v14 = vmax.f32 %v14508_v58, 0.0  ;;  %v4474_v12 = vmax.f32 %v14512_v29, 0.0 }
 0x633   :  { %4626 = vst.msk [vmem:[#allocation3 + $0x109] sm:$0xff] %vm90_vm0, %v4452_v57  ;;  %4627 = vst.msk [vmem:[#allocation3 + $0x111] sm:$0xff] %vm90_vm0, %v4453_v32  ;;  %v4475_v59 = vmax.f32 %v14516_v28, 0.0  ;;  %v4476_v37 = vmax.f32 %v14520_v19, 0.0  ;;  %4932 = vrot.lane.b32.xlu1 %v4801_v2, %s10383_s28  ;;  %v4477_v15 = vmax.f32 %v14524_v18, 0.0  ;;  %v4478_v58 = vmax.f32 %v14528_v39, 0.0 }
 0x634   :  { %4628 = vst.msk [vmem:[#allocation3 + $0x121] sm:$0xff] %vm90_vm0, %v4454_v27  ;;  %4629 = vst.msk [vmem:[#allocation3 + $0x129] sm:$0xff] %vm90_vm0, %v4455_v41  ;;  %v4479_v29 = vmax.f32 %v14532_v34, 0.0  ;;  %v18242_v54 = vld [vmem:[#allocation13_spill] sm:$0xff]  ;;  %v18243_v19 = vld [vmem:[#allocation12_spill] sm:$0xff]  ;;  %v4483_v18 = vmax.f32 %v14548_v22, 0.0 }
 0x635   :  { %4630 = vst.msk [vmem:[#allocation3 + $0x139] sm:$0xff] %vm90_vm0, %v4456_v5  ;;  %4631 = vst.msk [vmem:[#allocation3 + $0x141] sm:$0xff] %vm90_vm0, %v4457_v53  ;;  %v4480_v28 = vmax.f32 %v18242_v54, 0.0  ;;  %v4481_v0 = vmax.f32 %v18243_v19, 0.0  ;;  %v18244_v56 = vld [vmem:[#allocation15_spill] sm:$0xff]  ;;  %v4484_v39 = vmax.f32 %v14552_v60, 0.0 }
 0x636   :  { %4632 = vst.msk [vmem:[#allocation3 + $0x151] sm:$0xff] %vm90_vm0, %v4458_v52  ;;  %4633 = vst.msk [vmem:[#allocation3 + $0x159] sm:$0xff] %vm90_vm0, %v4459_v55  ;;  %v4482_v50 = vmax.f32 %v18244_v56, 0.0  ;;  %v4802_v34 = vld [vmem:[#allocation3 + $0x31] sm:$0xff]  ;;  %v4485_v1 = vmax.f32 %v14556_v16, 0.0  ;;  %v4486_v13 = vmax.f32 %v14560_v26, 0.0 }
 0x637   :  { %4634 = vst.msk [vmem:[#allocation3 + $0x169] sm:$0xff] %vm90_vm0, %v4460_v10  ;;  %4635 = vst.msk [vmem:[#allocation3 + $0x171] sm:$0xff] %vm90_vm0, %v4461_v9  ;;  %v4487_v42 = vmax.f32 %v14564_v61, 0.0  ;;  %v4488_v38 = vmax.f32 %v14568_v35, 0.0  ;;  %v4803_v22 = vld [vmem:[#allocation3 + $0x39] sm:$0xff]  ;;  %4934 = vrot.lane.b32.xlu0 %v4802_v34, %s10383_s28  ;;  %v18245_v60 = vld [vmem:[#allocation14_spill] sm:$0xff] }
 0x638   :  { %4636 = vst.msk [vmem:[#allocation3 + $0x181] sm:$0xff] %vm90_vm0, %v4462_v8  ;;  %4637 = vst.msk [vmem:[#allocation3 + $0x189] sm:$0xff] %vm90_vm0, %v4463_v63  ;;  %v4489_v51 = vmax.f32 %v18245_v60, 0.0  ;;  %v18246_v16 = vld [vmem:[#allocation17_spill] sm:$0xff]  ;;  %v18247_v26 = vld [vmem:[#allocation16_spill] sm:$0xff]  ;;  %4936 = vrot.lane.b32.xlu1 %v4803_v22, %s10383_s28  ;;  %v4495_v25 = vmax.f32 %v14592_v4, 0.0 }
 0x639   :  { %4638 = vst.msk [vmem:[#allocation3 + $0x1c9] sm:$0xff] %vm90_vm0, %v4464_v62  ;;  %4736 = vst.msk [vmem:[#allocation2 + $0x10] sm:$0xff] %vm90_vm0, %v14660_v33  ;;  %v4490_v24 = vmax.f32 %v18246_v16, 0.0  ;;  %v4491_v36 = vmax.f32 %v18247_v26, 0.0  ;;  %v18248_v61 = vld [vmem:[#allocation19_spill] sm:$0xff]  ;;  %v18249_v35 = vld [vmem:[#allocation18_spill] sm:$0xff] }
 0x63a   :  { %4639 = vst.msk [vmem:[#allocation3 + $0x1d1] sm:$0xff] %vm90_vm0, %v4465_v45  ;;  %4640 = vst.msk [vmem:[#allocation3 + $0x1e1] sm:$0xff] %vm90_vm0, %v4466_v44  ;;  %v4492_v17 = vmax.f32 %v18248_v61, 0.0  ;;  %v4493_v30 = vmax.f32 %v18249_v35, 0.0  ;;  %v4804_v49 = vld [vmem:[#allocation3 + $0x49] sm:$0xff]  ;;  %v4805_v4 = vld [vmem:[#allocation3 + $0x51] sm:$0xff] }
 0x63b   :  { %4641 = vst.msk [vmem:[#allocation3 + $0x1e9] sm:$0xff] %vm90_vm0, %v4467_v11  ;;  %4642 = vst.msk [vmem:[#allocation3 + $0x1f9] sm:$0xff] %vm90_vm0, %v4468_v23  ;;  %4938 = vrot.lane.b32.xlu0 %v4804_v49, %s10383_s28  ;;  %v4806_v48 = vld [vmem:[#allocation3 + $0x61] sm:$0xff]  ;;  %v4807_v21 = vld [vmem:[#allocation3 + $0x69] sm:$0xff] }
 0x63c   :  { %4643 = vst.msk [vmem:[#allocation3 + $0x201] sm:$0xff] %vm90_vm0, %v4469_v31  ;;  %4644 = vst.msk [vmem:[#allocation3 + $0x211] sm:$0xff] %vm90_vm0, %v4470_v47  ;;  %4940 = vrot.lane.b32.xlu1 %v4805_v4, %s10383_s28  ;;  %v4808_v7 = vld [vmem:[#allocation3 + $0x79] sm:$0xff]  ;;  %v4809_v40 = vld [vmem:[#allocation3 + $0x81] sm:$0xff] }
 0x63d   :  { %4645 = vst.msk [vmem:[#allocation3 + $0x219] sm:$0xff] %vm90_vm0, %v4471_v43  ;;  %4646 = vst.msk [vmem:[#allocation3 + $0x229] sm:$0xff] %vm90_vm0, %v4472_v3  ;;  %v4810_v57 = vld [vmem:[#allocation3 + $0x91] sm:$0xff]  ;;  %v4811_v32 = vld [vmem:[#allocation3 + $0x99] sm:$0xff] }
 0x63e   :  { %4647 = vst.msk [vmem:[#allocation3 + $0x231] sm:$0xff] %vm90_vm0, %v4473_v14  ;;  %4648 = vst.msk [vmem:[#allocation3 + $0x241] sm:$0xff] %vm90_vm0, %v4474_v12  ;;  %v14735_v46 = vld [vmem:[#allocation3 + $0x20] sm:$0xff]  ;;  %v14740_v27 = vld [vmem:[#allocation3 + $0x38] sm:$0xff] }
 0x63f   :  { %4649 = vst.msk [vmem:[#allocation3 + $0x249] sm:$0xff] %vm90_vm0, %v4475_v59  ;;  %4650 = vst.msk [vmem:[#allocation3 + $0x259] sm:$0xff] %vm90_vm0, %v4476_v37  ;;  %4942 = vrot.lane.b32.xlu0 %v4806_v48, %s10383_s28  ;;  %v14742_v6 = vld [vmem:[#allocation3 + $0x30] sm:$0xff]  ;;  %v14752_v53 = vld [vmem:[#allocation3 + $0x48] sm:$0xff] }
 0x640   :  { %4651 = vst.msk [vmem:[#allocation3 + $0x261] sm:$0xff] %vm90_vm0, %v4477_v15  ;;  %4652 = vst.msk [vmem:[#allocation3 + $0x271] sm:$0xff] %vm90_vm0, %v4478_v58  ;;  %4944 = vrot.lane.b32.xlu1 %v4807_v21, %s10383_s28  ;;  %v4812_v41 = vld [vmem:[#allocation3 + $0xa9] sm:$0xff]  ;;  %v14756_v55 = vld [vmem:[#allocation3 + $0x60] sm:$0xff] }
 0x641   :  { %4653 = vst.msk [vmem:[#allocation3 + $0x279] sm:$0xff] %vm90_vm0, %v4479_v29  ;;  %4654 = vst.msk [vmem:[#allocation3 + $0x289] sm:$0xff] %vm90_vm0, %v4480_v28  ;;  %v14748_v5 = vld [vmem:[#allocation3 + $0x50] sm:$0xff]  ;;  %v14754_v52 = vld [vmem:[#allocation3 + $0x68] sm:$0xff] }
 0x642   :  { %4655 = vst.msk [vmem:[#allocation3 + $0x291] sm:$0xff] %vm90_vm0, %v4481_v0  ;;  %4656 = vst.msk [vmem:[#allocation3 + $0x2a1] sm:$0xff] %vm90_vm0, %v4482_v50  ;;  %v4813_v10 = vld [vmem:[#allocation3 + $0xb1] sm:$0xff]  ;;  %v14765_v9 = vld [vmem:[#allocation3 + $0x80] sm:$0xff] }
 0x643   :  { %4657 = vst.msk [vmem:[#allocation3 + $0x2a9] sm:$0xff] %vm90_vm0, %v4483_v18  ;;  %4658 = vst.msk [vmem:[#allocation3 + $0x2b9] sm:$0xff] %vm90_vm0, %v4484_v39  ;;  %4946 = vrot.lane.b32.xlu0 %v4808_v7, %s10383_s28  ;;  %v14770_v8 = vld [vmem:[#allocation3 + $0x78] sm:$0xff]  ;;  %v14776_v62 = vld [vmem:[#allocation3 + $0x90] sm:$0xff] }
 0x644   :  { %4659 = vst.msk [vmem:[#allocation3 + $0x2c1] sm:$0xff] %vm90_vm0, %v4485_v1  ;;  %4660 = vst.msk [vmem:[#allocation3 + $0x2d1] sm:$0xff] %vm90_vm0, %v4486_v13  ;;  %4948 = vrot.lane.b32.xlu1 %v4809_v40, %s10383_s28  ;;  %v14774_v63 = vld [vmem:[#allocation3 + $0x98] sm:$0xff]  ;;  %v4814_v45 = vld [vmem:[#allocation3 + $0xc1] sm:$0xff] }
 0x645   :  { %4661 = vst.msk [vmem:[#allocation3 + $0x2d9] sm:$0xff] %vm90_vm0, %v4487_v42  ;;  %4662 = vst.msk [vmem:[#allocation3 + $0x2e9] sm:$0xff] %vm90_vm0, %v4488_v38  ;;  %v14782_v44 = vld [vmem:[#allocation3 + $0xb0] sm:$0xff]  ;;  %v14784_v11 = vld [vmem:[#allocation3 + $0xa8] sm:$0xff] }
 0x646   :  { %4663 = vst.msk [vmem:[#allocation3 + $0x2f1] sm:$0xff] %vm90_vm0, %v4489_v51  ;;  %4664 = vst.msk [vmem:[#allocation3 + $0x301] sm:$0xff] %vm90_vm0, %v4490_v24  ;;  %v4815_v23 = vld [vmem:[#allocation3 + $0xc9] sm:$0xff]  ;;  %v14796_v31 = vld [vmem:[#allocation3 + $0xc0] sm:$0xff] }
 0x647   :  { %4665 = vst.msk [vmem:[#allocation3 + $0x309] sm:$0xff] %vm90_vm0, %v4491_v36  ;;  %4666 = vst.msk [vmem:[#allocation3 + $0x319] sm:$0xff] %vm90_vm0, %v4492_v17  ;;  %4950 = vrot.lane.b32.xlu0 %v4810_v57, %s10383_s28  ;;  %v14791_v20 = vld [vmem:[#allocation3 + $0xc8] sm:$0xff]  ;;  %v14800_v47 = vld [vmem:[#allocation3 + $0xe0] sm:$0xff] }
 0x648   :  { %4667 = vst.msk [vmem:[#allocation3 + $0x321] sm:$0xff] %vm90_vm0, %v4493_v30  ;;  %4669 = vst.msk [vmem:[#allocation3 + $0x339] sm:$0xff] %vm90_vm0, %v4495_v25  ;;  %4952 = vrot.lane.b32.xlu1 %v4811_v32, %s10383_s28  ;;  %v14802_v43 = vld [vmem:[#allocation3 + $0xd8] sm:$0xff]  ;;  %v14810_v14 = vld [vmem:[#allocation3 + $0xf0] sm:$0xff] }
 0x649   :  { %4737 = vst.msk [vmem:[#allocation2 + $0x18] sm:$0xff] %vm90_vm0, %v14735_v46  ;;  %4739 = vst.msk [vmem:[#allocation2 + $0x28] sm:$0xff] %vm90_vm0, %v14740_v27  ;;  %v4816_v3 = vld [vmem:[#allocation3 + $0xd9] sm:$0xff]  ;;  %v4817_v12 = vld [vmem:[#allocation3 + $0xe1] sm:$0xff] }
 0x64a   :  { %4738 = vst.msk [vmem:[#allocation2 + $0x20] sm:$0xff] %vm90_vm0, %v14742_v6  ;;  %4741 = vst.msk [vmem:[#allocation2 + $0x38] sm:$0xff] %vm90_vm0, %v14748_v5  ;;  %v14808_v2 = vld [vmem:[#allocation3 + $0xf8] sm:$0xff]  ;;  %v14817_v59 = vld [vmem:[#allocation3 + $0x110] sm:$0xff] }
 0x64b   :  { %4954 = vrot.lane.b32.xlu0 %v4812_v41, %s10383_s28  ;;  %4740 = vst.msk [vmem:[#allocation2 + $0x30] sm:$0xff] %vm90_vm0, %v14752_v53  ;;  %4743 = vst.msk [vmem:[#allocation2 + $0x48] sm:$0xff] %vm90_vm0, %v14754_v52  ;;  %v14822_v37 = vld [vmem:[#allocation3 + $0x108] sm:$0xff]  ;;  %v14828_v58 = vld [vmem:[#allocation3 + $0x120] sm:$0xff] }
 0x64c   :  { %4742 = vst.msk [vmem:[#allocation2 + $0x40] sm:$0xff] %vm90_vm0, %v14756_v55  ;;  %4956 = vrot.lane.b32.xlu1 %v4813_v10, %s10383_s28  ;;  %4745 = vst.msk [vmem:[#allocation2 + $0x58] sm:$0xff] %vm90_vm0, %v14765_v9  ;;  %v14826_v15 = vld [vmem:[#allocation3 + $0x128] sm:$0xff]  ;;  %v4818_v29 = vld [vmem:[#allocation3 + $0xf1] sm:$0xff] }
 0x64d   :  { %4744 = vst.msk [vmem:[#allocation2 + $0x50] sm:$0xff] %vm90_vm0, %v14770_v8  ;;  %4747 = vst.msk [vmem:[#allocation2 + $0x68] sm:$0xff] %vm90_vm0, %v14774_v63  ;;  %v14834_v54 = vld [vmem:[#allocation3 + $0x140] sm:$0xff]  ;;  %v14836_v28 = vld [vmem:[#allocation3 + $0x138] sm:$0xff] }
 0x64e   :  { %4746 = vst.msk [vmem:[#allocation2 + $0x60] sm:$0xff] %vm90_vm0, %v14776_v62  ;;  %4749 = vst.msk [vmem:[#allocation2 + $0x78] sm:$0xff] %vm90_vm0, %v14782_v44  ;;  %v4819_v19 = vld [vmem:[#allocation3 + $0xf9] sm:$0xff]  ;;  %v14848_v56 = vld [vmem:[#allocation3 + $0x150] sm:$0xff] }
 0x64f   :  { %4958 = vrot.lane.b32.xlu0 %v4814_v45, %s10383_s28  ;;  %4748 = vst.msk [vmem:[#allocation2 + $0x70] sm:$0xff] %vm90_vm0, %v14784_v11  ;;  %4751 = vst.msk [vmem:[#allocation2 + $0x88] sm:$0xff] %vm90_vm0, %v14791_v20  ;;  %v14843_v0 = vld [vmem:[#allocation3 + $0x158] sm:$0xff]  ;;  %v14852_v50 = vld [vmem:[#allocation3 + $0x170] sm:$0xff] }
 0x650   :  { %4960 = vrot.lane.b32.xlu1 %v4815_v23, %s10383_s28  ;;  %4750 = vst.msk [vmem:[#allocation2 + $0x80] sm:$0xff] %vm90_vm0, %v14796_v31  ;;  %4753 = vst.msk [vmem:[#allocation2 + $0x98] sm:$0xff] %vm90_vm0, %v14800_v47  ;;  %v14854_v18 = vld [vmem:[#allocation3 + $0x168] sm:$0xff]  ;;  %v4821_v34 = vld [vmem:[#allocation3 + $0x111] sm:$0xff] }
 0x651   :  { %4752 = vst.msk [vmem:[#allocation2 + $0x90] sm:$0xff] %vm90_vm0, %v14802_v43  ;;  %4755 = vst.msk [vmem:[#allocation2 + $0xa8] sm:$0xff] %vm90_vm0, %v14808_v2  ;;  %v4820_v39 = vld [vmem:[#allocation3 + $0x109] sm:$0xff]  ;;  %v14872_v38 = vld [vmem:[#allocation3 + $0x1e0] sm:$0xff] }
 0x652   :  { %4754 = vst.msk [vmem:[#allocation2 + $0xa0] sm:$0xff] %vm90_vm0, %v14810_v14  ;;  %4757 = vst.msk [vmem:[#allocation2 + $0xb8] sm:$0xff] %vm90_vm0, %v14817_v59  ;;  %v14861_v1 = vld [vmem:[#allocation3 + $0x1d0] sm:$0xff]  ;;  %v14863_v13 = vld [vmem:[#allocation3 + $0x1c8] sm:$0xff] }
 0x653   :  { %4962 = vrot.lane.b32.xlu0 %v4816_v3, %s10383_s28  ;;  %4756 = vst.msk [vmem:[#allocation2 + $0xb0] sm:$0xff] %vm90_vm0, %v14822_v37  ;;  %4759 = vst.msk [vmem:[#allocation2 + $0xc8] sm:$0xff] %vm90_vm0, %v14826_v15  ;;  %v14870_v42 = vld [vmem:[#allocation3 + $0x1e8] sm:$0xff]  ;;  %v14878_v60 = vld [vmem:[#allocation3 + $0x200] sm:$0xff] }
 0x654   :  { %4964 = vrot.lane.b32.xlu1 %v4817_v12, %s10383_s28  ;;  %4758 = vst.msk [vmem:[#allocation2 + $0xc0] sm:$0xff] %vm90_vm0, %v14828_v58  ;;  %4761 = vst.msk [vmem:[#allocation2 + $0xd8] sm:$0xff] %vm90_vm0, %v14834_v54  ;;  %v4822_v22 = vld [vmem:[#allocation3 + $0x121] sm:$0xff]  ;;  %v14882_v51 = vld [vmem:[#allocation3 + $0x1f8] sm:$0xff] }
 0x655   :  { %4760 = vst.msk [vmem:[#allocation2 + $0xd0] sm:$0xff] %vm90_vm0, %v14836_v28  ;;  %4763 = vst.msk [vmem:[#allocation2 + $0xe8] sm:$0xff] %vm90_vm0, %v14843_v0  ;;  %v14884_v16 = vld [vmem:[#allocation3 + $0x218] sm:$0xff]  ;;  %v14886_v24 = vld [vmem:[#allocation3 + $0x210] sm:$0xff] }
 0x656   :  { %4762 = vst.msk [vmem:[#allocation2 + $0xe0] sm:$0xff] %vm90_vm0, %v14848_v56  ;;  %4765 = vst.msk [vmem:[#allocation2 + $0xf8] sm:$0xff] %vm90_vm0, %v14852_v50  ;;  %v4823_v26 = vld [vmem:[#allocation3 + $0x129] sm:$0xff]  ;;  %v4703_v61 = vld [vmem:[#allocation3 + $0x1b8] sm:$0xff] }
 0x657   :  { %4966 = vrot.lane.b32.xlu0 %v4818_v29, %s10383_s28  ;;  %4764 = vst.msk [vmem:[#allocation2 + $0xf0] sm:$0xff] %vm90_vm0, %v14854_v18  ;;  %4769 = vst.msk [vmem:[#allocation2 + $0x118] sm:$0xff] %vm90_vm0, %v14861_v1  ;;  %v14895_v36 = vld [vmem:[#allocation3 + $0x230] sm:$0xff]  ;;  %v14900_v17 = vld [vmem:[#allocation3 + $0x228] sm:$0xff] }
 0x658   :  { %4968 = vrot.lane.b32.xlu1 %v4819_v19, %s10383_s28  ;;  %4768 = vst.msk [vmem:[#allocation2 + $0x110] sm:$0xff] %vm90_vm0, %v14863_v13  ;;  %4771 = vst.msk [vmem:[#allocation2 + $0x128] sm:$0xff] %vm90_vm0, %v14870_v42  ;;  %v14905_v35 = vld [vmem:[#allocation3 + $0x248] sm:$0xff]  ;;  %v14907_v30 = vld [vmem:[#allocation3 + $0x240] sm:$0xff] }
 0x659   :  { %4770 = vst.msk [vmem:[#allocation2 + $0x120] sm:$0xff] %vm90_vm0, %v14872_v38  ;;  %4773 = vst.msk [vmem:[#allocation2 + $0x138] sm:$0xff] %vm90_vm0, %v14878_v60  ;;  %v4824_v25 = vld [vmem:[#allocation3 + $0x139] sm:$0xff]  ;;  %v4825_v4 = vld [vmem:[#allocation3 + $0x141] sm:$0xff] }
 0x65a   :  { %4772 = vst.msk [vmem:[#allocation2 + $0x130] sm:$0xff] %vm90_vm0, %v14882_v51  ;;  %4775 = vst.msk [vmem:[#allocation2 + $0x148] sm:$0xff] %vm90_vm0, %v14884_v16  ;;  %v14913_v49 = vld [vmem:[#allocation3 + $0x260] sm:$0xff]  ;;  %v4702_v48 = vld [vmem:[#allocation3 + $0x1b0] sm:$0xff] }
 0x65b   :  { %4970 = vrot.lane.b32.xlu0 %v4820_v39, %s10383_s28  ;;  %4774 = vst.msk [vmem:[#allocation2 + $0x140] sm:$0xff] %vm90_vm0, %v14886_v24  ;;  %4777 = vst.msk [vmem:[#allocation2 + $0x158] sm:$0xff] %vm90_vm0, %v14895_v36  ;;  %v14918_v21 = vld [vmem:[#allocation3 + $0x258] sm:$0xff]  ;;  %v14926_v40 = vld [vmem:[#allocation3 + $0x270] sm:$0xff] }
 0x65c   :  { %4972 = vrot.lane.b32.xlu1 %v4821_v34, %s10383_s28  ;;  %4767 = vst.msk [vmem:[#allocation2 + $0x108] sm:$0xff] %vm90_vm0, %v4703_v61  ;;  %4776 = vst.msk [vmem:[#allocation2 + $0x150] sm:$0xff] %vm90_vm0, %v14900_v17  ;;  %v14924_v7 = vld [vmem:[#allocation3 + $0x278] sm:$0xff]  ;;  %v14932_v57 = vld [vmem:[#allocation3 + $0x290] sm:$0xff] }
 0x65d   :  { %4779 = vst.msk [vmem:[#allocation2 + $0x168] sm:$0xff] %vm90_vm0, %v14905_v35  ;;  %4778 = vst.msk [vmem:[#allocation2 + $0x160] sm:$0xff] %vm90_vm0, %v14907_v30  ;;  %v4826_v32 = vld [vmem:[#allocation3 + $0x151] sm:$0xff]  ;;  %v14936_v41 = vld [vmem:[#allocation3 + $0x288] sm:$0xff] }
 0x65e   :  { %4781 = vst.msk [vmem:[#allocation2 + $0x178] sm:$0xff] %vm90_vm0, %v14913_v49  ;;  %4766 = vst.msk [vmem:[#allocation2 + $0x100] sm:$0xff] %vm90_vm0, %v4702_v48  ;;  %v4827_v10 = vld [vmem:[#allocation3 + $0x159] sm:$0xff]  ;;  %v14941_v45 = vld [vmem:[#allocation3 + $0x2a8] sm:$0xff] }
 0x65f   :  { %4974 = vrot.lane.b32.xlu0 %v4822_v22, %s10383_s28  ;;  %4780 = vst.msk [vmem:[#allocation2 + $0x170] sm:$0xff] %vm90_vm0, %v14918_v21  ;;  %4783 = vst.msk [vmem:[#allocation2 + $0x188] sm:$0xff] %vm90_vm0, %v14924_v7  ;;  %v14943_v23 = vld [vmem:[#allocation3 + $0x2a0] sm:$0xff]  ;;  %v14952_v12 = vld [vmem:[#allocation3 + $0x2b8] sm:$0xff] }
 0x660   :  { %4976 = vrot.lane.b32.xlu1 %v4823_v26, %s10383_s28  ;;  %4782 = vst.msk [vmem:[#allocation2 + $0x180] sm:$0xff] %vm90_vm0, %v14926_v40  ;;  %4785 = vst.msk [vmem:[#allocation2 + $0x198] sm:$0xff] %vm90_vm0, %v14932_v57  ;;  %v14950_v3 = vld [vmem:[#allocation3 + $0x2c0] sm:$0xff]  ;;  %v14958_v29 = vld [vmem:[#allocation3 + $0x2d8] sm:$0xff] }
 0x661   :  { %4784 = vst.msk [vmem:[#allocation2 + $0x190] sm:$0xff] %vm90_vm0, %v14936_v41  ;;  %4787 = vst.msk [vmem:[#allocation2 + $0x1a8] sm:$0xff] %vm90_vm0, %v14941_v45  ;;  %v4828_v19 = vld [vmem:[#allocation3 + $0x169] sm:$0xff]  ;;  %v4829_v34 = vld [vmem:[#allocation3 + $0x171] sm:$0xff] }
 0x662   :  { %4786 = vst.msk [vmem:[#allocation2 + $0x1a0] sm:$0xff] %vm90_vm0, %v14943_v23  ;;  %4789 = vst.msk [vmem:[#allocation2 + $0x1b8] sm:$0xff] %vm90_vm0, %v14950_v3  ;;  %v14962_v39 = vld [vmem:[#allocation3 + $0x2d0] sm:$0xff]  ;;  %v14969_v26 = vld [vmem:[#allocation3 + $0x2e8] sm:$0xff] }
 0x663   :  { %4978 = vrot.lane.b32.xlu0 %v4824_v25, %s10383_s28  ;;  %4788 = vst.msk [vmem:[#allocation2 + $0x1b0] sm:$0xff] %vm90_vm0, %v14952_v12  ;;  %4791 = vst.msk [vmem:[#allocation2 + $0x1c8] sm:$0xff] %vm90_vm0, %v14958_v29  ;;  %v14967_v22 = vld [vmem:[#allocation3 + $0x2f0] sm:$0xff]  ;;  %v14976_v25 = vld [vmem:[#allocation3 + $0x308] sm:$0xff] }
 0x664   :  { %4980 = vrot.lane.b32.xlu1 %v4825_v4, %s10383_s28  ;;  %4790 = vst.msk [vmem:[#allocation2 + $0x1c0] sm:$0xff] %vm90_vm0, %v14962_v39  ;;  %18250 = vst [vmem:[#allocation21_spill] sm:$0xff] %v14967_v22  ;;  %v4830_v61 = vld [vmem:[#allocation3 + $0x1b1] sm:$0xff]  ;;  %v14978_v4 = vld [vmem:[#allocation3 + $0x300] sm:$0xff] }
 0x665   :  { %18251 = vst [vmem:[#allocation20_spill] sm:$0xff] %v14969_v26  ;;  %4793 = vst.msk [vmem:[#allocation2 + $0x1d8] sm:$0xff] %vm90_vm0, %v14967_v22  ;;  %v4831_v48 = vld [vmem:[#allocation3 + $0x1b9] sm:$0xff]  ;;  %v4837_v22 = vld [vmem:[#allocation3 + $0x201] sm:$0xff] }
 0x666   :  { %4792 = vst.msk [vmem:[#allocation2 + $0x1d0] sm:$0xff] %vm90_vm0, %v14969_v26  ;;  %18252 = vst [vmem:[#allocation23_spill] sm:$0xff] %v14976_v25 }
 0x667   :  { %4982 = vrot.lane.b32.xlu0 %v4826_v32, %s10383_s28  ;;  %18253 = vst [vmem:[#allocation22_spill] sm:$0xff] %v14978_v4  ;;  %4795 = vst.msk [vmem:[#allocation2 + $0x1e8] sm:$0xff] %vm90_vm0, %v14976_v25  ;;  %v14984_v32 = vld [vmem:[#allocation3 + $0x320] sm:$0xff] }
 0x668   :  { %4984 = vrot.lane.b32.xlu1 %v4827_v10, %s10383_s28  ;;  %4794 = vst.msk [vmem:[#allocation2 + $0x1e0] sm:$0xff] %vm90_vm0, %v14978_v4  ;;  %18254 = vst [vmem:[#allocation25_spill] sm:$0xff] %v14984_v32  ;;  %v14988_v10 = vld [vmem:[#allocation3 + $0x318] sm:$0xff]  ;;  %v4834_v25 = vld [vmem:[#allocation3 + $0x1e1] sm:$0xff] }
 0x669   :  { %4797 = vst.msk [vmem:[#allocation2 + $0x1f8] sm:$0xff] %vm90_vm0, %v14984_v32  ;;  %18255 = vst [vmem:[#allocation24_spill] sm:$0xff] %v14988_v10  ;;  %v4835_v4 = vld [vmem:[#allocation3 + $0x1e9] sm:$0xff]  ;;  %v4836_v32 = vld [vmem:[#allocation3 + $0x1f9] sm:$0xff] }
 0x66a   :  { %4796 = vst.msk [vmem:[#allocation2 + $0x1f0] sm:$0xff] %vm90_vm0, %v14988_v10  ;;  %v4858_v10 = vld [vmem:[#allocation3 + $0x301] sm:$0xff] }
 0x66b   :  { %4986 = vrot.lane.b32.xlu0 %v4828_v19, %s10383_s28  ;;  %v4832_v19 = vld [vmem:[#allocation3 + $0x1c9] sm:$0xff] }
 0x66c   :  { %4988 = vrot.lane.b32.xlu1 %v4829_v34, %s10383_s28  ;;  %v4833_v34 = vld [vmem:[#allocation3 + $0x1d1] sm:$0xff] }
 0x66f   :  { %4990 = vrot.lane.b32.xlu0 %v4830_v61, %s10383_s28  ;;  %v4838_v61 = vld [vmem:[#allocation3 + $0x211] sm:$0xff] }
 0x670   :  { %4992 = vrot.lane.b32.xlu1 %v4831_v48, %s10383_s28  ;;  %v4839_v48 = vld [vmem:[#allocation3 + $0x219] sm:$0xff] }
 0x673   :  { %4994 = vrot.lane.b32.xlu0 %v4832_v19, %s10383_s28  ;;  %v4840_v19 = vld [vmem:[#allocation3 + $0x229] sm:$0xff] }
 0x674   :  { %4996 = vrot.lane.b32.xlu1 %v4833_v34, %s10383_s28  ;;  %v4841_v34 = vld [vmem:[#allocation3 + $0x231] sm:$0xff] }
 0x677   :  { %4998 = vrot.lane.b32.xlu0 %v4834_v25, %s10383_s28  ;;  %v4842_v25 = vld [vmem:[#allocation3 + $0x241] sm:$0xff] }
 0x678   :  { %5000 = vrot.lane.b32.xlu1 %v4835_v4, %s10383_s28  ;;  %v4843_v4 = vld [vmem:[#allocation3 + $0x249] sm:$0xff] }
 0x67b   :  { %5002 = vrot.lane.b32.xlu0 %v4836_v32, %s10383_s28  ;;  %v4844_v32 = vld [vmem:[#allocation3 + $0x259] sm:$0xff] }
 0x67c   :  { %5004 = vrot.lane.b32.xlu1 %v4837_v22, %s10383_s28  ;;  %v4845_v22 = vld [vmem:[#allocation3 + $0x261] sm:$0xff] }
 0x67f   :  { %5006 = vrot.lane.b32.xlu0 %v4838_v61, %s10383_s28  ;;  %v4846_v61 = vld [vmem:[#allocation3 + $0x271] sm:$0xff] }
 0x680   :  { %5008 = vrot.lane.b32.xlu1 %v4839_v48, %s10383_s28  ;;  %v4847_v48 = vld [vmem:[#allocation3 + $0x279] sm:$0xff] }
 0x683   :  { %5010 = vrot.lane.b32.xlu0 %v4840_v19, %s10383_s28  ;;  %v4848_v19 = vld [vmem:[#allocation3 + $0x289] sm:$0xff] }
 0x684   :  { %5012 = vrot.lane.b32.xlu1 %v4841_v34, %s10383_s28  ;;  %v4849_v34 = vld [vmem:[#allocation3 + $0x291] sm:$0xff] }
 0x687   :  { %5014 = vrot.lane.b32.xlu0 %v4842_v25, %s10383_s28  ;;  %v4850_v25 = vld [vmem:[#allocation3 + $0x2a1] sm:$0xff] }
 0x688   :  { %5016 = vrot.lane.b32.xlu1 %v4843_v4, %s10383_s28  ;;  %v4851_v4 = vld [vmem:[#allocation3 + $0x2a9] sm:$0xff] }
 0x68b   :  { %5018 = vrot.lane.b32.xlu0 %v4844_v32, %s10383_s28  ;;  %v4852_v32 = vld [vmem:[#allocation3 + $0x2b9] sm:$0xff] }
 0x68c   :  { %5020 = vrot.lane.b32.xlu1 %v4845_v22, %s10383_s28  ;;  %v4853_v22 = vld [vmem:[#allocation3 + $0x2c1] sm:$0xff] }
 0x68f   :  { %5022 = vrot.lane.b32.xlu0 %v4846_v61, %s10383_s28  ;;  %v4854_v61 = vld [vmem:[#allocation3 + $0x2d1] sm:$0xff] }
 0x690   :  { %5024 = vrot.lane.b32.xlu1 %v4847_v48, %s10383_s28  ;;  %v4855_v48 = vld [vmem:[#allocation3 + $0x2d9] sm:$0xff] }
 0x693   :  { %5026 = vrot.lane.b32.xlu0 %v4848_v19, %s10383_s28  ;;  %v4856_v19 = vld [vmem:[#allocation3 + $0x2e9] sm:$0xff] }
 0x694   :  { %5028 = vrot.lane.b32.xlu1 %v4849_v34, %s10383_s28  ;;  %v4857_v34 = vld [vmem:[#allocation3 + $0x2f1] sm:$0xff] }
 0x697   :  { %5030 = vrot.lane.b32.xlu0 %v4850_v25, %s10383_s28 }
 0x698   :  { %5032 = vrot.lane.b32.xlu1 %v4851_v4, %s10383_s28 }
 0x69b   :  { %5034 = vrot.lane.b32.xlu0 %v4852_v32, %s10383_s28  ;;  %v4859_v32 = vld [vmem:[#allocation3 + $0x309] sm:$0xff] }
 0x69c   :  { %5036 = vrot.lane.b32.xlu1 %v4853_v22, %s10383_s28 }
 0x69f   :  { %5038 = vrot.lane.b32.xlu0 %v4854_v61, %s10383_s28 }
 0x6a0   :  { %5040 = vrot.lane.b32.xlu1 %v4855_v48, %s10383_s28  ;;  %v4860_v48 = vld [vmem:[#allocation3 + $0x319] sm:$0xff] }
 0x6a3   :  { %5042 = vrot.lane.b32.xlu0 %v4856_v19, %s10383_s28  ;;  %v4931_v25 = vpop.permute.xlu0 %4930  ;;  %v4861_v19 = vld [vmem:[#allocation3 + $0x321] sm:$0xff] }
 0x6a4   :  { %5044 = vrot.lane.b32.xlu1 %v4857_v34, %s10383_s28  ;;  %5120 = vst.msk [vmem:[#allocation2 + $0x10] sm:$0xff] %vm475_vm1, %v4931_v25  ;;  %v5182_v34 = vld [vmem:[#allocation3 + $0x2] sm:$0xff] }
 0x6a5   :  { %v4933_v4 = vpop.permute.xlu1 %4932 }
 0x6a6   :  { %5121 = vst.msk [vmem:[#allocation2 + $0x18] sm:$0xff] %vm475_vm1, %v4933_v4  ;;  %v5183_v4 = vld [vmem:[#allocation3 + $0xa] sm:$0xff] }
 0x6a7   :  { %5046 = vrot.lane.b32.xlu0 %v4858_v10, %s10383_s28 }
 0x6a8   :  { %5048 = vrot.lane.b32.xlu1 %v4859_v32, %s10383_s28 }
 0x6a9   :  { %v4935_v22 = vpop.permute.xlu0 %4934 }
 0x6aa   :  { %v4937_v61 = vpop.permute.xlu1 %4936  ;;  %5122 = vst.msk [vmem:[#allocation2 + $0x20] sm:$0xff] %vm475_vm1, %v4935_v22  ;;  %v5184_v22 = vld [vmem:[#allocation3 + $0x1a] sm:$0xff] }
 0x6ab   :  { %5123 = vst.msk [vmem:[#allocation2 + $0x28] sm:$0xff] %vm475_vm1, %v4937_v61  ;;  %5050 = vrot.lane.b32.xlu0 %v4860_v48, %s10383_s28  ;;  %v5185_v61 = vld [vmem:[#allocation3 + $0x22] sm:$0xff] }
 0x6ac   :  { %5052 = vrot.lane.b32.xlu1 %v4861_v19, %s10383_s28 }
 0x6ad   :  { %v4939_v25 = vpop.permute.xlu0 %4938 }
 0x6ae   :  { %v4941_v26 = vpop.permute.xlu1 %4940  ;;  %5124 = vst.msk [vmem:[#allocation2 + $0x30] sm:$0xff] %vm475_vm1, %v4939_v25 }
 0x6af   :  { %5125 = vst.msk [vmem:[#allocation2 + $0x38] sm:$0xff] %vm475_vm1, %v4941_v26  ;;  %5310 = vrot.lane.b32.xlu0 %v5182_v34, %s10384_s20  ;;  %v5186_v26 = vld [vmem:[#allocation3 + $0x32] sm:$0xff]  ;;  %v5187_v34 = vld [vmem:[#allocation3 + $0x3a] sm:$0xff] }
 0x6b0   :  { %5312 = vrot.lane.b32.xlu1 %v5183_v4, %s10384_s20 }
 0x6b1   :  { %v4943_v10 = vpop.permute.xlu0 %4942 }
 0x6b2   :  { %v4945_v32 = vpop.permute.xlu1 %4944  ;;  %5126 = vst.msk [vmem:[#allocation2 + $0x40] sm:$0xff] %vm475_vm1, %v4943_v10  ;;  %v5188_v10 = vld [vmem:[#allocation3 + $0x4a] sm:$0xff] }
 0x6b3   :  { %5127 = vst.msk [vmem:[#allocation2 + $0x48] sm:$0xff] %vm475_vm1, %v4945_v32  ;;  %5314 = vrot.lane.b32.xlu0 %v5184_v22, %s10384_s20  ;;  %v5189_v32 = vld [vmem:[#allocation3 + $0x52] sm:$0xff] }
 0x6b4   :  { %5316 = vrot.lane.b32.xlu1 %v5185_v61, %s10384_s20 }
 0x6b5   :  { %v4947_v48 = vpop.permute.xlu0 %4946 }
 0x6b6   :  { %v4949_v19 = vpop.permute.xlu1 %4948  ;;  %5128 = vst.msk [vmem:[#allocation2 + $0x50] sm:$0xff] %vm475_vm1, %v4947_v48  ;;  %v5190_v48 = vld [vmem:[#allocation3 + $0x62] sm:$0xff] }
 0x6b7   :  { %5129 = vst.msk [vmem:[#allocation2 + $0x58] sm:$0xff] %vm475_vm1, %v4949_v19  ;;  %5318 = vrot.lane.b32.xlu0 %v5186_v26, %s10384_s20  ;;  %v5191_v19 = vld [vmem:[#allocation3 + $0x6a] sm:$0xff] }
 0x6b8   :  { %5320 = vrot.lane.b32.xlu1 %v5187_v34, %s10384_s20 }
 0x6b9   :  { %v4951_v25 = vpop.permute.xlu0 %4950 }
 0x6ba   :  { %v4953_v4 = vpop.permute.xlu1 %4952  ;;  %5130 = vst.msk [vmem:[#allocation2 + $0x60] sm:$0xff] %vm475_vm1, %v4951_v25  ;;  %v5192_v25 = vld [vmem:[#allocation3 + $0x7a] sm:$0xff] }
 0x6bb   :  { %5131 = vst.msk [vmem:[#allocation2 + $0x68] sm:$0xff] %vm475_vm1, %v4953_v4  ;;  %5322 = vrot.lane.b32.xlu0 %v5188_v10, %s10384_s20  ;;  %v5193_v4 = vld [vmem:[#allocation3 + $0x82] sm:$0xff] }
 0x6bc   :  { %5324 = vrot.lane.b32.xlu1 %v5189_v32, %s10384_s20 }
 0x6bd   :  { %v4955_v22 = vpop.permute.xlu0 %4954 }
 0x6be   :  { %v4957_v61 = vpop.permute.xlu1 %4956  ;;  %5132 = vst.msk [vmem:[#allocation2 + $0x70] sm:$0xff] %vm475_vm1, %v4955_v22  ;;  %v5194_v22 = vld [vmem:[#allocation3 + $0x92] sm:$0xff] }
 0x6bf   :  { %5133 = vst.msk [vmem:[#allocation2 + $0x78] sm:$0xff] %vm475_vm1, %v4957_v61  ;;  %5326 = vrot.lane.b32.xlu0 %v5190_v48, %s10384_s20  ;;  %v5195_v61 = vld [vmem:[#allocation3 + $0x9a] sm:$0xff] }
 0x6c0   :  { %5328 = vrot.lane.b32.xlu1 %v5191_v19, %s10384_s20 }
 0x6c1   :  { %v4959_v26 = vpop.permute.xlu0 %4958 }
 0x6c2   :  { %v4961_v34 = vpop.permute.xlu1 %4960  ;;  %5134 = vst.msk [vmem:[#allocation2 + $0x80] sm:$0xff] %vm475_vm1, %v4959_v26  ;;  %v5196_v26 = vld [vmem:[#allocation3 + $0xaa] sm:$0xff] }
 0x6c3   :  { %5135 = vst.msk [vmem:[#allocation2 + $0x88] sm:$0xff] %vm475_vm1, %v4961_v34  ;;  %5330 = vrot.lane.b32.xlu0 %v5192_v25, %s10384_s20  ;;  %v5197_v34 = vld [vmem:[#allocation3 + $0xb2] sm:$0xff] }
 0x6c4   :  { %5332 = vrot.lane.b32.xlu1 %v5193_v4, %s10384_s20 }
 0x6c5   :  { %v4963_v10 = vpop.permute.xlu0 %4962 }
 0x6c6   :  { %v4965_v32 = vpop.permute.xlu1 %4964  ;;  %5136 = vst.msk [vmem:[#allocation2 + $0x90] sm:$0xff] %vm475_vm1, %v4963_v10  ;;  %v5198_v10 = vld [vmem:[#allocation3 + $0xc2] sm:$0xff] }
 0x6c7   :  { %5137 = vst.msk [vmem:[#allocation2 + $0x98] sm:$0xff] %vm475_vm1, %v4965_v32  ;;  %5334 = vrot.lane.b32.xlu0 %v5194_v22, %s10384_s20  ;;  %v5199_v32 = vld [vmem:[#allocation3 + $0xca] sm:$0xff] }
 0x6c8   :  { %5336 = vrot.lane.b32.xlu1 %v5195_v61, %s10384_s20 }
 0x6c9   :  { %v4967_v48 = vpop.permute.xlu0 %4966 }
 0x6ca   :  { %v4969_v19 = vpop.permute.xlu1 %4968  ;;  %5138 = vst.msk [vmem:[#allocation2 + $0xa0] sm:$0xff] %vm475_vm1, %v4967_v48  ;;  %v5200_v48 = vld [vmem:[#allocation3 + $0xda] sm:$0xff] }
 0x6cb   :  { %5139 = vst.msk [vmem:[#allocation2 + $0xa8] sm:$0xff] %vm475_vm1, %v4969_v19  ;;  %5338 = vrot.lane.b32.xlu0 %v5196_v26, %s10384_s20  ;;  %v5201_v19 = vld [vmem:[#allocation3 + $0xe2] sm:$0xff] }
 0x6cc   :  { %5340 = vrot.lane.b32.xlu1 %v5197_v34, %s10384_s20 }
 0x6cd   :  { %v4971_v25 = vpop.permute.xlu0 %4970 }
 0x6ce   :  { %v4973_v4 = vpop.permute.xlu1 %4972  ;;  %5140 = vst.msk [vmem:[#allocation2 + $0xb0] sm:$0xff] %vm475_vm1, %v4971_v25  ;;  %v5202_v25 = vld [vmem:[#allocation3 + $0xf2] sm:$0xff] }
 0x6cf   :  { %5141 = vst.msk [vmem:[#allocation2 + $0xb8] sm:$0xff] %vm475_vm1, %v4973_v4  ;;  %5342 = vrot.lane.b32.xlu0 %v5198_v10, %s10384_s20  ;;  %v5203_v4 = vld [vmem:[#allocation3 + $0xfa] sm:$0xff] }
 0x6d0   :  { %5344 = vrot.lane.b32.xlu1 %v5199_v32, %s10384_s20 }
 0x6d1   :  { %v4975_v22 = vpop.permute.xlu0 %4974 }
 0x6d2   :  { %v4977_v61 = vpop.permute.xlu1 %4976  ;;  %5142 = vst.msk [vmem:[#allocation2 + $0xc0] sm:$0xff] %vm475_vm1, %v4975_v22  ;;  %v5204_v22 = vld [vmem:[#allocation3 + $0x10a] sm:$0xff] }
 0x6d3   :  { %5143 = vst.msk [vmem:[#allocation2 + $0xc8] sm:$0xff] %vm475_vm1, %v4977_v61  ;;  %5346 = vrot.lane.b32.xlu0 %v5200_v48, %s10384_s20  ;;  %v5205_v61 = vld [vmem:[#allocation3 + $0x112] sm:$0xff] }
 0x6d4   :  { %5348 = vrot.lane.b32.xlu1 %v5201_v19, %s10384_s20 }
 0x6d5   :  { %v4979_v26 = vpop.permute.xlu0 %4978 }
 0x6d6   :  { %v4981_v34 = vpop.permute.xlu1 %4980  ;;  %5144 = vst.msk [vmem:[#allocation2 + $0xd0] sm:$0xff] %vm475_vm1, %v4979_v26  ;;  %v5206_v26 = vld [vmem:[#allocation3 + $0x122] sm:$0xff] }
 0x6d7   :  { %5145 = vst.msk [vmem:[#allocation2 + $0xd8] sm:$0xff] %vm475_vm1, %v4981_v34  ;;  %5350 = vrot.lane.b32.xlu0 %v5202_v25, %s10384_s20  ;;  %v5207_v34 = vld [vmem:[#allocation3 + $0x12a] sm:$0xff] }
 0x6d8   :  { %5352 = vrot.lane.b32.xlu1 %v5203_v4, %s10384_s20 }
 0x6d9   :  { %v4983_v10 = vpop.permute.xlu0 %4982 }
 0x6da   :  { %v4985_v32 = vpop.permute.xlu1 %4984  ;;  %5146 = vst.msk [vmem:[#allocation2 + $0xe0] sm:$0xff] %vm475_vm1, %v4983_v10  ;;  %v5208_v10 = vld [vmem:[#allocation3 + $0x13a] sm:$0xff] }
 0x6db   :  { %5147 = vst.msk [vmem:[#allocation2 + $0xe8] sm:$0xff] %vm475_vm1, %v4985_v32  ;;  %5354 = vrot.lane.b32.xlu0 %v5204_v22, %s10384_s20  ;;  %v5209_v32 = vld [vmem:[#allocation3 + $0x142] sm:$0xff] }
 0x6dc   :  { %5356 = vrot.lane.b32.xlu1 %v5205_v61, %s10384_s20 }
 0x6dd   :  { %v4987_v48 = vpop.permute.xlu0 %4986 }
 0x6de   :  { %v4989_v19 = vpop.permute.xlu1 %4988  ;;  %5148 = vst.msk [vmem:[#allocation2 + $0xf0] sm:$0xff] %vm475_vm1, %v4987_v48  ;;  %v5210_v48 = vld [vmem:[#allocation3 + $0x152] sm:$0xff] }
 0x6df   :  { %5149 = vst.msk [vmem:[#allocation2 + $0xf8] sm:$0xff] %vm475_vm1, %v4989_v19  ;;  %5358 = vrot.lane.b32.xlu0 %v5206_v26, %s10384_s20  ;;  %v5211_v19 = vld [vmem:[#allocation3 + $0x15a] sm:$0xff] }
 0x6e0   :  { %5360 = vrot.lane.b32.xlu1 %v5207_v34, %s10384_s20 }
 0x6e1   :  { %v4991_v25 = vpop.permute.xlu0 %4990 }
 0x6e2   :  { %v4993_v4 = vpop.permute.xlu1 %4992  ;;  %5150 = vst.msk [vmem:[#allocation2 + $0x100] sm:$0xff] %vm475_vm1, %v4991_v25  ;;  %v5212_v25 = vld [vmem:[#allocation3 + $0x16a] sm:$0xff] }
 0x6e3   :  { %5151 = vst.msk [vmem:[#allocation2 + $0x108] sm:$0xff] %vm475_vm1, %v4993_v4  ;;  %5362 = vrot.lane.b32.xlu0 %v5208_v10, %s10384_s20  ;;  %v5213_v4 = vld [vmem:[#allocation3 + $0x172] sm:$0xff] }
 0x6e4   :  { %5364 = vrot.lane.b32.xlu1 %v5209_v32, %s10384_s20  ;;  %v5214_v10 = vld [vmem:[#allocation3 + $0x1b2] sm:$0xff] }
 0x6e5   :  { %v4995_v22 = vpop.permute.xlu0 %4994 }
 0x6e6   :  { %v4997_v61 = vpop.permute.xlu1 %4996  ;;  %5152 = vst.msk [vmem:[#allocation2 + $0x110] sm:$0xff] %vm475_vm1, %v4995_v22  ;;  %v5215_v22 = vld [vmem:[#allocation3 + $0x1ba] sm:$0xff] }
 0x6e7   :  { %5153 = vst.msk [vmem:[#allocation2 + $0x118] sm:$0xff] %vm475_vm1, %v4997_v61  ;;  %5366 = vrot.lane.b32.xlu0 %v5210_v48, %s10384_s20 }
 0x6e8   :  { %5368 = vrot.lane.b32.xlu1 %v5211_v19, %s10384_s20 }
 0x6e9   :  { %v4999_v26 = vpop.permute.xlu0 %4998 }
 0x6ea   :  { %v5001_v34 = vpop.permute.xlu1 %5000  ;;  %5154 = vst.msk [vmem:[#allocation2 + $0x120] sm:$0xff] %vm475_vm1, %v4999_v26  ;;  %v5216_v26 = vld [vmem:[#allocation3 + $0x1ca] sm:$0xff] }
 0x6eb   :  { %5155 = vst.msk [vmem:[#allocation2 + $0x128] sm:$0xff] %vm475_vm1, %v5001_v34  ;;  %5370 = vrot.lane.b32.xlu0 %v5212_v25, %s10384_s20  ;;  %v5217_v34 = vld [vmem:[#allocation3 + $0x1d2] sm:$0xff] }
 0x6ec   :  { %5372 = vrot.lane.b32.xlu1 %v5213_v4, %s10384_s20 }
 0x6ed   :  { %v5003_v32 = vpop.permute.xlu0 %5002 }
 0x6ee   :  { %v5005_v61 = vpop.permute.xlu1 %5004  ;;  %5156 = vst.msk [vmem:[#allocation2 + $0x130] sm:$0xff] %vm475_vm1, %v5003_v32  ;;  %v5218_v32 = vld [vmem:[#allocation3 + $0x1e2] sm:$0xff] }
 0x6ef   :  { %5157 = vst.msk [vmem:[#allocation2 + $0x138] sm:$0xff] %vm475_vm1, %v5005_v61  ;;  %5374 = vrot.lane.b32.xlu0 %v5214_v10, %s10384_s20  ;;  %v5219_v10 = vld [vmem:[#allocation3 + $0x1ea] sm:$0xff] }
 0x6f0   :  { %5376 = vrot.lane.b32.xlu1 %v5215_v22, %s10384_s20 }
 0x6f1   :  { %v5007_v48 = vpop.permute.xlu0 %5006 }
 0x6f2   :  { %v5009_v19 = vpop.permute.xlu1 %5008  ;;  %5158 = vst.msk [vmem:[#allocation2 + $0x140] sm:$0xff] %vm475_vm1, %v5007_v48  ;;  %v5220_v48 = vld [vmem:[#allocation3 + $0x1fa] sm:$0xff] }
 0x6f3   :  { %5159 = vst.msk [vmem:[#allocation2 + $0x148] sm:$0xff] %vm475_vm1, %v5009_v19  ;;  %5378 = vrot.lane.b32.xlu0 %v5216_v26, %s10384_s20  ;;  %v5221_v19 = vld [vmem:[#allocation3 + $0x202] sm:$0xff] }
 0x6f4   :  { %5380 = vrot.lane.b32.xlu1 %v5217_v34, %s10384_s20 }
 0x6f5   :  { %v5011_v25 = vpop.permute.xlu0 %5010 }
 0x6f6   :  { %v5013_v4 = vpop.permute.xlu1 %5012  ;;  %5160 = vst.msk [vmem:[#allocation2 + $0x150] sm:$0xff] %vm475_vm1, %v5011_v25  ;;  %v5222_v25 = vld [vmem:[#allocation3 + $0x212] sm:$0xff] }
 0x6f7   :  { %5161 = vst.msk [vmem:[#allocation2 + $0x158] sm:$0xff] %vm475_vm1, %v5013_v4  ;;  %5382 = vrot.lane.b32.xlu0 %v5218_v32, %s10384_s20  ;;  %v5223_v4 = vld [vmem:[#allocation3 + $0x21a] sm:$0xff] }
 0x6f8   :  { %5384 = vrot.lane.b32.xlu1 %v5219_v10, %s10384_s20 }
 0x6f9   :  { %v5015_v22 = vpop.permute.xlu0 %5014 }
 0x6fa   :  { %v5017_v61 = vpop.permute.xlu1 %5016  ;;  %5162 = vst.msk [vmem:[#allocation2 + $0x160] sm:$0xff] %vm475_vm1, %v5015_v22  ;;  %v5224_v22 = vld [vmem:[#allocation3 + $0x22a] sm:$0xff] }
 0x6fb   :  { %5163 = vst.msk [vmem:[#allocation2 + $0x168] sm:$0xff] %vm475_vm1, %v5017_v61  ;;  %5386 = vrot.lane.b32.xlu0 %v5220_v48, %s10384_s20  ;;  %v5225_v61 = vld [vmem:[#allocation3 + $0x232] sm:$0xff] }
 0x6fc   :  { %5388 = vrot.lane.b32.xlu1 %v5221_v19, %s10384_s20 }
 0x6fd   :  { %v5019_v26 = vpop.permute.xlu0 %5018 }
 0x6fe   :  { %v5021_v34 = vpop.permute.xlu1 %5020  ;;  %5164 = vst.msk [vmem:[#allocation2 + $0x170] sm:$0xff] %vm475_vm1, %v5019_v26  ;;  %v5226_v26 = vld [vmem:[#allocation3 + $0x242] sm:$0xff] }
 0x6ff   :  { %5165 = vst.msk [vmem:[#allocation2 + $0x178] sm:$0xff] %vm475_vm1, %v5021_v34  ;;  %5390 = vrot.lane.b32.xlu0 %v5222_v25, %s10384_s20  ;;  %v5227_v34 = vld [vmem:[#allocation3 + $0x24a] sm:$0xff] }
 0x700   :  { %5392 = vrot.lane.b32.xlu1 %v5223_v4, %s10384_s20 }
 0x701   :  { %v5023_v32 = vpop.permute.xlu0 %5022 }
 0x702   :  { %v5025_v10 = vpop.permute.xlu1 %5024  ;;  %5166 = vst.msk [vmem:[#allocation2 + $0x180] sm:$0xff] %vm475_vm1, %v5023_v32  ;;  %v5228_v32 = vld [vmem:[#allocation3 + $0x25a] sm:$0xff] }
 0x703   :  { %5167 = vst.msk [vmem:[#allocation2 + $0x188] sm:$0xff] %vm475_vm1, %v5025_v10  ;;  %5394 = vrot.lane.b32.xlu0 %v5224_v22, %s10384_s20  ;;  %v5229_v10 = vld [vmem:[#allocation3 + $0x262] sm:$0xff] }
 0x704   :  { %5396 = vrot.lane.b32.xlu1 %v5225_v61, %s10384_s20 }
 0x705   :  { %v5027_v48 = vpop.permute.xlu0 %5026 }
 0x706   :  { %v5029_v19 = vpop.permute.xlu1 %5028  ;;  %5168 = vst.msk [vmem:[#allocation2 + $0x190] sm:$0xff] %vm475_vm1, %v5027_v48  ;;  %v5230_v48 = vld [vmem:[#allocation3 + $0x272] sm:$0xff] }
 0x707   :  { %5169 = vst.msk [vmem:[#allocation2 + $0x198] sm:$0xff] %vm475_vm1, %v5029_v19  ;;  %5398 = vrot.lane.b32.xlu0 %v5226_v26, %s10384_s20  ;;  %v5231_v19 = vld [vmem:[#allocation3 + $0x27a] sm:$0xff] }
 0x708   :  { %5400 = vrot.lane.b32.xlu1 %v5227_v34, %s10384_s20 }
 0x709   :  { %v5031_v25 = vpop.permute.xlu0 %5030 }
 0x70a   :  { %v5033_v4 = vpop.permute.xlu1 %5032  ;;  %5170 = vst.msk [vmem:[#allocation2 + $0x1a0] sm:$0xff] %vm475_vm1, %v5031_v25  ;;  %v5232_v25 = vld [vmem:[#allocation3 + $0x28a] sm:$0xff] }
 0x70b   :  { %5171 = vst.msk [vmem:[#allocation2 + $0x1a8] sm:$0xff] %vm475_vm1, %v5033_v4  ;;  %5402 = vrot.lane.b32.xlu0 %v5228_v32, %s10384_s20  ;;  %v5233_v4 = vld [vmem:[#allocation3 + $0x292] sm:$0xff] }
 0x70c   :  { %5404 = vrot.lane.b32.xlu1 %v5229_v10, %s10384_s20 }
 0x70d   :  { %v5035_v22 = vpop.permute.xlu0 %5034 }
 0x70e   :  { %v5037_v61 = vpop.permute.xlu1 %5036  ;;  %5172 = vst.msk [vmem:[#allocation2 + $0x1b0] sm:$0xff] %vm475_vm1, %v5035_v22  ;;  %v5234_v22 = vld [vmem:[#allocation3 + $0x2a2] sm:$0xff] }
 0x70f   :  { %5173 = vst.msk [vmem:[#allocation2 + $0x1b8] sm:$0xff] %vm475_vm1, %v5037_v61  ;;  %5406 = vrot.lane.b32.xlu0 %v5230_v48, %s10384_s20  ;;  %v5235_v61 = vld [vmem:[#allocation3 + $0x2aa] sm:$0xff] }
 0x710   :  { %5408 = vrot.lane.b32.xlu1 %v5231_v19, %s10384_s20 }
 0x711   :  { %v5039_v26 = vpop.permute.xlu0 %5038 }
 0x712   :  { %v5041_v34 = vpop.permute.xlu1 %5040  ;;  %5174 = vst.msk [vmem:[#allocation2 + $0x1c0] sm:$0xff] %vm475_vm1, %v5039_v26  ;;  %v5236_v26 = vld [vmem:[#allocation3 + $0x2ba] sm:$0xff] }
 0x713   :  { %5175 = vst.msk [vmem:[#allocation2 + $0x1c8] sm:$0xff] %vm475_vm1, %v5041_v34  ;;  %5410 = vrot.lane.b32.xlu0 %v5232_v25, %s10384_s20  ;;  %v5237_v34 = vld [vmem:[#allocation3 + $0x2c2] sm:$0xff] }
 0x714   :  { %5412 = vrot.lane.b32.xlu1 %v5233_v4, %s10384_s20 }
 0x715   :  { %v5043_v32 = vpop.permute.xlu0 %5042 }
 0x716   :  { %v5045_v10 = vpop.permute.xlu1 %5044  ;;  %5176 = vst.msk [vmem:[#allocation2 + $0x1d0] sm:$0xff] %vm475_vm1, %v5043_v32  ;;  %v5238_v32 = vld [vmem:[#allocation3 + $0x2d2] sm:$0xff] }
 0x717   :  { %5177 = vst.msk [vmem:[#allocation2 + $0x1d8] sm:$0xff] %vm475_vm1, %v5045_v10  ;;  %5414 = vrot.lane.b32.xlu0 %v5234_v22, %s10384_s20  ;;  %v5239_v10 = vld [vmem:[#allocation3 + $0x2da] sm:$0xff] }
 0x718   :  { %5416 = vrot.lane.b32.xlu1 %v5235_v61, %s10384_s20 }
 0x719   :  { %v5047_v48 = vpop.permute.xlu0 %5046 }
 0x71a   :  { %v5049_v19 = vpop.permute.xlu1 %5048  ;;  %5178 = vst.msk [vmem:[#allocation2 + $0x1e0] sm:$0xff] %vm475_vm1, %v5047_v48  ;;  %v5240_v48 = vld [vmem:[#allocation3 + $0x2ea] sm:$0xff] }
 0x71b   :  { %5179 = vst.msk [vmem:[#allocation2 + $0x1e8] sm:$0xff] %vm475_vm1, %v5049_v19  ;;  %5418 = vrot.lane.b32.xlu0 %v5236_v26, %s10384_s20  ;;  %v5241_v19 = vld [vmem:[#allocation3 + $0x2f2] sm:$0xff] }
 0x71c   :  { %5420 = vrot.lane.b32.xlu1 %v5237_v34, %s10384_s20 }
 0x71d   :  { %v5051_v25 = vpop.permute.xlu0 %5050 }
 0x71e   :  { %v5053_v4 = vpop.permute.xlu1 %5052  ;;  %5180 = vst.msk [vmem:[#allocation2 + $0x1f0] sm:$0xff] %vm475_vm1, %v5051_v25  ;;  %v5242_v25 = vld [vmem:[#allocation3 + $0x302] sm:$0xff] }
 0x71f   :  { %5181 = vst.msk [vmem:[#allocation2 + $0x1f8] sm:$0xff] %vm475_vm1, %v5053_v4  ;;  %5422 = vrot.lane.b32.xlu0 %v5238_v32, %s10384_s20  ;;  %v5243_v4 = vld [vmem:[#allocation3 + $0x30a] sm:$0xff] }
 0x720   :  { %5424 = vrot.lane.b32.xlu1 %v5239_v10, %s10384_s20 }
 0x721   :  { %v5311_v22 = vpop.permute.xlu0 %5310 }
 0x722   :  { %v5313_v61 = vpop.permute.xlu1 %5312  ;;  %5502 = vst.msk [vmem:[#allocation2] sm:$0xff] %vm860_vm2, %v5311_v22  ;;  %v5244_v22 = vld [vmem:[#allocation3 + $0x31a] sm:$0xff] }
 0x723   :  { %5503 = vst.msk [vmem:[#allocation2 + $0x8] sm:$0xff] %vm860_vm2, %v5313_v61  ;;  %5426 = vrot.lane.b32.xlu0 %v5240_v48, %s10384_s20  ;;  %v5245_v61 = vld [vmem:[#allocation3 + $0x322] sm:$0xff] }
 0x724   :  { %5428 = vrot.lane.b32.xlu1 %v5241_v19, %s10384_s20 }
 0x725   :  { %v5315_v26 = vpop.permute.xlu0 %5314 }
 0x726   :  { %v5317_v34 = vpop.permute.xlu1 %5316  ;;  %5504 = vst.msk [vmem:[#allocation2 + $0x10] sm:$0xff] %vm860_vm2, %v5315_v26 }
 0x727   :  { %5505 = vst.msk [vmem:[#allocation2 + $0x18] sm:$0xff] %vm860_vm2, %v5317_v34  ;;  %5430 = vrot.lane.b32.xlu0 %v5242_v25, %s10384_s20 }
 0x728   :  { %5432 = vrot.lane.b32.xlu1 %v5243_v4, %s10384_s20 }
 0x729   :  { %v5319_v32 = vpop.permute.xlu0 %5318 }
 0x72a   :  { %v5321_v10 = vpop.permute.xlu1 %5320  ;;  %5506 = vst.msk [vmem:[#allocation2 + $0x20] sm:$0xff] %vm860_vm2, %v5319_v32 }
 0x72b   :  { %5507 = vst.msk [vmem:[#allocation2 + $0x28] sm:$0xff] %vm860_vm2, %v5321_v10  ;;  %5434 = vrot.lane.b32.xlu0 %v5244_v22, %s10384_s20 }
 0x72c   :  { %5436 = vrot.lane.b32.xlu1 %v5245_v61, %s10384_s20 }
 0x72d   :  { %v5323_v48 = vpop.permute.xlu0 %5322 }
 0x72e   :  { %v5325_v19 = vpop.permute.xlu1 %5324  ;;  %5508 = vst.msk [vmem:[#allocation2 + $0x30] sm:$0xff] %vm860_vm2, %v5323_v48 }
 0x72f   :  { %5509 = vst.msk [vmem:[#allocation2 + $0x38] sm:$0xff] %vm860_vm2, %v5325_v19  ;;  %5694 = vrot.lane.b32.xlu0 %v14660_v33, %s10385_s18 }
 0x730   :  { %5696 = vrot.lane.b32.xlu1 %v14735_v46, %s10385_s18 }
 0x731   :  { %v5327_v26 = vpop.permute.xlu0 %5326 }
 0x732   :  { %v5329_v34 = vpop.permute.xlu1 %5328  ;;  %5510 = vst.msk [vmem:[#allocation2 + $0x40] sm:$0xff] %vm860_vm2, %v5327_v26 }
 0x733   :  { %5511 = vst.msk [vmem:[#allocation2 + $0x48] sm:$0xff] %vm860_vm2, %v5329_v34  ;;  %5698 = vrot.lane.b32.xlu0 %v14742_v6, %s10385_s18 }
 0x734   :  { %5700 = vrot.lane.b32.xlu1 %v14740_v27, %s10385_s18 }
 0x735   :  { %v5331_v25 = vpop.permute.xlu0 %5330 }
 0x736   :  { %v5333_v4 = vpop.permute.xlu1 %5332  ;;  %5512 = vst.msk [vmem:[#allocation2 + $0x50] sm:$0xff] %vm860_vm2, %v5331_v25  ;;  %v18260_v25 = vld [vmem:[#allocation24_spill] sm:$0xff] }
 0x737   :  { %5513 = vst.msk [vmem:[#allocation2 + $0x58] sm:$0xff] %vm860_vm2, %v5333_v4  ;;  %5702 = vrot.lane.b32.xlu0 %v14752_v53, %s10385_s18  ;;  %v18261_v4 = vld [vmem:[#allocation25_spill] sm:$0xff] }
 0x738   :  { %5704 = vrot.lane.b32.xlu1 %v14748_v5, %s10385_s18 }
 0x739   :  { %v5335_v33 = vpop.permute.xlu0 %5334 }
 0x73a   :  { %v5337_v46 = vpop.permute.xlu1 %5336  ;;  %5514 = vst.msk [vmem:[#allocation2 + $0x60] sm:$0xff] %vm860_vm2, %v5335_v33 }
 0x73b   :  { %5515 = vst.msk [vmem:[#allocation2 + $0x68] sm:$0xff] %vm860_vm2, %v5337_v46  ;;  %5706 = vrot.lane.b32.xlu0 %v14756_v55, %s10385_s18 }
 0x73c   :  { %5708 = vrot.lane.b32.xlu1 %v14754_v52, %s10385_s18 }
 0x73d   :  { %v5339_v27 = vpop.permute.xlu0 %5338 }
 0x73e   :  { %v5341_v6 = vpop.permute.xlu1 %5340  ;;  %5516 = vst.msk [vmem:[#allocation2 + $0x70] sm:$0xff] %vm860_vm2, %v5339_v27  ;;  %v5628_v27 = vld [vmem:[#allocation3 + $0x330] sm:$0xff] }
 0x73f   :  { %5517 = vst.msk [vmem:[#allocation2 + $0x78] sm:$0xff] %vm860_vm2, %v5341_v6  ;;  %5710 = vrot.lane.b32.xlu0 %v14770_v8, %s10385_s18  ;;  %v5629_v6 = vld [vmem:[#allocation3 + $0x338] sm:$0xff] }
 0x740   :  { %5712 = vrot.lane.b32.xlu1 %v14765_v9, %s10385_s18 }
 0x741   :  { %v5343_v5 = vpop.permute.xlu0 %5342 }
 0x742   :  { %v5345_v53 = vpop.permute.xlu1 %5344  ;;  %5518 = vst.msk [vmem:[#allocation2 + $0x80] sm:$0xff] %vm860_vm2, %v5343_v5 }
 0x743   :  { %5519 = vst.msk [vmem:[#allocation2 + $0x88] sm:$0xff] %vm860_vm2, %v5345_v53  ;;  %5714 = vrot.lane.b32.xlu0 %v14776_v62, %s10385_s18 }
 0x744   :  { %5716 = vrot.lane.b32.xlu1 %v14774_v63, %s10385_s18 }
 0x745   :  { %v5347_v52 = vpop.permute.xlu0 %5346 }
 0x746   :  { %v5349_v55 = vpop.permute.xlu1 %5348  ;;  %5520 = vst.msk [vmem:[#allocation2 + $0x90] sm:$0xff] %vm860_vm2, %v5347_v52  ;;  %v5950_v52 = vld [vmem:[#allocation3 + $0x19] sm:$0xff] }
 0x747   :  { %5521 = vst.msk [vmem:[#allocation2 + $0x98] sm:$0xff] %vm860_vm2, %v5349_v55  ;;  %5718 = vrot.lane.b32.xlu0 %v14784_v11, %s10385_s18  ;;  %v5951_v55 = vld [vmem:[#allocation3 + $0x21] sm:$0xff] }
 0x748   :  { %5720 = vrot.lane.b32.xlu1 %v14782_v44, %s10385_s18 }
 0x749   :  { %v5351_v9 = vpop.permute.xlu0 %5350 }
 0x74a   :  { %v5353_v8 = vpop.permute.xlu1 %5352  ;;  %5522 = vst.msk [vmem:[#allocation2 + $0xa0] sm:$0xff] %vm860_vm2, %v5351_v9 }
 0x74b   :  { %5523 = vst.msk [vmem:[#allocation2 + $0xa8] sm:$0xff] %vm860_vm2, %v5353_v8  ;;  %5722 = vrot.lane.b32.xlu0 %v14796_v31, %s10385_s18 }
 0x74c   :  { %5724 = vrot.lane.b32.xlu1 %v14791_v20, %s10385_s18 }
 0x74d   :  { %v5355_v63 = vpop.permute.xlu0 %5354 }
 0x74e   :  { %v5357_v62 = vpop.permute.xlu1 %5356  ;;  %5524 = vst.msk [vmem:[#allocation2 + $0xb0] sm:$0xff] %vm860_vm2, %v5355_v63  ;;  %v15349_v63 = vld [vmem:[#allocation3 + $0x31] sm:$0xff] }
 0x74f   :  { %5525 = vst.msk [vmem:[#allocation2 + $0xb8] sm:$0xff] %vm860_vm2, %v5357_v62  ;;  %5726 = vrot.lane.b32.xlu0 %v14802_v43, %s10385_s18  ;;  %v15352_v62 = vld [vmem:[#allocation3 + $0x39] sm:$0xff] }
 0x750   :  { %5728 = vrot.lane.b32.xlu1 %v14800_v47, %s10385_s18 }
 0x751   :  { %v5359_v44 = vpop.permute.xlu0 %5358 }
 0x752   :  { %v5361_v11 = vpop.permute.xlu1 %5360  ;;  %5526 = vst.msk [vmem:[#allocation2 + $0xc0] sm:$0xff] %vm860_vm2, %v5359_v44 }
 0x753   :  { %5527 = vst.msk [vmem:[#allocation2 + $0xc8] sm:$0xff] %vm860_vm2, %v5361_v11  ;;  %5730 = vrot.lane.b32.xlu0 %v14810_v14, %s10385_s18 }
 0x754   :  { %5732 = vrot.lane.b32.xlu1 %v14808_v2, %s10385_s18 }
 0x755   :  { %v5363_v20 = vpop.permute.xlu0 %5362 }
 0x756   :  { %v5365_v31 = vpop.permute.xlu1 %5364  ;;  %5528 = vst.msk [vmem:[#allocation2 + $0xd0] sm:$0xff] %vm860_vm2, %v5363_v20  ;;  %v15359_v20 = vld [vmem:[#allocation3 + $0x49] sm:$0xff] }
 0x757   :  { %5529 = vst.msk [vmem:[#allocation2 + $0xd8] sm:$0xff] %vm860_vm2, %v5365_v31  ;;  %5734 = vrot.lane.b32.xlu0 %v14822_v37, %s10385_s18  ;;  %v15362_v31 = vld [vmem:[#allocation3 + $0x51] sm:$0xff] }
 0x758   :  { %5736 = vrot.lane.b32.xlu1 %v14817_v59, %s10385_s18 }
 0x759   :  { %v5367_v47 = vpop.permute.xlu0 %5366 }
 0x75a   :  { %v5369_v43 = vpop.permute.xlu1 %5368  ;;  %5530 = vst.msk [vmem:[#allocation2 + $0xe0] sm:$0xff] %vm860_vm2, %v5367_v47 }
 0x75b   :  { %5531 = vst.msk [vmem:[#allocation2 + $0xe8] sm:$0xff] %vm860_vm2, %v5369_v43  ;;  %5738 = vrot.lane.b32.xlu0 %v14828_v58, %s10385_s18 }
 0x75c   :  { %5740 = vrot.lane.b32.xlu1 %v14826_v15, %s10385_s18 }
 0x75d   :  { %v5371_v2 = vpop.permute.xlu0 %5370 }
 0x75e   :  { %v5373_v14 = vpop.permute.xlu1 %5372  ;;  %5532 = vst.msk [vmem:[#allocation2 + $0xf0] sm:$0xff] %vm860_vm2, %v5371_v2  ;;  %v15369_v2 = vld [vmem:[#allocation3 + $0x61] sm:$0xff] }
 0x75f   :  { %5533 = vst.msk [vmem:[#allocation2 + $0xf8] sm:$0xff] %vm860_vm2, %v5373_v14  ;;  %5742 = vrot.lane.b32.xlu0 %v14836_v28, %s10385_s18  ;;  %v15372_v14 = vld [vmem:[#allocation3 + $0x69] sm:$0xff] }
 0x760   :  { %5744 = vrot.lane.b32.xlu1 %v14834_v54, %s10385_s18 }
 0x761   :  { %v5375_v59 = vpop.permute.xlu0 %5374 }
 0x762   :  { %v5377_v37 = vpop.permute.xlu1 %5376  ;;  %5534 = vst.msk [vmem:[#allocation2 + $0x100] sm:$0xff] %vm860_vm2, %v5375_v59 }
 0x763   :  { %5535 = vst.msk [vmem:[#allocation2 + $0x108] sm:$0xff] %vm860_vm2, %v5377_v37  ;;  %5746 = vrot.lane.b32.xlu0 %v14848_v56, %s10385_s18  ;;  %v5596_v56 = vld [vmem:[#allocation3 + $0x180] sm:$0xff] }
 0x764   :  { %5748 = vrot.lane.b32.xlu1 %v14843_v0, %s10385_s18  ;;  %v5597_v0 = vld [vmem:[#allocation3 + $0x188] sm:$0xff] }
 0x765   :  { %v5379_v15 = vpop.permute.xlu0 %5378 }
 0x766   :  { %v5381_v58 = vpop.permute.xlu1 %5380  ;;  %5536 = vst.msk [vmem:[#allocation2 + $0x110] sm:$0xff] %vm860_vm2, %v5379_v15  ;;  %v15379_v15 = vld [vmem:[#allocation3 + $0x79] sm:$0xff] }
 0x767   :  { %5537 = vst.msk [vmem:[#allocation2 + $0x118] sm:$0xff] %vm860_vm2, %v5381_v58  ;;  %5750 = vrot.lane.b32.xlu0 %v14854_v18, %s10385_s18  ;;  %v15382_v58 = vld [vmem:[#allocation3 + $0x81] sm:$0xff] }
 0x768   :  { %5752 = vrot.lane.b32.xlu1 %v14852_v50, %s10385_s18 }
 0x769   :  { %v5383_v54 = vpop.permute.xlu0 %5382 }
 0x76a   :  { %v5385_v28 = vpop.permute.xlu1 %5384  ;;  %5538 = vst.msk [vmem:[#allocation2 + $0x120] sm:$0xff] %vm860_vm2, %v5383_v54 }
 0x76b   :  { %5539 = vst.msk [vmem:[#allocation2 + $0x128] sm:$0xff] %vm860_vm2, %v5385_v28  ;;  %5754 = vrot.lane.b32.xlu0 %v5596_v56, %s10385_s18  ;;  %v15389_v56 = vld [vmem:[#allocation3 + $0x91] sm:$0xff] }
 0x76c   :  { %5756 = vrot.lane.b32.xlu1 %v5597_v0, %s10385_s18  ;;  %v15392_v0 = vld [vmem:[#allocation3 + $0x99] sm:$0xff] }
 0x76d   :  { %v5387_v32 = vpop.permute.xlu0 %5386 }
 0x76e   :  { %v5389_v10 = vpop.permute.xlu1 %5388  ;;  %5540 = vst.msk [vmem:[#allocation2 + $0x130] sm:$0xff] %vm860_vm2, %v5387_v32 }
 0x76f   :  { %5541 = vst.msk [vmem:[#allocation2 + $0x138] sm:$0xff] %vm860_vm2, %v5389_v10  ;;  %5758 = vrot.lane.b32.xlu0 %v14863_v13, %s10385_s18 }
 0x770   :  { %5760 = vrot.lane.b32.xlu1 %v14861_v1, %s10385_s18 }
 0x771   :  { %v5391_v50 = vpop.permute.xlu0 %5390 }
 0x772   :  { %v5393_v18 = vpop.permute.xlu1 %5392  ;;  %5542 = vst.msk [vmem:[#allocation2 + $0x140] sm:$0xff] %vm860_vm2, %v5391_v50  ;;  %v15399_v50 = vld [vmem:[#allocation3 + $0xa9] sm:$0xff] }
 0x773   :  { %5543 = vst.msk [vmem:[#allocation2 + $0x148] sm:$0xff] %vm860_vm2, %v5393_v18  ;;  %5762 = vrot.lane.b32.xlu0 %v14872_v38, %s10385_s18  ;;  %v15402_v18 = vld [vmem:[#allocation3 + $0xb1] sm:$0xff] }
 0x774   :  { %5764 = vrot.lane.b32.xlu1 %v14870_v42, %s10385_s18 }
 0x775   :  { %v5395_v22 = vpop.permute.xlu0 %5394 }
 0x776   :  { %v5397_v61 = vpop.permute.xlu1 %5396  ;;  %5544 = vst.msk [vmem:[#allocation2 + $0x150] sm:$0xff] %vm860_vm2, %v5395_v22 }
 0x777   :  { %5545 = vst.msk [vmem:[#allocation2 + $0x158] sm:$0xff] %vm860_vm2, %v5397_v61  ;;  %5766 = vrot.lane.b32.xlu0 %v14882_v51, %s10385_s18 }
 0x778   :  { %5768 = vrot.lane.b32.xlu1 %v14878_v60, %s10385_s18 }
 0x779   :  { %v5399_v1 = vpop.permute.xlu0 %5398 }
 0x77a   :  { %v5401_v13 = vpop.permute.xlu1 %5400  ;;  %5546 = vst.msk [vmem:[#allocation2 + $0x160] sm:$0xff] %vm860_vm2, %v5399_v1  ;;  %v15409_v1 = vld [vmem:[#allocation3 + $0xc1] sm:$0xff] }
 0x77b   :  { %5547 = vst.msk [vmem:[#allocation2 + $0x168] sm:$0xff] %vm860_vm2, %v5401_v13  ;;  %5770 = vrot.lane.b32.xlu0 %v14886_v24, %s10385_s18  ;;  %v15412_v13 = vld [vmem:[#allocation3 + $0xc9] sm:$0xff] }
 0x77c   :  { %5772 = vrot.lane.b32.xlu1 %v14884_v16, %s10385_s18 }
 0x77d   :  { %v5403_v42 = vpop.permute.xlu0 %5402 }
 0x77e   :  { %v5405_v38 = vpop.permute.xlu1 %5404  ;;  %5548 = vst.msk [vmem:[#allocation2 + $0x170] sm:$0xff] %vm860_vm2, %v5403_v42 }
 0x77f   :  { %5549 = vst.msk [vmem:[#allocation2 + $0x178] sm:$0xff] %vm860_vm2, %v5405_v38  ;;  %5774 = vrot.lane.b32.xlu0 %v14900_v17, %s10385_s18 }
 0x780   :  { %5776 = vrot.lane.b32.xlu1 %v14895_v36, %s10385_s18 }
 0x781   :  { %v5407_v60 = vpop.permute.xlu0 %5406 }
 0x782   :  { %v5409_v51 = vpop.permute.xlu1 %5408  ;;  %5550 = vst.msk [vmem:[#allocation2 + $0x180] sm:$0xff] %vm860_vm2, %v5407_v60  ;;  %v15419_v60 = vld [vmem:[#allocation3 + $0xd9] sm:$0xff] }
 0x783   :  { %5551 = vst.msk [vmem:[#allocation2 + $0x188] sm:$0xff] %vm860_vm2, %v5409_v51  ;;  %5778 = vrot.lane.b32.xlu0 %v14907_v30, %s10385_s18  ;;  %v15422_v51 = vld [vmem:[#allocation3 + $0xe1] sm:$0xff] }
 0x784   :  { %5780 = vrot.lane.b32.xlu1 %v14905_v35, %s10385_s18 }
 0x785   :  { %v5411_v16 = vpop.permute.xlu0 %5410 }
 0x786   :  { %v5413_v24 = vpop.permute.xlu1 %5412  ;;  %5552 = vst.msk [vmem:[#allocation2 + $0x190] sm:$0xff] %vm860_vm2, %v5411_v16 }
 0x787   :  { %5553 = vst.msk [vmem:[#allocation2 + $0x198] sm:$0xff] %vm860_vm2, %v5413_v24  ;;  %5782 = vrot.lane.b32.xlu0 %v14918_v21, %s10385_s18  ;;  %v7935_v24 = vld [vmem:[%s18025_s4] sm:$0xff] }
 0x788   :  { %5784 = vrot.lane.b32.xlu1 %v14913_v49, %s10385_s18 }
 0x789   :  { %v5415_v36 = vpop.permute.xlu0 %5414 }
 0x78a   :  { %v5417_v17 = vpop.permute.xlu1 %5416  ;;  %5554 = vst.msk [vmem:[#allocation2 + $0x1a0] sm:$0xff] %vm860_vm2, %v5415_v36  ;;  %v7936_v36 = vld [vmem:[%s18025_s4 + $0x8] sm:$0xff] }
 0x78b   :  { %5555 = vst.msk [vmem:[#allocation2 + $0x1a8] sm:$0xff] %vm860_vm2, %v5417_v17  ;;  %5786 = vrot.lane.b32.xlu0 %v14926_v40, %s10385_s18 }
 0x78c   :  { %5788 = vrot.lane.b32.xlu1 %v14924_v7, %s10385_s18 }
 0x78d   :  { %v5419_v35 = vpop.permute.xlu0 %5418 }
 0x78e   :  { %v5421_v30 = vpop.permute.xlu1 %5420  ;;  %5556 = vst.msk [vmem:[#allocation2 + $0x1b0] sm:$0xff] %vm860_vm2, %v5419_v35  ;;  %v15435_v35 = vld [vmem:[#allocation3 + $0xf1] sm:$0xff] }
 0x78f   :  { %5557 = vst.msk [vmem:[#allocation2 + $0x1b8] sm:$0xff] %vm860_vm2, %v5421_v30  ;;  %5790 = vrot.lane.b32.xlu0 %v14936_v41, %s10385_s18  ;;  %v10354_v30 = vpack.c.bf16 %v7936_v36, %v7935_v24  ;;  %v6340_v24 = vld [vmem:[#allocation3 + $0x62] sm:$0xff] }
 0x790   :  { %5792 = vrot.lane.b32.xlu1 %v14932_v57, %s10385_s18 }
 0x791   :  { %v5423_v49 = vpop.permute.xlu0 %5422  ;;  %10355 = vmatprep.subr.bf16.mxu1 %v10354_v30 }
 0x792   :  { %v5425_v21 = vpop.permute.xlu1 %5424  ;;  %5558 = vst.msk [vmem:[#allocation2 + $0x1c0] sm:$0xff] %vm860_vm2, %v5423_v49  ;;  %v15438_v49 = vld [vmem:[#allocation3 + $0xf9] sm:$0xff]  ;;  %10357 = vmatpush3.bf16.msra.mxu1 %v10354_v30  ;;  %v6341_v30 = vld [vmem:[#allocation3 + $0x6a] sm:$0xff] }
 0x793   :  { %5559 = vst.msk [vmem:[#allocation2 + $0x1c8] sm:$0xff] %vm860_vm2, %v5425_v21  ;;  %5794 = vrot.lane.b32.xlu0 %v14943_v23, %s10385_s18  ;;  %v7937_v21 = vld [vmem:[%s18025_s4 + $0x10] sm:$0xff] }
 0x794   :  { %5796 = vrot.lane.b32.xlu1 %v14941_v45, %s10385_s18 }
 0x795   :  { %v5427_v7 = vpop.permute.xlu0 %5426 }
 0x796   :  { %v5429_v40 = vpop.permute.xlu1 %5428  ;;  %5560 = vst.msk [vmem:[#allocation2 + $0x1d0] sm:$0xff] %vm860_vm2, %v5427_v7  ;;  %v7938_v7 = vld [vmem:[%s18025_s4 + $0x18] sm:$0xff] }
 0x797   :  { %5561 = vst.msk [vmem:[#allocation2 + $0x1d8] sm:$0xff] %vm860_vm2, %v5429_v40  ;;  %5798 = vrot.lane.b32.xlu0 %v14952_v12, %s10385_s18  ;;  %v18257_v12 = vld [vmem:[#allocation21_spill] sm:$0xff] }
 0x798   :  { %5800 = vrot.lane.b32.xlu1 %v14950_v3, %s10385_s18  ;;  %v18256_v3 = vld [vmem:[#allocation20_spill] sm:$0xff] }
 0x799   :  { %v5431_v57 = vpop.permute.xlu0 %5430 }
 0x79a   :  { %v5433_v41 = vpop.permute.xlu1 %5432  ;;  %5562 = vst.msk [vmem:[#allocation2 + $0x1e0] sm:$0xff] %vm860_vm2, %v5431_v57  ;;  %v10358_v57 = vpack.c.bf16 %v7938_v7, %v7937_v21  ;;  %v6725_v21 = vld [vmem:[#allocation3 + $0x78] sm:$0xff]  ;;  %v6726_v7 = vld [vmem:[#allocation3 + $0x80] sm:$0xff] }
 0x79b   :  { %5563 = vst.msk [vmem:[#allocation2 + $0x1e8] sm:$0xff] %vm860_vm2, %v5433_v41  ;;  %5802 = vrot.lane.b32.xlu0 %v14962_v39, %s10385_s18  ;;  %v18259_v39 = vld [vmem:[#allocation23_spill] sm:$0xff] }
 0x79c   :  { %5804 = vrot.lane.b32.xlu1 %v14958_v29, %s10385_s18  ;;  %v18258_v29 = vld [vmem:[#allocation22_spill] sm:$0xff]  ;;  %10359 = vmatprep.subr.bf16.mxu1 %v10358_v57 }
 0x79d   :  { %v5435_v45 = vpop.permute.xlu0 %5434  ;;  %10361 = vmatpush3.bf16.msra.mxu1 %v10358_v57 }
 0x79e   :  { %v5437_v23 = vpop.permute.xlu1 %5436  ;;  %5564 = vst.msk [vmem:[#allocation2 + $0x1f0] sm:$0xff] %vm860_vm2, %v5435_v45  ;;  %v6334_v45 = vld [vmem:[#allocation3 + $0x1a] sm:$0xff] }
 0x79f   :  { %5565 = vst.msk [vmem:[#allocation2 + $0x1f8] sm:$0xff] %vm860_vm2, %v5437_v23  ;;  %5806 = vrot.lane.b32.xlu0 %v18256_v3, %s10385_s18  ;;  %v6335_v23 = vld [vmem:[#allocation3 + $0x22] sm:$0xff] }
 0x7a0   :  { %5808 = vrot.lane.b32.xlu1 %v18257_v12, %s10385_s18  ;;  %v7939_v3 = vld [vmem:[%s18025_s4 + $0x20] sm:$0xff]  ;;  %v7940_v12 = vld [vmem:[%s18025_s4 + $0x28] sm:$0xff] }
 0x7a1   :  { %v5695_v48 = vpop.permute.xlu0 %5694 }
 0x7a2   :  { %v5697_v19 = vpop.permute.xlu1 %5696  ;;  %5886 = vst.msk [vmem:[#allocation2] sm:$0xff] %vm1246_vm3, %v5695_v48 }
 0x7a3   :  { %5887 = vst.msk [vmem:[#allocation2 + $0x8] sm:$0xff] %vm1246_vm3, %v5697_v19  ;;  %5810 = vrot.lane.b32.xlu0 %v18258_v29, %s10385_s18  ;;  %v10362_v19 = vpack.c.bf16 %v7940_v12, %v7939_v3 }
 0x7a4   :  { %5812 = vrot.lane.b32.xlu1 %v18259_v39, %s10385_s18  ;;  %v6719_v39 = vld [vmem:[#allocation3 + $0x30] sm:$0xff] }
 0x7a5   :  { %v5699_v26 = vpop.permute.xlu0 %5698  ;;  %10363 = vmatprep.subr.bf16.mxu1 %v10362_v19 }
 0x7a6   :  { %v5701_v34 = vpop.permute.xlu1 %5700  ;;  %5888 = vst.msk [vmem:[#allocation2 + $0x10] sm:$0xff] %vm1246_vm3, %v5699_v26  ;;  %v6720_v26 = vld [vmem:[#allocation3 + $0x38] sm:$0xff]  ;;  %10365 = vmatpush3.bf16.msra.mxu1 %v10362_v19  ;;  %v6727_v19 = vld [vmem:[#allocation3 + $0x90] sm:$0xff] }
 0x7a7   :  { %5889 = vst.msk [vmem:[#allocation2 + $0x18] sm:$0xff] %vm1246_vm3, %v5701_v34  ;;  %5814 = vrot.lane.b32.xlu0 %v18260_v25, %s10385_s18  ;;  %v7941_v34 = vld [vmem:[%s18025_s4 + $0x30] sm:$0xff]  ;;  %v7942_v25 = vld [vmem:[%s18025_s4 + $0x38] sm:$0xff] }
 0x7a8   :  { %5816 = vrot.lane.b32.xlu1 %v18261_v4, %s10385_s18 }
 0x7a9   :  { %v5703_v33 = vpop.permute.xlu0 %5702 }
 0x7aa   :  { %v5705_v46 = vpop.permute.xlu1 %5704  ;;  %5890 = vst.msk [vmem:[#allocation2 + $0x20] sm:$0xff] %vm1246_vm3, %v5703_v33  ;;  %v10366_v33 = vpack.c.bf16 %v7942_v25, %v7941_v34 }
 0x7ab   :  { %5891 = vst.msk [vmem:[#allocation2 + $0x28] sm:$0xff] %vm1246_vm3, %v5705_v46  ;;  %5818 = vrot.lane.b32.xlu0 %v5628_v27, %s10385_s18  ;;  %v7943_v27 = vld [vmem:[%s18025_s4 + $0x40] sm:$0xff] }
 0x7ac   :  { %5820 = vrot.lane.b32.xlu1 %v5629_v6, %s10385_s18  ;;  %10367 = vmatprep.subr.bf16.mxu1 %v10366_v33 }
 0x7ad   :  { %v5707_v5 = vpop.permute.xlu0 %5706  ;;  %10369 = vmatpush3.bf16.msra.mxu1 %v10366_v33 }
 0x7ae   :  { %v5709_v53 = vpop.permute.xlu1 %5708  ;;  %5892 = vst.msk [vmem:[#allocation2 + $0x30] sm:$0xff] %vm1246_vm3, %v5707_v5  ;;  %10240 = vmatprep.subr.mxu1 %v7943_v27 }
 0x7af   :  { %5893 = vst.msk [vmem:[#allocation2 + $0x38] sm:$0xff] %vm1246_vm3, %v5709_v53  ;;  %6078 = vrot.lane.b32.xlu0 %v5950_v52, %s10386_s10  ;;  %v6336_v53 = vld [vmem:[#allocation3 + $0x32] sm:$0xff] }
 0x7b0   :  { %6080 = vrot.lane.b32.xlu1 %v5951_v55, %s10386_s10 }
 0x7b1   :  { %v5711_v9 = vpop.permute.xlu0 %5710  ;;  %10241 = vmatpush3.msra.mxu1 %v7943_v27  ;;  %v6345_v27 = vld [vmem:[#allocation3 + $0x9a] sm:$0xff] }
 0x7b2   :  { %v5713_v8 = vpop.permute.xlu1 %5712  ;;  %5894 = vst.msk [vmem:[#allocation2 + $0x40] sm:$0xff] %vm1246_vm3, %v5711_v9  ;;  %v6337_v9 = vld [vmem:[#allocation3 + $0x3a] sm:$0xff] }
 0x7b3   :  { %5895 = vst.msk [vmem:[#allocation2 + $0x48] sm:$0xff] %vm1246_vm3, %v5713_v8  ;;  %6082 = vrot.lane.b32.xlu0 %v15349_v63, %s10386_s10 }
 0x7b4   :  { %6084 = vrot.lane.b32.xlu1 %v15352_v62, %s10386_s10 }
 0x7b5   :  { %v5715_v44 = vpop.permute.xlu0 %5714 }
 0x7b6   :  { %v5717_v11 = vpop.permute.xlu1 %5716  ;;  %5896 = vst.msk [vmem:[#allocation2 + $0x50] sm:$0xff] %vm1246_vm3, %v5715_v44  ;;  %v6722_v44 = vld [vmem:[#allocation3 + $0x50] sm:$0xff] }
 0x7b7   :  { %5897 = vst.msk [vmem:[#allocation2 + $0x58] sm:$0xff] %vm1246_vm3, %v5717_v11  ;;  %6086 = vrot.lane.b32.xlu0 %v15359_v20, %s10386_s10 }
 0x7b8   :  { %6088 = vrot.lane.b32.xlu1 %v15362_v31, %s10386_s10 }
 0x7b9   :  { %v5719_v47 = vpop.permute.xlu0 %5718 }
 0x7ba   :  { %v5721_v43 = vpop.permute.xlu1 %5720  ;;  %5898 = vst.msk [vmem:[#allocation2 + $0x60] sm:$0xff] %vm1246_vm3, %v5719_v47 }
 0x7bb   :  { %5899 = vst.msk [vmem:[#allocation2 + $0x68] sm:$0xff] %vm1246_vm3, %v5721_v43  ;;  %6090 = vrot.lane.b32.xlu0 %v15369_v2, %s10386_s10 }
 0x7bc   :  { %6092 = vrot.lane.b32.xlu1 %v15372_v14, %s10386_s10 }
 0x7bd   :  { %v5723_v59 = vpop.permute.xlu0 %5722 }
 0x7be   :  { %v5725_v37 = vpop.permute.xlu1 %5724  ;;  %5900 = vst.msk [vmem:[#allocation2 + $0x70] sm:$0xff] %vm1246_vm3, %v5723_v59 }
 0x7bf   :  { %5901 = vst.msk [vmem:[#allocation2 + $0x78] sm:$0xff] %vm1246_vm3, %v5725_v37  ;;  %6094 = vrot.lane.b32.xlu0 %v15379_v15, %s10386_s10  ;;  %v6338_v37 = vld [vmem:[#allocation3 + $0x4a] sm:$0xff] }
 0x7c0   :  { %6096 = vrot.lane.b32.xlu1 %v15382_v58, %s10386_s10 }
 0x7c1   :  { %v5727_v54 = vpop.permute.xlu0 %5726 }
 0x7c2   :  { %v5729_v28 = vpop.permute.xlu1 %5728  ;;  %5902 = vst.msk [vmem:[#allocation2 + $0x80] sm:$0xff] %vm1246_vm3, %v5727_v54 }
 0x7c3   :  { %5903 = vst.msk [vmem:[#allocation2 + $0x88] sm:$0xff] %vm1246_vm3, %v5729_v28  ;;  %6098 = vrot.lane.b32.xlu0 %v15389_v56, %s10386_s10 }
 0x7c4   :  { %6100 = vrot.lane.b32.xlu1 %v15392_v0, %s10386_s10 }
 0x7c5   :  { %v5731_v32 = vpop.permute.xlu0 %5730 }
 0x7c6   :  { %v5733_v10 = vpop.permute.xlu1 %5732  ;;  %5904 = vst.msk [vmem:[#allocation2 + $0x90] sm:$0xff] %vm1246_vm3, %v5731_v32  ;;  %v6339_v32 = vld [vmem:[#allocation3 + $0x52] sm:$0xff] }
 0x7c7   :  { %5905 = vst.msk [vmem:[#allocation2 + $0x98] sm:$0xff] %vm1246_vm3, %v5733_v10  ;;  %6102 = vrot.lane.b32.xlu0 %v15399_v50, %s10386_s10  ;;  %v6723_v10 = vld [vmem:[#allocation3 + $0x60] sm:$0xff] }
 0x7c8   :  { %6104 = vrot.lane.b32.xlu1 %v15402_v18, %s10386_s10 }
 0x7c9   :  { %v5735_v22 = vpop.permute.xlu0 %5734 }
 0x7ca   :  { %v5737_v61 = vpop.permute.xlu1 %5736  ;;  %5906 = vst.msk [vmem:[#allocation2 + $0xa0] sm:$0xff] %vm1246_vm3, %v5735_v22  ;;  %v6724_v22 = vld [vmem:[#allocation3 + $0x68] sm:$0xff] }
 0x7cb   :  { %5907 = vst.msk [vmem:[#allocation2 + $0xa8] sm:$0xff] %vm1246_vm3, %v5737_v61  ;;  %6106 = vrot.lane.b32.xlu0 %v15409_v1, %s10386_s10 }
 0x7cc   :  { %6108 = vrot.lane.b32.xlu1 %v15412_v13, %s10386_s10 }
 0x7cd   :  { %v5739_v42 = vpop.permute.xlu0 %5738 }
 0x7ce   :  { %v5741_v38 = vpop.permute.xlu1 %5740  ;;  %5908 = vst.msk [vmem:[#allocation2 + $0xb0] sm:$0xff] %vm1246_vm3, %v5739_v42 }
 0x7cf   :  { %5909 = vst.msk [vmem:[#allocation2 + $0xb8] sm:$0xff] %vm1246_vm3, %v5741_v38  ;;  %6110 = vrot.lane.b32.xlu0 %v15419_v60, %s10386_s10 }
 0x7d0   :  { %6112 = vrot.lane.b32.xlu1 %v15422_v51, %s10386_s10 }
 0x7d1   :  { %v5743_v16 = vpop.permute.xlu0 %5742 }
 0x7d2   :  { %v5745_v17 = vpop.permute.xlu1 %5744  ;;  %5910 = vst.msk [vmem:[#allocation2 + $0xc0] sm:$0xff] %vm1246_vm3, %v5743_v16 }
 0x7d3   :  { %5911 = vst.msk [vmem:[#allocation2 + $0xc8] sm:$0xff] %vm1246_vm3, %v5745_v17  ;;  %6114 = vrot.lane.b32.xlu0 %v15435_v35, %s10386_s10 }
 0x7d4   :  { %6116 = vrot.lane.b32.xlu1 %v15438_v49, %s10386_s10 }
 0x7d5   :  { %v5747_v40 = vpop.permute.xlu0 %5746 }
 0x7d6   :  { %v5749_v41 = vpop.permute.xlu1 %5748  ;;  %5912 = vst.msk [vmem:[#allocation2 + $0xd0] sm:$0xff] %vm1246_vm3, %v5747_v40 }
 0x7d7   :  { %5913 = vst.msk [vmem:[#allocation2 + $0xd8] sm:$0xff] %vm1246_vm3, %v5749_v41  ;;  %6462 = vrot.lane.b32.xlu0 %v6334_v45, %s10387_s27 }
 0x7d8   :  { %6464 = vrot.lane.b32.xlu1 %v6335_v23, %s10387_s27  ;;  %v6342_v23 = vld [vmem:[#allocation3 + $0x7a] sm:$0xff] }
 0x7d9   :  { %v5751_v48 = vpop.permute.xlu0 %5750 }
 0x7da   :  { %v5753_v29 = vpop.permute.xlu1 %5752  ;;  %5914 = vst.msk [vmem:[#allocation2 + $0xe0] sm:$0xff] %vm1246_vm3, %v5751_v48  ;;  %v6343_v48 = vld [vmem:[#allocation3 + $0x82] sm:$0xff] }
 0x7db   :  { %5915 = vst.msk [vmem:[#allocation2 + $0xe8] sm:$0xff] %vm1246_vm3, %v5753_v29  ;;  %6847 = vrot.lane.b32.xlu0 %v6719_v39, %s10388_s8  ;;  %v6728_v29 = vld [vmem:[#allocation3 + $0x98] sm:$0xff] }
 0x7dc   :  { %6849 = vrot.lane.b32.xlu1 %v6720_v26, %s10388_s8 }
 0x7dd   :  { %v5755_v4 = vpop.permute.xlu0 %5754 }
 0x7de   :  { %v5757_v46 = vpop.permute.xlu1 %5756  ;;  %5916 = vst.msk [vmem:[#allocation2 + $0xf0] sm:$0xff] %vm1246_vm3, %v5755_v4  ;;  %v6344_v4 = vld [vmem:[#allocation3 + $0x92] sm:$0xff] }
 0x7df   :  { %5917 = vst.msk [vmem:[#allocation2 + $0xf8] sm:$0xff] %vm1246_vm3, %v5757_v46  ;;  %7231 = vrot.lane.b32.xlu0 %v15349_v63, %s10389_s21 }
 0x7e0   :  { %7233 = vrot.lane.b32.xlu1 %v15352_v62, %s10389_s21  ;;  %v6721_v62 = vld [vmem:[#allocation3 + $0x48] sm:$0xff] }
 0x7e1   :  { %v5759_v6 = vpop.permute.xlu0 %5758 }
 0x7e2   :  { %v5761_v5 = vpop.permute.xlu1 %5760  ;;  %5918 = vst.msk [vmem:[#allocation2 + $0x100] sm:$0xff] %vm1246_vm3, %v5759_v6  ;;  %v6729_v6 = vld [vmem:[#allocation3 + $0xa8] sm:$0xff] }
 0x7e3   :  { %5919 = vst.msk [vmem:[#allocation2 + $0x108] sm:$0xff] %vm1246_vm3, %v5761_v5  ;;  %7615 = vrot.lane.b32.xlu0 %v6336_v53, %s10390_s17  ;;  %v6730_v5 = vld [vmem:[#allocation3 + $0xb0] sm:$0xff] }
 0x7e4   :  { %6466 = vrot.lane.b32.xlu1 %v6336_v53, %s10387_s27 }
 0x7e5   :  { %v5763_v52 = vpop.permute.xlu0 %5762 }
 0x7e6   :  { %v5765_v55 = vpop.permute.xlu1 %5764  ;;  %5920 = vst.msk [vmem:[#allocation2 + $0x110] sm:$0xff] %vm1246_vm3, %v5763_v52 }
 0x7e7   :  { %5921 = vst.msk [vmem:[#allocation2 + $0x118] sm:$0xff] %vm1246_vm3, %v5765_v55  ;;  %7617 = vrot.lane.b32.xlu0 %v6337_v9, %s10390_s17 }
 0x7e8   :  { %6468 = vrot.lane.b32.xlu1 %v6337_v9, %s10387_s27 }
 0x7e9   :  { %v5767_v8 = vpop.permute.xlu0 %5766 }
 0x7ea   :  { %v5769_v63 = vpop.permute.xlu1 %5768  ;;  %5922 = vst.msk [vmem:[#allocation2 + $0x120] sm:$0xff] %vm1246_vm3, %v5767_v8  ;;  %v6346_v8 = vld [vmem:[#allocation3 + $0xaa] sm:$0xff] }
 0x7eb   :  { %5923 = vst.msk [vmem:[#allocation2 + $0x128] sm:$0xff] %vm1246_vm3, %v5769_v63  ;;  %6851 = vrot.lane.b32.xlu0 %v6721_v62, %s10388_s8 }
 0x7ec   :  { %6853 = vrot.lane.b32.xlu1 %v6722_v44, %s10388_s8  ;;  %v6347_v44 = vld [vmem:[#allocation3 + $0xb2] sm:$0xff] }
 0x7ed   :  { %v5771_v11 = vpop.permute.xlu0 %5770 }
 0x7ee   :  { %v5773_v47 = vpop.permute.xlu1 %5772  ;;  %5924 = vst.msk [vmem:[#allocation2 + $0x130] sm:$0xff] %vm1246_vm3, %v5771_v11  ;;  %v6731_v11 = vld [vmem:[#allocation3 + $0xc0] sm:$0xff] }
 0x7ef   :  { %5925 = vst.msk [vmem:[#allocation2 + $0x138] sm:$0xff] %vm1246_vm3, %v5773_v47  ;;  %7235 = vrot.lane.b32.xlu0 %v15359_v20, %s10389_s21  ;;  %v6732_v47 = vld [vmem:[#allocation3 + $0xc8] sm:$0xff] }
 0x7f0   :  { %7237 = vrot.lane.b32.xlu1 %v15362_v31, %s10389_s21 }
 0x7f1   :  { %v5775_v43 = vpop.permute.xlu0 %5774 }
 0x7f2   :  { %v5777_v59 = vpop.permute.xlu1 %5776  ;;  %5926 = vst.msk [vmem:[#allocation2 + $0x140] sm:$0xff] %vm1246_vm3, %v5775_v43 }
 0x7f3   :  { %5927 = vst.msk [vmem:[#allocation2 + $0x148] sm:$0xff] %vm1246_vm3, %v5777_v59  ;;  %7619 = vrot.lane.b32.xlu0 %v6338_v37, %s10390_s17 }
 0x7f4   :  { %6470 = vrot.lane.b32.xlu1 %v6338_v37, %s10387_s27 }
 0x7f5   :  { %v5779_v54 = vpop.permute.xlu0 %5778 }
 0x7f6   :  { %v5781_v28 = vpop.permute.xlu1 %5780  ;;  %5928 = vst.msk [vmem:[#allocation2 + $0x150] sm:$0xff] %vm1246_vm3, %v5779_v54 }
 0x7f7   :  { %5929 = vst.msk [vmem:[#allocation2 + $0x158] sm:$0xff] %vm1246_vm3, %v5781_v28  ;;  %7621 = vrot.lane.b32.xlu0 %v6339_v32, %s10390_s17  ;;  %v6348_v28 = vld [vmem:[#allocation3 + $0xc2] sm:$0xff] }
 0x7f8   :  { %6472 = vrot.lane.b32.xlu1 %v6339_v32, %s10387_s27 }
 0x7f9   :  { %v5783_v20 = vpop.permute.xlu0 %5782 }
 0x7fa   :  { %v5785_v31 = vpop.permute.xlu1 %5784  ;;  %5930 = vst.msk [vmem:[#allocation2 + $0x160] sm:$0xff] %vm1246_vm3, %v5783_v20 }
 0x7fb   :  { %5931 = vst.msk [vmem:[#allocation2 + $0x168] sm:$0xff] %vm1246_vm3, %v5785_v31  ;;  %6855 = vrot.lane.b32.xlu0 %v6723_v10, %s10388_s8  ;;  %v6349_v31 = vld [vmem:[#allocation3 + $0xca] sm:$0xff]  ;;  %v6733_v10 = vld [vmem:[#allocation3 + $0xd8] sm:$0xff] }
 0x7fc   :  { %6857 = vrot.lane.b32.xlu1 %v6724_v22, %s10388_s8  ;;  %v6734_v22 = vld [vmem:[#allocation3 + $0xe0] sm:$0xff] }
 0x7fd   :  { %v5787_v61 = vpop.permute.xlu0 %5786 }
 0x7fe   :  { %v5789_v42 = vpop.permute.xlu1 %5788  ;;  %5932 = vst.msk [vmem:[#allocation2 + $0x170] sm:$0xff] %vm1246_vm3, %v5787_v61 }
 0x7ff   :  { %5933 = vst.msk [vmem:[#allocation2 + $0x178] sm:$0xff] %vm1246_vm3, %v5789_v42  ;;  %7239 = vrot.lane.b32.xlu0 %v15369_v2, %s10389_s21 }
 0x800   :  { %7241 = vrot.lane.b32.xlu1 %v15372_v14, %s10389_s21 }
 0x801   :  { %v5791_v38 = vpop.permute.xlu0 %5790 }
 0x802   :  { %v5793_v16 = vpop.permute.xlu1 %5792  ;;  %5934 = vst.msk [vmem:[#allocation2 + $0x180] sm:$0xff] %vm1246_vm3, %v5791_v38 }
 0x803   :  { %5935 = vst.msk [vmem:[#allocation2 + $0x188] sm:$0xff] %vm1246_vm3, %v5793_v16  ;;  %7623 = vrot.lane.b32.xlu0 %v6340_v24, %s10390_s17 }
 0x804   :  { %6474 = vrot.lane.b32.xlu1 %v6340_v24, %s10387_s27  ;;  %v6350_v24 = vld [vmem:[#allocation3 + $0xda] sm:$0xff] }
 0x805   :  { %v5795_v36 = vpop.permute.xlu0 %5794 }
 0x806   :  { %v5797_v17 = vpop.permute.xlu1 %5796  ;;  %5936 = vst.msk [vmem:[#allocation2 + $0x190] sm:$0xff] %vm1246_vm3, %v5795_v36 }
 0x807   :  { %5937 = vst.msk [vmem:[#allocation2 + $0x198] sm:$0xff] %vm1246_vm3, %v5797_v17  ;;  %7625 = vrot.lane.b32.xlu0 %v6341_v30, %s10390_s17 }
 0x808   :  { %6476 = vrot.lane.b32.xlu1 %v6341_v30, %s10387_s27  ;;  %v6351_v30 = vld [vmem:[#allocation3 + $0xe2] sm:$0xff] }
 0x809   :  { %v5799_v2 = vpop.permute.xlu0 %5798 }
 0x80a   :  { %v5801_v14 = vpop.permute.xlu1 %5800  ;;  %5938 = vst.msk [vmem:[#allocation2 + $0x1a0] sm:$0xff] %vm1246_vm3, %v5799_v2  ;;  %v6735_v2 = vld [vmem:[#allocation3 + $0xf0] sm:$0xff] }
 0x80b   :  { %5939 = vst.msk [vmem:[#allocation2 + $0x1a8] sm:$0xff] %vm1246_vm3, %v5801_v14  ;;  %6859 = vrot.lane.b32.xlu0 %v6725_v21, %s10388_s8  ;;  %v6736_v14 = vld [vmem:[#allocation3 + $0xf8] sm:$0xff] }
 0x80c   :  { %6861 = vrot.lane.b32.xlu1 %v6726_v7, %s10388_s8 }
 0x80d   :  { %v5803_v40 = vpop.permute.xlu0 %5802 }
 0x80e   :  { %v5805_v57 = vpop.permute.xlu1 %5804  ;;  %5940 = vst.msk [vmem:[#allocation2 + $0x1b0] sm:$0xff] %vm1246_vm3, %v5803_v40 }
 0x80f   :  { %5941 = vst.msk [vmem:[#allocation2 + $0x1b8] sm:$0xff] %vm1246_vm3, %v5805_v57  ;;  %7243 = vrot.lane.b32.xlu0 %v15379_v15, %s10389_s21 }
 0x810   :  { %7245 = vrot.lane.b32.xlu1 %v15382_v58, %s10389_s21 }
 0x811   :  { %v5807_v41 = vpop.permute.xlu0 %5806 }
 0x812   :  { %v5809_v45 = vpop.permute.xlu1 %5808  ;;  %5942 = vst.msk [vmem:[#allocation2 + $0x1c0] sm:$0xff] %vm1246_vm3, %v5807_v41 }
 0x813   :  { %5943 = vst.msk [vmem:[#allocation2 + $0x1c8] sm:$0xff] %vm1246_vm3, %v5809_v45  ;;  %7627 = vrot.lane.b32.xlu0 %v6342_v23, %s10390_s17 }
 0x814   :  { %6478 = vrot.lane.b32.xlu1 %v6342_v23, %s10387_s27  ;;  %v6352_v23 = vld [vmem:[#allocation3 + $0xf2] sm:$0xff] }
 0x815   :  { %v5811_v3 = vpop.permute.xlu0 %5810 }
 0x816   :  { %v5813_v12 = vpop.permute.xlu1 %5812  ;;  %5944 = vst.msk [vmem:[#allocation2 + $0x1d0] sm:$0xff] %vm1246_vm3, %v5811_v3 }
 0x817   :  { %5945 = vst.msk [vmem:[#allocation2 + $0x1d8] sm:$0xff] %vm1246_vm3, %v5813_v12  ;;  %7629 = vrot.lane.b32.xlu0 %v6343_v48, %s10390_s17 }
 0x818   :  { %6480 = vrot.lane.b32.xlu1 %v6343_v48, %s10387_s27 }
 0x819   :  { %v5815_v15 = vpop.permute.xlu0 %5814 }
 0x81a   :  { %v5817_v58 = vpop.permute.xlu1 %5816  ;;  %5946 = vst.msk [vmem:[#allocation2 + $0x1e0] sm:$0xff] %vm1246_vm3, %v5815_v15  ;;  %v6737_v15 = vld [vmem:[#allocation3 + $0x108] sm:$0xff] }
 0x81b   :  { %5947 = vst.msk [vmem:[#allocation2 + $0x1e8] sm:$0xff] %vm1246_vm3, %v5817_v58  ;;  %6863 = vrot.lane.b32.xlu0 %v6727_v19, %s10388_s8  ;;  %v6738_v58 = vld [vmem:[#allocation3 + $0x110] sm:$0xff] }
 0x81c   :  { %6865 = vrot.lane.b32.xlu1 %v6728_v29, %s10388_s8 }
 0x81d   :  { %v5819_v39 = vpop.permute.xlu0 %5818 }
 0x81e   :  { %v5821_v26 = vpop.permute.xlu1 %5820  ;;  %5948 = vst.msk [vmem:[#allocation2 + $0x1f0] sm:$0xff] %vm1246_vm3, %v5819_v39 }
 0x81f   :  { %5949 = vst.msk [vmem:[#allocation2 + $0x1f8] sm:$0xff] %vm1246_vm3, %v5821_v26  ;;  %7247 = vrot.lane.b32.xlu0 %v15389_v56, %s10389_s21  ;;  %v5970_v26 = vld [vmem:[#allocation3 + $0x109] sm:$0xff] }
 0x820   :  { %7249 = vrot.lane.b32.xlu1 %v15392_v0, %s10389_s21 }
 0x821   :  { %v6079_v34 = vpop.permute.xlu0 %6078 }
 0x822   :  { %v6081_v25 = vpop.permute.xlu1 %6080  ;;  %6270 = vst.msk [vmem:[#allocation2] sm:$0xff] %vm1631_vm4, %v6079_v34 }
 0x823   :  { %6271 = vst.msk [vmem:[#allocation2 + $0x8] sm:$0xff] %vm1631_vm4, %v6081_v25  ;;  %7631 = vrot.lane.b32.xlu0 %v6344_v4, %s10390_s17 }
 0x824   :  { %6482 = vrot.lane.b32.xlu1 %v6344_v4, %s10387_s27 }
 0x825   :  { %v6083_v33 = vpop.permute.xlu0 %6082 }
 0x826   :  { %v6085_v46 = vpop.permute.xlu1 %6084  ;;  %6272 = vst.msk [vmem:[#allocation2 + $0x10] sm:$0xff] %vm1631_vm4, %v6083_v33  ;;  %v7122_v33 = vld [vmem:[#allocation3 + $0x111] sm:$0xff] }
 0x827   :  { %6273 = vst.msk [vmem:[#allocation2 + $0x18] sm:$0xff] %vm1631_vm4, %v6085_v46  ;;  %7633 = vrot.lane.b32.xlu0 %v6345_v27, %s10390_s17  ;;  %v7505_v46 = vld [vmem:[#allocation3 + $0x10a] sm:$0xff] }
 0x828   :  { %6484 = vrot.lane.b32.xlu1 %v6345_v27, %s10387_s27 }
 0x829   :  { %v6087_v56 = vpop.permute.xlu0 %6086 }
 0x82a   :  { %v6089_v0 = vpop.permute.xlu1 %6088  ;;  %6274 = vst.msk [vmem:[#allocation2 + $0x20] sm:$0xff] %vm1631_vm4, %v6087_v56 }
 0x82b   :  { %6275 = vst.msk [vmem:[#allocation2 + $0x28] sm:$0xff] %vm1631_vm4, %v6089_v0  ;;  %6867 = vrot.lane.b32.xlu0 %v6729_v6, %s10388_s8 }
 0x82c   :  { %6869 = vrot.lane.b32.xlu1 %v6730_v5, %s10388_s8  ;;  %v6355_v5 = vld [vmem:[#allocation3 + $0x112] sm:$0xff] }
 0x82d   :  { %v6091_v53 = vpop.permute.xlu0 %6090 }
 0x82e   :  { %v6093_v52 = vpop.permute.xlu1 %6092  ;;  %6276 = vst.msk [vmem:[#allocation2 + $0x30] sm:$0xff] %vm1631_vm4, %v6091_v53 }
 0x82f   :  { %6277 = vst.msk [vmem:[#allocation2 + $0x38] sm:$0xff] %vm1631_vm4, %v6093_v52  ;;  %7251 = vrot.lane.b32.xlu0 %v15399_v50, %s10389_s21 }
 0x830   :  { %7253 = vrot.lane.b32.xlu1 %v15402_v18, %s10389_s21 }
 0x831   :  { %v6095_v55 = vpop.permute.xlu0 %6094 }
 0x832   :  { %v6097_v9 = vpop.permute.xlu1 %6096  ;;  %6278 = vst.msk [vmem:[#allocation2 + $0x40] sm:$0xff] %vm1631_vm4, %v6095_v55 }
 0x833   :  { %6279 = vst.msk [vmem:[#allocation2 + $0x48] sm:$0xff] %vm1631_vm4, %v6097_v9  ;;  %7635 = vrot.lane.b32.xlu0 %v6346_v8, %s10390_s17  ;;  %v6739_v9 = vld [vmem:[#allocation3 + $0x120] sm:$0xff] }
 0x834   :  { %6486 = vrot.lane.b32.xlu1 %v6346_v8, %s10387_s27  ;;  %v6740_v8 = vld [vmem:[#allocation3 + $0x128] sm:$0xff] }
 0x835   :  { %v6099_v63 = vpop.permute.xlu0 %6098 }
 0x836   :  { %v6101_v62 = vpop.permute.xlu1 %6100  ;;  %6280 = vst.msk [vmem:[#allocation2 + $0x50] sm:$0xff] %vm1631_vm4, %v6099_v63 }
 0x837   :  { %6281 = vst.msk [vmem:[#allocation2 + $0x58] sm:$0xff] %vm1631_vm4, %v6101_v62  ;;  %7637 = vrot.lane.b32.xlu0 %v6347_v44, %s10390_s17 }
 0x838   :  { %6488 = vrot.lane.b32.xlu1 %v6347_v44, %s10387_s27 }
 0x839   :  { %v6103_v50 = vpop.permute.xlu0 %6102 }
 0x83a   :  { %v6105_v18 = vpop.permute.xlu1 %6104  ;;  %6282 = vst.msk [vmem:[#allocation2 + $0x60] sm:$0xff] %vm1631_vm4, %v6103_v50  ;;  %v5972_v50 = vld [vmem:[#allocation3 + $0x121] sm:$0xff] }
 0x83b   :  { %6283 = vst.msk [vmem:[#allocation2 + $0x68] sm:$0xff] %vm1631_vm4, %v6105_v18  ;;  %6871 = vrot.lane.b32.xlu0 %v6731_v11, %s10388_s8 }
 0x83c   :  { %6873 = vrot.lane.b32.xlu1 %v6732_v47, %s10388_s8  ;;  %v7124_v47 = vld [vmem:[#allocation3 + $0x129] sm:$0xff] }
 0x83d   :  { %v6107_v43 = vpop.permute.xlu0 %6106 }
 0x83e   :  { %v6109_v59 = vpop.permute.xlu1 %6108  ;;  %6284 = vst.msk [vmem:[#allocation2 + $0x70] sm:$0xff] %vm1631_vm4, %v6107_v43  ;;  %v7507_v43 = vld [vmem:[#allocation3 + $0x122] sm:$0xff] }
 0x83f   :  { %6285 = vst.msk [vmem:[#allocation2 + $0x78] sm:$0xff] %vm1631_vm4, %v6109_v59  ;;  %7255 = vrot.lane.b32.xlu0 %v15409_v1, %s10389_s21 }
 0x840   :  { %7257 = vrot.lane.b32.xlu1 %v15412_v13, %s10389_s21 }
 0x841   :  { %v6111_v37 = vpop.permute.xlu0 %6110 }
 0x842   :  { %v6113_v54 = vpop.permute.xlu1 %6112  ;;  %6286 = vst.msk [vmem:[#allocation2 + $0x80] sm:$0xff] %vm1631_vm4, %v6111_v37 }
 0x843   :  { %6287 = vst.msk [vmem:[#allocation2 + $0x88] sm:$0xff] %vm1631_vm4, %v6113_v54  ;;  %7639 = vrot.lane.b32.xlu0 %v6348_v28, %s10390_s17 }
 0x844   :  { %6490 = vrot.lane.b32.xlu1 %v6348_v28, %s10387_s27 }
 0x845   :  { %v6115_v32 = vpop.permute.xlu0 %6114 }
 0x846   :  { %v6117_v20 = vpop.permute.xlu1 %6116  ;;  %6288 = vst.msk [vmem:[#allocation2 + $0x90] sm:$0xff] %vm1631_vm4, %v6115_v32 }
 0x847   :  { %6289 = vst.msk [vmem:[#allocation2 + $0x98] sm:$0xff] %vm1631_vm4, %v6117_v20  ;;  %7641 = vrot.lane.b32.xlu0 %v6349_v31, %s10390_s17  ;;  %v6357_v20 = vld [vmem:[#allocation3 + $0x12a] sm:$0xff] }
 0x848   :  { %6492 = vrot.lane.b32.xlu1 %v6349_v31, %s10387_s27 }
 0x849   :  { %v6463_v1 = vpop.permute.xlu0 %6462 }
 0x84a   :  { %v6465_v13 = vpop.permute.xlu1 %6464  ;;  %6654 = vst.msk [vmem:[#allocation2] sm:$0xff] %vm2016_vm5, %v6463_v1 }
 0x84b   :  { %6655 = vst.msk [vmem:[#allocation2 + $0x8] sm:$0xff] %vm2016_vm5, %v6465_v13  ;;  %6875 = vrot.lane.b32.xlu0 %v6733_v10, %s10388_s8  ;;  %v6741_v10 = vld [vmem:[#allocation3 + $0x138] sm:$0xff] }
 0x84c   :  { %6877 = vrot.lane.b32.xlu1 %v6734_v22, %s10388_s8  ;;  %v6742_v22 = vld [vmem:[#allocation3 + $0x140] sm:$0xff] }
 0x84d   :  { %v6848_v61 = vpop.permute.xlu0 %6847 }
 0x84e   :  { %v6850_v42 = vpop.permute.xlu1 %6849  ;;  %7039 = vst.msk [vmem:[#allocation2] sm:$0xff] %vm2402_vm6, %v6848_v61 }
 0x84f   :  { %7040 = vst.msk [vmem:[#allocation2 + $0x8] sm:$0xff] %vm2402_vm6, %v6850_v42  ;;  %7259 = vrot.lane.b32.xlu0 %v15419_v60, %s10389_s21 }
 0x850   :  { %7261 = vrot.lane.b32.xlu1 %v15422_v51, %s10389_s21 }
 0x851   :  { %v7232_v38 = vpop.permute.xlu0 %7231 }
 0x852   :  { %v7234_v16 = vpop.permute.xlu1 %7233  ;;  %7423 = vst.msk [vmem:[#allocation2] sm:$0xff] %vm2787_vm7, %v7232_v38  ;;  %v5974_v38 = vld [vmem:[#allocation3 + $0x139] sm:$0xff] }
 0x853   :  { %7424 = vst.msk [vmem:[#allocation2 + $0x8] sm:$0xff] %vm2787_vm7, %v7234_v16  ;;  %7643 = vrot.lane.b32.xlu0 %v6350_v24, %s10390_s17 }
 0x854   :  { %6494 = vrot.lane.b32.xlu1 %v6350_v24, %s10387_s27 }
 0x855   :  { %v7616_v36 = vpop.permute.xlu0 %7615 }
 0x856   :  { %v6467_v17 = vpop.permute.xlu1 %6466  ;;  %7807 = vst.msk [vmem:[#allocation2] sm:$0xff] %vm3172_vm8, %v7616_v36  ;;  %v7126_v36 = vld [vmem:[#allocation3 + $0x141] sm:$0xff] }
 0x857   :  { %6656 = vst.msk [vmem:[#allocation2 + $0x10] sm:$0xff] %vm2016_vm5, %v6467_v17  ;;  %7645 = vrot.lane.b32.xlu0 %v6351_v30, %s10390_s17  ;;  %v7509_v17 = vld [vmem:[#allocation3 + $0x13a] sm:$0xff] }
 0x858   :  { %6496 = vrot.lane.b32.xlu1 %v6351_v30, %s10387_s27 }
 0x859   :  { %v7618_v60 = vpop.permute.xlu0 %7617 }
 0x85a   :  { %v6469_v51 = vpop.permute.xlu1 %6468  ;;  %7808 = vst.msk [vmem:[#allocation2 + $0x8] sm:$0xff] %vm3172_vm8, %v7618_v60 }
 0x85b   :  { %6657 = vst.msk [vmem:[#allocation2 + $0x18] sm:$0xff] %vm2016_vm5, %v6469_v51  ;;  %6879 = vrot.lane.b32.xlu0 %v6735_v2, %s10388_s8 }
 0x85c   :  { %6881 = vrot.lane.b32.xlu1 %v6736_v14, %s10388_s8 }
 0x85d   :  { %v6852_v21 = vpop.permute.xlu0 %6851  ;;  %v7871_v7 = vld [vmem:[#allocation2] sm:$0xff] }
 0x85e   :  { %v6854_v40 = vpop.permute.xlu1 %6853  ;;  %7041 = vst.msk [vmem:[#allocation2 + $0x10] sm:$0xff] %vm2402_vm6, %v6852_v21  ;;  %10242 = vmatprep.mubr.msk.f32.mxu1 %vm3310_vm9, %v7871_v7  ;;  %v6359_v7 = vld [vmem:[#allocation3 + $0x142] sm:$0xff] }
 0x85f   :  { %7042 = vst.msk [vmem:[#allocation2 + $0x18] sm:$0xff] %vm2402_vm6, %v6854_v40  ;;  %7263 = vrot.lane.b32.xlu0 %v15435_v35, %s10389_s21  ;;  %v6353_v35 = vld [vmem:[#allocation3 + $0xfa] sm:$0xff] }
 0x860   :  { %7265 = vrot.lane.b32.xlu1 %v15438_v49, %s10389_s21 }
 0x861   :  { %v7236_v57 = vpop.permute.xlu0 %7235  ;;  %v7872_v41 = vld [vmem:[#allocation2 + $0x8] sm:$0xff] }
 0x862   :  { %v7238_v45 = vpop.permute.xlu1 %7237  ;;  %7425 = vst.msk [vmem:[#allocation2 + $0x10] sm:$0xff] %vm2787_vm7, %v7236_v57  ;;  %10243 = vmatmul.mubr.msk.f32.vlgmr.msra.gmra.mrb[0].mxu1 %vm3310_vm9, %v7872_v41  ;;  %v6743_v41 = vld [vmem:[#allocation3 + $0x150] sm:$0xff] }
 0x863   :  { %7426 = vst.msk [vmem:[#allocation2 + $0x18] sm:$0xff] %vm2787_vm7, %v7238_v45  ;;  %7647 = vrot.lane.b32.xlu0 %v6352_v23, %s10390_s17  ;;  %v6744_v45 = vld [vmem:[#allocation3 + $0x158] sm:$0xff] }
 0x864   :  { %6498 = vrot.lane.b32.xlu1 %v6352_v23, %s10387_s27 }
 0x865   :  { %v7620_v3 = vpop.permute.xlu0 %7619 }
 0x866   :  { %v6471_v12 = vpop.permute.xlu1 %6470  ;;  %7809 = vst.msk [vmem:[#allocation2 + $0x10] sm:$0xff] %vm3172_vm8, %v7620_v3 }
 0x867   :  { %6658 = vst.msk [vmem:[#allocation2 + $0x20] sm:$0xff] %vm2016_vm5, %v6471_v12  ;;  %7649 = vrot.lane.b32.xlu0 %v6353_v35, %s10390_s17  ;;  %v5976_v12 = vld [vmem:[#allocation3 + $0x151] sm:$0xff] }
 0x868   :  { %6500 = vrot.lane.b32.xlu1 %v6353_v35, %s10387_s27 }
 0x869   :  { %v7622_v49 = vpop.permute.xlu0 %7621 }
 0x86a   :  { %v6473_v48 = vpop.permute.xlu1 %6472  ;;  %7810 = vst.msk [vmem:[#allocation2 + $0x18] sm:$0xff] %vm3172_vm8, %v7622_v49 }
 0x86b   :  { %6659 = vst.msk [vmem:[#allocation2 + $0x28] sm:$0xff] %vm2016_vm5, %v6473_v48  ;;  %6883 = vrot.lane.b32.xlu0 %v6737_v15, %s10388_s8  ;;  %v7128_v15 = vld [vmem:[#allocation3 + $0x159] sm:$0xff] }
 0x86c   :  { %6885 = vrot.lane.b32.xlu1 %v6738_v58, %s10388_s8  ;;  %v7511_v58 = vld [vmem:[#allocation3 + $0x152] sm:$0xff] }
 0x86d   :  { %v6856_v19 = vpop.permute.xlu0 %6855  ;;  %v7873_v29 = vld [vmem:[#allocation2 + $0x10] sm:$0xff] }
 0x86e   :  { %v6858_v39 = vpop.permute.xlu1 %6857  ;;  %7043 = vst.msk [vmem:[#allocation2 + $0x20] sm:$0xff] %vm2402_vm6, %v6856_v19  ;;  %10245 = vmatprep.mubr.msk.f32.mxu1 %vm3310_vm9, %v7873_v29 }
 0x86f   :  { %7044 = vst.msk [vmem:[#allocation2 + $0x28] sm:$0xff] %vm2402_vm6, %v6858_v39  ;;  %7267 = vrot.lane.b32.xlu0 %v5970_v26, %s10389_s21 }
 0x870   :  { %6118 = vrot.lane.b32.xlu1 %v5970_v26, %s10386_s10 }
 0x871   :  { %v7240_v34 = vpop.permute.xlu0 %7239  ;;  %v7874_v25 = vld [vmem:[#allocation2 + $0x18] sm:$0xff] }
 0x872   :  { %v7242_v4 = vpop.permute.xlu1 %7241  ;;  %7427 = vst.msk [vmem:[#allocation2 + $0x20] sm:$0xff] %vm2787_vm7, %v7240_v34  ;;  %10246 = vmatmul.mubr.msk.f32.gmra.mrb[2].mxu1 %vm3310_vm9, %v7874_v25  ;;  %v6361_v25 = vld [vmem:[#allocation3 + $0x15a] sm:$0xff] }
 0x873   :  { %7428 = vst.msk [vmem:[#allocation2 + $0x28] sm:$0xff] %vm2787_vm7, %v7242_v4  ;;  %7269 = vrot.lane.b32.xlu0 %v7122_v33, %s10389_s21 }
 0x874   :  { %7651 = vrot.lane.b32.xlu1 %v7505_v46, %s10390_s17 }
 0x875   :  { %v7624_v27 = vpop.permute.xlu0 %7623 }
 0x876   :  { %v6475_v56 = vpop.permute.xlu1 %6474  ;;  %7811 = vst.msk [vmem:[#allocation2 + $0x20] sm:$0xff] %vm3172_vm8, %v7624_v27  ;;  %v6746_v27 = vld [vmem:[#allocation3 + $0x170] sm:$0xff] }
 0x877   :  { %6660 = vst.msk [vmem:[#allocation2 + $0x30] sm:$0xff] %vm2016_vm5, %v6475_v56  ;;  %6120 = vrot.lane.b32.xlu0 %v7122_v33, %s10386_s10 }
 0x878   :  { %6502 = vrot.lane.b32.xlu1 %v7505_v46, %s10387_s27  ;;  %v6745_v46 = vld [vmem:[#allocation3 + $0x168] sm:$0xff] }
 0x879   :  { %v7626_v0 = vpop.permute.xlu0 %7625 }
 0x87a   :  { %v6477_v6 = vpop.permute.xlu1 %6476  ;;  %7812 = vst.msk [vmem:[#allocation2 + $0x28] sm:$0xff] %vm3172_vm8, %v7626_v0 }
 0x87b   :  { %6661 = vst.msk [vmem:[#allocation2 + $0x38] sm:$0xff] %vm2016_vm5, %v6477_v6  ;;  %7653 = vrot.lane.b32.xlu0 %v6355_v5, %s10390_s17 }
 0x87c   :  { %6504 = vrot.lane.b32.xlu1 %v6355_v5, %s10387_s27  ;;  %v5978_v5 = vld [vmem:[#allocation3 + $0x169] sm:$0xff] }
 0x87d   :  { %v6860_v53 = vpop.permute.xlu0 %6859  ;;  %v7875_v52 = vld [vmem:[#allocation2 + $0x20] sm:$0xff] }
 0x87e   :  { %v6862_v55 = vpop.permute.xlu1 %6861  ;;  %7045 = vst.msk [vmem:[#allocation2 + $0x30] sm:$0xff] %vm2402_vm6, %v6860_v53  ;;  %10248 = vmatprep.mubr.msk.f32.mxu1 %vm3310_vm9, %v7875_v52 }
 0x87f   :  { %7046 = vst.msk [vmem:[#allocation2 + $0x38] sm:$0xff] %vm2402_vm6, %v6862_v55  ;;  %6887 = vrot.lane.b32.xlu0 %v6739_v9, %s10388_s8  ;;  %v7130_v9 = vld [vmem:[#allocation3 + $0x171] sm:$0xff] }
 0x880   :  { %6889 = vrot.lane.b32.xlu1 %v6740_v8, %s10388_s8  ;;  %v7513_v8 = vld [vmem:[#allocation3 + $0x16a] sm:$0xff] }
 0x881   :  { %v7244_v63 = vpop.permute.xlu0 %7243  ;;  %v7876_v62 = vld [vmem:[#allocation2 + $0x28] sm:$0xff] }
 0x882   :  { %v7246_v44 = vpop.permute.xlu1 %7245  ;;  %7429 = vst.msk [vmem:[#allocation2 + $0x30] sm:$0xff] %vm2787_vm7, %v7244_v63  ;;  %10249 = vmatmul.mubr.msk.f32.gmra.mrb[4].mxu1 %vm3310_vm9, %v7876_v62 }
 0x883   :  { %7430 = vst.msk [vmem:[#allocation2 + $0x38] sm:$0xff] %vm2787_vm7, %v7246_v44  ;;  %7271 = vrot.lane.b32.xlu0 %v5972_v50, %s10389_s21 }
 0x884   :  { %6122 = vrot.lane.b32.xlu1 %v5972_v50, %s10386_s10 }
 0x885   :  { %v7628_v18 = vpop.permute.xlu0 %7627 }
 0x886   :  { %v6479_v11 = vpop.permute.xlu1 %6478  ;;  %7813 = vst.msk [vmem:[#allocation2 + $0x30] sm:$0xff] %vm3172_vm8, %v7628_v18  ;;  %v6363_v18 = vld [vmem:[#allocation3 + $0x172] sm:$0xff] }
 0x887   :  { %6662 = vst.msk [vmem:[#allocation2 + $0x40] sm:$0xff] %vm2016_vm5, %v6479_v11  ;;  %7273 = vrot.lane.b32.xlu0 %v7124_v47, %s10389_s21 }
 0x888   :  { %7655 = vrot.lane.b32.xlu1 %v7507_v43, %s10390_s17 }
 0x889   :  { %v7630_v59 = vpop.permute.xlu0 %7629 }
 0x88a   :  { %v6481_v37 = vpop.permute.xlu1 %6480  ;;  %7814 = vst.msk [vmem:[#allocation2 + $0x38] sm:$0xff] %vm3172_vm8, %v7630_v59  ;;  %v6747_v59 = vld [vmem:[#allocation3 + $0x180] sm:$0xff] }
 0x88b   :  { %6663 = vst.msk [vmem:[#allocation2 + $0x48] sm:$0xff] %vm2016_vm5, %v6481_v37  ;;  %6124 = vrot.lane.b32.xlu0 %v7124_v47, %s10386_s10  ;;  %v6748_v37 = vld [vmem:[#allocation3 + $0x188] sm:$0xff] }
 0x88c   :  { %6506 = vrot.lane.b32.xlu1 %v7507_v43, %s10387_s27 }
 0x88d   :  { %v6864_v54 = vpop.permute.xlu0 %6863  ;;  %v7877_v28 = vld [vmem:[#allocation2 + $0x30] sm:$0xff] }
 0x88e   :  { %v6866_v32 = vpop.permute.xlu1 %6865  ;;  %7047 = vst.msk [vmem:[#allocation2 + $0x40] sm:$0xff] %vm2402_vm6, %v6864_v54  ;;  %10251 = vmatprep.mubr.msk.f32.mxu1 %vm3310_vm9, %v7877_v28 }
 0x88f   :  { %7048 = vst.msk [vmem:[#allocation2 + $0x48] sm:$0xff] %vm2402_vm6, %v6866_v32  ;;  %7657 = vrot.lane.b32.xlu0 %v6357_v20, %s10390_s17 }
 0x890   :  { %6508 = vrot.lane.b32.xlu1 %v6357_v20, %s10387_s27  ;;  %v5980_v20 = vld [vmem:[#allocation3 + $0x181] sm:$0xff] }
 0x891   :  { %v7248_v31 = vpop.permute.xlu0 %7247  ;;  %v7878_v1 = vld [vmem:[#allocation2 + $0x38] sm:$0xff] }
 0x892   :  { %v7250_v13 = vpop.permute.xlu1 %7249  ;;  %7431 = vst.msk [vmem:[#allocation2 + $0x40] sm:$0xff] %vm2787_vm7, %v7248_v31  ;;  %10252 = vmatmul.mubr.msk.f32.gmra.mrb[6].mxu1 %vm3310_vm9, %v7878_v1 }
 0x893   :  { %7432 = vst.msk [vmem:[#allocation2 + $0x48] sm:$0xff] %vm2787_vm7, %v7250_v13  ;;  %6891 = vrot.lane.b32.xlu0 %v6741_v10, %s10388_s8  ;;  %v7132_v13 = vld [vmem:[#allocation3 + $0x189] sm:$0xff] }
 0x894   :  { %6893 = vrot.lane.b32.xlu1 %v6742_v22, %s10388_s8  ;;  %v7515_v10 = vld [vmem:[#allocation3 + $0x182] sm:$0xff] }
 0x895   :  { %v7632_v61 = vpop.permute.xlu0 %7631 }
 0x896   :  { %v6483_v42 = vpop.permute.xlu1 %6482  ;;  %7815 = vst.msk [vmem:[#allocation2 + $0x40] sm:$0xff] %vm3172_vm8, %v7632_v61 }
 0x897   :  { %6664 = vst.msk [vmem:[#allocation2 + $0x50] sm:$0xff] %vm2016_vm5, %v6483_v42  ;;  %7275 = vrot.lane.b32.xlu0 %v5974_v38, %s10389_s21 }
 0x898   :  { %6126 = vrot.lane.b32.xlu1 %v5974_v38, %s10386_s10 }
 0x899   :  { %v7634_v16 = vpop.permute.xlu0 %7633 }
 0x89a   :  { %v6485_v24 = vpop.permute.xlu1 %6484  ;;  %7816 = vst.msk [vmem:[#allocation2 + $0x48] sm:$0xff] %vm3172_vm8, %v7634_v16 }
 0x89b   :  { %6665 = vst.msk [vmem:[#allocation2 + $0x58] sm:$0xff] %vm2016_vm5, %v6485_v24  ;;  %7277 = vrot.lane.b32.xlu0 %v7126_v36, %s10389_s21  ;;  %v6365_v24 = vld [vmem:[#allocation3 + $0x18a] sm:$0xff] }
 0x89c   :  { %7659 = vrot.lane.b32.xlu1 %v7509_v17, %s10390_s17 }
 0x89d   :  { %v6868_v30 = vpop.permute.xlu0 %6867  ;;  %v7879_v60 = vld [vmem:[#allocation2 + $0x40] sm:$0xff] }
 0x89e   :  { %v6870_v51 = vpop.permute.xlu1 %6869  ;;  %7049 = vst.msk [vmem:[#allocation2 + $0x50] sm:$0xff] %vm2402_vm6, %v6868_v30  ;;  %10254 = vmatprep.mubr.msk.f32.mxu1 %vm3310_vm9, %v7879_v60  ;;  %v6750_v60 = vld [vmem:[#allocation3 + $0x1a0] sm:$0xff] }
 0x89f   :  { %7050 = vst.msk [vmem:[#allocation2 + $0x58] sm:$0xff] %vm2402_vm6, %v6870_v51  ;;  %6128 = vrot.lane.b32.xlu0 %v7126_v36, %s10386_s10  ;;  %v6749_v36 = vld [vmem:[#allocation3 + $0x198] sm:$0xff] }
 0x8a0   :  { %6510 = vrot.lane.b32.xlu1 %v7509_v17, %s10387_s27 }
 0x8a1   :  { %v7252_v2 = vpop.permute.xlu0 %7251  ;;  %v7880_v14 = vld [vmem:[#allocation2 + $0x48] sm:$0xff] }
 0x8a2   :  { %v7254_v21 = vpop.permute.xlu1 %7253  ;;  %7433 = vst.msk [vmem:[#allocation2 + $0x50] sm:$0xff] %vm2787_vm7, %v7252_v2  ;;  %10255 = vmatmul.mubr.msk.f32.gmra.mrb[8].mxu1 %vm3310_vm9, %v7880_v14  ;;  %v7133_v2 = vld [vmem:[#allocation3 + $0x199] sm:$0xff] }
 0x8a3   :  { %7434 = vst.msk [vmem:[#allocation2 + $0x58] sm:$0xff] %vm2787_vm7, %v7254_v21  ;;  %7661 = vrot.lane.b32.xlu0 %v6359_v7, %s10390_s17 }
 0x8a4   :  { %6512 = vrot.lane.b32.xlu1 %v6359_v7, %s10387_s27  ;;  %v5982_v7 = vld [vmem:[#allocation3 + $0x1c9] sm:$0xff] }
 0x8a5   :  { %v7636_v40 = vpop.permute.xlu0 %7635 }
 0x8a6   :  { %v6487_v57 = vpop.permute.xlu1 %6486  ;;  %7817 = vst.msk [vmem:[#allocation2 + $0x50] sm:$0xff] %vm3172_vm8, %v7636_v40  ;;  %v7134_v40 = vld [vmem:[#allocation3 + $0x1a1] sm:$0xff] }
 0x8a7   :  { %6666 = vst.msk [vmem:[#allocation2 + $0x60] sm:$0xff] %vm2016_vm5, %v6487_v57  ;;  %6895 = vrot.lane.b32.xlu0 %v6743_v41, %s10388_s8  ;;  %v7517_v41 = vld [vmem:[#allocation3 + $0x19a] sm:$0xff] }
 0x8a8   :  { %6897 = vrot.lane.b32.xlu1 %v6744_v45, %s10388_s8 }
 0x8a9   :  { %v7638_v23 = vpop.permute.xlu0 %7637 }
 0x8aa   :  { %v6489_v3 = vpop.permute.xlu1 %6488  ;;  %7818 = vst.msk [vmem:[#allocation2 + $0x58] sm:$0xff] %vm3172_vm8, %v7638_v23 }
 0x8ab   :  { %6667 = vst.msk [vmem:[#allocation2 + $0x68] sm:$0xff] %vm2016_vm5, %v6489_v3  ;;  %7279 = vrot.lane.b32.xlu0 %v5976_v12, %s10389_s21 }
 0x8ac   :  { %6130 = vrot.lane.b32.xlu1 %v5976_v12, %s10386_s10 }
 0x8ad   :  { %v6872_v35 = vpop.permute.xlu0 %6871  ;;  %v7881_v49 = vld [vmem:[#allocation2 + $0x50] sm:$0xff] }
 0x8ae   :  { %v6874_v48 = vpop.permute.xlu1 %6873  ;;  %7051 = vst.msk [vmem:[#allocation2 + $0x60] sm:$0xff] %vm2402_vm6, %v6872_v35  ;;  %10257 = vmatprep.mubr.msk.f32.mxu1 %vm3310_vm9, %v7881_v49  ;;  %v5983_v35 = vld [vmem:[#allocation3 + $0x1d1] sm:$0xff] }
 0x8af   :  { %7052 = vst.msk [vmem:[#allocation2 + $0x68] sm:$0xff] %vm2402_vm6, %v6874_v48  ;;  %7281 = vrot.lane.b32.xlu0 %v7128_v15, %s10389_s21  ;;  %v6366_v49 = vld [vmem:[#allocation3 + $0x1ca] sm:$0xff]  ;;  %v7518_v48 = vld [vmem:[#allocation3 + $0x1a2] sm:$0xff] }
 0x8b0   :  { %7663 = vrot.lane.b32.xlu1 %v7511_v58, %s10390_s17 }
 0x8b1   :  { %v7256_v19 = vpop.permute.xlu0 %7255  ;;  %v7882_v29 = vld [vmem:[#allocation2 + $0x58] sm:$0xff] }
 0x8b2   :  { %v7258_v39 = vpop.permute.xlu1 %7257  ;;  %7435 = vst.msk [vmem:[#allocation2 + $0x60] sm:$0xff] %vm2787_vm7, %v7256_v19  ;;  %10258 = vmatmul.mubr.msk.f32.gmra.mrb[10].mxu1 %vm3310_vm9, %v7882_v29  ;;  %v6367_v19 = vld [vmem:[#allocation3 + $0x1d2] sm:$0xff] }
 0x8b3   :  { %7436 = vst.msk [vmem:[#allocation2 + $0x68] sm:$0xff] %vm2787_vm7, %v7258_v39  ;;  %6132 = vrot.lane.b32.xlu0 %v7128_v15, %s10386_s10 }
 0x8b4   :  { %6514 = vrot.lane.b32.xlu1 %v7511_v58, %s10387_s27 }
 0x8b5   :  { %v7640_v26 = vpop.permute.xlu0 %7639 }
 0x8b6   :  { %v6491_v34 = vpop.permute.xlu1 %6490  ;;  %7819 = vst.msk [vmem:[#allocation2 + $0x60] sm:$0xff] %vm3172_vm8, %v7640_v26 }
 0x8b7   :  { %6668 = vst.msk [vmem:[#allocation2 + $0x70] sm:$0xff] %vm2016_vm5, %v6491_v34  ;;  %7665 = vrot.lane.b32.xlu0 %v6361_v25, %s10390_s17  ;;  %v6751_v34 = vld [vmem:[#allocation3 + $0x1e0] sm:$0xff] }
 0x8b8   :  { %6516 = vrot.lane.b32.xlu1 %v6361_v25, %s10387_s27  ;;  %v6752_v25 = vld [vmem:[#allocation3 + $0x1e8] sm:$0xff] }
 0x8b9   :  { %v7642_v4 = vpop.permute.xlu0 %7641 }
 0x8ba   :  { %v6493_v33 = vpop.permute.xlu1 %6492  ;;  %7820 = vst.msk [vmem:[#allocation2 + $0x68] sm:$0xff] %vm3172_vm8, %v7642_v4 }
 0x8bb   :  { %6669 = vst.msk [vmem:[#allocation2 + $0x78] sm:$0xff] %vm2016_vm5, %v6493_v33  ;;  %6899 = vrot.lane.b32.xlu0 %v6745_v46, %s10388_s8  ;;  %v5984_v46 = vld [vmem:[#allocation3 + $0x1e1] sm:$0xff] }
 0x8bc   :  { %6901 = vrot.lane.b32.xlu1 %v6746_v27, %s10388_s8 }
 0x8bd   :  { %v6876_v56 = vpop.permute.xlu0 %6875  ;;  %v7883_v0 = vld [vmem:[#allocation2 + $0x60] sm:$0xff] }
 0x8be   :  { %v6878_v6 = vpop.permute.xlu1 %6877  ;;  %7053 = vst.msk [vmem:[#allocation2 + $0x70] sm:$0xff] %vm2402_vm6, %v6876_v56  ;;  %10260 = vmatprep.mubr.msk.f32.mxu1 %vm3310_vm9, %v7883_v0  ;;  %v7136_v0 = vld [vmem:[#allocation3 + $0x1e9] sm:$0xff] }
 0x8bf   :  { %7054 = vst.msk [vmem:[#allocation2 + $0x78] sm:$0xff] %vm2402_vm6, %v6878_v6  ;;  %7283 = vrot.lane.b32.xlu0 %v5978_v5, %s10389_s21  ;;  %v7519_v6 = vld [vmem:[#allocation3 + $0x1e2] sm:$0xff] }
 0x8c0   :  { %6134 = vrot.lane.b32.xlu1 %v5978_v5, %s10386_s10 }
 0x8c1   :  { %v7260_v53 = vpop.permute.xlu0 %7259  ;;  %v7884_v52 = vld [vmem:[#allocation2 + $0x68] sm:$0xff] }
 0x8c2   :  { %v7262_v55 = vpop.permute.xlu1 %7261  ;;  %7437 = vst.msk [vmem:[#allocation2 + $0x70] sm:$0xff] %vm2787_vm7, %v7260_v53  ;;  %10261 = vmatmul.mubr.msk.f32.gmra.mrb[12].mxu1 %vm3310_vm9, %v7884_v52 }
 0x8c3   :  { %7438 = vst.msk [vmem:[#allocation2 + $0x78] sm:$0xff] %vm2787_vm7, %v7262_v55  ;;  %7285 = vrot.lane.b32.xlu0 %v7130_v9, %s10389_s21 }
 0x8c4   :  { %7667 = vrot.lane.b32.xlu1 %v7513_v8, %s10390_s17 }
 0x8c5   :  { %v7644_v63 = vpop.permute.xlu0 %7643 }
 0x8c6   :  { %v6495_v62 = vpop.permute.xlu1 %6494  ;;  %7821 = vst.msk [vmem:[#allocation2 + $0x70] sm:$0xff] %vm3172_vm8, %v7644_v63 }
 0x8c7   :  { %6670 = vst.msk [vmem:[#allocation2 + $0x80] sm:$0xff] %vm2016_vm5, %v6495_v62  ;;  %6136 = vrot.lane.b32.xlu0 %v7130_v9, %s10386_s10 }
 0x8c8   :  { %6518 = vrot.lane.b32.xlu1 %v7513_v8, %s10387_s27  ;;  %v6369_v8 = vld [vmem:[#allocation3 + $0x1ea] sm:$0xff] }
 0x8c9   :  { %v7646_v44 = vpop.permute.xlu0 %7645 }
 0x8ca   :  { %v6497_v50 = vpop.permute.xlu1 %6496  ;;  %7822 = vst.msk [vmem:[#allocation2 + $0x78] sm:$0xff] %vm3172_vm8, %v7646_v44 }
 0x8cb   :  { %6671 = vst.msk [vmem:[#allocation2 + $0x88] sm:$0xff] %vm2016_vm5, %v6497_v50  ;;  %7669 = vrot.lane.b32.xlu0 %v6363_v18, %s10390_s17  ;;  %v6753_v50 = vld [vmem:[#allocation3 + $0x1f8] sm:$0xff] }
 0x8cc   :  { %6520 = vrot.lane.b32.xlu1 %v6363_v18, %s10387_s27  ;;  %v6754_v18 = vld [vmem:[#allocation3 + $0x200] sm:$0xff] }
 0x8cd   :  { %v6880_v11 = vpop.permute.xlu0 %6879  ;;  %v7885_v47 = vld [vmem:[#allocation2 + $0x70] sm:$0xff] }
 0x8ce   :  { %v6882_v43 = vpop.permute.xlu1 %6881  ;;  %7055 = vst.msk [vmem:[#allocation2 + $0x80] sm:$0xff] %vm2402_vm6, %v6880_v11  ;;  %10263 = vmatprep.mubr.msk.f32.mxu1 %vm3310_vm9, %v7885_v47 }
 0x8cf   :  { %7056 = vst.msk [vmem:[#allocation2 + $0x88] sm:$0xff] %vm2402_vm6, %v6882_v43  ;;  %6903 = vrot.lane.b32.xlu0 %v6747_v59, %s10388_s8  ;;  %v5986_v43 = vld [vmem:[#allocation3 + $0x1f9] sm:$0xff] }
 0x8d0   :  { %6905 = vrot.lane.b32.xlu1 %v6748_v37, %s10388_s8 }
 0x8d1   :  { %v7264_v54 = vpop.permute.xlu0 %7263  ;;  %v7886_v28 = vld [vmem:[#allocation2 + $0x78] sm:$0xff] }
 0x8d2   :  { %v7266_v32 = vpop.permute.xlu1 %7265  ;;  %7439 = vst.msk [vmem:[#allocation2 + $0x80] sm:$0xff] %vm2787_vm7, %v7264_v54  ;;  %10264 = vmatmul.mubr.msk.f32.gmra.mrb[14].mxu1 %vm3310_vm9, %v7886_v28  ;;  %v7138_v54 = vld [vmem:[#allocation3 + $0x201] sm:$0xff] }
 0x8d3   :  { %7440 = vst.msk [vmem:[#allocation2 + $0x88] sm:$0xff] %vm2787_vm7, %v7266_v32  ;;  %7287 = vrot.lane.b32.xlu0 %v5980_v20, %s10389_s21  ;;  %v7521_v28 = vld [vmem:[#allocation3 + $0x1fa] sm:$0xff] }
 0x8d4   :  { %6138 = vrot.lane.b32.xlu1 %v5980_v20, %s10386_s10 }
 0x8d5   :  { %v7648_v31 = vpop.permute.xlu0 %7647 }
 0x8d6   :  { %v6499_v1 = vpop.permute.xlu1 %6498  ;;  %7823 = vst.msk [vmem:[#allocation2 + $0x80] sm:$0xff] %vm3172_vm8, %v7648_v31 }
 0x8d7   :  { %6672 = vst.msk [vmem:[#allocation2 + $0x90] sm:$0xff] %vm2016_vm5, %v6499_v1  ;;  %7289 = vrot.lane.b32.xlu0 %v7132_v13, %s10389_s21 }
 0x8d8   :  { %7671 = vrot.lane.b32.xlu1 %v7515_v10, %s10390_s17 }
 0x8d9   :  { %v7650_v22 = vpop.permute.xlu0 %7649 }
 0x8da   :  { %v6501_v61 = vpop.permute.xlu1 %6500  ;;  %7824 = vst.msk [vmem:[#allocation2 + $0x88] sm:$0xff] %vm3172_vm8, %v7650_v22 }
 0x8db   :  { %6673 = vst.msk [vmem:[#allocation2 + $0x98] sm:$0xff] %vm2016_vm5, %v6501_v61  ;;  %6140 = vrot.lane.b32.xlu0 %v7132_v13, %s10386_s10 }
 0x8dc   :  { %6522 = vrot.lane.b32.xlu1 %v7515_v10, %s10387_s27  ;;  %v6371_v10 = vld [vmem:[#allocation3 + $0x202] sm:$0xff] }
 0x8dd   :  { %v6884_v42 = vpop.permute.xlu0 %6883  ;;  %v7887_v38 = vld [vmem:[#allocation2 + $0x80] sm:$0xff] }
 0x8de   :  { %v6886_v16 = vpop.permute.xlu1 %6885  ;;  %7057 = vst.msk [vmem:[#allocation2 + $0x90] sm:$0xff] %vm2402_vm6, %v6884_v42  ;;  %10266 = vmatprep.mubr.msk.f32.mxu1 %vm3310_vm9, %v7887_v38  ;;  %v6755_v38 = vld [vmem:[#allocation3 + $0x210] sm:$0xff] }
 0x8df   :  { %7058 = vst.msk [vmem:[#allocation2 + $0x98] sm:$0xff] %vm2402_vm6, %v6886_v16  ;;  %7673 = vrot.lane.b32.xlu0 %v6365_v24, %s10390_s17  ;;  %v6756_v16 = vld [vmem:[#allocation3 + $0x218] sm:$0xff] }
 0x8e0   :  { %6524 = vrot.lane.b32.xlu1 %v6365_v24, %s10387_s27 }
 0x8e1   :  { %v7268_v17 = vpop.permute.xlu0 %7267  ;;  %v7888_v30 = vld [vmem:[#allocation2 + $0x88] sm:$0xff] }
 0x8e2   :  { %v6119_v51 = vpop.permute.xlu1 %6118  ;;  %7441 = vst.msk [vmem:[#allocation2 + $0x90] sm:$0xff] %vm2787_vm7, %v7268_v17  ;;  %10267 = vmatmul.mubr.msk.f32.gmra.mrb[16].mxu1 %vm3310_vm9, %v7888_v30  ;;  %v5988_v17 = vld [vmem:[#allocation3 + $0x211] sm:$0xff] }
 0x8e3   :  { %6290 = vst.msk [vmem:[#allocation2 + $0xa0] sm:$0xff] %vm1631_vm4, %v6119_v51  ;;  %6907 = vrot.lane.b32.xlu0 %v6749_v36, %s10388_s8  ;;  %v7140_v51 = vld [vmem:[#allocation3 + $0x219] sm:$0xff] }
 0x8e4   :  { %6909 = vrot.lane.b32.xlu1 %v6750_v60, %s10388_s8 }
 0x8e5   :  { %v7270_v14 = vpop.permute.xlu0 %7269 }
 0x8e6   :  { %v7652_v21 = vpop.permute.xlu1 %7651  ;;  %7442 = vst.msk [vmem:[#allocation2 + $0x98] sm:$0xff] %vm2787_vm7, %v7270_v14 }
 0x8e7   :  { %7825 = vst.msk [vmem:[#allocation2 + $0x90] sm:$0xff] %vm3172_vm8, %v7652_v21  ;;  %7291 = vrot.lane.b32.xlu0 %v7133_v2, %s10389_s21  ;;  %v7523_v2 = vld [vmem:[#allocation3 + $0x212] sm:$0xff] }
 0x8e8   :  { %6142 = vrot.lane.b32.xlu1 %v5982_v7, %s10386_s10 }
 0x8e9   :  { %v6121_v57 = vpop.permute.xlu0 %6120 }
 0x8ea   :  { %v6503_v45 = vpop.permute.xlu1 %6502  ;;  %6291 = vst.msk [vmem:[#allocation2 + $0xa8] sm:$0xff] %vm1631_vm4, %v6121_v57 }
 0x8eb   :  { %6674 = vst.msk [vmem:[#allocation2 + $0xa0] sm:$0xff] %vm2016_vm5, %v6503_v45  ;;  %7293 = vrot.lane.b32.xlu0 %v7134_v40, %s10389_s21 }
 0x8ec   :  { %7675 = vrot.lane.b32.xlu1 %v7517_v41, %s10390_s17  ;;  %v6373_v41 = vld [vmem:[#allocation3 + $0x21a] sm:$0xff] }
 0x8ed   :  { %v7654_v23 = vpop.permute.xlu0 %7653 }
 0x8ee   :  { %v6505_v3 = vpop.permute.xlu1 %6504  ;;  %7826 = vst.msk [vmem:[#allocation2 + $0x98] sm:$0xff] %vm3172_vm8, %v7654_v23  ;;  %v7889_v12 = vld [vmem:[#allocation2 + $0x90] sm:$0xff] }
 0x8ef   :  { %6675 = vst.msk [vmem:[#allocation2 + $0xa8] sm:$0xff] %vm2016_vm5, %v6505_v3  ;;  %10269 = vmatprep.mubr.msk.f32.mxu1 %vm3310_vm9, %v7889_v12  ;;  %6144 = vrot.lane.b32.xlu0 %v5983_v35, %s10386_s10  ;;  %v6757_v12 = vld [vmem:[#allocation3 + $0x228] sm:$0xff]  ;;  %v6758_v35 = vld [vmem:[#allocation3 + $0x230] sm:$0xff] }
 0x8f0   :  { %6526 = vrot.lane.b32.xlu1 %v6366_v49, %s10387_s27 }
 0x8f1   :  { %v6888_v15 = vpop.permute.xlu0 %6887 }
 0x8f2   :  { %v6890_v58 = vpop.permute.xlu1 %6889  ;;  %7059 = vst.msk [vmem:[#allocation2 + $0xa0] sm:$0xff] %vm2402_vm6, %v6888_v15 }
 0x8f3   :  { %7060 = vst.msk [vmem:[#allocation2 + $0xa8] sm:$0xff] %vm2402_vm6, %v6890_v58  ;;  %7677 = vrot.lane.b32.xlu0 %v7518_v48, %s10390_s17 }
 0x8f4   :  { %6528 = vrot.lane.b32.xlu1 %v6367_v19, %s10387_s27 }
 0x8f5   :  { %v7272_v29 = vpop.permute.xlu0 %7271  ;;  %v7890_v39 = vld [vmem:[#allocation2 + $0x98] sm:$0xff] }
 0x8f6   :  { %v6123_v26 = vpop.permute.xlu1 %6122  ;;  %7443 = vst.msk [vmem:[#allocation2 + $0xa0] sm:$0xff] %vm2787_vm7, %v7272_v29  ;;  %10270 = vmatmul.mubr.msk.f32.gmra.mrb[18].mxu1 %vm3310_vm9, %v7890_v39  ;;  %v5990_v29 = vld [vmem:[#allocation3 + $0x229] sm:$0xff] }
 0x8f7   :  { %6292 = vst.msk [vmem:[#allocation2 + $0xb0] sm:$0xff] %vm1631_vm4, %v6123_v26  ;;  %6911 = vrot.lane.b32.xlu0 %v6751_v34, %s10388_s8 }
 0x8f8   :  { %6913 = vrot.lane.b32.xlu1 %v6752_v25, %s10388_s8 }
 0x8f9   :  { %v7274_v4 = vpop.permute.xlu0 %7273 }
 0x8fa   :  { %v7656_v33 = vpop.permute.xlu1 %7655  ;;  %7444 = vst.msk [vmem:[#allocation2 + $0xa8] sm:$0xff] %vm2787_vm7, %v7274_v4  ;;  %v7142_v4 = vld [vmem:[#allocation3 + $0x231] sm:$0xff] }
 0x8fb   :  { %7827 = vst.msk [vmem:[#allocation2 + $0xa0] sm:$0xff] %vm3172_vm8, %v7656_v33  ;;  %7295 = vrot.lane.b32.xlu0 %v5984_v46, %s10389_s21  ;;  %v7525_v33 = vld [vmem:[#allocation3 + $0x22a] sm:$0xff] }
 0x8fc   :  { %6146 = vrot.lane.b32.xlu1 %v5984_v46, %s10386_s10 }
 0x8fd   :  { %v6125_v27 = vpop.permute.xlu0 %6124 }
 0x8fe   :  { %v6507_v56 = vpop.permute.xlu1 %6506  ;;  %6293 = vst.msk [vmem:[#allocation2 + $0xb8] sm:$0xff] %vm1631_vm4, %v6125_v27 }
 0x8ff   :  { %6676 = vst.msk [vmem:[#allocation2 + $0xb0] sm:$0xff] %vm2016_vm5, %v6507_v56  ;;  %7297 = vrot.lane.b32.xlu0 %v7136_v0, %s10389_s21 }
 0x900   :  { %7679 = vrot.lane.b32.xlu1 %v7519_v6, %s10390_s17 }
 0x901   :  { %v7658_v5 = vpop.permute.xlu0 %7657 }
 0x902   :  { %v6509_v53 = vpop.permute.xlu1 %6508  ;;  %7828 = vst.msk [vmem:[#allocation2 + $0xa8] sm:$0xff] %vm3172_vm8, %v7658_v5  ;;  %v7891_v52 = vld [vmem:[#allocation2 + $0xa0] sm:$0xff]  ;;  %v6375_v5 = vld [vmem:[#allocation3 + $0x232] sm:$0xff] }
 0x903   :  { %6677 = vst.msk [vmem:[#allocation2 + $0xb8] sm:$0xff] %vm2016_vm5, %v6509_v53  ;;  %10272 = vmatprep.mubr.msk.f32.mxu1 %vm3310_vm9, %v7891_v52  ;;  %6148 = vrot.lane.b32.xlu0 %v7136_v0, %s10386_s10 }
 0x904   :  { %6530 = vrot.lane.b32.xlu1 %v7519_v6, %s10387_s27 }
 0x905   :  { %v6892_v55 = vpop.permute.xlu0 %6891 }
 0x906   :  { %v6894_v9 = vpop.permute.xlu1 %6893  ;;  %7061 = vst.msk [vmem:[#allocation2 + $0xb0] sm:$0xff] %vm2402_vm6, %v6892_v55 }
 0x907   :  { %7062 = vst.msk [vmem:[#allocation2 + $0xb8] sm:$0xff] %vm2402_vm6, %v6894_v9  ;;  %7681 = vrot.lane.b32.xlu0 %v6369_v8, %s10390_s17 }
 0x908   :  { %6532 = vrot.lane.b32.xlu1 %v6369_v8, %s10387_s27 }
 0x909   :  { %v7276_v63 = vpop.permute.xlu0 %7275  ;;  %v7892_v62 = vld [vmem:[#allocation2 + $0xa8] sm:$0xff] }
 0x90a   :  { %v6127_v44 = vpop.permute.xlu1 %6126  ;;  %7445 = vst.msk [vmem:[#allocation2 + $0xb0] sm:$0xff] %vm2787_vm7, %v7276_v63  ;;  %10273 = vmatmul.mubr.msk.f32.gmra.mrb[20].mxu1 %vm3310_vm9, %v7892_v62  ;;  %v6759_v63 = vld [vmem:[#allocation3 + $0x240] sm:$0xff] }
 0x90b   :  { %6294 = vst.msk [vmem:[#allocation2 + $0xc0] sm:$0xff] %vm1631_vm4, %v6127_v44  ;;  %6915 = vrot.lane.b32.xlu0 %v6753_v50, %s10388_s8  ;;  %v6760_v44 = vld [vmem:[#allocation3 + $0x248] sm:$0xff] }
 0x90c   :  { %6917 = vrot.lane.b32.xlu1 %v6754_v18, %s10388_s8 }
 0x90d   :  { %v7278_v11 = vpop.permute.xlu0 %7277 }
 0x90e   :  { %v7660_v47 = vpop.permute.xlu1 %7659  ;;  %7446 = vst.msk [vmem:[#allocation2 + $0xb8] sm:$0xff] %vm2787_vm7, %v7278_v11 }
 0x90f   :  { %7829 = vst.msk [vmem:[#allocation2 + $0xb0] sm:$0xff] %vm3172_vm8, %v7660_v47  ;;  %7299 = vrot.lane.b32.xlu0 %v5986_v43, %s10389_s21 }
 0x910   :  { %6150 = vrot.lane.b32.xlu1 %v5986_v43, %s10386_s10 }
 0x911   :  { %v6129_v59 = vpop.permute.xlu0 %6128 }
 0x912   :  { %v6511_v37 = vpop.permute.xlu1 %6510  ;;  %6295 = vst.msk [vmem:[#allocation2 + $0xc8] sm:$0xff] %vm1631_vm4, %v6129_v59  ;;  %v5992_v59 = vld [vmem:[#allocation3 + $0x241] sm:$0xff] }
 0x913   :  { %6678 = vst.msk [vmem:[#allocation2 + $0xc0] sm:$0xff] %vm2016_vm5, %v6511_v37  ;;  %7301 = vrot.lane.b32.xlu0 %v7138_v54, %s10389_s21 }
 0x914   :  { %7683 = vrot.lane.b32.xlu1 %v7521_v28, %s10390_s17 }
 0x915   :  { %v7662_v32 = vpop.permute.xlu0 %7661 }
 0x916   :  { %v6513_v20 = vpop.permute.xlu1 %6512  ;;  %7830 = vst.msk [vmem:[#allocation2 + $0xb8] sm:$0xff] %vm3172_vm8, %v7662_v32  ;;  %v7893_v31 = vld [vmem:[#allocation2 + $0xb0] sm:$0xff]  ;;  %v7527_v32 = vld [vmem:[#allocation3 + $0x242] sm:$0xff] }
 0x917   :  { %6679 = vst.msk [vmem:[#allocation2 + $0xc8] sm:$0xff] %vm2016_vm5, %v6513_v20  ;;  %10275 = vmatprep.mubr.msk.f32.mxu1 %vm3310_vm9, %v7893_v31  ;;  %6152 = vrot.lane.b32.xlu0 %v7138_v54, %s10386_s10 }
 0x918   :  { %6534 = vrot.lane.b32.xlu1 %v7521_v28, %s10387_s27  ;;  %v7144_v28 = vld [vmem:[#allocation3 + $0x249] sm:$0xff] }
 0x919   :  { %v6896_v1 = vpop.permute.xlu0 %6895 }
 0x91a   :  { %v6898_v13 = vpop.permute.xlu1 %6897  ;;  %7063 = vst.msk [vmem:[#allocation2 + $0xc0] sm:$0xff] %vm2402_vm6, %v6896_v1 }
 0x91b   :  { %7064 = vst.msk [vmem:[#allocation2 + $0xc8] sm:$0xff] %vm2402_vm6, %v6898_v13  ;;  %7685 = vrot.lane.b32.xlu0 %v6371_v10, %s10390_s17 }
 0x91c   :  { %6536 = vrot.lane.b32.xlu1 %v6371_v10, %s10387_s27 }
 0x91d   :  { %v7280_v22 = vpop.permute.xlu0 %7279  ;;  %v7894_v61 = vld [vmem:[#allocation2 + $0xb8] sm:$0xff] }
 0x91e   :  { %v6131_v42 = vpop.permute.xlu1 %6130  ;;  %7447 = vst.msk [vmem:[#allocation2 + $0xc0] sm:$0xff] %vm2787_vm7, %v7280_v22  ;;  %10276 = vmatmul.mubr.msk.f32.gmra.mrb[22].mxu1 %vm3310_vm9, %v7894_v61 }
 0x91f   :  { %6296 = vst.msk [vmem:[#allocation2 + $0xd0] sm:$0xff] %vm1631_vm4, %v6131_v42  ;;  %6919 = vrot.lane.b32.xlu0 %v6755_v38, %s10388_s8  ;;  %v6377_v42 = vld [vmem:[#allocation3 + $0x24a] sm:$0xff] }
 0x920   :  { %6921 = vrot.lane.b32.xlu1 %v6756_v16, %s10388_s8 }
 0x921   :  { %v7282_v24 = vpop.permute.xlu0 %7281 }
 0x922   :  { %v7664_v36 = vpop.permute.xlu1 %7663  ;;  %7448 = vst.msk [vmem:[#allocation2 + $0xc8] sm:$0xff] %vm2787_vm7, %v7282_v24 }
 0x923   :  { %7831 = vst.msk [vmem:[#allocation2 + $0xc0] sm:$0xff] %vm3172_vm8, %v7664_v36  ;;  %7303 = vrot.lane.b32.xlu0 %v5988_v17, %s10389_s21 }
 0x924   :  { %6154 = vrot.lane.b32.xlu1 %v5988_v17, %s10386_s10 }
 0x925   :  { %v6133_v30 = vpop.permute.xlu0 %6132 }
 0x926   :  { %v6515_v60 = vpop.permute.xlu1 %6514  ;;  %6297 = vst.msk [vmem:[#allocation2 + $0xd8] sm:$0xff] %vm1631_vm4, %v6133_v30 }
 0x927   :  { %6680 = vst.msk [vmem:[#allocation2 + $0xd0] sm:$0xff] %vm2016_vm5, %v6515_v60  ;;  %7305 = vrot.lane.b32.xlu0 %v7140_v51, %s10389_s21  ;;  %v6761_v60 = vld [vmem:[#allocation3 + $0x258] sm:$0xff] }
 0x928   :  { %7687 = vrot.lane.b32.xlu1 %v7523_v2, %s10390_s17 }
 0x929   :  { %v7666_v14 = vpop.permute.xlu0 %7665 }
 0x92a   :  { %v6517_v21 = vpop.permute.xlu1 %6516  ;;  %7832 = vst.msk [vmem:[#allocation2 + $0xc8] sm:$0xff] %vm3172_vm8, %v7666_v14  ;;  %v7895_v7 = vld [vmem:[#allocation2 + $0xc0] sm:$0xff] }
 0x92b   :  { %6681 = vst.msk [vmem:[#allocation2 + $0xd8] sm:$0xff] %vm2016_vm5, %v6517_v21  ;;  %10278 = vmatprep.mubr.msk.f32.mxu1 %vm3310_vm9, %v7895_v7  ;;  %6156 = vrot.lane.b32.xlu0 %v7140_v51, %s10386_s10  ;;  %v5994_v7 = vld [vmem:[#allocation3 + $0x259] sm:$0xff] }
 0x92c   :  { %6538 = vrot.lane.b32.xlu1 %v7523_v2, %s10387_s27  ;;  %v6762_v2 = vld [vmem:[#allocation3 + $0x260] sm:$0xff] }
 0x92d   :  { %v6900_v40 = vpop.permute.xlu0 %6899 }
 0x92e   :  { %v6902_v57 = vpop.permute.xlu1 %6901  ;;  %7065 = vst.msk [vmem:[#allocation2 + $0xd0] sm:$0xff] %vm2402_vm6, %v6900_v40 }
 0x92f   :  { %7066 = vst.msk [vmem:[#allocation2 + $0xd8] sm:$0xff] %vm2402_vm6, %v6902_v57  ;;  %7689 = vrot.lane.b32.xlu0 %v6373_v41, %s10390_s17 }
 0x930   :  { %6540 = vrot.lane.b32.xlu1 %v6373_v41, %s10387_s27  ;;  %v7146_v41 = vld [vmem:[#allocation3 + $0x261] sm:$0xff] }
 0x931   :  { %v7284_v45 = vpop.permute.xlu0 %7283  ;;  %v7896_v23 = vld [vmem:[#allocation2 + $0xc8] sm:$0xff] }
 0x932   :  { %v6135_v3 = vpop.permute.xlu1 %6134  ;;  %7449 = vst.msk [vmem:[#allocation2 + $0xd0] sm:$0xff] %vm2787_vm7, %v7284_v45  ;;  %10279 = vmatmul.mubr.msk.f32.gmra.mrb[24].mxu1 %vm3310_vm9, %v7896_v23  ;;  %v7529_v45 = vld [vmem:[#allocation3 + $0x25a] sm:$0xff] }
 0x933   :  { %6298 = vst.msk [vmem:[#allocation2 + $0xe0] sm:$0xff] %vm1631_vm4, %v6135_v3  ;;  %6923 = vrot.lane.b32.xlu0 %v6757_v12, %s10388_s8 }
 0x934   :  { %6925 = vrot.lane.b32.xlu1 %v6758_v35, %s10388_s8 }
 0x935   :  { %v15861_v49 = vpop.f32.mrb[0].mxu1  ;;  %v7286_v48 = vpop.permute.xlu0 %7285 }
 0x936   :  { %18262 = vst [vmem:[#allocation26_spill] sm:$0xff] %v15861_v49  ;;  %v7668_v15 = vpop.permute.xlu1 %7667  ;;  %v8524_v58 = vsel %vm90_vm0, %v15861_v49, 0.0  ;;  %7450 = vst.msk [vmem:[#allocation2 + $0xd8] sm:$0xff] %vm2787_vm7, %v7286_v48  ;;  %v15866_v19 = vpop.f32.mrb[1].mxu1 }
 0x937   :  { %7833 = vst.msk [vmem:[#allocation2 + $0xd0] sm:$0xff] %vm3172_vm8, %v7668_v15  ;;  %v8523_v39 = vsel %vm90_vm0, %v15866_v19, 0.0  ;;  %7307 = vrot.lane.b32.xlu0 %v5990_v29, %s10389_s21 }
 0x938   :  { %v8525_v26 = vadd.f32 %v8524_v58, %v8523_v39  ;;  %6158 = vrot.lane.b32.xlu1 %v5990_v29, %s10386_s10 }
 0x939   :  { %v6137_v34 = vpop.permute.xlu0 %6136 }
 0x93a   :  { %v6519_v25 = vpop.permute.xlu1 %6518  ;;  %6299 = vst.msk [vmem:[#allocation2 + $0xe8] sm:$0xff] %vm1631_vm4, %v6137_v34  ;;  %v6379_v34 = vld [vmem:[#allocation3 + $0x262] sm:$0xff] }
 0x93b   :  { %6682 = vst.msk [vmem:[#allocation2 + $0xe0] sm:$0xff] %vm2016_vm5, %v6519_v25  ;;  %7309 = vrot.lane.b32.xlu0 %v7142_v4, %s10389_s21 }
 0x93c   :  { %7691 = vrot.lane.b32.xlu1 %v7525_v33, %s10390_s17 }
 0x93d   :  { %v7670_v46 = vpop.permute.xlu0 %7669 }
 0x93e   :  { %v6521_v27 = vpop.permute.xlu1 %6520  ;;  %7834 = vst.msk [vmem:[#allocation2 + $0xd8] sm:$0xff] %vm3172_vm8, %v7670_v46  ;;  %v7897_v56 = vld [vmem:[#allocation2 + $0xd0] sm:$0xff] }
 0x93f   :  { %6683 = vst.msk [vmem:[#allocation2 + $0xe8] sm:$0xff] %vm2016_vm5, %v6521_v27  ;;  %10281 = vmatprep.mubr.msk.f32.mxu1 %vm3310_vm9, %v7897_v56  ;;  %6160 = vrot.lane.b32.xlu0 %v7142_v4, %s10386_s10  ;;  %v6763_v27 = vld [vmem:[#allocation3 + $0x270] sm:$0xff]  ;;  %v6764_v56 = vld [vmem:[#allocation3 + $0x278] sm:$0xff] }
 0x940   :  { %6542 = vrot.lane.b32.xlu1 %v7525_v33, %s10387_s27 }
 0x941   :  { %v6904_v0 = vpop.permute.xlu0 %6903 }
 0x942   :  { %v6906_v6 = vpop.permute.xlu1 %6905  ;;  %7067 = vst.msk [vmem:[#allocation2 + $0xe0] sm:$0xff] %vm2402_vm6, %v6904_v0 }
 0x943   :  { %7068 = vst.msk [vmem:[#allocation2 + $0xe8] sm:$0xff] %vm2402_vm6, %v6906_v6  ;;  %7693 = vrot.lane.b32.xlu0 %v6375_v5, %s10390_s17 }
 0x944   :  { %6544 = vrot.lane.b32.xlu1 %v6375_v5, %s10387_s27  ;;  %v5996_v5 = vld [vmem:[#allocation3 + $0x271] sm:$0xff] }
 0x945   :  { %v7288_v53 = vpop.permute.xlu0 %7287  ;;  %v15886_v52 = vpop.f32.mrb[2].mxu1  ;;  %v7898_v55 = vld [vmem:[#allocation2 + $0xd8] sm:$0xff] }
 0x946   :  { %18263 = vst [vmem:[#allocation4_spill] sm:$0xff] %v15886_v52  ;;  %v6139_v9 = vpop.permute.xlu1 %6138  ;;  %7451 = vst.msk [vmem:[#allocation2 + $0xe0] sm:$0xff] %vm2787_vm7, %v7288_v53  ;;  %v15889_v8 = vpop.f32.mrb[3].mxu1  ;;  %10282 = vmatmul.mubr.msk.f32.gmra.mrb[26].mxu1 %vm3310_vm9, %v7898_v55  ;;  %v8528_v18 = vsel %vm90_vm0, %v15886_v52, 0.0 }
 0x947   :  { %18264 = vst [vmem:[#allocation6_spill] sm:$0xff] %v15889_v8  ;;  %6300 = vst.msk [vmem:[#allocation2 + $0xf0] sm:$0xff] %vm1631_vm4, %v6139_v9  ;;  %v8526_v62 = vsel %vm90_vm0, %v15889_v8, 0.0  ;;  %6927 = vrot.lane.b32.xlu0 %v6759_v63, %s10388_s8 }
 0x948   :  { %v8527_v50 = vadd.f32 %v8526_v62, %v8525_v26  ;;  %6929 = vrot.lane.b32.xlu1 %v6760_v44, %s10388_s8  ;;  %v7148_v62 = vld [vmem:[#allocation3 + $0x279] sm:$0xff] }
 0x949   :  { %v7290_v11 = vpop.permute.xlu0 %7289 }
 0x94a   :  { %v8529_v47 = vadd.f32 %v8528_v18, %v8527_v50  ;;  %v7672_v43 = vpop.permute.xlu1 %7671  ;;  %7452 = vst.msk [vmem:[#allocation2 + $0xe8] sm:$0xff] %vm2787_vm7, %v7290_v11  ;;  %v7531_v50 = vld [vmem:[#allocation3 + $0x272] sm:$0xff] }
 0x94b   :  { %7835 = vst.msk [vmem:[#allocation2 + $0xe0] sm:$0xff] %vm3172_vm8, %v7672_v43  ;;  %7311 = vrot.lane.b32.xlu0 %v5992_v59, %s10389_s21 }
 0x94c   :  { %6162 = vrot.lane.b32.xlu1 %v5992_v59, %s10386_s10 }
 0x94d   :  { %v6141_v37 = vpop.permute.xlu0 %6140 }
 0x94e   :  { %v6523_v54 = vpop.permute.xlu1 %6522  ;;  %6301 = vst.msk [vmem:[#allocation2 + $0xf8] sm:$0xff] %vm1631_vm4, %v6141_v37 }
 0x94f   :  { %6684 = vst.msk [vmem:[#allocation2 + $0xf0] sm:$0xff] %vm2016_vm5, %v6523_v54  ;;  %7313 = vrot.lane.b32.xlu0 %v7144_v28, %s10389_s21 }
 0x950   :  { %7695 = vrot.lane.b32.xlu1 %v7527_v32, %s10390_s17 }
 0x951   :  { %v7674_v20 = vpop.permute.xlu0 %7673 }
 0x952   :  { %v6525_v31 = vpop.permute.xlu1 %6524  ;;  %7836 = vst.msk [vmem:[#allocation2 + $0xe8] sm:$0xff] %vm3172_vm8, %v7674_v20  ;;  %v7899_v1 = vld [vmem:[#allocation2 + $0xe0] sm:$0xff] }
 0x953   :  { %6685 = vst.msk [vmem:[#allocation2 + $0xf8] sm:$0xff] %vm2016_vm5, %v6525_v31  ;;  %10284 = vmatprep.mubr.msk.f32.mxu1 %vm3310_vm9, %v7899_v1  ;;  %6164 = vrot.lane.b32.xlu0 %v7144_v28, %s10386_s10 }
 0x954   :  { %6546 = vrot.lane.b32.xlu1 %v7527_v32, %s10387_s27  ;;  %v6381_v32 = vld [vmem:[#allocation3 + $0x27a] sm:$0xff] }
 0x955   :  { %v6908_v13 = vpop.permute.xlu0 %6907  ;;  %v15912_v10 = vpop.f32.mrb[4].mxu1 }
 0x956   :  { %18265 = vst [vmem:[#allocation5_spill] sm:$0xff] %v15912_v10  ;;  %v6910_v22 = vpop.permute.xlu1 %6909  ;;  %7069 = vst.msk [vmem:[#allocation2 + $0xf0] sm:$0xff] %vm2402_vm6, %v6908_v13  ;;  %v15915_v61 = vpop.f32.mrb[5].mxu1  ;;  %v8532_v24 = vsel %vm90_vm0, %v15912_v10, 0.0  ;;  %v6765_v13 = vld [vmem:[#allocation3 + $0x288] sm:$0xff] }
 0x957   :  { %18266 = vst [vmem:[#allocation8_spill] sm:$0xff] %v15915_v61  ;;  %7070 = vst.msk [vmem:[#allocation2 + $0xf8] sm:$0xff] %vm2402_vm6, %v6910_v22  ;;  %v8530_v38 = vsel %vm90_vm0, %v15915_v61, 0.0  ;;  %7697 = vrot.lane.b32.xlu0 %v6377_v42, %s10390_s17  ;;  %v6766_v22 = vld [vmem:[#allocation3 + $0x290] sm:$0xff] }
 0x958   :  { %v8531_v16 = vadd.f32 %v8530_v38, %v8529_v47  ;;  %6548 = vrot.lane.b32.xlu1 %v6377_v42, %s10387_s27 }
 0x959   :  { %v7292_v36 = vpop.permute.xlu0 %7291  ;;  %v7900_v17 = vld [vmem:[#allocation2 + $0xe8] sm:$0xff] }
 0x95a   :  { %v6143_v30 = vpop.permute.xlu1 %6142  ;;  %7453 = vst.msk [vmem:[#allocation2 + $0xf0] sm:$0xff] %vm2787_vm7, %v7292_v36  ;;  %10285 = vmatmul.mubr.msk.f32.gmra.mrb[28].mxu1 %vm3310_vm9, %v7900_v17  ;;  %v8533_v51 = vadd.f32 %v8532_v24, %v8531_v16  ;;  %v5998_v36 = vld [vmem:[#allocation3 + $0x289] sm:$0xff] }
 0x95b   :  { %6302 = vst.msk [vmem:[#allocation2 + $0x100] sm:$0xff] %vm1631_vm4, %v6143_v30  ;;  %6931 = vrot.lane.b32.xlu0 %v6761_v60, %s10388_s8 }
 0x95c   :  { %6933 = vrot.lane.b32.xlu1 %v6762_v2, %s10388_s8 }
 0x95d   :  { %v7294_v14 = vpop.permute.xlu0 %7293 }
 0x95e   :  { %v7676_v21 = vpop.permute.xlu1 %7675  ;;  %7454 = vst.msk [vmem:[#allocation2 + $0xf8] sm:$0xff] %vm2787_vm7, %v7294_v14  ;;  %v7150_v14 = vld [vmem:[#allocation3 + $0x291] sm:$0xff] }
 0x95f   :  { %7837 = vst.msk [vmem:[#allocation2 + $0xf0] sm:$0xff] %vm3172_vm8, %v7676_v21  ;;  %7315 = vrot.lane.b32.xlu0 %v5994_v7, %s10389_s21 }
 0x960   :  { %6166 = vrot.lane.b32.xlu1 %v5994_v7, %s10386_s10  ;;  %v7533_v7 = vld [vmem:[#allocation3 + $0x28a] sm:$0xff] }
 0x961   :  { %v6145_v40 = vpop.permute.xlu0 %6144 }
 0x962   :  { %v6527_v57 = vpop.permute.xlu1 %6526  ;;  %6303 = vst.msk [vmem:[#allocation2 + $0x108] sm:$0xff] %vm1631_vm4, %v6145_v40 }
 0x963   :  { %6686 = vst.msk [vmem:[#allocation2 + $0x100] sm:$0xff] %vm2016_vm5, %v6527_v57  ;;  %7317 = vrot.lane.b32.xlu0 %v7146_v41, %s10389_s21 }
 0x964   :  { %7699 = vrot.lane.b32.xlu1 %v7529_v45, %s10390_s17 }
 0x965   :  { %v7678_v23 = vpop.permute.xlu0 %7677  ;;  %v15937_v3 = vpop.f32.mrb[6].mxu1 }
 0x966   :  { %v6529_v12 = vpop.permute.xlu1 %6528  ;;  %7838 = vst.msk [vmem:[#allocation2 + $0xf8] sm:$0xff] %vm3172_vm8, %v7678_v23  ;;  %v15940_v35 = vpop.f32.mrb[7].mxu1  ;;  %v7901_v48 = vld [vmem:[#allocation2 + $0xf0] sm:$0xff]  ;;  %v8536_v29 = vsel %vm90_vm0, %v15937_v3, 0.0 }
 0x967   :  { %6687 = vst.msk [vmem:[#allocation2 + $0x108] sm:$0xff] %vm2016_vm5, %v6529_v12  ;;  %v8534_v15 = vsel %vm90_vm0, %v15940_v35, 0.0  ;;  %6168 = vrot.lane.b32.xlu0 %v7146_v41, %s10386_s10  ;;  %10287 = vmatprep.mubr.msk.f32.mxu1 %vm3310_vm9, %v7901_v48  ;;  %v6383_v12 = vld [vmem:[#allocation3 + $0x292] sm:$0xff] }
 0x968   :  { %v8535_v58 = vadd.f32 %v8534_v15, %v8533_v51  ;;  %6550 = vrot.lane.b32.xlu1 %v7529_v45, %s10387_s27 }
 0x969   :  { %v6912_v39 = vpop.permute.xlu0 %6911 }
 0x96a   :  { %v6914_v26 = vpop.permute.xlu1 %6913  ;;  %7071 = vst.msk [vmem:[#allocation2 + $0x100] sm:$0xff] %vm2402_vm6, %v6912_v39  ;;  %v8537_v25 = vadd.f32 %v8536_v29, %v8535_v58 }
 0x96b   :  { %7072 = vst.msk [vmem:[#allocation2 + $0x108] sm:$0xff] %vm2402_vm6, %v6914_v26  ;;  %7701 = vrot.lane.b32.xlu0 %v6379_v34, %s10390_s17  ;;  %v6767_v26 = vld [vmem:[#allocation3 + $0x2a0] sm:$0xff] }
 0x96c   :  { %6552 = vrot.lane.b32.xlu1 %v6379_v34, %s10387_s27 }
 0x96d   :  { %v7296_v4 = vpop.permute.xlu0 %7295  ;;  %v7902_v33 = vld [vmem:[#allocation2 + $0xf8] sm:$0xff] }
 0x96e   :  { %v6147_v46 = vpop.permute.xlu1 %6146  ;;  %7455 = vst.msk [vmem:[#allocation2 + $0x100] sm:$0xff] %vm2787_vm7, %v7296_v4  ;;  %10288 = vmatmul.mubr.msk.f32.gmra.mrb[30].mxu1 %vm3310_vm9, %v7902_v33 }
 0x96f   :  { %6304 = vst.msk [vmem:[#allocation2 + $0x110] sm:$0xff] %vm1631_vm4, %v6147_v46  ;;  %6935 = vrot.lane.b32.xlu0 %v6763_v27, %s10388_s8 }
 0x970   :  { %6937 = vrot.lane.b32.xlu1 %v6764_v56, %s10388_s8  ;;  %v6000_v56 = vld [vmem:[#allocation3 + $0x2a1] sm:$0xff] }
 0x971   :  { %v7298_v0 = vpop.permute.xlu0 %7297 }
 0x972   :  { %v7680_v6 = vpop.permute.xlu1 %7679  ;;  %7456 = vst.msk [vmem:[#allocation2 + $0x108] sm:$0xff] %vm2787_vm7, %v7298_v0 }
 0x973   :  { %7839 = vst.msk [vmem:[#allocation2 + $0x100] sm:$0xff] %vm3172_vm8, %v7680_v6  ;;  %7319 = vrot.lane.b32.xlu0 %v5996_v5, %s10389_s21 }
 0x974   :  { %6170 = vrot.lane.b32.xlu1 %v5996_v5, %s10386_s10 }
 0x975   :  { %v6149_v53 = vpop.permute.xlu0 %6148  ;;  %v15963_v55 = vpop.f32.mrb[8].mxu1 }
 0x976   :  { %v6531_v9 = vpop.permute.xlu1 %6530  ;;  %6305 = vst.msk [vmem:[#allocation2 + $0x118] sm:$0xff] %vm1631_vm4, %v6149_v53  ;;  %v15966_v63 = vpop.f32.mrb[9].mxu1  ;;  %v8540_v11 = vsel %vm90_vm0, %v15963_v55, 0.0  ;;  %v7152_v53 = vld [vmem:[#allocation3 + $0x2a9] sm:$0xff] }
 0x977   :  { %6688 = vst.msk [vmem:[#allocation2 + $0x110] sm:$0xff] %vm2016_vm5, %v6531_v9  ;;  %v8538_v44 = vsel %vm90_vm0, %v15966_v63, 0.0  ;;  %7321 = vrot.lane.b32.xlu0 %v7148_v62, %s10389_s21  ;;  %v7535_v9 = vld [vmem:[#allocation3 + $0x2a2] sm:$0xff] }
 0x978   :  { %v8539_v18 = vadd.f32 %v8538_v44, %v8537_v25  ;;  %7703 = vrot.lane.b32.xlu1 %v7531_v50, %s10390_s17  ;;  %v6768_v25 = vld [vmem:[#allocation3 + $0x2a8] sm:$0xff] }
 0x979   :  { %v7682_v47 = vpop.permute.xlu0 %7681 }
 0x97a   :  { %v6533_v43 = vpop.permute.xlu1 %6532  ;;  %7840 = vst.msk [vmem:[#allocation2 + $0x108] sm:$0xff] %vm3172_vm8, %v7682_v47  ;;  %v7903_v59 = vld [vmem:[#allocation2 + $0x100] sm:$0xff]  ;;  %v8541_v37 = vadd.f32 %v8540_v11, %v8539_v18 }
 0x97b   :  { %6689 = vst.msk [vmem:[#allocation2 + $0x118] sm:$0xff] %vm2016_vm5, %v6533_v43  ;;  %10290 = vmatprep.mubr.msk.f32.mxu1 %vm3310_vm9, %v7903_v59  ;;  %6172 = vrot.lane.b32.xlu0 %v7148_v62, %s10386_s10  ;;  %v6385_v59 = vld [vmem:[#allocation3 + $0x2aa] sm:$0xff] }
 0x97c   :  { %6554 = vrot.lane.b32.xlu1 %v7531_v50, %s10387_s27 }
 0x97d   :  { %v6916_v54 = vpop.permute.xlu0 %6915 }
 0x97e   :  { %v6918_v28 = vpop.permute.xlu1 %6917  ;;  %7073 = vst.msk [vmem:[#allocation2 + $0x110] sm:$0xff] %vm2402_vm6, %v6916_v54 }
 0x97f   :  { %7074 = vst.msk [vmem:[#allocation2 + $0x118] sm:$0xff] %vm2402_vm6, %v6918_v28  ;;  %7705 = vrot.lane.b32.xlu0 %v6381_v32, %s10390_s17 }
 0x980   :  { %6556 = vrot.lane.b32.xlu1 %v6381_v32, %s10387_s27 }
 0x981   :  { %v7300_v20 = vpop.permute.xlu0 %7299  ;;  %v7904_v31 = vld [vmem:[#allocation2 + $0x108] sm:$0xff] }
 0x982   :  { %v6151_v1 = vpop.permute.xlu1 %6150  ;;  %7457 = vst.msk [vmem:[#allocation2 + $0x110] sm:$0xff] %vm2787_vm7, %v7300_v20  ;;  %10291 = vmatmul.mubr.msk.f32.gmra.mrb[32].mxu1 %vm3310_vm9, %v7904_v31 }
 0x983   :  { %6306 = vst.msk [vmem:[#allocation2 + $0x120] sm:$0xff] %vm1631_vm4, %v6151_v1  ;;  %6939 = vrot.lane.b32.xlu0 %v6765_v13, %s10388_s8  ;;  %v6769_v1 = vld [vmem:[#allocation3 + $0x2b8] sm:$0xff] }
 0x984   :  { %6941 = vrot.lane.b32.xlu1 %v6766_v22, %s10388_s8  ;;  %v6770_v22 = vld [vmem:[#allocation3 + $0x2c0] sm:$0xff] }
 0x985   :  { %v7302_v42 = vpop.permute.xlu0 %7301  ;;  %v15989_v38 = vpop.f32.mrb[10].mxu1 }
 0x986   :  { %v7684_v16 = vpop.permute.xlu1 %7683  ;;  %7458 = vst.msk [vmem:[#allocation2 + $0x118] sm:$0xff] %vm2787_vm7, %v7302_v42  ;;  %v15992_v24 = vpop.f32.mrb[11].mxu1  ;;  %v8544_v60 = vsel %vm90_vm0, %v15989_v38, 0.0 }
 0x987   :  { %7841 = vst.msk [vmem:[#allocation2 + $0x110] sm:$0xff] %vm3172_vm8, %v7684_v16  ;;  %v8542_v17 = vsel %vm90_vm0, %v15992_v24, 0.0  ;;  %7323 = vrot.lane.b32.xlu0 %v5998_v36, %s10389_s21 }
 0x988   :  { %v8543_v30 = vadd.f32 %v8542_v17, %v8541_v37  ;;  %6174 = vrot.lane.b32.xlu1 %v5998_v36, %s10386_s10  ;;  %v6002_v36 = vld [vmem:[#allocation3 + $0x2b9] sm:$0xff] }
 0x989   :  { %v6153_v51 = vpop.permute.xlu0 %6152 }
 0x98a   :  { %v6535_v2 = vpop.permute.xlu1 %6534  ;;  %6307 = vst.msk [vmem:[#allocation2 + $0x128] sm:$0xff] %vm1631_vm4, %v6153_v51  ;;  %v8545_v21 = vadd.f32 %v8544_v60, %v8543_v30  ;;  %v7154_v60 = vld [vmem:[#allocation3 + $0x2c1] sm:$0xff] }
 0x98b   :  { %6690 = vst.msk [vmem:[#allocation2 + $0x120] sm:$0xff] %vm2016_vm5, %v6535_v2  ;;  %7325 = vrot.lane.b32.xlu0 %v7150_v14, %s10389_s21  ;;  %v7537_v51 = vld [vmem:[#allocation3 + $0x2ba] sm:$0xff] }
 0x98c   :  { %7707 = vrot.lane.b32.xlu1 %v7533_v7, %s10390_s17 }
 0x98d   :  { %v7686_v40 = vpop.permute.xlu0 %7685 }
 0x98e   :  { %v6537_v57 = vpop.permute.xlu1 %6536  ;;  %7842 = vst.msk [vmem:[#allocation2 + $0x118] sm:$0xff] %vm3172_vm8, %v7686_v40  ;;  %v7905_v41 = vld [vmem:[#allocation2 + $0x110] sm:$0xff] }
 0x98f   :  { %6691 = vst.msk [vmem:[#allocation2 + $0x128] sm:$0xff] %vm2016_vm5, %v6537_v57  ;;  %10293 = vmatprep.mubr.msk.f32.mxu1 %vm3310_vm9, %v7905_v41  ;;  %6176 = vrot.lane.b32.xlu0 %v7150_v14, %s10386_s10 }
 0x990   :  { %6558 = vrot.lane.b32.xlu1 %v7533_v7, %s10387_s27 }
 0x991   :  { %v6920_v45 = vpop.permute.xlu0 %6919 }
 0x992   :  { %v6922_v23 = vpop.permute.xlu1 %6921  ;;  %7075 = vst.msk [vmem:[#allocation2 + $0x120] sm:$0xff] %vm2402_vm6, %v6920_v45 }
 0x993   :  { %7076 = vst.msk [vmem:[#allocation2 + $0x128] sm:$0xff] %vm2402_vm6, %v6922_v23  ;;  %7709 = vrot.lane.b32.xlu0 %v6383_v12, %s10390_s17 }
 0x994   :  { %6560 = vrot.lane.b32.xlu1 %v6383_v12, %s10387_s27 }
 0x995   :  { %v7304_v48 = vpop.permute.xlu0 %7303  ;;  %v16014_v15 = vpop.f32.mrb[12].mxu1  ;;  %v7906_v58 = vld [vmem:[#allocation2 + $0x118] sm:$0xff] }
 0x996   :  { %v6155_v29 = vpop.permute.xlu1 %6154  ;;  %7459 = vst.msk [vmem:[#allocation2 + $0x120] sm:$0xff] %vm2787_vm7, %v7304_v48  ;;  %v16017_v39 = vpop.f32.mrb[13].mxu1  ;;  %10294 = vmatmul.mubr.msk.f32.gmra.mrb[34].mxu1 %vm3310_vm9, %v7906_v58  ;;  %v8548_v33 = vsel %vm90_vm0, %v16014_v15, 0.0  ;;  %v6387_v48 = vld [vmem:[#allocation3 + $0x2c2] sm:$0xff] }
 0x997   :  { %6308 = vst.msk [vmem:[#allocation2 + $0x130] sm:$0xff] %vm1631_vm4, %v6155_v29  ;;  %v8546_v34 = vsel %vm90_vm0, %v16017_v39, 0.0  ;;  %6943 = vrot.lane.b32.xlu0 %v6767_v26, %s10388_s8 }
 0x998   :  { %v8547_v4 = vadd.f32 %v8546_v34, %v8545_v21  ;;  %6945 = vrot.lane.b32.xlu1 %v6768_v25, %s10388_s8  ;;  %v6771_v25 = vld [vmem:[#allocation3 + $0x2d0] sm:$0xff] }
 0x999   :  { %v7306_v46 = vpop.permute.xlu0 %7305 }
 0x99a   :  { %v7688_v27 = vpop.permute.xlu1 %7687  ;;  %7460 = vst.msk [vmem:[#allocation2 + $0x128] sm:$0xff] %vm2787_vm7, %v7306_v46  ;;  %v8549_v0 = vadd.f32 %v8548_v33, %v8547_v4  ;;  %v6772_v4 = vld [vmem:[#allocation3 + $0x2d8] sm:$0xff] }
 0x99b   :  { %7843 = vst.msk [vmem:[#allocation2 + $0x120] sm:$0xff] %vm3172_vm8, %v7688_v27  ;;  %7327 = vrot.lane.b32.xlu0 %v6000_v56, %s10389_s21  ;;  %v6004_v27 = vld [vmem:[#allocation3 + $0x2d1] sm:$0xff] }
 0x99c   :  { %6178 = vrot.lane.b32.xlu1 %v6000_v56, %s10386_s10 }
 0x99d   :  { %v6157_v6 = vpop.permute.xlu0 %6156 }
 0x99e   :  { %v6539_v5 = vpop.permute.xlu1 %6538  ;;  %6309 = vst.msk [vmem:[#allocation2 + $0x138] sm:$0xff] %vm1631_vm4, %v6157_v6  ;;  %v7156_v6 = vld [vmem:[#allocation3 + $0x2d9] sm:$0xff] }
 0x99f   :  { %6692 = vst.msk [vmem:[#allocation2 + $0x130] sm:$0xff] %vm2016_vm5, %v6539_v5  ;;  %7329 = vrot.lane.b32.xlu0 %v7152_v53, %s10389_s21  ;;  %v7539_v5 = vld [vmem:[#allocation3 + $0x2d2] sm:$0xff] }
 0x9a0   :  { %7711 = vrot.lane.b32.xlu1 %v7535_v9, %s10390_s17 }
 0x9a1   :  { %v7690_v62 = vpop.permute.xlu0 %7689 }
 0x9a2   :  { %v6541_v44 = vpop.permute.xlu1 %6540  ;;  %7844 = vst.msk [vmem:[#allocation2 + $0x128] sm:$0xff] %vm3172_vm8, %v7690_v62  ;;  %v7907_v50 = vld [vmem:[#allocation2 + $0x120] sm:$0xff] }
 0x9a3   :  { %6693 = vst.msk [vmem:[#allocation2 + $0x138] sm:$0xff] %vm2016_vm5, %v6541_v44  ;;  %10296 = vmatprep.mubr.msk.f32.mxu1 %vm3310_vm9, %v7907_v50  ;;  %6180 = vrot.lane.b32.xlu0 %v7152_v53, %s10386_s10 }
 0x9a4   :  { %6562 = vrot.lane.b32.xlu1 %v7535_v9, %s10387_s27 }
 0x9a5   :  { %v6924_v18 = vpop.permute.xlu0 %6923  ;;  %v16040_v11 = vpop.f32.mrb[14].mxu1 }
 0x9a6   :  { %v6926_v47 = vpop.permute.xlu1 %6925  ;;  %7077 = vst.msk [vmem:[#allocation2 + $0x130] sm:$0xff] %vm2402_vm6, %v6924_v18  ;;  %v16043_v43 = vpop.f32.mrb[15].mxu1  ;;  %v8552_v28 = vsel %vm90_vm0, %v16040_v11, 0.0 }
 0x9a7   :  { %7078 = vst.msk [vmem:[#allocation2 + $0x138] sm:$0xff] %vm2402_vm6, %v6926_v47  ;;  %v8550_v37 = vsel %vm90_vm0, %v16043_v43, 0.0  ;;  %7713 = vrot.lane.b32.xlu0 %v6385_v59, %s10390_s17 }
 0x9a8   :  { %v8551_v54 = vadd.f32 %v8550_v37, %v8549_v0  ;;  %6564 = vrot.lane.b32.xlu1 %v6385_v59, %s10387_s27 }
 0x9a9   :  { %v7308_v32 = vpop.permute.xlu0 %7307  ;;  %v7908_v20 = vld [vmem:[#allocation2 + $0x128] sm:$0xff] }
 0x9aa   :  { %v6159_v31 = vpop.permute.xlu1 %6158  ;;  %7461 = vst.msk [vmem:[#allocation2 + $0x130] sm:$0xff] %vm2787_vm7, %v7308_v32  ;;  %10297 = vmatmul.mubr.msk.f32.gmra.mrb[36].mxu1 %vm3310_vm9, %v7908_v20  ;;  %v8553_v13 = vadd.f32 %v8552_v28, %v8551_v54  ;;  %v6389_v28 = vld [vmem:[#allocation3 + $0x2da] sm:$0xff] }
 0x9ab   :  { %6310 = vst.msk [vmem:[#allocation2 + $0x140] sm:$0xff] %vm1631_vm4, %v6159_v31  ;;  %6947 = vrot.lane.b32.xlu0 %v6769_v1, %s10388_s8 }
 0x9ac   :  { %6949 = vrot.lane.b32.xlu1 %v6770_v22, %s10388_s8  ;;  %v6774_v22 = vld [vmem:[#allocation3 + $0x2f0] sm:$0xff] }
 0x9ad   :  { %v7310_v42 = vpop.permute.xlu0 %7309 }
 0x9ae   :  { %v7692_v16 = vpop.permute.xlu1 %7691  ;;  %7462 = vst.msk [vmem:[#allocation2 + $0x138] sm:$0xff] %vm2787_vm7, %v7310_v42 }
 0x9af   :  { %7845 = vst.msk [vmem:[#allocation2 + $0x130] sm:$0xff] %vm3172_vm8, %v7692_v16  ;;  %7331 = vrot.lane.b32.xlu0 %v6002_v36, %s10389_s21 }
 0x9b0   :  { %6182 = vrot.lane.b32.xlu1 %v6002_v36, %s10386_s10  ;;  %v6006_v36 = vld [vmem:[#allocation3 + $0x2e9] sm:$0xff] }
 0x9b1   :  { %v6161_v17 = vpop.permute.xlu0 %6160 }
 0x9b2   :  { %v6543_v30 = vpop.permute.xlu1 %6542  ;;  %6311 = vst.msk [vmem:[#allocation2 + $0x148] sm:$0xff] %vm1631_vm4, %v6161_v17 }
 0x9b3   :  { %6694 = vst.msk [vmem:[#allocation2 + $0x140] sm:$0xff] %vm2016_vm5, %v6543_v30  ;;  %7333 = vrot.lane.b32.xlu0 %v7154_v60, %s10389_s21 }
 0x9b4   :  { %7715 = vrot.lane.b32.xlu1 %v7537_v51, %s10390_s17 }
 0x9b5   :  { %v7694_v2 = vpop.permute.xlu0 %7693  ;;  %v16065_v14 = vpop.f32.mrb[16].mxu1 }
 0x9b6   :  { %v6545_v21 = vpop.permute.xlu1 %6544  ;;  %7846 = vst.msk [vmem:[#allocation2 + $0x138] sm:$0xff] %vm3172_vm8, %v7694_v2  ;;  %v16068_v7 = vpop.f32.mrb[17].mxu1  ;;  %v7909_v40 = vld [vmem:[#allocation2 + $0x130] sm:$0xff]  ;;  %v8556_v45 = vsel %vm90_vm0, %v16065_v14, 0.0 }
 0x9b7   :  { %6695 = vst.msk [vmem:[#allocation2 + $0x148] sm:$0xff] %vm2016_vm5, %v6545_v21  ;;  %v8554_v57 = vsel %vm90_vm0, %v16068_v7, 0.0  ;;  %10299 = vmatprep.mubr.msk.f32.mxu1 %vm3310_vm9, %v7909_v40  ;;  %6184 = vrot.lane.b32.xlu0 %v7154_v60, %s10386_s10  ;;  %v7158_v60 = vld [vmem:[#allocation3 + $0x2f1] sm:$0xff] }
 0x9b8   :  { %v8555_v41 = vadd.f32 %v8554_v57, %v8553_v13  ;;  %6566 = vrot.lane.b32.xlu1 %v7537_v51, %s10387_s27  ;;  %v6773_v13 = vld [vmem:[#allocation3 + $0x2e8] sm:$0xff] }
 0x9b9   :  { %v6928_v23 = vpop.permute.xlu0 %6927  ;;  %v7541_v51 = vld [vmem:[#allocation3 + $0x2ea] sm:$0xff] }
 0x9ba   :  { %v6930_v12 = vpop.permute.xlu1 %6929  ;;  %7079 = vst.msk [vmem:[#allocation2 + $0x140] sm:$0xff] %vm2402_vm6, %v6928_v23  ;;  %v8557_v58 = vadd.f32 %v8556_v45, %v8555_v41 }
 0x9bb   :  { %7080 = vst.msk [vmem:[#allocation2 + $0x148] sm:$0xff] %vm2402_vm6, %v6930_v12  ;;  %7717 = vrot.lane.b32.xlu0 %v6387_v48, %s10390_s17 }
 0x9bc   :  { %6568 = vrot.lane.b32.xlu1 %v6387_v48, %s10387_s27 }
 0x9bd   :  { %v7312_v29 = vpop.permute.xlu0 %7311  ;;  %v7910_v26 = vld [vmem:[#allocation2 + $0x138] sm:$0xff] }
 0x9be   :  { %v6163_v34 = vpop.permute.xlu1 %6162  ;;  %7463 = vst.msk [vmem:[#allocation2 + $0x140] sm:$0xff] %vm2787_vm7, %v7312_v29  ;;  %10300 = vmatmul.mubr.msk.f32.gmra.mrb[38].mxu1 %vm3310_vm9, %v7910_v26  ;;  %v6391_v29 = vld [vmem:[#allocation3 + $0x2f2] sm:$0xff] }
 0x9bf   :  { %6312 = vst.msk [vmem:[#allocation2 + $0x150] sm:$0xff] %vm1631_vm4, %v6163_v34  ;;  %6951 = vrot.lane.b32.xlu0 %v6771_v25, %s10388_s8 }
 0x9c0   :  { %6953 = vrot.lane.b32.xlu1 %v6772_v4, %s10388_s8 }
 0x9c1   :  { %v7314_v33 = vpop.permute.xlu0 %7313 }
 0x9c2   :  { %v7696_v46 = vpop.permute.xlu1 %7695  ;;  %7464 = vst.msk [vmem:[#allocation2 + $0x148] sm:$0xff] %vm2787_vm7, %v7314_v33  ;;  %v6775_v33 = vld [vmem:[#allocation3 + $0x300] sm:$0xff] }
 0x9c3   :  { %7847 = vst.msk [vmem:[#allocation2 + $0x140] sm:$0xff] %vm3172_vm8, %v7696_v46  ;;  %7335 = vrot.lane.b32.xlu0 %v6004_v27, %s10389_s21  ;;  %v6776_v46 = vld [vmem:[#allocation3 + $0x308] sm:$0xff] }
 0x9c4   :  { %6186 = vrot.lane.b32.xlu1 %v6004_v27, %s10386_s10 }
 0x9c5   :  { %v6165_v56 = vpop.permute.xlu0 %6164 }
 0x9c6   :  { %v6547_v0 = vpop.permute.xlu1 %6546  ;;  %6313 = vst.msk [vmem:[#allocation2 + $0x158] sm:$0xff] %vm1631_vm4, %v6165_v56 }
 0x9c7   :  { %6696 = vst.msk [vmem:[#allocation2 + $0x150] sm:$0xff] %vm2016_vm5, %v6547_v0  ;;  %7337 = vrot.lane.b32.xlu0 %v7156_v6, %s10389_s21  ;;  %v6008_v0 = vld [vmem:[#allocation3 + $0x301] sm:$0xff] }
 0x9c8   :  { %7719 = vrot.lane.b32.xlu1 %v7539_v5, %s10390_s17 }
 0x9c9   :  { %v7698_v53 = vpop.permute.xlu0 %7697  ;;  %v16095_v9 = vpop.f32.mrb[18].mxu1 }
 0x9ca   :  { %v6549_v62 = vpop.permute.xlu1 %6548  ;;  %7848 = vst.msk [vmem:[#allocation2 + $0x148] sm:$0xff] %vm3172_vm8, %v7698_v53  ;;  %v16098_v44 = vpop.f32.mrb[19].mxu1  ;;  %v7911_v50 = vld [vmem:[#allocation2 + $0x140] sm:$0xff]  ;;  %v8560_v59 = vsel %vm90_vm0, %v16095_v9, 0.0  ;;  %v7160_v53 = vld [vmem:[#allocation3 + $0x309] sm:$0xff] }
 0x9cb   :  { %6697 = vst.msk [vmem:[#allocation2 + $0x158] sm:$0xff] %vm2016_vm5, %v6549_v62  ;;  %v8558_v18 = vsel %vm90_vm0, %v16098_v44, 0.0  ;;  %10302 = vmatprep.mubr.msk.f32.mxu1 %vm3310_vm9, %v7911_v50  ;;  %6188 = vrot.lane.b32.xlu0 %v7156_v6, %s10386_s10  ;;  %v7543_v62 = vld [vmem:[#allocation3 + $0x302] sm:$0xff] }
 0x9cc   :  { %v8559_v47 = vadd.f32 %v8558_v18, %v8557_v58  ;;  %6570 = vrot.lane.b32.xlu1 %v7539_v5, %s10387_s27 }
 0x9cd   :  { %v6932_v37 = vpop.permute.xlu0 %6931 }
 0x9ce   :  { %v6934_v54 = vpop.permute.xlu1 %6933  ;;  %7081 = vst.msk [vmem:[#allocation2 + $0x150] sm:$0xff] %vm2402_vm6, %v6932_v37  ;;  %v8561_v32 = vadd.f32 %v8560_v59, %v8559_v47 }
 0x9cf   :  { %7082 = vst.msk [vmem:[#allocation2 + $0x158] sm:$0xff] %vm2402_vm6, %v6934_v54  ;;  %7721 = vrot.lane.b32.xlu0 %v6389_v28, %s10390_s17 }
 0x9d0   :  { %6572 = vrot.lane.b32.xlu1 %v6389_v28, %s10387_s27 }
 0x9d1   :  { %v7316_v20 = vpop.permute.xlu0 %7315  ;;  %v7912_v31 = vld [vmem:[#allocation2 + $0x148] sm:$0xff] }
 0x9d2   :  { %v6167_v1 = vpop.permute.xlu1 %6166  ;;  %7465 = vst.msk [vmem:[#allocation2 + $0x150] sm:$0xff] %vm2787_vm7, %v7316_v20  ;;  %10303 = vmatmul.mubr.msk.f32.gmra.mrb[40].mxu1 %vm3310_vm9, %v7912_v31 }
 0x9d3   :  { %6314 = vst.msk [vmem:[#allocation2 + $0x160] sm:$0xff] %vm1631_vm4, %v6167_v1  ;;  %6955 = vrot.lane.b32.xlu0 %v6773_v13, %s10388_s8  ;;  %v6393_v1 = vld [vmem:[#allocation3 + $0x30a] sm:$0xff] }
 0x9d4   :  { %6957 = vrot.lane.b32.xlu1 %v6774_v22, %s10388_s8 }
 0x9d5   :  { %v7318_v42 = vpop.permute.xlu0 %7317 }
 0x9d6   :  { %v7700_v16 = vpop.permute.xlu1 %7699  ;;  %7466 = vst.msk [vmem:[#allocation2 + $0x158] sm:$0xff] %vm2787_vm7, %v7318_v42 }
 0x9d7   :  { %7849 = vst.msk [vmem:[#allocation2 + $0x150] sm:$0xff] %vm3172_vm8, %v7700_v16  ;;  %7339 = vrot.lane.b32.xlu0 %v6006_v36, %s10389_s21 }
 0x9d8   :  { %6190 = vrot.lane.b32.xlu1 %v6006_v36, %s10386_s10  ;;  %v6777_v36 = vld [vmem:[#allocation3 + $0x318] sm:$0xff] }
 0x9d9   :  { %v6169_v17 = vpop.permute.xlu0 %6168 }
 0x9da   :  { %v6551_v30 = vpop.permute.xlu1 %6550  ;;  %6315 = vst.msk [vmem:[#allocation2 + $0x168] sm:$0xff] %vm1631_vm4, %v6169_v17  ;;  %v6778_v17 = vld [vmem:[#allocation3 + $0x320] sm:$0xff] }
 0x9db   :  { %6698 = vst.msk [vmem:[#allocation2 + $0x160] sm:$0xff] %vm2016_vm5, %v6551_v30  ;;  %7341 = vrot.lane.b32.xlu0 %v7158_v60, %s10389_s21 }
 0x9dc   :  { %7723 = vrot.lane.b32.xlu1 %v7541_v51, %s10390_s17 }
 0x9dd   :  { %v7702_v2 = vpop.permute.xlu0 %7701  ;;  %v16125_v21 = vpop.f32.mrb[20].mxu1 }
 0x9de   :  { %v6553_v40 = vpop.permute.xlu1 %6552  ;;  %7850 = vst.msk [vmem:[#allocation2 + $0x158] sm:$0xff] %vm3172_vm8, %v7702_v2  ;;  %v16128_v57 = vpop.f32.mrb[21].mxu1  ;;  %v7913_v41 = vld [vmem:[#allocation2 + $0x150] sm:$0xff]  ;;  %v8564_v12 = vsel %vm90_vm0, %v16125_v21, 0.0 }
 0x9df   :  { %6699 = vst.msk [vmem:[#allocation2 + $0x168] sm:$0xff] %vm2016_vm5, %v6553_v40  ;;  %v8562_v45 = vsel %vm90_vm0, %v16128_v57, 0.0  ;;  %10305 = vmatprep.mubr.msk.f32.mxu1 %vm3310_vm9, %v7913_v41  ;;  %6192 = vrot.lane.b32.xlu0 %v7158_v60, %s10386_s10  ;;  %v7162_v41 = vld [vmem:[#allocation3 + $0x321] sm:$0xff] }
 0x9e0   :  { %v8563_v23 = vadd.f32 %v8562_v45, %v8561_v32  ;;  %6574 = vrot.lane.b32.xlu1 %v7541_v51, %s10387_s27  ;;  %v6010_v51 = vld [vmem:[#allocation3 + $0x319] sm:$0xff] }
 0x9e1   :  { %v6936_v48 = vpop.permute.xlu0 %6935  ;;  %v7545_v45 = vld [vmem:[#allocation3 + $0x31a] sm:$0xff] }
 0x9e2   :  { %v6938_v58 = vpop.permute.xlu1 %6937  ;;  %7083 = vst.msk [vmem:[#allocation2 + $0x160] sm:$0xff] %vm2402_vm6, %v6936_v48  ;;  %v8565_v26 = vadd.f32 %v8564_v12, %v8563_v23 }
 0x9e3   :  { %7084 = vst.msk [vmem:[#allocation2 + $0x168] sm:$0xff] %vm2402_vm6, %v6938_v58  ;;  %7725 = vrot.lane.b32.xlu0 %v6391_v29, %s10390_s17 }
 0x9e4   :  { %6576 = vrot.lane.b32.xlu1 %v6391_v29, %s10387_s27 }
 0x9e5   :  { %v7320_v34 = vpop.permute.xlu0 %7319  ;;  %v7914_v25 = vld [vmem:[#allocation2 + $0x158] sm:$0xff] }
 0x9e6   :  { %v6171_v4 = vpop.permute.xlu1 %6170  ;;  %7467 = vst.msk [vmem:[#allocation2 + $0x160] sm:$0xff] %vm2787_vm7, %v7320_v34  ;;  %10306 = vmatmul.mubr.msk.f32.gmra.mrb[42].mxu1 %vm3310_vm9, %v7914_v25 }
 0x9e7   :  { %6316 = vst.msk [vmem:[#allocation2 + $0x170] sm:$0xff] %vm1631_vm4, %v6171_v4  ;;  %6959 = vrot.lane.b32.xlu0 %v6775_v33, %s10388_s8 }
 0x9e8   :  { %6961 = vrot.lane.b32.xlu1 %v6776_v46, %s10388_s8  ;;  %v6395_v46 = vld [vmem:[#allocation3 + $0x322] sm:$0xff] }
 0x9e9   :  { %v7322_v27 = vpop.permute.xlu0 %7321 }
 0x9ea   :  { %v7704_v56 = vpop.permute.xlu1 %7703  ;;  %7468 = vst.msk [vmem:[#allocation2 + $0x168] sm:$0xff] %vm2787_vm7, %v7322_v27 }
 0x9eb   :  { %7851 = vst.msk [vmem:[#allocation2 + $0x160] sm:$0xff] %vm3172_vm8, %v7704_v56  ;;  %7343 = vrot.lane.b32.xlu0 %v6008_v0, %s10389_s21 }
 0x9ec   :  { %6194 = vrot.lane.b32.xlu1 %v6008_v0, %s10386_s10 }
 0x9ed   :  { %v6173_v6 = vpop.permute.xlu0 %6172 }
 0x9ee   :  { %v6555_v5 = vpop.permute.xlu1 %6554  ;;  %6317 = vst.msk [vmem:[#allocation2 + $0x178] sm:$0xff] %vm1631_vm4, %v6173_v6 }
 0x9ef   :  { %6700 = vst.msk [vmem:[#allocation2 + $0x170] sm:$0xff] %vm2016_vm5, %v6555_v5  ;;  %7345 = vrot.lane.b32.xlu0 %v7160_v53, %s10389_s21  ;;  %v6779_v5 = vld [vmem:[#allocation3 + $0x330] sm:$0xff] }
 0x9f0   :  { %7727 = vrot.lane.b32.xlu1 %v7543_v62, %s10390_s17 }
 0x9f1   :  { %v7706_v50 = vpop.permute.xlu0 %7705  ;;  %v16155_v18 = vpop.f32.mrb[22].mxu1 }
 0x9f2   :  { %v6557_v47 = vpop.permute.xlu1 %6556  ;;  %7852 = vst.msk [vmem:[#allocation2 + $0x168] sm:$0xff] %vm3172_vm8, %v7706_v50  ;;  %v16158_v59 = vpop.f32.mrb[23].mxu1  ;;  %v7915_v37 = vld [vmem:[#allocation2 + $0x160] sm:$0xff]  ;;  %v8568_v32 = vsel %vm90_vm0, %v16155_v18, 0.0 }
 0x9f3   :  { %6701 = vst.msk [vmem:[#allocation2 + $0x178] sm:$0xff] %vm2016_vm5, %v6557_v47  ;;  %v8566_v54 = vsel %vm90_vm0, %v16158_v59, 0.0  ;;  %10308 = vmatprep.mubr.msk.f32.mxu1 %vm3310_vm9, %v7915_v37  ;;  %6196 = vrot.lane.b32.xlu0 %v7160_v53, %s10386_s10  ;;  %v6780_v53 = vld [vmem:[#allocation3 + $0x338] sm:$0xff] }
 0x9f4   :  { %v8567_v28 = vadd.f32 %v8566_v54, %v8565_v26  ;;  %6578 = vrot.lane.b32.xlu1 %v7543_v62, %s10387_s27  ;;  %v6012_v47 = vld [vmem:[#allocation3 + $0x331] sm:$0xff] }
 0x9f5   :  { %v6940_v20 = vpop.permute.xlu0 %6939 }
 0x9f6   :  { %v6942_v31 = vpop.permute.xlu1 %6941  ;;  %7085 = vst.msk [vmem:[#allocation2 + $0x170] sm:$0xff] %vm2402_vm6, %v6940_v20  ;;  %v8569_v13 = vadd.f32 %v8568_v32, %v8567_v28  ;;  %v7164_v28 = vld [vmem:[#allocation3 + $0x339] sm:$0xff] }
 0x9f7   :  { %7086 = vst.msk [vmem:[#allocation2 + $0x178] sm:$0xff] %vm2402_vm6, %v6942_v31  ;;  %7729 = vrot.lane.b32.xlu0 %v6393_v1, %s10390_s17  ;;  %v7547_v32 = vld [vmem:[#allocation3 + $0x332] sm:$0xff] }
 0x9f8   :  { %6580 = vrot.lane.b32.xlu1 %v6393_v1, %s10387_s27 }
 0x9f9   :  { %v7324_v22 = vpop.permute.xlu0 %7323  ;;  %v7916_v42 = vld [vmem:[#allocation2 + $0x168] sm:$0xff] }
 0x9fa   :  { %v6175_v16 = vpop.permute.xlu1 %6174  ;;  %7469 = vst.msk [vmem:[#allocation2 + $0x170] sm:$0xff] %vm2787_vm7, %v7324_v22  ;;  %10309 = vmatmul.mubr.msk.f32.gmra.mrb[44].mxu1 %vm3310_vm9, %v7916_v42 }
 0x9fb   :  { %6318 = vst.msk [vmem:[#allocation2 + $0x180] sm:$0xff] %vm1631_vm4, %v6175_v16  ;;  %6963 = vrot.lane.b32.xlu0 %v6777_v36, %s10388_s8 }
 0x9fc   :  { %6965 = vrot.lane.b32.xlu1 %v6778_v17, %s10388_s8 }
 0x9fd   :  { %v7326_v30 = vpop.permute.xlu0 %7325 }
 0x9fe   :  { %v7708_v60 = vpop.permute.xlu1 %7707  ;;  %7470 = vst.msk [vmem:[#allocation2 + $0x178] sm:$0xff] %vm2787_vm7, %v7326_v30 }
 0x9ff   :  { %7853 = vst.msk [vmem:[#allocation2 + $0x170] sm:$0xff] %vm3172_vm8, %v7708_v60  ;;  %7347 = vrot.lane.b32.xlu0 %v6010_v51, %s10389_s21  ;;  %v6397_v60 = vld [vmem:[#allocation3 + $0x33a] sm:$0xff] }
 0xa00   :  { %6198 = vrot.lane.b32.xlu1 %v6010_v51, %s10386_s10 }
 0xa01   :  { %v6177_v2 = vpop.permute.xlu0 %6176 }
 0xa02   :  { %v6559_v40 = vpop.permute.xlu1 %6558  ;;  %6319 = vst.msk [vmem:[#allocation2 + $0x188] sm:$0xff] %vm1631_vm4, %v6177_v2  ;;  %v6781_v2 = vld [vmem:[#allocation3 + $0x348] sm:$0xff] }
 0xa03   :  { %6702 = vst.msk [vmem:[#allocation2 + $0x180] sm:$0xff] %vm2016_vm5, %v6559_v40  ;;  %7349 = vrot.lane.b32.xlu0 %v7162_v41, %s10389_s21 }
 0xa04   :  { %7731 = vrot.lane.b32.xlu1 %v7545_v45, %s10390_s17 }
 0xa05   :  { %v7710_v23 = vpop.permute.xlu0 %7709  ;;  %v16185_v12 = vpop.f32.mrb[24].mxu1 }
 0xa06   :  { %v6561_v48 = vpop.permute.xlu1 %6560  ;;  %7854 = vst.msk [vmem:[#allocation2 + $0x178] sm:$0xff] %vm3172_vm8, %v7710_v23  ;;  %v16188_v58 = vpop.f32.mrb[25].mxu1  ;;  %v7917_v29 = vld [vmem:[#allocation2 + $0x170] sm:$0xff]  ;;  %v8572_v25 = vsel %vm90_vm0, %v16185_v12, 0.0 }
 0xa07   :  { %6703 = vst.msk [vmem:[#allocation2 + $0x188] sm:$0xff] %vm2016_vm5, %v6561_v48  ;;  %v8570_v26 = vsel %vm90_vm0, %v16188_v58, 0.0  ;;  %10311 = vmatprep.mubr.msk.f32.mxu1 %vm3310_vm9, %v7917_v29  ;;  %6200 = vrot.lane.b32.xlu0 %v7162_v41, %s10386_s10  ;;  %v7165_v48 = vld [vmem:[#allocation3 + $0x349] sm:$0xff] }
 0xa08   :  { %v8571_v34 = vadd.f32 %v8570_v26, %v8569_v13  ;;  %6582 = vrot.lane.b32.xlu1 %v7545_v45, %s10387_s27  ;;  %v6782_v45 = vld [vmem:[#allocation3 + $0x350] sm:$0xff] }
 0xa09   :  { %v6944_v4 = vpop.permute.xlu0 %6943  ;;  %v7166_v26 = vld [vmem:[#allocation3 + $0x351] sm:$0xff] }
 0xa0a   :  { %v6946_v33 = vpop.permute.xlu1 %6945  ;;  %7087 = vst.msk [vmem:[#allocation2 + $0x180] sm:$0xff] %vm2402_vm6, %v6944_v4  ;;  %v8573_v27 = vadd.f32 %v8572_v25, %v8571_v34  ;;  %v7549_v25 = vld [vmem:[#allocation3 + $0x34a] sm:$0xff] }
 0xa0b   :  { %7088 = vst.msk [vmem:[#allocation2 + $0x188] sm:$0xff] %vm2402_vm6, %v6946_v33  ;;  %7733 = vrot.lane.b32.xlu0 %v6395_v46, %s10390_s17  ;;  %v7550_v33 = vld [vmem:[#allocation3 + $0x352] sm:$0xff] }
 0xa0c   :  { %6584 = vrot.lane.b32.xlu1 %v6395_v46, %s10387_s27 }
 0xa0d   :  { %v7328_v56 = vpop.permute.xlu0 %7327  ;;  %v7918_v0 = vld [vmem:[#allocation2 + $0x178] sm:$0xff] }
 0xa0e   :  { %v6179_v6 = vpop.permute.xlu1 %6178  ;;  %7471 = vst.msk [vmem:[#allocation2 + $0x180] sm:$0xff] %vm2787_vm7, %v7328_v56  ;;  %10312 = vmatmul.mubr.msk.f32.gmra.mrb[46].mxu1 %vm3310_vm9, %v7918_v0 }
 0xa0f   :  { %6320 = vst.msk [vmem:[#allocation2 + $0x190] sm:$0xff] %vm1631_vm4, %v6179_v6  ;;  %6967 = vrot.lane.b32.xlu0 %v6779_v5, %s10388_s8 }
 0xa10   :  { %6969 = vrot.lane.b32.xlu1 %v6780_v53, %s10388_s8 }
 0xa11   :  { %v7330_v62 = vpop.permute.xlu0 %7329 }
 0xa12   :  { %v7712_v50 = vpop.permute.xlu1 %7711  ;;  %7472 = vst.msk [vmem:[#allocation2 + $0x188] sm:$0xff] %vm2787_vm7, %v7330_v62 }
 0xa13   :  { %7855 = vst.msk [vmem:[#allocation2 + $0x180] sm:$0xff] %vm3172_vm8, %v7712_v50  ;;  %7351 = vrot.lane.b32.xlu0 %v6012_v47, %s10389_s21 }
 0xa14   :  { %6202 = vrot.lane.b32.xlu1 %v6012_v47, %s10386_s10 }
 0xa15   :  { %v6181_v37 = vpop.permute.xlu0 %6180 }
 0xa16   :  { %v6563_v54 = vpop.permute.xlu1 %6562  ;;  %6321 = vst.msk [vmem:[#allocation2 + $0x198] sm:$0xff] %vm1631_vm4, %v6181_v37 }
 0xa17   :  { %6704 = vst.msk [vmem:[#allocation2 + $0x190] sm:$0xff] %vm2016_vm5, %v6563_v54  ;;  %7353 = vrot.lane.b32.xlu0 %v7164_v28, %s10389_s21 }
 0xa18   :  { %7735 = vrot.lane.b32.xlu1 %v7547_v32, %s10390_s17 }
 0xa19   :  { %v7714_v20 = vpop.permute.xlu0 %7713  ;;  %v16215_v31 = vpop.f32.mrb[26].mxu1 }
 0xa1a   :  { %v6565_v1 = vpop.permute.xlu1 %6564  ;;  %7856 = vst.msk [vmem:[#allocation2 + $0x188] sm:$0xff] %vm3172_vm8, %v7714_v20  ;;  %v16218_v13 = vpop.f32.mrb[27].mxu1  ;;  %v7919_v22 = vld [vmem:[#allocation2 + $0x180] sm:$0xff]  ;;  %v8576_v36 = vsel %vm90_vm0, %v16215_v31, 0.0 }
 0xa1b   :  { %6705 = vst.msk [vmem:[#allocation2 + $0x198] sm:$0xff] %vm2016_vm5, %v6565_v1  ;;  %v8574_v42 = vsel %vm90_vm0, %v16218_v13, 0.0  ;;  %10314 = vmatprep.mubr.msk.f32.mxu1 %vm3310_vm9, %v7919_v22  ;;  %6204 = vrot.lane.b32.xlu0 %v7164_v28, %s10386_s10 }
 0xa1c   :  { %v8575_v16 = vadd.f32 %v8574_v42, %v8573_v27  ;;  %6586 = vrot.lane.b32.xlu1 %v7547_v32, %s10387_s27 }
 0xa1d   :  { %v6948_v17 = vpop.permute.xlu0 %6947 }
 0xa1e   :  { %v6950_v30 = vpop.permute.xlu1 %6949  ;;  %7089 = vst.msk [vmem:[#allocation2 + $0x190] sm:$0xff] %vm2402_vm6, %v6948_v17  ;;  %v8577_v51 = vadd.f32 %v8576_v36, %v8575_v16 }
 0xa1f   :  { %7090 = vst.msk [vmem:[#allocation2 + $0x198] sm:$0xff] %vm2402_vm6, %v6950_v30  ;;  %7737 = vrot.lane.b32.xlu0 %v6397_v60, %s10390_s17 }
 0xa20   :  { %6588 = vrot.lane.b32.xlu1 %v6397_v60, %s10387_s27 }
 0xa21   :  { %v7332_v40 = vpop.permute.xlu0 %7331  ;;  %v7920_v41 = vld [vmem:[#allocation2 + $0x188] sm:$0xff] }
 0xa22   :  { %v6183_v23 = vpop.permute.xlu1 %6182  ;;  %7473 = vst.msk [vmem:[#allocation2 + $0x190] sm:$0xff] %vm2787_vm7, %v7332_v40  ;;  %10315 = vmatmul.mubr.msk.f32.gmra.mrb[48].mxu1 %vm3310_vm9, %v7920_v41 }
 0xa23   :  { %6322 = vst.msk [vmem:[#allocation2 + $0x1a0] sm:$0xff] %vm1631_vm4, %v6183_v23  ;;  %6971 = vrot.lane.b32.xlu0 %v6781_v2, %s10388_s8 }
 0xa24   :  { %6973 = vrot.lane.b32.xlu1 %v6782_v45, %s10388_s8 }
 0xa25   :  { %v7334_v29 = vpop.permute.xlu0 %7333 }
 0xa26   :  { %v7716_v34 = vpop.permute.xlu1 %7715  ;;  %7474 = vst.msk [vmem:[#allocation2 + $0x198] sm:$0xff] %vm2787_vm7, %v7334_v29 }
 0xa27   :  { %7857 = vst.msk [vmem:[#allocation2 + $0x190] sm:$0xff] %vm3172_vm8, %v7716_v34  ;;  %7355 = vrot.lane.b32.xlu0 %v7165_v48, %s10389_s21 }
 0xa28   :  { %7357 = vrot.lane.b32.xlu1 %v7166_v26, %s10389_s21 }
 0xa29   :  { %v6185_v4 = vpop.permute.xlu0 %6184 }
 0xa2a   :  { %v6567_v46 = vpop.permute.xlu1 %6566  ;;  %6323 = vst.msk [vmem:[#allocation2 + $0x1a8] sm:$0xff] %vm1631_vm4, %v6185_v4 }
 0xa2b   :  { %6706 = vst.msk [vmem:[#allocation2 + $0x1a0] sm:$0xff] %vm2016_vm5, %v6567_v46  ;;  %7739 = vrot.lane.b32.xlu0 %v7549_v25, %s10390_s17 }
 0xa2c   :  { %7741 = vrot.lane.b32.xlu1 %v7550_v33, %s10390_s17 }
 0xa2d   :  { %v7718_v27 = vpop.permute.xlu0 %7717  ;;  %v16245_v56 = vpop.f32.mrb[28].mxu1 }
 0xa2e   :  { %v6569_v0 = vpop.permute.xlu1 %6568  ;;  %7858 = vst.msk [vmem:[#allocation2 + $0x198] sm:$0xff] %vm3172_vm8, %v7718_v27  ;;  %v16248_v6 = vpop.f32.mrb[29].mxu1  ;;  %v7921_v5 = vld [vmem:[#allocation2 + $0x190] sm:$0xff]  ;;  %v8580_v50 = vsel %vm90_vm0, %v16245_v56, 0.0 }
 0xa2f   :  { %6707 = vst.msk [vmem:[#allocation2 + $0x1a8] sm:$0xff] %vm2016_vm5, %v6569_v0  ;;  %v8578_v53 = vsel %vm90_vm0, %v16248_v6, 0.0  ;;  %10317 = vmatprep.mubr.msk.f32.mxu1 %vm3310_vm9, %v7921_v5 }
 0xa30   :  { %v8579_v62 = vadd.f32 %v8578_v53, %v8577_v51 }
 0xa31   :  { %v6952_v47 = vpop.permute.xlu0 %6951 }
 0xa32   :  { %v6954_v37 = vpop.permute.xlu1 %6953  ;;  %7091 = vst.msk [vmem:[#allocation2 + $0x1a0] sm:$0xff] %vm2402_vm6, %v6952_v47  ;;  %v8581_v54 = vadd.f32 %v8580_v50, %v8579_v62 }
 0xa33   :  { %7092 = vst.msk [vmem:[#allocation2 + $0x1a8] sm:$0xff] %vm2402_vm6, %v6954_v37 }
 0xa35   :  { %v7336_v28 = vpop.permute.xlu0 %7335  ;;  %v7922_v32 = vld [vmem:[#allocation2 + $0x198] sm:$0xff] }
 0xa36   :  { %v6187_v20 = vpop.permute.xlu1 %6186  ;;  %7475 = vst.msk [vmem:[#allocation2 + $0x1a0] sm:$0xff] %vm2787_vm7, %v7336_v28  ;;  %10318 = vmatmul.mubr.msk.f32.gmra.mrb[50].mxu1 %vm3310_vm9, %v7922_v32 }
 0xa37   :  { %6324 = vst.msk [vmem:[#allocation2 + $0x1b0] sm:$0xff] %vm1631_vm4, %v6187_v20 }
 0xa39   :  { %v7338_v1 = vpop.permute.xlu0 %7337 }
 0xa3a   :  { %v7720_v22 = vpop.permute.xlu1 %7719  ;;  %7476 = vst.msk [vmem:[#allocation2 + $0x1a8] sm:$0xff] %vm2787_vm7, %v7338_v1 }
 0xa3b   :  { %7859 = vst.msk [vmem:[#allocation2 + $0x1a0] sm:$0xff] %vm3172_vm8, %v7720_v22 }
 0xa3d   :  { %v6189_v42 = vpop.permute.xlu0 %6188 }
 0xa3e   :  { %v6571_v16 = vpop.permute.xlu1 %6570  ;;  %6325 = vst.msk [vmem:[#allocation2 + $0x1b8] sm:$0xff] %vm1631_vm4, %v6189_v42 }
 0xa3f   :  { %6708 = vst.msk [vmem:[#allocation2 + $0x1b0] sm:$0xff] %vm2016_vm5, %v6571_v16 }
 0xa41   :  { %v7722_v36 = vpop.permute.xlu0 %7721  ;;  %v16265_v17 = vpop.f32.mrb[30].mxu1 }
 0xa42   :  { %v6573_v30 = vpop.permute.xlu1 %6572  ;;  %7860 = vst.msk [vmem:[#allocation2 + $0x1a8] sm:$0xff] %vm3172_vm8, %v7722_v36  ;;  %v16268_v60 = vpop.f32.mrb[31].mxu1  ;;  %v7923_v51 = vld [vmem:[#allocation2 + $0x1a0] sm:$0xff]  ;;  %v8584_v41 = vsel %vm90_vm0, %v16265_v17, 0.0 }
 0xa43   :  { %6709 = vst.msk [vmem:[#allocation2 + $0x1b8] sm:$0xff] %vm2016_vm5, %v6573_v30  ;;  %v8582_v2 = vsel %vm90_vm0, %v16268_v60, 0.0  ;;  %10320 = vmatprep.mubr.msk.f32.mxu1 %vm3310_vm9, %v7923_v51 }
 0xa44   :  { %v8583_v40 = vadd.f32 %v8582_v2, %v8581_v54 }
 0xa45   :  { %v6956_v45 = vpop.permute.xlu0 %6955 }
 0xa46   :  { %v6958_v23 = vpop.permute.xlu1 %6957  ;;  %7093 = vst.msk [vmem:[#allocation2 + $0x1b0] sm:$0xff] %vm2402_vm6, %v6956_v45  ;;  %v8585_v48 = vadd.f32 %v8584_v41, %v8583_v40 }
 0xa47   :  { %7094 = vst.msk [vmem:[#allocation2 + $0x1b8] sm:$0xff] %vm2402_vm6, %v6958_v23 }
 0xa49   :  { %v7340_v29 = vpop.permute.xlu0 %7339  ;;  %v7924_v26 = vld [vmem:[#allocation2 + $0x1a8] sm:$0xff] }
 0xa4a   :  { %v6191_v34 = vpop.permute.xlu1 %6190  ;;  %7477 = vst.msk [vmem:[#allocation2 + $0x1b0] sm:$0xff] %vm2787_vm7, %v7340_v29  ;;  %10321 = vmatmul.mubr.msk.f32.gmra.mrb[52].mxu1 %vm3310_vm9, %v7924_v26 }
 0xa4b   :  { %6326 = vst.msk [vmem:[#allocation2 + $0x1c0] sm:$0xff] %vm1631_vm4, %v6191_v34 }
 0xa4d   :  { %v7342_v25 = vpop.permute.xlu0 %7341 }
 0xa4e   :  { %v7724_v4 = vpop.permute.xlu1 %7723  ;;  %7478 = vst.msk [vmem:[#allocation2 + $0x1b8] sm:$0xff] %vm2787_vm7, %v7342_v25 }
 0xa4f   :  { %7861 = vst.msk [vmem:[#allocation2 + $0x1b0] sm:$0xff] %vm3172_vm8, %v7724_v4 }
 0xa51   :  { %v6193_v33 = vpop.permute.xlu0 %6192 }
 0xa52   :  { %v6575_v46 = vpop.permute.xlu1 %6574  ;;  %6327 = vst.msk [vmem:[#allocation2 + $0x1c8] sm:$0xff] %vm1631_vm4, %v6193_v33 }
 0xa53   :  { %6710 = vst.msk [vmem:[#allocation2 + $0x1c0] sm:$0xff] %vm2016_vm5, %v6575_v46 }
 0xa55   :  { %v7726_v27 = vpop.permute.xlu0 %7725  ;;  %v16285_v0 = vpop.f32.mrb[32].mxu1 }
 0xa56   :  { %v6577_v5 = vpop.permute.xlu1 %6576  ;;  %7862 = vst.msk [vmem:[#allocation2 + $0x1b8] sm:$0xff] %vm3172_vm8, %v7726_v27  ;;  %v16288_v53 = vpop.f32.mrb[33].mxu1  ;;  %v7925_v62 = vld [vmem:[#allocation2 + $0x1b0] sm:$0xff]  ;;  %v8588_v37 = vsel %vm90_vm0, %v16285_v0, 0.0 }
 0xa57   :  { %6711 = vst.msk [vmem:[#allocation2 + $0x1c8] sm:$0xff] %vm2016_vm5, %v6577_v5  ;;  %v8586_v50 = vsel %vm90_vm0, %v16288_v53, 0.0  ;;  %10323 = vmatprep.mubr.msk.f32.mxu1 %vm3310_vm9, %v7925_v62 }
 0xa58   :  { %v8587_v47 = vadd.f32 %v8586_v50, %v8585_v48 }
 0xa59   :  { %v6960_v54 = vpop.permute.xlu0 %6959 }
 0xa5a   :  { %v6962_v28 = vpop.permute.xlu1 %6961  ;;  %7095 = vst.msk [vmem:[#allocation2 + $0x1c0] sm:$0xff] %vm2402_vm6, %v6960_v54  ;;  %v8589_v32 = vadd.f32 %v8588_v37, %v8587_v47 }
 0xa5b   :  { %7096 = vst.msk [vmem:[#allocation2 + $0x1c8] sm:$0xff] %vm2402_vm6, %v6962_v28 }
 0xa5d   :  { %v7344_v20 = vpop.permute.xlu0 %7343  ;;  %v7926_v1 = vld [vmem:[#allocation2 + $0x1b8] sm:$0xff] }
 0xa5e   :  { %v6195_v22 = vpop.permute.xlu1 %6194  ;;  %7479 = vst.msk [vmem:[#allocation2 + $0x1c0] sm:$0xff] %vm2787_vm7, %v7344_v20  ;;  %10324 = vmatmul.mubr.msk.f32.gmra.mrb[54].mxu1 %vm3310_vm9, %v7926_v1 }
 0xa5f   :  { %6328 = vst.msk [vmem:[#allocation2 + $0x1d0] sm:$0xff] %vm1631_vm4, %v6195_v22 }
 0xa61   :  { %v7346_v42 = vpop.permute.xlu0 %7345 }
 0xa62   :  { %v7728_v16 = vpop.permute.xlu1 %7727  ;;  %7480 = vst.msk [vmem:[#allocation2 + $0x1c8] sm:$0xff] %vm2787_vm7, %v7346_v42 }
 0xa63   :  { %7863 = vst.msk [vmem:[#allocation2 + $0x1c0] sm:$0xff] %vm3172_vm8, %v7728_v16 }
 0xa65   :  { %v6197_v36 = vpop.permute.xlu0 %6196 }
 0xa66   :  { %v6579_v30 = vpop.permute.xlu1 %6578  ;;  %6329 = vst.msk [vmem:[#allocation2 + $0x1d8] sm:$0xff] %vm1631_vm4, %v6197_v36 }
 0xa67   :  { %6712 = vst.msk [vmem:[#allocation2 + $0x1d0] sm:$0xff] %vm2016_vm5, %v6579_v30 }
 0xa69   :  { %v7730_v51 = vpop.permute.xlu0 %7729  ;;  %v16305_v2 = vpop.f32.mrb[34].mxu1 }
 0xa6a   :  { %v6581_v40 = vpop.permute.xlu1 %6580  ;;  %7864 = vst.msk [vmem:[#allocation2 + $0x1c8] sm:$0xff] %vm3172_vm8, %v7730_v51  ;;  %v16308_v41 = vpop.f32.mrb[35].mxu1  ;;  %v7927_v45 = vld [vmem:[#allocation2 + $0x1c0] sm:$0xff]  ;;  %v8592_v29 = vsel %vm90_vm0, %v16305_v2, 0.0 }
 0xa6b   :  { %6713 = vst.msk [vmem:[#allocation2 + $0x1d8] sm:$0xff] %vm2016_vm5, %v6581_v40  ;;  %v8590_v23 = vsel %vm90_vm0, %v16308_v41, 0.0  ;;  %10326 = vmatprep.mubr.msk.f32.mxu1 %vm3310_vm9, %v7927_v45 }
 0xa6c   :  { %v8591_v48 = vadd.f32 %v8590_v23, %v8589_v32 }
 0xa6d   :  { %v6964_v26 = vpop.permute.xlu0 %6963 }
 0xa6e   :  { %v6966_v34 = vpop.permute.xlu1 %6965  ;;  %7097 = vst.msk [vmem:[#allocation2 + $0x1d0] sm:$0xff] %vm2402_vm6, %v6964_v26  ;;  %v8593_v25 = vadd.f32 %v8592_v29, %v8591_v48 }
 0xa6f   :  { %7098 = vst.msk [vmem:[#allocation2 + $0x1d8] sm:$0xff] %vm2402_vm6, %v6966_v34 }
 0xa71   :  { %v7348_v4 = vpop.permute.xlu0 %7347  ;;  %v7928_v33 = vld [vmem:[#allocation2 + $0x1c8] sm:$0xff] }
 0xa72   :  { %v6199_v46 = vpop.permute.xlu1 %6198  ;;  %7481 = vst.msk [vmem:[#allocation2 + $0x1d0] sm:$0xff] %vm2787_vm7, %v7348_v4  ;;  %10327 = vmatmul.mubr.msk.f32.gmra.mrb[56].mxu1 %vm3310_vm9, %v7928_v33 }
 0xa73   :  { %6330 = vst.msk [vmem:[#allocation2 + $0x1e0] sm:$0xff] %vm1631_vm4, %v6199_v46 }
 0xa75   :  { %v7350_v27 = vpop.permute.xlu0 %7349 }
 0xa76   :  { %v7732_v5 = vpop.permute.xlu1 %7731  ;;  %7482 = vst.msk [vmem:[#allocation2 + $0x1d8] sm:$0xff] %vm2787_vm7, %v7350_v27 }
 0xa77   :  { %7865 = vst.msk [vmem:[#allocation2 + $0x1d0] sm:$0xff] %vm3172_vm8, %v7732_v5 }
 0xa79   :  { %v6201_v62 = vpop.permute.xlu0 %6200 }
 0xa7a   :  { %v6583_v50 = vpop.permute.xlu1 %6582  ;;  %6331 = vst.msk [vmem:[#allocation2 + $0x1e8] sm:$0xff] %vm1631_vm4, %v6201_v62 }
 0xa7b   :  { %6714 = vst.msk [vmem:[#allocation2 + $0x1e0] sm:$0xff] %vm2016_vm5, %v6583_v50 }
 0xa7d   :  { %v7734_v47 = vpop.permute.xlu0 %7733  ;;  %v16325_v37 = vpop.f32.mrb[36].mxu1 }
 0xa7e   :  { %v6585_v54 = vpop.permute.xlu1 %6584  ;;  %7866 = vst.msk [vmem:[#allocation2 + $0x1d8] sm:$0xff] %vm3172_vm8, %v7734_v47  ;;  %v16328_v28 = vpop.f32.mrb[37].mxu1  ;;  %v7929_v32 = vld [vmem:[#allocation2 + $0x1d0] sm:$0xff]  ;;  %v8596_v22 = vsel %vm90_vm0, %v16325_v37, 0.0 }
 0xa7f   :  { %6715 = vst.msk [vmem:[#allocation2 + $0x1e8] sm:$0xff] %vm2016_vm5, %v6585_v54  ;;  %v8594_v20 = vsel %vm90_vm0, %v16328_v28, 0.0  ;;  %10329 = vmatprep.mubr.msk.f32.mxu1 %vm3310_vm9, %v7929_v32 }
 0xa80   :  { %v8595_v1 = vadd.f32 %v8594_v20, %v8593_v25 }
 0xa81   :  { %v6968_v42 = vpop.permute.xlu0 %6967 }
 0xa82   :  { %v6970_v16 = vpop.permute.xlu1 %6969  ;;  %7099 = vst.msk [vmem:[#allocation2 + $0x1e0] sm:$0xff] %vm2402_vm6, %v6968_v42  ;;  %v8597_v36 = vadd.f32 %v8596_v22, %v8595_v1 }
 0xa83   :  { %7100 = vst.msk [vmem:[#allocation2 + $0x1e8] sm:$0xff] %vm2402_vm6, %v6970_v16 }
 0xa85   :  { %v7352_v30 = vpop.permute.xlu0 %7351  ;;  %v7930_v51 = vld [vmem:[#allocation2 + $0x1d8] sm:$0xff] }
 0xa86   :  { %v6203_v40 = vpop.permute.xlu1 %6202  ;;  %7483 = vst.msk [vmem:[#allocation2 + $0x1e0] sm:$0xff] %vm2787_vm7, %v7352_v30  ;;  %10330 = vmatmul.mubr.msk.f32.gmra.mrb[58].mxu1 %vm3310_vm9, %v7930_v51 }
 0xa87   :  { %6332 = vst.msk [vmem:[#allocation2 + $0x1f0] sm:$0xff] %vm1631_vm4, %v6203_v40 }
 0xa89   :  { %v7354_v45 = vpop.permute.xlu0 %7353 }
 0xa8a   :  { %v7736_v23 = vpop.permute.xlu1 %7735  ;;  %7484 = vst.msk [vmem:[#allocation2 + $0x1e8] sm:$0xff] %vm2787_vm7, %v7354_v45 }
 0xa8b   :  { %7867 = vst.msk [vmem:[#allocation2 + $0x1e0] sm:$0xff] %vm3172_vm8, %v7736_v23 }
 0xa8d   :  { %v6205_v48 = vpop.permute.xlu0 %6204 }
 0xa8e   :  { %v6587_v29 = vpop.permute.xlu1 %6586  ;;  %6333 = vst.msk [vmem:[#allocation2 + $0x1f8] sm:$0xff] %vm1631_vm4, %v6205_v48 }
 0xa8f   :  { %6716 = vst.msk [vmem:[#allocation2 + $0x1f0] sm:$0xff] %vm2016_vm5, %v6587_v29 }
 0xa91   :  { %v7738_v26 = vpop.permute.xlu0 %7737  ;;  %v16345_v34 = vpop.f32.mrb[38].mxu1 }
 0xa92   :  { %v6589_v25 = vpop.permute.xlu1 %6588  ;;  %7868 = vst.msk [vmem:[#allocation2 + $0x1e8] sm:$0xff] %vm3172_vm8, %v7738_v26  ;;  %v16348_v4 = vpop.f32.mrb[39].mxu1  ;;  %v7931_v33 = vld [vmem:[#allocation2 + $0x1e0] sm:$0xff]  ;;  %v8600_v5 = vsel %vm90_vm0, %v16345_v34, 0.0 }
 0xa93   :  { %6717 = vst.msk [vmem:[#allocation2 + $0x1f8] sm:$0xff] %vm2016_vm5, %v6589_v25  ;;  %v8598_v46 = vsel %vm90_vm0, %v16348_v4, 0.0  ;;  %10332 = vmatprep.mubr.msk.f32.mxu1 %vm3310_vm9, %v7931_v33 }
 0xa94   :  { %v8599_v27 = vadd.f32 %v8598_v46, %v8597_v36 }
 0xa95   :  { %v6972_v62 = vpop.permute.xlu0 %6971 }
 0xa96   :  { %7101 = vst.msk [vmem:[#allocation2 + $0x1f0] sm:$0xff] %vm2402_vm6, %v6972_v62  ;;  %v6974_v50 = vpop.permute.xlu1 %6973  ;;  %v8601_v47 = vadd.f32 %v8600_v5, %v8599_v27 }
 0xa97   :  { %7102 = vst.msk [vmem:[#allocation2 + $0x1f8] sm:$0xff] %vm2402_vm6, %v6974_v50 }
 0xa99   :  { %v7356_v54 = vpop.permute.xlu0 %7355  ;;  %v7932_v32 = vld [vmem:[#allocation2 + $0x1e8] sm:$0xff] }
 0xa9a   :  { %7485 = vst.msk [vmem:[#allocation2 + $0x1f0] sm:$0xff] %vm2787_vm7, %v7356_v54  ;;  %v7358_v20 = vpop.permute.xlu1 %7357  ;;  %10333 = vmatmul.mubr.msk.f32.gmra.mrb[60].mxu1 %vm3310_vm9, %v7932_v32 }
 0xa9b   :  { %7486 = vst.msk [vmem:[#allocation2 + $0x1f8] sm:$0xff] %vm2787_vm7, %v7358_v20 }
 0xa9d   :  { %v7740_v1 = vpop.permute.xlu0 %7739 }
 0xa9e   :  { %7869 = vst.msk [vmem:[#allocation2 + $0x1f0] sm:$0xff] %vm3172_vm8, %v7740_v1  ;;  %v7742_v22 = vpop.permute.xlu1 %7741 }
 0xa9f   :  { %7870 = vst.msk [vmem:[#allocation2 + $0x1f8] sm:$0xff] %vm3172_vm8, %v7742_v22 }
 0xaa5   :  { %v16363_v42 = vpop.f32.mrb[40].mxu1  ;;  %v7933_v16 = vld [vmem:[#allocation2 + $0x1f0] sm:$0xff] }
 0xaa6   :  { %v16365_v36 = vpop.f32.mrb[41].mxu1  ;;  %10335 = vmatprep.mubr.msk.f32.mxu1 %vm3310_vm9, %v7933_v16  ;;  %v7934_v30 = vld [vmem:[#allocation2 + $0x1f8] sm:$0xff]  ;;  %v8604_v45 = vsel %vm90_vm0, %v16363_v42, 0.0 }
 0xaa7   :  { %v8602_v51 = vsel %vm90_vm0, %v16365_v36, 0.0  ;;  %10336 = vmatmul.mubr.msk.f32.gmra.mrb[62].mxu1 %vm3310_vm9, %v7934_v30 }
 0xaa8   :  { %v8603_v40 = vadd.f32 %v8602_v51, %v8601_v47 }
 0xaaa   :  { %v8605_v23 = vadd.f32 %v8604_v45, %v8603_v40 }
 0xab9   :  { %v16373_v48 = vpop.f32.mrb[42].mxu1 }
 0xaba   :  { %v16375_v29 = vpop.f32.mrb[43].mxu1  ;;  %v8608_v33 = vsel %vm90_vm0, %v16373_v48, 0.0 }
 0xabb   :  { %v8606_v26 = vsel %vm90_vm0, %v16375_v29, 0.0 }
 0xabc   :  { %v8607_v25 = vadd.f32 %v8606_v26, %v8605_v23 }
 0xabe   :  { %v8609_v46 = vadd.f32 %v8608_v33, %v8607_v25 }
 0xacd   :  { %v16381_v27 = vpop.f32.mrb[44].mxu1 }
 0xace   :  { %18267 = vst [vmem:[#allocation7_spill] sm:$0xff] %v16381_v27  ;;  %v16383_v5 = vpop.f32.mrb[45].mxu1  ;;  %v8612_v47 = vsel %vm90_vm0, %v16381_v27, 0.0 }
 0xacf   :  { %v8610_v62 = vsel %vm90_vm0, %v16383_v5, 0.0 }
 0xad0   :  { %v8611_v50 = vadd.f32 %v8610_v62, %v8609_v46 }
 0xad2   :  { %v8613_v54 = vadd.f32 %v8612_v47, %v8611_v50 }
 0xae1   :  { %v16389_v32 = vpop.f32.mrb[46].mxu1 }
 0xae2   :  { %18268 = vst [vmem:[#allocation9_spill] sm:$0xff] %v16389_v32  ;;  %v16391_v20 = vpop.f32.mrb[47].mxu1  ;;  %v8616_v16 = vsel %vm90_vm0, %v16389_v32, 0.0 }
 0xae3   :  { %18269 = vst [vmem:[#allocation11_spill] sm:$0xff] %v16391_v20  ;;  %v8614_v1 = vsel %vm90_vm0, %v16391_v20, 0.0 }
 0xae4   :  { %v8615_v22 = vadd.f32 %v8614_v1, %v8613_v54 }
 0xae6   :  { %v8617_v30 = vadd.f32 %v8616_v16, %v8615_v22 }
 0xaf5   :  { %v16397_v51 = vpop.f32.mrb[48].mxu1 }
 0xaf6   :  { %18270 = vst [vmem:[#allocation10_spill] sm:$0xff] %v16397_v51  ;;  %v16399_v40 = vpop.f32.mrb[49].mxu1  ;;  %v8620_v26 = vsel %vm90_vm0, %v16397_v51, 0.0 }
 0xaf7   :  { %18271 = vst [vmem:[#allocation13_spill] sm:$0xff] %v16399_v40  ;;  %v8618_v45 = vsel %vm90_vm0, %v16399_v40, 0.0 }
 0xaf8   :  { %v8619_v23 = vadd.f32 %v8618_v45, %v8617_v30 }
 0xafa   :  { %v8621_v25 = vadd.f32 %v8620_v26, %v8619_v23 }
 0xb09   :  { %v16405_v33 = vpop.f32.mrb[50].mxu1 }
 0xb0a   :  { %18272 = vst [vmem:[#allocation12_spill] sm:$0xff] %v16405_v33  ;;  %v16407_v46 = vpop.f32.mrb[51].mxu1  ;;  %v8624_v47 = vsel %vm90_vm0, %v16405_v33, 0.0 }
 0xb0b   :  { %18273 = vst [vmem:[#allocation15_spill] sm:$0xff] %v16407_v46  ;;  %v8622_v62 = vsel %vm90_vm0, %v16407_v46, 0.0 }
 0xb0c   :  { %v8623_v50 = vadd.f32 %v8622_v62, %v8621_v25 }
 0xb0e   :  { %v8625_v54 = vadd.f32 %v8624_v47, %v8623_v50 }
 0xb1d   :  { %v16413_v1 = vpop.f32.mrb[52].mxu1 }
 0xb1e   :  { %18274 = vst [vmem:[#allocation14_spill] sm:$0xff] %v16413_v1  ;;  %v16415_v22 = vpop.f32.mrb[53].mxu1  ;;  %v8628_v45 = vsel %vm90_vm0, %v16413_v1, 0.0 }
 0xb1f   :  { %18275 = vst [vmem:[#allocation17_spill] sm:$0xff] %v16415_v22  ;;  %v8626_v16 = vsel %vm90_vm0, %v16415_v22, 0.0 }
 0xb20   :  { %v8627_v30 = vadd.f32 %v8626_v16, %v8625_v54 }
 0xb22   :  { %v8629_v23 = vadd.f32 %v8628_v45, %v8627_v30 }
 0xb31   :  { %v16421_v26 = vpop.f32.mrb[54].mxu1 }
 0xb32   :  { %18276 = vst [vmem:[#allocation16_spill] sm:$0xff] %v16421_v26  ;;  %v16423_v46 = vpop.f32.mrb[55].mxu1  ;;  %v8632_v50 = vsel %vm90_vm0, %v16421_v26, 0.0 }
 0xb33   :  { %18277 = vst [vmem:[#allocation19_spill] sm:$0xff] %v16423_v46  ;;  %v8630_v25 = vsel %vm90_vm0, %v16423_v46, 0.0 }
 0xb34   :  { %v8631_v62 = vadd.f32 %v8630_v25, %v8629_v23 }
 0xb36   :  { %v8633_v47 = vadd.f32 %v8632_v50, %v8631_v62 }
 0xb45   :  { %v16429_v33 = vpop.f32.mrb[56].mxu1 }
 0xb46   :  { %18278 = vst [vmem:[#allocation18_spill] sm:$0xff] %v16429_v33  ;;  %v16431_v22 = vpop.f32.mrb[57].mxu1  ;;  %v8636_v30 = vsel %vm90_vm0, %v16429_v33, 0.0 }
 0xb47   :  { %18279 = vst [vmem:[#allocation20_spill] sm:$0xff] %v16431_v22  ;;  %v8634_v54 = vsel %vm90_vm0, %v16431_v22, 0.0 }
 0xb48   :  { %v8635_v16 = vadd.f32 %v8634_v54, %v8633_v47 }
 0xb4a   :  { %v8637_v45 = vadd.f32 %v8636_v30, %v8635_v16 }
 0xb59   :  { %v16437_v1 = vpop.f32.mrb[58].mxu1 }
 0xb5a   :  { %18280 = vst [vmem:[#allocation21_spill] sm:$0xff] %v16437_v1  ;;  %v16439_v46 = vpop.f32.mrb[59].mxu1  ;;  %v8640_v62 = vsel %vm90_vm0, %v16437_v1, 0.0 }
 0xb5b   :  { %18281 = vst [vmem:[#allocation22_spill] sm:$0xff] %v16439_v46  ;;  %v8638_v23 = vsel %vm90_vm0, %v16439_v46, 0.0 }
 0xb5c   :  { %v8639_v25 = vadd.f32 %v8638_v23, %v8637_v45 }
 0xb5e   :  { %v8641_v50 = vadd.f32 %v8640_v62, %v8639_v25 }
 0xb6d   :  { %v16445_v26 = vpop.f32.mrb[60].mxu1 }
 0xb6e   :  { %18282 = vst [vmem:[#allocation23_spill] sm:$0xff] %v16445_v26  ;;  %v16447_v22 = vpop.f32.mrb[61].mxu1  ;;  %v8644_v16 = vsel %vm90_vm0, %v16445_v26, 0.0 }
 0xb6f   :  { %18283 = vst [vmem:[#allocation24_spill] sm:$0xff] %v16447_v22  ;;  %v8642_v47 = vsel %vm90_vm0, %v16447_v22, 0.0 }
 0xb70   :  { %v8643_v54 = vadd.f32 %v8642_v47, %v8641_v50 }
 0xb72   :  { %v8645_v30 = vadd.f32 %v8644_v16, %v8643_v54 }
 0xb7a   :  { %v16453_v33 = vpop.f32.mrb[62].mxu1 }
 0xb7b   :  { %18284 = vst [vmem:[#allocation25_spill] sm:$0xff] %v16453_v33  ;;  %v16455_v46 = vpop.f32.mrb[63].mxu1  ;;  %v8648_v25 = vsel %vm90_vm0, %v16453_v33, 0.0 }
 0xb7c   :  { %18285 = vst [vmem:[#allocation28_spill] sm:$0xff] %v16455_v46  ;;  %v8646_v45 = vsel %vm90_vm0, %v16455_v46, 0.0 }
 0xb7d   :  { %v8647_v23 = vadd.f32 %v8646_v45, %v8645_v30 }
 0xb7f   :  { %v8649_v62 = vadd.f32 %v8648_v25, %v8647_v23 }
 0xb81   :  { %v8650_v1 = vrot.slane %v8649_v62, 4 }
 0xb83   :  { %v8651_v51 = vadd.f32 %v8650_v1, %v8649_v62 }
 0xb85   :  { %v8652_v22 = vrot.slane %v8651_v51, 2 }
 0xb87   :  { %v8653_v50 = vadd.f32 %v8652_v22, %v8651_v51 }
 0xb89   :  { %v8654_v47 = vrot.slane %v8653_v50, 1 }
 0xb8b   :  { %v8655_v40 = vadd.f32 %v8654_v47, %v8653_v50 }
 0xb8d   :  { %v16461_v26 = vmul.f32 0.001953125, %v8655_v40 }
 0xb8f   :  { %v8657_v54 = vsub.f32 %v15866_v19, %v16461_v26  ;;  %v8658_v16 = vsub.f32 %v15861_v49, %v16461_v26  ;;  %v8659_v30 = vsub.f32 %v15889_v8, %v16461_v26  ;;  %v8660_v45 = vsub.f32 %v15886_v52, %v16461_v26 }
 0xb90   :  { %v8661_v51 = vsub.f32 %v15915_v61, %v16461_v26  ;;  %v8662_v40 = vsub.f32 %v15912_v10, %v16461_v26  ;;  %v8663_v8 = vsub.f32 %v15940_v35, %v16461_v26  ;;  %v8664_v61 = vsub.f32 %v15937_v3, %v16461_v26 }
 0xb91   :  { %v8721_v23 = vmul.f32 %v8657_v54, %v8657_v54  ;;  %v8722_v1 = vmul.f32 %v8658_v16, %v8658_v16  ;;  %v8723_v22 = vmul.f32 %v8659_v30, %v8659_v30  ;;  %v8724_v25 = vmul.f32 %v8660_v45, %v8660_v45 }
 0xb92   :  { %v8725_v49 = vmul.f32 %v8661_v51, %v8661_v51  ;;  %v8726_v30 = vmul.f32 %v8662_v40, %v8662_v40  ;;  %v8665_v45 = vsub.f32 %v15966_v63, %v16461_v26  ;;  %v8666_v51 = vsub.f32 %v15963_v55, %v16461_v26 }
 0xb93   :  { %v8785_v62 = vsel %vm90_vm0, %v8721_v23, 0.0  ;;  %v8786_v50 = vsel %vm90_vm0, %v8722_v1, 0.0  ;;  %v8788_v54 = vsel %vm90_vm0, %v8723_v22, 0.0  ;;  %v8790_v52 = vsel %vm90_vm0, %v8724_v25, 0.0 }
 0xb94   :  { %v8787_v47 = vadd.f32 %v8786_v50, %v8785_v62  ;;  %v8727_v23 = vmul.f32 %v8663_v8, %v8663_v8  ;;  %v8792_v1 = vsel %vm90_vm0, %v8725_v49, 0.0  ;;  %v8728_v50 = vmul.f32 %v8664_v61, %v8664_v61 }
 0xb95   :  { %v8794_v22 = vsel %vm90_vm0, %v8726_v30, 0.0  ;;  %v8667_v40 = vsub.f32 %v15992_v24, %v16461_v26  ;;  %v8668_v8 = vsub.f32 %v15989_v38, %v16461_v26  ;;  %v8669_v61 = vsub.f32 %v16017_v39, %v16461_v26 }
 0xb96   :  { %v8789_v16 = vadd.f32 %v8788_v54, %v8787_v47  ;;  %v8729_v54 = vmul.f32 %v8665_v45, %v8665_v45  ;;  %v8798_v49 = vsel %vm90_vm0, %v8728_v50, 0.0  ;;  %v8670_v45 = vsub.f32 %v16014_v15, %v16461_v26 }
 0xb98   :  { %v8791_v10 = vadd.f32 %v8790_v52, %v8789_v16  ;;  %v8796_v52 = vsel %vm90_vm0, %v8727_v23, 0.0  ;;  %v8730_v16 = vmul.f32 %v8666_v51, %v8666_v51  ;;  %v8800_v30 = vsel %vm90_vm0, %v8729_v54, 0.0 }
 0xb99   :  { %v8671_v51 = vsub.f32 %v16043_v43, %v16461_v26 }
 0xb9a   :  { %v8793_v62 = vadd.f32 %v8792_v1, %v8791_v10  ;;  %v8731_v1 = vmul.f32 %v8667_v40, %v8667_v40  ;;  %v8802_v23 = vsel %vm90_vm0, %v8730_v16, 0.0  ;;  %v8672_v40 = vsub.f32 %v16040_v11, %v16461_v26 }
 0xb9c   :  { %v8795_v47 = vadd.f32 %v8794_v22, %v8793_v62  ;;  %v8732_v22 = vmul.f32 %v8668_v8, %v8668_v8  ;;  %v8804_v50 = vsel %vm90_vm0, %v8731_v1, 0.0  ;;  %v8673_v8 = vsub.f32 %v16068_v7, %v16461_v26 }
 0xb9e   :  { %v8797_v25 = vadd.f32 %v8796_v52, %v8795_v47  ;;  %v8733_v52 = vmul.f32 %v8669_v61, %v8669_v61  ;;  %v8806_v54 = vsel %vm90_vm0, %v8732_v22, 0.0  ;;  %v8674_v61 = vsub.f32 %v16065_v14, %v16461_v26 }
 0xba0   :  { %v8799_v10 = vadd.f32 %v8798_v49, %v8797_v25  ;;  %v8734_v49 = vmul.f32 %v8670_v45, %v8670_v45  ;;  %v8808_v16 = vsel %vm90_vm0, %v8733_v52, 0.0  ;;  %v8675_v45 = vsub.f32 %v16098_v44, %v16461_v26 }
 0xba2   :  { %v8801_v62 = vadd.f32 %v8800_v30, %v8799_v10  ;;  %v8735_v30 = vmul.f32 %v8671_v51, %v8671_v51  ;;  %v8810_v1 = vsel %vm90_vm0, %v8734_v49, 0.0  ;;  %v8676_v51 = vsub.f32 %v16095_v9, %v16461_v26 }
 0xba4   :  { %v8803_v47 = vadd.f32 %v8802_v23, %v8801_v62  ;;  %v8736_v23 = vmul.f32 %v8672_v40, %v8672_v40  ;;  %v8812_v22 = vsel %vm90_vm0, %v8735_v30, 0.0  ;;  %v8677_v40 = vsub.f32 %v16128_v57, %v16461_v26 }
 0xba6   :  { %v8805_v25 = vadd.f32 %v8804_v50, %v8803_v47  ;;  %v8737_v50 = vmul.f32 %v8673_v8, %v8673_v8  ;;  %v8814_v52 = vsel %vm90_vm0, %v8736_v23, 0.0  ;;  %v8678_v8 = vsub.f32 %v16125_v21, %v16461_v26 }
 0xba8   :  { %v8807_v10 = vadd.f32 %v8806_v54, %v8805_v25  ;;  %v8738_v54 = vmul.f32 %v8674_v61, %v8674_v61  ;;  %v8816_v49 = vsel %vm90_vm0, %v8737_v50, 0.0  ;;  %v8679_v61 = vsub.f32 %v16158_v59, %v16461_v26 }
 0xbaa   :  { %v8809_v62 = vadd.f32 %v8808_v16, %v8807_v10  ;;  %v8739_v16 = vmul.f32 %v8675_v45, %v8675_v45  ;;  %v8818_v30 = vsel %vm90_vm0, %v8738_v54, 0.0  ;;  %v8680_v45 = vsub.f32 %v16155_v18, %v16461_v26 }
 0xbac   :  { %v8811_v47 = vadd.f32 %v8810_v1, %v8809_v62  ;;  %v8740_v1 = vmul.f32 %v8676_v51, %v8676_v51  ;;  %v8820_v23 = vsel %vm90_vm0, %v8739_v16, 0.0  ;;  %v8681_v51 = vsub.f32 %v16188_v58, %v16461_v26 }
 0xbae   :  { %v8813_v25 = vadd.f32 %v8812_v22, %v8811_v47  ;;  %v8741_v22 = vmul.f32 %v8677_v40, %v8677_v40  ;;  %v8822_v50 = vsel %vm90_vm0, %v8740_v1, 0.0  ;;  %v8682_v40 = vsub.f32 %v16185_v12, %v16461_v26 }
 0xbb0   :  { %v8815_v10 = vadd.f32 %v8814_v52, %v8813_v25  ;;  %v8742_v52 = vmul.f32 %v8678_v8, %v8678_v8  ;;  %v8824_v54 = vsel %vm90_vm0, %v8741_v22, 0.0  ;;  %v8683_v8 = vsub.f32 %v16218_v13, %v16461_v26 }
 0xbb2   :  { %v8817_v62 = vadd.f32 %v8816_v49, %v8815_v10  ;;  %v8743_v49 = vmul.f32 %v8679_v61, %v8679_v61  ;;  %v8826_v16 = vsel %vm90_vm0, %v8742_v52, 0.0  ;;  %v8684_v61 = vsub.f32 %v16215_v31, %v16461_v26 }
 0xbb4   :  { %v8819_v47 = vadd.f32 %v8818_v30, %v8817_v62  ;;  %v8744_v30 = vmul.f32 %v8680_v45, %v8680_v45  ;;  %v8828_v1 = vsel %vm90_vm0, %v8743_v49, 0.0  ;;  %v8685_v45 = vsub.f32 %v16248_v6, %v16461_v26 }
 0xbb6   :  { %v8821_v25 = vadd.f32 %v8820_v23, %v8819_v47  ;;  %v8745_v23 = vmul.f32 %v8681_v51, %v8681_v51  ;;  %v8830_v22 = vsel %vm90_vm0, %v8744_v30, 0.0  ;;  %v8686_v51 = vsub.f32 %v16245_v56, %v16461_v26 }
 0xbb8   :  { %v8823_v10 = vadd.f32 %v8822_v50, %v8821_v25  ;;  %v8746_v50 = vmul.f32 %v8682_v40, %v8682_v40  ;;  %v8832_v52 = vsel %vm90_vm0, %v8745_v23, 0.0  ;;  %v8687_v40 = vsub.f32 %v16268_v60, %v16461_v26 }
 0xbba   :  { %v8825_v62 = vadd.f32 %v8824_v54, %v8823_v10  ;;  %v8747_v54 = vmul.f32 %v8683_v8, %v8683_v8  ;;  %v8834_v49 = vsel %vm90_vm0, %v8746_v50, 0.0  ;;  %v8688_v8 = vsub.f32 %v16265_v17, %v16461_v26 }
 0xbbc   :  { %v8827_v47 = vadd.f32 %v8826_v16, %v8825_v62  ;;  %v8748_v16 = vmul.f32 %v8684_v61, %v8684_v61  ;;  %v8836_v30 = vsel %vm90_vm0, %v8747_v54, 0.0  ;;  %v8689_v61 = vsub.f32 %v16288_v53, %v16461_v26 }
 0xbbe   :  { %v8829_v25 = vadd.f32 %v8828_v1, %v8827_v47  ;;  %v8749_v1 = vmul.f32 %v8685_v45, %v8685_v45  ;;  %v8838_v23 = vsel %vm90_vm0, %v8748_v16, 0.0  ;;  %v8690_v45 = vsub.f32 %v16285_v0, %v16461_v26 }
 0xbc0   :  { %v8831_v10 = vadd.f32 %v8830_v22, %v8829_v25  ;;  %v8750_v22 = vmul.f32 %v8686_v51, %v8686_v51  ;;  %v8840_v50 = vsel %vm90_vm0, %v8749_v1, 0.0  ;;  %v8691_v51 = vsub.f32 %v16308_v41, %v16461_v26 }
 0xbc2   :  { %v8833_v62 = vadd.f32 %v8832_v52, %v8831_v10  ;;  %v8751_v52 = vmul.f32 %v8687_v40, %v8687_v40  ;;  %v8842_v54 = vsel %vm90_vm0, %v8750_v22, 0.0  ;;  %v8692_v40 = vsub.f32 %v16305_v2, %v16461_v26 }
 0xbc4   :  { %v8835_v47 = vadd.f32 %v8834_v49, %v8833_v62  ;;  %v8752_v49 = vmul.f32 %v8688_v8, %v8688_v8  ;;  %v8844_v16 = vsel %vm90_vm0, %v8751_v52, 0.0  ;;  %v8693_v8 = vsub.f32 %v16328_v28, %v16461_v26 }
 0xbc6   :  { %v8837_v25 = vadd.f32 %v8836_v30, %v8835_v47  ;;  %v8753_v30 = vmul.f32 %v8689_v61, %v8689_v61  ;;  %v8846_v1 = vsel %vm90_vm0, %v8752_v49, 0.0  ;;  %v8694_v61 = vsub.f32 %v16325_v37, %v16461_v26 }
 0xbc8   :  { %v8839_v10 = vadd.f32 %v8838_v23, %v8837_v25  ;;  %v8754_v23 = vmul.f32 %v8690_v45, %v8690_v45  ;;  %v8848_v22 = vsel %vm90_vm0, %v8753_v30, 0.0  ;;  %v8695_v45 = vsub.f32 %v16348_v4, %v16461_v26 }
 0xbca   :  { %v8841_v62 = vadd.f32 %v8840_v50, %v8839_v10  ;;  %v8755_v50 = vmul.f32 %v8691_v51, %v8691_v51  ;;  %v8850_v52 = vsel %vm90_vm0, %v8754_v23, 0.0  ;;  %v8696_v51 = vsub.f32 %v16345_v34, %v16461_v26 }
 0xbcc   :  { %v8843_v47 = vadd.f32 %v8842_v54, %v8841_v62  ;;  %v8756_v54 = vmul.f32 %v8692_v40, %v8692_v40  ;;  %v8852_v49 = vsel %vm90_vm0, %v8755_v50, 0.0  ;;  %v8697_v40 = vsub.f32 %v16365_v36, %v16461_v26 }
 0xbce   :  { %v8845_v25 = vadd.f32 %v8844_v16, %v8843_v47  ;;  %v8757_v16 = vmul.f32 %v8693_v8, %v8693_v8  ;;  %v8854_v30 = vsel %vm90_vm0, %v8756_v54, 0.0  ;;  %v8698_v8 = vsub.f32 %v16363_v42, %v16461_v26 }
 0xbd0   :  { %v8847_v10 = vadd.f32 %v8846_v1, %v8845_v25  ;;  %v8758_v1 = vmul.f32 %v8694_v61, %v8694_v61  ;;  %v8856_v23 = vsel %vm90_vm0, %v8757_v16, 0.0  ;;  %v8699_v61 = vsub.f32 %v16375_v29, %v16461_v26 }
 0xbd2   :  { %v8849_v62 = vadd.f32 %v8848_v22, %v8847_v10  ;;  %v8759_v22 = vmul.f32 %v8695_v45, %v8695_v45  ;;  %v8858_v50 = vsel %vm90_vm0, %v8758_v1, 0.0  ;;  %v8700_v45 = vsub.f32 %v16373_v48, %v16461_v26 }
 0xbd4   :  { %v8851_v47 = vadd.f32 %v8850_v52, %v8849_v62  ;;  %v8760_v52 = vmul.f32 %v8696_v51, %v8696_v51  ;;  %v8860_v54 = vsel %vm90_vm0, %v8759_v22, 0.0  ;;  %v8701_v51 = vsub.f32 %v16383_v5, %v16461_v26 }
 0xbd6   :  { %v8853_v25 = vadd.f32 %v8852_v49, %v8851_v47  ;;  %v8761_v49 = vmul.f32 %v8697_v40, %v8697_v40  ;;  %v8862_v16 = vsel %vm90_vm0, %v8760_v52, 0.0  ;;  %v8702_v40 = vsub.f32 %v16381_v27, %v16461_v26 }
 0xbd8   :  { %v8855_v10 = vadd.f32 %v8854_v30, %v8853_v25  ;;  %v8762_v30 = vmul.f32 %v8698_v8, %v8698_v8  ;;  %v8864_v1 = vsel %vm90_vm0, %v8761_v49, 0.0  ;;  %v8703_v8 = vsub.f32 %v16391_v20, %v16461_v26 }
 0xbda   :  { %v8857_v62 = vadd.f32 %v8856_v23, %v8855_v10  ;;  %v8763_v23 = vmul.f32 %v8699_v61, %v8699_v61  ;;  %v8866_v22 = vsel %vm90_vm0, %v8762_v30, 0.0  ;;  %v8704_v61 = vsub.f32 %v16389_v32, %v16461_v26 }
 0xbdb   :  { %v8767_v27 = vmul.f32 %v8703_v8, %v8703_v8 }
 0xbdc   :  { %v8859_v47 = vadd.f32 %v8858_v50, %v8857_v62  ;;  %v8764_v50 = vmul.f32 %v8700_v45, %v8700_v45  ;;  %v8868_v52 = vsel %vm90_vm0, %v8763_v23, 0.0  ;;  %v8768_v20 = vmul.f32 %v8704_v61, %v8704_v61 }
 0xbde   :  { %v8861_v25 = vadd.f32 %v8860_v54, %v8859_v47  ;;  %v8765_v54 = vmul.f32 %v8701_v51, %v8701_v51  ;;  %v8870_v49 = vsel %vm90_vm0, %v8764_v50, 0.0  ;;  %v8876_v50 = vsel %vm90_vm0, %v8767_v27, 0.0 }
 0xbe0   :  { %v8863_v10 = vadd.f32 %v8862_v16, %v8861_v25  ;;  %v8766_v16 = vmul.f32 %v8702_v40, %v8702_v40  ;;  %v8872_v30 = vsel %vm90_vm0, %v8765_v54, 0.0  ;;  %v8878_v54 = vsel %vm90_vm0, %v8768_v20, 0.0 }
 0xbe2   :  { %v8865_v62 = vadd.f32 %v8864_v1, %v8863_v10  ;;  %v18286_v1 = vld [vmem:[#allocation13_spill] sm:$0xff]  ;;  %v8874_v23 = vsel %vm90_vm0, %v8766_v16, 0.0 }
 0xbe3   :  { %v8705_v45 = vsub.f32 %v18286_v1, %v16461_v26 }
 0xbe4   :  { %v8867_v47 = vadd.f32 %v8866_v22, %v8865_v62  ;;  %v18287_v22 = vld [vmem:[#allocation10_spill] sm:$0xff] }
 0xbe5   :  { %v8706_v51 = vsub.f32 %v18287_v22, %v16461_v26  ;;  %v8769_v32 = vmul.f32 %v8705_v45, %v8705_v45 }
 0xbe6   :  { %v8869_v25 = vadd.f32 %v8868_v52, %v8867_v47  ;;  %v18288_v52 = vld [vmem:[#allocation15_spill] sm:$0xff] }
 0xbe7   :  { %v8707_v40 = vsub.f32 %v18288_v52, %v16461_v26  ;;  %v8770_v1 = vmul.f32 %v8706_v51, %v8706_v51  ;;  %v8880_v16 = vsel %vm90_vm0, %v8769_v32, 0.0 }
 0xbe8   :  { %v8871_v10 = vadd.f32 %v8870_v49, %v8869_v25  ;;  %v18289_v49 = vld [vmem:[#allocation12_spill] sm:$0xff] }
 0xbe9   :  { %v8708_v8 = vsub.f32 %v18289_v49, %v16461_v26  ;;  %v8771_v22 = vmul.f32 %v8707_v40, %v8707_v40  ;;  %v8882_v27 = vsel %vm90_vm0, %v8770_v1, 0.0 }
 0xbea   :  { %v8873_v62 = vadd.f32 %v8872_v30, %v8871_v10  ;;  %v18290_v30 = vld [vmem:[#allocation17_spill] sm:$0xff] }
 0xbeb   :  { %v8709_v61 = vsub.f32 %v18290_v30, %v16461_v26  ;;  %v8772_v52 = vmul.f32 %v8708_v8, %v8708_v8  ;;  %v8884_v20 = vsel %vm90_vm0, %v8771_v22, 0.0 }
 0xbec   :  { %v8875_v47 = vadd.f32 %v8874_v23, %v8873_v62  ;;  %v18291_v23 = vld [vmem:[#allocation14_spill] sm:$0xff] }
 0xbed   :  { %v8710_v45 = vsub.f32 %v18291_v23, %v16461_v26  ;;  %v8773_v49 = vmul.f32 %v8709_v61, %v8709_v61  ;;  %v8886_v32 = vsel %vm90_vm0, %v8772_v52, 0.0 }
 0xbee   :  { %v8877_v25 = vadd.f32 %v8876_v50, %v8875_v47  ;;  %v18292_v50 = vld [vmem:[#allocation19_spill] sm:$0xff] }
 0xbef   :  { %v8711_v51 = vsub.f32 %v18292_v50, %v16461_v26  ;;  %v8774_v30 = vmul.f32 %v8710_v45, %v8710_v45  ;;  %v8888_v1 = vsel %vm90_vm0, %v8773_v49, 0.0 }
 0xbf0   :  { %v8879_v10 = vadd.f32 %v8878_v54, %v8877_v25  ;;  %v18293_v54 = vld [vmem:[#allocation16_spill] sm:$0xff] }
 0xbf1   :  { %v8712_v40 = vsub.f32 %v18293_v54, %v16461_v26  ;;  %v8775_v23 = vmul.f32 %v8711_v51, %v8711_v51  ;;  %v8890_v22 = vsel %vm90_vm0, %v8774_v30, 0.0 }
 0xbf2   :  { %v8881_v62 = vadd.f32 %v8880_v16, %v8879_v10  ;;  %v18294_v16 = vld [vmem:[#allocation20_spill] sm:$0xff] }
 0xbf3   :  { %v8713_v8 = vsub.f32 %v18294_v16, %v16461_v26  ;;  %v8776_v50 = vmul.f32 %v8712_v40, %v8712_v40  ;;  %v8892_v52 = vsel %vm90_vm0, %v8775_v23, 0.0 }
 0xbf4   :  { %v8883_v47 = vadd.f32 %v8882_v27, %v8881_v62  ;;  %v18295_v27 = vld [vmem:[#allocation18_spill] sm:$0xff] }
 0xbf5   :  { %v8714_v61 = vsub.f32 %v18295_v27, %v16461_v26  ;;  %v8777_v54 = vmul.f32 %v8713_v8, %v8713_v8  ;;  %v8894_v49 = vsel %vm90_vm0, %v8776_v50, 0.0 }
 0xbf6   :  { %v8885_v25 = vadd.f32 %v8884_v20, %v8883_v47  ;;  %v18296_v20 = vld [vmem:[#allocation22_spill] sm:$0xff] }
 0xbf7   :  { %v8715_v45 = vsub.f32 %v18296_v20, %v16461_v26  ;;  %v8778_v16 = vmul.f32 %v8714_v61, %v8714_v61  ;;  %v8896_v30 = vsel %vm90_vm0, %v8777_v54, 0.0  ;;  %v8719_v61 = vsub.f32 %v16455_v46, %v16461_v26 }
 0xbf8   :  { %v8887_v10 = vadd.f32 %v8886_v32, %v8885_v25  ;;  %v18297_v32 = vld [vmem:[#allocation21_spill] sm:$0xff] }
 0xbf9   :  { %v8716_v51 = vsub.f32 %v18297_v32, %v16461_v26  ;;  %v8779_v27 = vmul.f32 %v8715_v45, %v8715_v45  ;;  %v8898_v23 = vsel %vm90_vm0, %v8778_v16, 0.0  ;;  %v8720_v45 = vsub.f32 %v16453_v33, %v16461_v26 }
 0xbfa   :  { %v8889_v62 = vadd.f32 %v8888_v1, %v8887_v10  ;;  %v18298_v1 = vld [vmem:[#allocation24_spill] sm:$0xff] }
 0xbfb   :  { %v8717_v40 = vsub.f32 %v18298_v1, %v16461_v26  ;;  %v8780_v20 = vmul.f32 %v8716_v51, %v8716_v51  ;;  %v8900_v50 = vsel %vm90_vm0, %v8779_v27, 0.0  ;;  %v8784_v16 = vmul.f32 %v8720_v45, %v8720_v45 }
 0xbfc   :  { %v8891_v47 = vadd.f32 %v8890_v22, %v8889_v62  ;;  %v18299_v22 = vld [vmem:[#allocation23_spill] sm:$0xff] }
 0xbfd   :  { %v8718_v8 = vsub.f32 %v18299_v22, %v16461_v26  ;;  %v8902_v54 = vsel %vm90_vm0, %v8780_v20, 0.0  ;;  %v8910_v27 = vsel %vm90_vm0, %v8784_v16, 0.0 }
 0xbfe   :  { %v8893_v25 = vadd.f32 %v8892_v52, %v8891_v47  ;;  %v8781_v52 = vmul.f32 %v8717_v40, %v8717_v40 }
 0xc00   :  { %v8895_v10 = vadd.f32 %v8894_v49, %v8893_v25  ;;  %v8782_v49 = vmul.f32 %v8718_v8, %v8718_v8  ;;  %v8904_v51 = vsel %vm90_vm0, %v8781_v52, 0.0  ;;  %v8521_v52 = vld [vmem:[%s18026_s5] sm:$0x1] }
 0xc02   :  { %v8897_v62 = vadd.f32 %v8896_v30, %v8895_v10  ;;  %v8783_v30 = vmul.f32 %v8719_v61, %v8719_v61 }
 0xc04   :  { %v8899_v47 = vadd.f32 %v8898_v23, %v8897_v62  ;;  %v8906_v62 = vsel %vm90_vm0, %v8782_v49, 0.0  ;;  %v8908_v40 = vsel %vm90_vm0, %v8783_v30, 0.0  ;;  %v16661_v49 = vld [vmem:[%s18027_s6] sm:$0x1] }
 0xc06   :  { %v8901_v25 = vadd.f32 %v8900_v50, %v8899_v47 }
 0xc08   :  { %v8903_v10 = vadd.f32 %v8902_v54, %v8901_v25 }
 0xc0a   :  { %v8905_v22 = vadd.f32 %v8904_v51, %v8903_v10  ;;  %v18301_v51 = vld [vmem:[#allocation26_spill] sm:$0xff] }
 0xc0c   :  { %v8907_v23 = vadd.f32 %v8906_v62, %v8905_v22  ;;  %v18302_v62 = vld [vmem:[#allocation6_spill] sm:$0xff] }
 0xc0e   :  { %v8909_v46 = vadd.f32 %v8908_v40, %v8907_v23 }
 0xc10   :  { %v8911_v47 = vadd.f32 %v8910_v27, %v8909_v46  ;;  %v18304_v27 = vld [vmem:[#allocation8_spill] sm:$0xff] }
 0xc12   :  { %v8912_v50 = vrot.slane %v8911_v47, 4 }
 0xc14   :  { %v8913_v33 = vadd.f32 %v8912_v50, %v8911_v47  ;;  %v18305_v50 = vld [vmem:[#allocation5_spill] sm:$0xff] }
 0xc16   :  { %v8914_v8 = vrot.slane %v8913_v33, 2 }
 0xc18   :  { %v8915_v1 = vadd.f32 %v8914_v8, %v8913_v33  ;;  %v18300_v33 = vld [vmem:[#allocation27_spill] sm:$0xff] }
 0xc1a   :  { %v8916_v20 = vrot.slane %v8915_v1, 1 }
 0xc1c   :  { %v8917_v25 = vadd.f32 %v8916_v20, %v8915_v1  ;;  %v18319_v1 = vld [vmem:[#allocation14_spill] sm:$0xff] }
 0xc1e   :  { %v8918_v61 = vmul.f32 0.001953125, %v8917_v25 }
 0xc20   :  { %v8919_v54 = vadd.f32 1e-05, %v8918_v61 }
 0xc22   :  { %10381 = vrsqrt.f32 %v8919_v54 }
 0xc2c   :  { %v10382_v22 = vpop.eup %10381 }
 0xc2d   :  { %v8921_v45 = vmul.f32 %v10382_v22, %v8521_v52  ;;  %v18306_v52 = vld [vmem:[#allocation7_spill] sm:$0xff] }
 0xc2e   :  { %v18307_v22 = vld [vmem:[#allocation11_spill] sm:$0xff] }
 0xc2f   :  { %v16664_v46 = vmul.f32 %v8921_v45, %v16461_v26  ;;  %v16667_v10 = vrot.slane %v8921_v45, %v18300_v33  ;;  %v18303_v26 = vld [vmem:[#allocation4_spill] sm:$0xff]  ;;  %v18308_v45 = vld [vmem:[#allocation9_spill] sm:$0xff] }
 0xc31   :  { %v16673_v30 = vmul.f32 %v16667_v10, %v15866_v19  ;;  %v16677_v16 = vmul.f32 %v18301_v51, %v16667_v10  ;;  %v16681_v23 = vmul.f32 %v16667_v10, %v18302_v62  ;;  %v16685_v40 = vmul.f32 %v18303_v26, %v16667_v10  ;;  %v18309_v51 = vld [vmem:[#allocation13_spill] sm:$0xff]  ;;  %v18311_v62 = vld [vmem:[#allocation10_spill] sm:$0xff]  ;;  %v18313_v26 = vld [vmem:[#allocation15_spill] sm:$0xff] }
 0xc32   :  { %v16689_v47 = vmul.f32 %v16667_v10, %v18304_v27  ;;  %v16693_v19 = vmul.f32 %v18305_v50, %v16667_v10  ;;  %v16697_v8 = vmul.f32 %v16667_v10, %v15940_v35  ;;  %v16701_v20 = vmul.f32 %v15937_v3, %v16667_v10  ;;  %v18315_v50 = vld [vmem:[#allocation12_spill] sm:$0xff] }
 0xc33   :  { %v16705_v25 = vmul.f32 %v16667_v10, %v15966_v63  ;;  %v16709_v61 = vmul.f32 %v15963_v55, %v16667_v10  ;;  %v16713_v54 = vmul.f32 %v16667_v10, %v15992_v24  ;;  %v16717_v35 = vmul.f32 %v15989_v38, %v16667_v10 }
 0xc34   :  { %v16721_v3 = vmul.f32 %v16667_v10, %v16017_v39  ;;  %v16725_v63 = vmul.f32 %v16014_v15, %v16667_v10  ;;  %v16729_v55 = vmul.f32 %v16667_v10, %v16043_v43  ;;  %v16733_v24 = vmul.f32 %v16040_v11, %v16667_v10 }
 0xc35   :  { %v16737_v38 = vmul.f32 %v16667_v10, %v16068_v7  ;;  %v16741_v39 = vmul.f32 %v16065_v14, %v16667_v10  ;;  %v16745_v15 = vmul.f32 %v16667_v10, %v16098_v44  ;;  %v16749_v43 = vmul.f32 %v16095_v9, %v16667_v10 }
 0xc36   :  { %v16753_v11 = vmul.f32 %v16667_v10, %v16128_v57  ;;  %v16757_v7 = vmul.f32 %v16125_v21, %v16667_v10  ;;  %v16761_v14 = vmul.f32 %v16667_v10, %v16158_v59  ;;  %v16765_v44 = vmul.f32 %v16155_v18, %v16667_v10 }
 0xc37   :  { %v16769_v9 = vmul.f32 %v16667_v10, %v16188_v58  ;;  %v16773_v57 = vmul.f32 %v16185_v12, %v16667_v10  ;;  %v16777_v21 = vmul.f32 %v16667_v10, %v16218_v13  ;;  %v16781_v59 = vmul.f32 %v16215_v31, %v16667_v10 }
 0xc38   :  { %v16785_v18 = vmul.f32 %v16667_v10, %v16248_v6  ;;  %v16789_v58 = vmul.f32 %v16245_v56, %v16667_v10  ;;  %v16793_v12 = vmul.f32 %v16667_v10, %v16268_v60  ;;  %v16797_v13 = vmul.f32 %v16265_v17, %v16667_v10 }
 0xc39   :  { %v16801_v31 = vmul.f32 %v16667_v10, %v16288_v53  ;;  %v16805_v6 = vmul.f32 %v16285_v0, %v16667_v10  ;;  %v16809_v56 = vmul.f32 %v16667_v10, %v16308_v41  ;;  %v16813_v60 = vmul.f32 %v16305_v2, %v16667_v10 }
 0xc3a   :  { %v16817_v17 = vmul.f32 %v16667_v10, %v16328_v28  ;;  %v16821_v53 = vmul.f32 %v16325_v37, %v16667_v10  ;;  %v16825_v0 = vmul.f32 %v16667_v10, %v16348_v4  ;;  %v16829_v41 = vmul.f32 %v16345_v34, %v16667_v10 }
 0xc3b   :  { %v16833_v2 = vmul.f32 %v16667_v10, %v16365_v36  ;;  %v16837_v28 = vmul.f32 %v16363_v42, %v16667_v10  ;;  %v16841_v37 = vmul.f32 %v16667_v10, %v16375_v29  ;;  %v16845_v4 = vmul.f32 %v16373_v48, %v16667_v10 }
 0xc3c   :  { %v16849_v34 = vmul.f32 %v16667_v10, %v16383_v5  ;;  %v16853_v36 = vmul.f32 %v18306_v52, %v16667_v10  ;;  %v16857_v42 = vmul.f32 %v16667_v10, %v18307_v22  ;;  %v16861_v29 = vmul.f32 %v18308_v45, %v16667_v10  ;;  %v18317_v22 = vld [vmem:[#allocation17_spill] sm:$0xff] }
 0xc3d   :  { %v16865_v48 = vmul.f32 %v16667_v10, %v18309_v51  ;;  %v16869_v5 = vmul.f32 %v18311_v62, %v16667_v10  ;;  %v16873_v27 = vmul.f32 %v16667_v10, %v18313_v26  ;;  %v16877_v52 = vmul.f32 %v18315_v50, %v16667_v10 }
 0xc3e   :  { %v16881_v45 = vmul.f32 %v16667_v10, %v18317_v22  ;;  %v16885_v51 = vmul.f32 %v18319_v1, %v16667_v10 }
 0xc3f   :  { %18310 = vst [vmem:[#allocation21_spill] sm:$0xff] %v16865_v48  ;;  %18312 = vst [vmem:[#allocation27_spill] sm:$0xff] %v16869_v5  ;;  %v18320_v48 = vld [vmem:[#allocation19_spill] sm:$0xff]  ;;  %v18322_v5 = vld [vmem:[#allocation16_spill] sm:$0xff] }
 0xc40   :  { %18314 = vst [vmem:[#allocation26_spill] sm:$0xff] %v16873_v27  ;;  %18316 = vst [vmem:[#allocation6_spill] sm:$0xff] %v16877_v52  ;;  %v16889_v62 = vmul.f32 %v16667_v10, %v18320_v48  ;;  %v16893_v26 = vmul.f32 %v18322_v5, %v16667_v10  ;;  %v18324_v27 = vld [vmem:[#allocation20_spill] sm:$0xff]  ;;  %v18326_v52 = vld [vmem:[#allocation18_spill] sm:$0xff]  ;;  %v16909_v48 = vmul.f32 %v18297_v32, %v16667_v10 }
 0xc41   :  { %18318 = vst [vmem:[#allocation4_spill] sm:$0xff] %v16881_v45  ;;  %v16897_v50 = vmul.f32 %v16667_v10, %v18324_v27  ;;  %v16901_v22 = vmul.f32 %v18326_v52, %v16667_v10  ;;  %v18328_v45 = vld [vmem:[#allocation22_spill] sm:$0xff]  ;;  %v18334_v32 = vsub.f32 %v16661_v49, %v16664_v46 }
 0xc42   :  { %18321 = vst [vmem:[#allocation8_spill] sm:$0xff] %v16889_v62  ;;  %18323 = vst [vmem:[#allocation5_spill] sm:$0xff] %v16893_v26  ;;  %v16905_v1 = vmul.f32 %v16667_v10, %v18328_v45  ;;  %v18330_v62 = vld [vmem:[#allocation24_spill] sm:$0xff]  ;;  %v18331_v26 = vld [vmem:[#allocation23_spill] sm:$0xff] }
 0xc43   :  { %18325 = vst [vmem:[#allocation7_spill] sm:$0xff] %v16897_v50  ;;  %18327 = vst [vmem:[#allocation11_spill] sm:$0xff] %v16901_v22  ;;  %v16913_v5 = vmul.f32 %v16667_v10, %v18330_v62  ;;  %v16917_v27 = vmul.f32 %v18331_v26, %v16667_v10  ;;  %v18332_v50 = vld [vmem:[#allocation28_spill] sm:$0xff]  ;;  %v18333_v22 = vld [vmem:[#allocation25_spill] sm:$0xff] }
 0xc44   :  { %18329 = vst [vmem:[#allocation9_spill] sm:$0xff] %v16909_v48  ;;  %v16921_v52 = vmul.f32 %v16667_v10, %v18332_v50  ;;  %v16925_v45 = vmul.f32 %v18333_v22, %v16667_v10  ;;  %v16931_v48 = vrot.slane %v18334_v32, %v18300_v33 }
 0xc46   :  { %v16935_v62 = vadd.f32 %v16931_v48, %v16673_v30  ;;  %v16939_v26 = vadd.f32 %v16931_v48, %v16677_v16  ;;  %v16943_v50 = vadd.f32 %v16931_v48, %v16681_v23  ;;  %v16947_v10 = vadd.f32 %v16931_v48, %v16685_v40 }
 0xc47   :  { %v16951_v49 = vadd.f32 %v16931_v48, %v16689_v47  ;;  %v16955_v46 = vadd.f32 %v16931_v48, %v16693_v19  ;;  %v16959_v33 = vadd.f32 %v16931_v48, %v16697_v8  ;;  %v16963_v30 = vadd.f32 %v16931_v48, %v16701_v20  ;;  %v18356_v22 = vld [vmem:[#allocation26_spill] sm:$0xff] }
 0xc48   :  { %v16967_v16 = vadd.f32 %v16931_v48, %v16705_v25  ;;  %v16971_v23 = vadd.f32 %v16931_v48, %v16709_v61  ;;  %v16975_v40 = vadd.f32 %v16931_v48, %v16713_v54  ;;  %v16979_v47 = vadd.f32 %v16931_v48, %v16717_v35  ;;  %v18358_v32 = vld [vmem:[#allocation6_spill] sm:$0xff] }
 0xc49   :  { %v16983_v19 = vadd.f32 %v16931_v48, %v16721_v3  ;;  %v16987_v8 = vadd.f32 %v16931_v48, %v16725_v63  ;;  %v16991_v20 = vadd.f32 %v16931_v48, %v16729_v55  ;;  %v16995_v25 = vadd.f32 %v16931_v48, %v16733_v24 }
 0xc4a   :  { %v16999_v61 = vadd.f32 %v16931_v48, %v16737_v38  ;;  %v17003_v54 = vadd.f32 %v16931_v48, %v16741_v39  ;;  %v17007_v35 = vadd.f32 %v16931_v48, %v16745_v15  ;;  %v17011_v3 = vadd.f32 %v16931_v48, %v16749_v43 }
 0xc4b   :  { %v17015_v63 = vadd.f32 %v16931_v48, %v16753_v11  ;;  %v17019_v55 = vadd.f32 %v16931_v48, %v16757_v7  ;;  %v17023_v24 = vadd.f32 %v16931_v48, %v16761_v14  ;;  %v17027_v38 = vadd.f32 %v16931_v48, %v16765_v44 }
 0xc4c   :  { %v17031_v39 = vadd.f32 %v16931_v48, %v16769_v9  ;;  %v17035_v15 = vadd.f32 %v16931_v48, %v16773_v57  ;;  %v17039_v43 = vadd.f32 %v16931_v48, %v16777_v21  ;;  %v17043_v11 = vadd.f32 %v16931_v48, %v16781_v59 }
 0xc4d   :  { %v17047_v7 = vadd.f32 %v16931_v48, %v16785_v18  ;;  %v17051_v14 = vadd.f32 %v16931_v48, %v16789_v58  ;;  %v17055_v44 = vadd.f32 %v16931_v48, %v16793_v12  ;;  %v17059_v9 = vadd.f32 %v16931_v48, %v16797_v13 }
 0xc4e   :  { %v17063_v57 = vadd.f32 %v16931_v48, %v16801_v31  ;;  %v17067_v21 = vadd.f32 %v16931_v48, %v16805_v6  ;;  %v17071_v59 = vadd.f32 %v16931_v48, %v16809_v56  ;;  %v17075_v18 = vadd.f32 %v16931_v48, %v16813_v60 }
 0xc4f   :  { %18335 = vst [vmem:[#allocation13_spill] sm:$0xff] %v17059_v9  ;;  %v17079_v58 = vadd.f32 %v16931_v48, %v16817_v17  ;;  %v17083_v12 = vadd.f32 %v16931_v48, %v16821_v53  ;;  %v17087_v13 = vadd.f32 %v16931_v48, %v16825_v0  ;;  %v17091_v31 = vadd.f32 %v16931_v48, %v16829_v41  ;;  %v9924_v9 = vld [vmem:[%s18021_s0 + $0x139] sm:$0xff] }
 0xc50   :  { %18336 = vst [vmem:[#allocation10_spill] sm:$0xff] %v17063_v57  ;;  %18337 = vst [vmem:[#allocation15_spill] sm:$0xff] %v17067_v21  ;;  %v17095_v6 = vadd.f32 %v16931_v48, %v16833_v2  ;;  %v17099_v56 = vadd.f32 %v16931_v48, %v16837_v28  ;;  %v17103_v60 = vadd.f32 %v16931_v48, %v16841_v37  ;;  %v18352_v28 = vld [vmem:[#allocation21_spill] sm:$0xff]  ;;  %v18392_v21 = vmax.f32 %v16947_v10, 0.0 }
 0xc51   :  { %18338 = vst [vmem:[#allocation12_spill] sm:$0xff] %v17071_v59  ;;  %18339 = vst [vmem:[#allocation17_spill] sm:$0xff] %v17075_v18  ;;  %v17107_v17 = vadd.f32 %v16931_v48, %v16845_v4  ;;  %v17111_v53 = vadd.f32 %v16931_v48, %v16849_v34  ;;  %v17115_v0 = vadd.f32 %v16931_v48, %v16853_v36  ;;  %v18354_v4 = vld [vmem:[#allocation27_spill] sm:$0xff]  ;;  %v18391_v18 = vmax.f32 %v16943_v50, 0.0 }
 0xc52   :  { %18340 = vst [vmem:[#allocation14_spill] sm:$0xff] %v17079_v58  ;;  %18341 = vst [vmem:[#allocation19_spill] sm:$0xff] %v17083_v12  ;;  %v17119_v41 = vadd.f32 %v16931_v48, %v16857_v42  ;;  %v17123_v2 = vadd.f32 %v16931_v48, %v16861_v29  ;;  %v17127_v37 = vadd.f32 %v16931_v48, %v18352_v28  ;;  %v9918_v12 = vld [vmem:[%s18021_s0 + $0xf1] sm:$0xff]  ;;  %v9927_v50 = vld [vmem:[%s18021_s0 + $0x159] sm:$0xff]  ;;  %v18393_v10 = vmax.f32 %v16951_v49, 0.0 }
 0xc53   :  { %18342 = vst [vmem:[#allocation16_spill] sm:$0xff] %v17087_v13  ;;  %18343 = vst [vmem:[#allocation20_spill] sm:$0xff] %v17091_v31  ;;  %v17131_v34 = vadd.f32 %v16931_v48, %v18354_v4  ;;  %v17135_v36 = vadd.f32 %v16931_v48, %v18356_v22  ;;  %v17139_v42 = vadd.f32 %v16931_v48, %v18358_v32  ;;  %v9916_v31 = vld [vmem:[%s18021_s0 + $0xd9] sm:$0xff]  ;;  %v9917_v13 = vld [vmem:[%s18021_s0 + $0xe1] sm:$0xff] }
 0xc54   :  { %18344 = vst [vmem:[#allocation18_spill] sm:$0xff] %v17095_v6  ;;  %18345 = vst [vmem:[#allocation22_spill] sm:$0xff] %v17099_v56  ;;  %v17147_v28 = vadd.f32 %v16931_v48, %v16885_v51  ;;  %v17167_v51 = vadd.f32 %v16931_v48, %v16905_v1  ;;  %v17187_v1 = vadd.f32 %v16931_v48, %v16925_v45  ;;  %v9913_v56 = vld [vmem:[%s18021_s0 + $0xb1] sm:$0xff]  ;;  %v9914_v6 = vld [vmem:[%s18021_s0 + $0xc1] sm:$0xff] }
 0xc55   :  { %18346 = vst [vmem:[#allocation24_spill] sm:$0xff] %v17103_v60  ;;  %18347 = vst [vmem:[#allocation23_spill] sm:$0xff] %v17107_v17  ;;  %v9906_v17 = vld [vmem:[%s18021_s0 + $0x61] sm:$0xff]  ;;  %v9910_v60 = vld [vmem:[%s18021_s0 + $0x91] sm:$0xff] }
 0xc56   :  { %18348 = vst [vmem:[#allocation28_spill] sm:$0xff] %v17111_v53  ;;  %18349 = vst [vmem:[#allocation25_spill] sm:$0xff] %v17115_v0  ;;  %v9904_v0 = vld [vmem:[%s18021_s0 + $0x49] sm:$0xff]  ;;  %v9905_v53 = vld [vmem:[%s18021_s0 + $0x51] sm:$0xff] }
 0xc57   :  { %18350 = vst [vmem:[#allocation29_spill] sm:$0xff] %v17119_v41  ;;  %18351 = vst [vmem:[#allocation30_spill] sm:$0xff] %v17123_v2  ;;  %v18360_v41 = vld [vmem:[#allocation4_spill] sm:$0xff]  ;;  %v9915_v45 = vld [vmem:[%s18021_s0 + $0xc9] sm:$0xff]  ;;  %v18390_v2 = vmax.f32 %v16939_v26, 0.0 }
 0xc58   :  { %18353 = vst [vmem:[#allocation21_spill] sm:$0xff] %v17127_v37  ;;  %18355 = vst [vmem:[#allocation27_spill] sm:$0xff] %v17131_v34  ;;  %v17143_v29 = vadd.f32 %v16931_v48, %v18360_v41  ;;  %v18363_v37 = vld [vmem:[#allocation8_spill] sm:$0xff]  ;;  %v18365_v34 = vld [vmem:[#allocation5_spill] sm:$0xff] }
 0xc59   :  { %18357 = vst [vmem:[#allocation26_spill] sm:$0xff] %v17135_v36  ;;  %18359 = vst [vmem:[#allocation6_spill] sm:$0xff] %v17139_v42  ;;  %v17151_v4 = vadd.f32 %v16931_v48, %v18363_v37  ;;  %v17155_v22 = vadd.f32 %v16931_v48, %v18365_v34  ;;  %v18367_v36 = vld [vmem:[#allocation7_spill] sm:$0xff]  ;;  %v17175_v34 = vadd.f32 %v16931_v48, %v16913_v5 }
 0xc5a   :  { %18361 = vst [vmem:[#allocation4_spill] sm:$0xff] %v17143_v29  ;;  %18362 = vst [vmem:[#allocation31_spill] sm:$0xff] %v17147_v28  ;;  %v17159_v32 = vadd.f32 %v16931_v48, %v18367_v36  ;;  %v18369_v42 = vld [vmem:[#allocation11_spill] sm:$0xff]  ;;  %v18372_v28 = vld [vmem:[#allocation9_spill] sm:$0xff]  ;;  %v17179_v36 = vadd.f32 %v16931_v48, %v16917_v27 }
 0xc5b   :  { %18364 = vst [vmem:[#allocation8_spill] sm:$0xff] %v17151_v4  ;;  %18366 = vst [vmem:[#allocation5_spill] sm:$0xff] %v17155_v22  ;;  %v17163_v41 = vadd.f32 %v16931_v48, %v18369_v42  ;;  %v17171_v37 = vadd.f32 %v16931_v48, %v18372_v28  ;;  %v17183_v42 = vadd.f32 %v16931_v48, %v16921_v52  ;;  %v9900_v48 = vld [vmem:[%s18021_s0 + $0x19] sm:$0xff]  ;;  %v9901_v28 = vld [vmem:[%s18021_s0 + $0x21] sm:$0xff]  ;;  %v18389_v4 = vmax.f32 %v16935_v62, 0.0 }
 0xc5c   :  { %18368 = vst [vmem:[#allocation7_spill] sm:$0xff] %v17159_v32  ;;  %18371 = vst [vmem:[#allocation32_spill] sm:$0xff] %v17167_v51  ;;  %v9902_v5 = vld [vmem:[%s18021_s0 + $0x31] sm:$0xff]  ;;  %v9903_v27 = vld [vmem:[%s18021_s0 + $0x39] sm:$0xff]  ;;  %v17331_v58 = vadd.f32 %v9901_v28, %v18390_v2 }
 0xc5d   :  { %18370 = vst [vmem:[#allocation11_spill] sm:$0xff] %v17163_v41  ;;  %18373 = vst [vmem:[#allocation9_spill] sm:$0xff] %v17171_v37  ;;  %v9907_v52 = vld [vmem:[%s18021_s0 + $0x69] sm:$0xff]  ;;  %v9908_v37 = vld [vmem:[%s18021_s0 + $0x79] sm:$0xff]  ;;  %v17335_v59 = vadd.f32 %v9902_v5, %v18391_v18  ;;  %v17339_v57 = vadd.f32 %v9903_v27, %v18392_v21  ;;  %v17355_v21 = vadd.f32 %v9904_v0, %v18393_v10  ;;  %v18394_v18 = vmax.f32 %v16955_v46, 0.0 }
 0xc5e   :  { %18374 = vst [vmem:[#allocation33_spill] sm:$0xff] %v17175_v34  ;;  %18375 = vst [vmem:[#allocation34_spill] sm:$0xff] %v17179_v36  ;;  %v9909_v34 = vld [vmem:[%s18021_s0 + $0x81] sm:$0xff]  ;;  %v9911_v51 = vld [vmem:[%s18021_s0 + $0x99] sm:$0xff]  ;;  %v18396_v5 = vmax.f32 %v16963_v30, 0.0  ;;  %v18397_v30 = vmax.f32 %v16967_v16, 0.0 }
 0xc5f   :  { %18376 = vst [vmem:[#allocation35_spill] sm:$0xff] %v17183_v42  ;;  %18377 = vst [vmem:[#allocation36_spill] sm:$0xff] %v17187_v1  ;;  %v9912_v29 = vld [vmem:[%s18021_s0 + $0xa9] sm:$0xff]  ;;  %v9919_v36 = vld [vmem:[%s18021_s0 + $0xf9] sm:$0xff]  ;;  %v17327_v42 = vadd.f32 %v9900_v48, %v18389_v4  ;;  %v17359_v2 = vadd.f32 %v9905_v53, %v18394_v18  ;;  %v18395_v4 = vmax.f32 %v16959_v33, 0.0  ;;  %v18398_v53 = vmax.f32 %v16971_v23, 0.0 }
 0xc60   :  { %v9920_v32 = vld [vmem:[%s18021_s0 + $0x109] sm:$0xff]  ;;  %v9921_v41 = vld [vmem:[%s18021_s0 + $0x111] sm:$0xff]  ;;  %v9922_v22 = vld [vmem:[%s18021_s0 + $0x121] sm:$0xff]  ;;  %v17367_v27 = vadd.f32 %v9907_v52, %v18396_v5  ;;  %v18399_v52 = vmax.f32 %v16975_v40, 0.0  ;;  %v18400_v18 = vmax.f32 %v16979_v47, 0.0  ;;  %v18401_v47 = vmax.f32 %v16983_v19, 0.0 }
 0xc61   :  { %v9923_v1 = vld [vmem:[%s18021_s0 + $0x129] sm:$0xff]  ;;  %v9925_v62 = vld [vmem:[%s18021_s0 + $0x141] sm:$0xff]  ;;  %v9926_v26 = vld [vmem:[%s18021_s0 + $0x151] sm:$0xff]  ;;  %v17363_v28 = vadd.f32 %v9906_v17, %v18395_v4  ;;  %v17383_v17 = vadd.f32 %v9908_v37, %v18397_v30  ;;  %v17387_v0 = vadd.f32 %v9909_v34, %v18398_v53  ;;  %v18403_v34 = vmax.f32 %v16991_v20, 0.0 }
 0xc62   :  { %v9928_v48 = vld [vmem:[%s18021_s0 + $0x169] sm:$0xff]  ;;  %v9929_v49 = vld [vmem:[%s18021_s0 + $0x171] sm:$0xff]  ;;  %v9930_v46 = vld [vmem:[%s18021_s0 + $0x181] sm:$0xff]  ;;  %v17391_v10 = vadd.f32 %v9910_v60, %v18399_v52  ;;  %v17395_v4 = vadd.f32 %v9911_v51, %v18400_v18  ;;  %v17411_v60 = vadd.f32 %v9912_v29, %v18401_v47  ;;  %v18402_v51 = vmax.f32 %v16987_v8, 0.0 }
 0xc63   :  { %v9931_v33 = vld [vmem:[%s18021_s0 + $0x189] sm:$0xff]  ;;  %v9933_v16 = vld [vmem:[%s18021_s0 + $0x1d1] sm:$0xff]  ;;  %v9934_v23 = vld [vmem:[%s18021_s0 + $0x1e1] sm:$0xff]  ;;  %v17419_v30 = vadd.f32 %v9914_v6, %v18403_v34  ;;  %v18404_v53 = vmax.f32 %v16995_v25, 0.0  ;;  %v18405_v25 = vmax.f32 %v16999_v61, 0.0 }
 0xc64   :  { %v9932_v5 = vld [vmem:[%s18021_s0 + $0x1c9] sm:$0xff]  ;;  %v17415_v37 = vadd.f32 %v9913_v56, %v18402_v51  ;;  %v9936_v18 = vld [vmem:[%s18021_s0 + $0x1f9] sm:$0xff]  ;;  %v9937_v19 = vld [vmem:[%s18021_s0 + $0x201] sm:$0xff]  ;;  %v18406_v56 = vmax.f32 %v17003_v54, 0.0  ;;  %v18408_v51 = vmax.f32 %v17011_v3, 0.0  ;;  %v18410_v3 = vmax.f32 %v17019_v55, 0.0 }
 0xc65   :  { %v9935_v40 = vld [vmem:[%s18021_s0 + $0x1e9] sm:$0xff]  ;;  %v17423_v52 = vadd.f32 %v9915_v45, %v18404_v53  ;;  %v9938_v8 = vld [vmem:[%s18021_s0 + $0x211] sm:$0xff]  ;;  %v9939_v20 = vld [vmem:[%s18021_s0 + $0x219] sm:$0xff]  ;;  %v17439_v6 = vadd.f32 %v9916_v31, %v18405_v25  ;;  %v18407_v45 = vmax.f32 %v17007_v35, 0.0  ;;  %v18409_v35 = vmax.f32 %v17015_v63, 0.0 }
 0xc66   :  { %v17443_v29 = vadd.f32 %v9917_v13, %v18406_v56  ;;  %v17451_v34 = vadd.f32 %v9919_v36, %v18408_v51  ;;  %v9940_v53 = vld [vmem:[%s18021_s0 + $0x229] sm:$0xff]  ;;  %v9941_v61 = vld [vmem:[%s18021_s0 + $0x231] sm:$0xff]  ;;  %v9942_v54 = vld [vmem:[%s18021_s0 + $0x241] sm:$0xff]  ;;  %v17468_v13 = vadd.f32 %v9921_v41, %v18410_v3  ;;  %v18411_v31 = vmax.f32 %v17023_v24, 0.0 }
 0xc67   :  { %v17447_v47 = vadd.f32 %v9918_v12, %v18407_v45  ;;  %v17464_v12 = vadd.f32 %v9920_v32, %v18409_v35  ;;  %v18412_v25 = vmax.f32 %v17027_v38, 0.0  ;;  %v9943_v45 = vld [vmem:[%s18021_s0 + $0x249] sm:$0xff]  ;;  %v9944_v63 = vld [vmem:[%s18021_s0 + $0x259] sm:$0xff]  ;;  %v9945_v55 = vld [vmem:[%s18021_s0 + $0x261] sm:$0xff]  ;;  %v18413_v24 = vmax.f32 %v17031_v39, 0.0 }
 0xc68   :  { %v17472_v36 = vadd.f32 %v9922_v22, %v18411_v31  ;;  %v18414_v38 = vmax.f32 %v17035_v15, 0.0  ;;  %v18415_v41 = vmax.f32 %v17039_v43, 0.0  ;;  %v18416_v51 = vmax.f32 %v17043_v11, 0.0  ;;  %v9946_v3 = vld [vmem:[%s18021_s0 + $0x271] sm:$0xff]  ;;  %v9947_v39 = vld [vmem:[%s18021_s0 + $0x279] sm:$0xff]  ;;  %v9948_v15 = vld [vmem:[%s18021_s0 + $0x289] sm:$0xff] }
 0xc69   :  { %v17476_v56 = vadd.f32 %v9923_v1, %v18412_v25  ;;  %v17489_v22 = vadd.f32 %v9924_v9, %v18413_v24  ;;  %v18417_v43 = vmax.f32 %v17047_v7, 0.0  ;;  %v18418_v11 = vmax.f32 %v17051_v14, 0.0  ;;  %v18420_v31 = vld [vmem:[#allocation13_spill] sm:$0xff] }
 0xc6a   :  { %v17493_v32 = vadd.f32 %v9925_v62, %v18414_v38  ;;  %v17497_v1 = vadd.f32 %v9926_v26, %v18415_v41  ;;  %v17501_v35 = vadd.f32 %v9927_v50, %v18416_v51  ;;  %v18419_v26 = vmax.f32 %v17055_v44, 0.0  ;;  %v9949_v38 = vld [vmem:[%s18021_s0 + $0x291] sm:$0xff]  ;;  %v9950_v7 = vld [vmem:[%s18021_s0 + $0x2a1] sm:$0xff]  ;;  %v9951_v14 = vld [vmem:[%s18021_s0 + $0x2a9] sm:$0xff] }
 0xc6b   :  { %v17514_v9 = vadd.f32 %v9928_v48, %v18417_v43  ;;  %v17518_v62 = vadd.f32 %v9929_v49, %v18418_v11  ;;  %v18421_v25 = vmax.f32 %v18420_v31, 0.0  ;;  %v18423_v48 = vld [vmem:[#allocation10_spill] sm:$0xff]  ;;  %v18428_v51 = vld [vmem:[#allocation12_spill] sm:$0xff] }
 0xc6c   :  { %v17522_v50 = vadd.f32 %v9930_v46, %v18419_v26  ;;  %v18424_v44 = vmax.f32 %v18423_v48, 0.0  ;;  %v18425_v46 = vld [vmem:[#allocation15_spill] sm:$0xff]  ;;  %v18429_v43 = vmax.f32 %v18428_v51, 0.0  ;;  %v18431_v26 = vld [vmem:[#allocation17_spill] sm:$0xff]  ;;  %v18434_v48 = vld [vmem:[#allocation14_spill] sm:$0xff] }
 0xc6d   :  { %v17526_v24 = vadd.f32 %v9931_v33, %v18421_v25  ;;  %v18426_v41 = vmax.f32 %v18425_v46, 0.0  ;;  %v18432_v31 = vmax.f32 %v18431_v26, 0.0  ;;  %v18437_v46 = vld [vmem:[#allocation19_spill] sm:$0xff]  ;;  %v18440_v51 = vld [vmem:[#allocation16_spill] sm:$0xff] }
 0xc6e   :  { %v17539_v49 = vadd.f32 %v9932_v5, %v18424_v44  ;;  %v17547_v11 = vadd.f32 %v9934_v23, %v18429_v43  ;;  %v9953_v5 = vld [vmem:[%s18021_s0 + $0x2c1] sm:$0xff]  ;;  %v18435_v44 = vmax.f32 %v18434_v48, 0.0  ;;  %v18441_v43 = vmax.f32 %v18440_v51, 0.0  ;;  %v18446_v48 = vld [vmem:[#allocation18_spill] sm:$0xff] }
 0xc6f   :  { %18422 = vst [vmem:[#allocation13_spill] sm:$0xff] %v17526_v24  ;;  %v17543_v33 = vadd.f32 %v9933_v16, %v18426_v41  ;;  %v17551_v25 = vadd.f32 %v9935_v40, %v18432_v31  ;;  %v9952_v24 = vld [vmem:[%s18021_s0 + $0x2b9] sm:$0xff]  ;;  %v9954_v16 = vld [vmem:[%s18021_s0 + $0x2d1] sm:$0xff]  ;;  %v18438_v41 = vmax.f32 %v18437_v46, 0.0 }
 0xc70   :  { %18430 = vst [vmem:[#allocation15_spill] sm:$0xff] %v17547_v11  ;;  %v17564_v23 = vadd.f32 %v9936_v18, %v18435_v44  ;;  %v17572_v26 = vadd.f32 %v9938_v8, %v18441_v43  ;;  %v18443_v31 = vld [vmem:[#allocation20_spill] sm:$0xff]  ;;  %v9956_v18 = vld [vmem:[%s18021_s0 + $0x2e9] sm:$0xff]  ;;  %v18447_v44 = vmax.f32 %v18446_v48, 0.0 }
 0xc71   :  { %18427 = vst [vmem:[#allocation10_spill] sm:$0xff] %v17543_v33  ;;  %18433 = vst [vmem:[#allocation12_spill] sm:$0xff] %v17551_v25  ;;  %v17568_v40 = vadd.f32 %v9937_v19, %v18438_v41  ;;  %v18444_v25 = vmax.f32 %v18443_v31, 0.0  ;;  %v9955_v33 = vld [vmem:[%s18021_s0 + $0x2d9] sm:$0xff]  ;;  %v9957_v19 = vld [vmem:[%s18021_s0 + $0x2f1] sm:$0xff] }
 0xc72   :  { %18436 = vst [vmem:[#allocation17_spill] sm:$0xff] %v17564_v23  ;;  %18442 = vst [vmem:[#allocation19_spill] sm:$0xff] %v17572_v26  ;;  %v17589_v8 = vadd.f32 %v9940_v53, %v18447_v44  ;;  %v18449_v46 = vld [vmem:[#allocation22_spill] sm:$0xff]  ;;  %v18455_v31 = vld [vmem:[#allocation23_spill] sm:$0xff] }
 0xc73   :  { %18439 = vst [vmem:[#allocation14_spill] sm:$0xff] %v17568_v40  ;;  %v17576_v11 = vadd.f32 %v9939_v20, %v18444_v25  ;;  %v18450_v41 = vmax.f32 %v18449_v46, 0.0  ;;  %v18452_v25 = vld [vmem:[#allocation24_spill] sm:$0xff]  ;;  %v9959_v53 = vld [vmem:[%s18021_s0 + $0x309] sm:$0xff]  ;;  %v18480_v23 = vld [vmem:[#allocation31_spill] sm:$0xff] }
 0xc74   :  { %18448 = vst [vmem:[#allocation20_spill] sm:$0xff] %v17589_v8  ;;  %v18453_v51 = vmax.f32 %v18452_v25, 0.0  ;;  %v9958_v40 = vld [vmem:[%s18021_s0 + $0x301] sm:$0xff] }
 0xc75   :  { %18445 = vst [vmem:[#allocation16_spill] sm:$0xff] %v17576_v11  ;;  %v17593_v20 = vadd.f32 %v9941_v61, %v18450_v41  ;;  %v18456_v11 = vmax.f32 %v18455_v31, 0.0  ;;  %v9960_v61 = vld [vmem:[%s18021_s0 + $0x319] sm:$0xff]  ;;  %v18461_v46 = vld [vmem:[#allocation25_spill] sm:$0xff]  ;;  %v18467_v31 = vld [vmem:[#allocation30_spill] sm:$0xff] }
 0xc76   :  { %v17597_v43 = vadd.f32 %v9942_v54, %v18453_v51  ;;  %v18458_v48 = vld [vmem:[#allocation28_spill] sm:$0xff]  ;;  %v18462_v41 = vmax.f32 %v18461_v46, 0.0  ;;  %v18472_v46 = vld [vmem:[#allocation27_spill] sm:$0xff] }
 0xc77   :  { %18451 = vst [vmem:[#allocation18_spill] sm:$0xff] %v17593_v20  ;;  %v17601_v26 = vadd.f32 %v9943_v45, %v18456_v11  ;;  %v18459_v44 = vmax.f32 %v18458_v48, 0.0  ;;  %v18464_v11 = vld [vmem:[#allocation29_spill] sm:$0xff] }
 0xc78   :  { %18454 = vst [vmem:[#allocation22_spill] sm:$0xff] %v17597_v43  ;;  %v17618_v45 = vadd.f32 %v9945_v55, %v18462_v41  ;;  %v18465_v25 = vmax.f32 %v18464_v11, 0.0  ;;  %v9961_v20 = vld [vmem:[%s18021_s0 + $0x321] sm:$0xff]  ;;  %v9963_v55 = vld [vmem:[%s18021_s0 + $0x339] sm:$0xff]  ;;  %v18473_v41 = vmax.f32 %v18472_v46, 0.0 }
 0xc79   :  { %18457 = vst [vmem:[#allocation24_spill] sm:$0xff] %v17601_v26  ;;  %v17614_v54 = vadd.f32 %v9944_v63, %v18459_v44  ;;  %v18468_v26 = vmax.f32 %v18467_v31, 0.0  ;;  %v9962_v63 = vld [vmem:[%s18021_s0 + $0x331] sm:$0xff]  ;;  %v18470_v48 = vld [vmem:[#allocation21_spill] sm:$0xff] }
 0xc7a   :  { %18463 = vst [vmem:[#allocation28_spill] sm:$0xff] %v17618_v45  ;;  %v17622_v51 = vadd.f32 %v9946_v3, %v18465_v25  ;;  %v18471_v44 = vmax.f32 %v18470_v48, 0.0  ;;  %v18476_v31 = vld [vmem:[#allocation6_spill] sm:$0xff]  ;;  %v18478_v45 = vld [vmem:[#allocation4_spill] sm:$0xff]  ;;  %v18481_v48 = vmax.f32 %v18480_v23, 0.0 }
 0xc7b   :  { %18460 = vst [vmem:[#allocation23_spill] sm:$0xff] %v17614_v54  ;;  %v17626_v43 = vadd.f32 %v9947_v39, %v18468_v26  ;;  %v17643_v39 = vadd.f32 %v9949_v38, %v18473_v41  ;;  %v18474_v26 = vld [vmem:[#allocation26_spill] sm:$0xff]  ;;  %v18479_v54 = vmax.f32 %v18478_v45, 0.0  ;;  %v18484_v41 = vld [vmem:[#allocation5_spill] sm:$0xff] }
 0xc7c   :  { %18466 = vst [vmem:[#allocation25_spill] sm:$0xff] %v17622_v51  ;;  %v17639_v3 = vadd.f32 %v9948_v15, %v18471_v44  ;;  %v18475_v11 = vmax.f32 %v18474_v26, 0.0  ;;  %v17659_v15 = vadd.f32 %v9953_v5, %v18481_v48  ;;  %v18482_v44 = vld [vmem:[#allocation8_spill] sm:$0xff]  ;;  %v18485_v26 = vmax.f32 %v18484_v41, 0.0  ;;  %v18492_v48 = vld [vmem:[#allocation9_spill] sm:$0xff] }
 0xc7d   :  { %18469 = vst [vmem:[#allocation29_spill] sm:$0xff] %v17626_v43  ;;  %v18477_v43 = vmax.f32 %v18476_v31, 0.0  ;;  %v17655_v8 = vadd.f32 %v9952_v24, %v18479_v54  ;;  %v18483_v46 = vmax.f32 %v18482_v44, 0.0  ;;  %v18490_v54 = vld [vmem:[#allocation32_spill] sm:$0xff]  ;;  %v18493_v44 = vmax.f32 %v18492_v48, 0.0 }
 0xc7e   :  { %v17647_v25 = vadd.f32 %v9950_v7, %v18475_v11  ;;  %v17667_v7 = vadd.f32 %v9955_v33, %v18485_v26  ;;  %v18486_v11 = vld [vmem:[#allocation7_spill] sm:$0xff]  ;;  %v18491_v23 = vmax.f32 %v18490_v54, 0.0  ;;  %v18496_v26 = vld [vmem:[#allocation34_spill] sm:$0xff]  ;;  %v9258_v48 = vmax.f32 %v17335_v59, 0.0 }
 0xc7f   :  { %v17651_v51 = vadd.f32 %v9951_v14, %v18477_v43  ;;  %v17663_v38 = vadd.f32 %v9954_v16, %v18483_v46  ;;  %v18487_v31 = vmax.f32 %v18486_v11, 0.0  ;;  %v18488_v43 = vld [vmem:[#allocation11_spill] sm:$0xff]  ;;  %v17683_v16 = vadd.f32 %v9959_v53, %v18493_v44  ;;  %v18494_v46 = vld [vmem:[#allocation33_spill] sm:$0xff] }
 0xc80   :  { %v18489_v45 = vmax.f32 %v18488_v43, 0.0  ;;  %v17679_v5 = vadd.f32 %v9958_v40, %v18491_v23  ;;  %v18495_v41 = vmax.f32 %v18494_v46, 0.0  ;;  %v18497_v11 = vmax.f32 %v18496_v26, 0.0  ;;  %9322 = vst.msk [vmem:[%s18028_s7 + $0x10] sm:$0xff] %vm90_vm0, %v9258_v48  ;;  %v18507_v26 = vld [vmem:[#allocation14_spill] sm:$0xff] }
 0xc81   :  { %v17671_v14 = vadd.f32 %v9956_v18, %v18487_v31  ;;  %v18498_v31 = vld [vmem:[#allocation35_spill] sm:$0xff]  ;;  %v9256_v23 = vmax.f32 %v17327_v42, 0.0  ;;  %v9257_v53 = vmax.f32 %v17331_v58, 0.0  ;;  %v9260_v44 = vmax.f32 %v17355_v21, 0.0  ;;  %v18511_v48 = vld [vmem:[#allocation18_spill] sm:$0xff] }
 0xc82   :  { %v17675_v24 = vadd.f32 %v9957_v19, %v18489_v45  ;;  %v17687_v33 = vadd.f32 %v9960_v61, %v18495_v41  ;;  %v17691_v18 = vadd.f32 %v9961_v20, %v18497_v11  ;;  %v18499_v43 = vmax.f32 %v18498_v31, 0.0  ;;  %v18500_v45 = vld [vmem:[#allocation36_spill] sm:$0xff]  ;;  %v18508_v31 = vld [vmem:[#allocation19_spill] sm:$0xff] }
 0xc83   :  { %v18501_v54 = vmax.f32 %v18500_v45, 0.0  ;;  %v9259_v61 = vmax.f32 %v17339_v57, 0.0  ;;  %v9261_v20 = vmax.f32 %v17359_v2, 0.0  ;;  %v9262_v46 = vmax.f32 %v17363_v28, 0.0  ;;  %9320 = vst.msk [vmem:[%s18028_s7] sm:$0xff] %vm90_vm0, %v9256_v23  ;;  %9321 = vst.msk [vmem:[%s18028_s7 + $0x8] sm:$0xff] %vm90_vm0, %v9257_v53 }
 0xc84   :  { %v17695_v19 = vadd.f32 %v9962_v63, %v18499_v43  ;;  %v9263_v63 = vmax.f32 %v17367_v27, 0.0  ;;  %v9264_v41 = vmax.f32 %v17383_v17, 0.0  ;;  %v9266_v42 = vmax.f32 %v17391_v10, 0.0  ;;  %9324 = vst.msk [vmem:[%s18028_s7 + $0x20] sm:$0xff] %vm90_vm0, %v9260_v44  ;;  %v18509_v45 = vld [vmem:[#allocation16_spill] sm:$0xff]  ;;  %v18512_v44 = vld [vmem:[#allocation22_spill] sm:$0xff] }
 0xc85   :  { %v17699_v40 = vadd.f32 %v9963_v55, %v18501_v54  ;;  %v9265_v55 = vmax.f32 %v17387_v0, 0.0  ;;  %v9267_v58 = vmax.f32 %v17395_v4, 0.0  ;;  %9323 = vst.msk [vmem:[%s18028_s7 + $0x18] sm:$0xff] %vm90_vm0, %v9259_v61  ;;  %v9268_v57 = vmax.f32 %v17411_v60, 0.0  ;;  %9325 = vst.msk [vmem:[%s18028_s7 + $0x28] sm:$0xff] %vm90_vm0, %v9261_v20  ;;  %v18510_v23 = vld [vmem:[#allocation20_spill] sm:$0xff] }
 0xc86   :  { %v9269_v59 = vmax.f32 %v17415_v37, 0.0  ;;  %v9270_v21 = vmax.f32 %v17419_v30, 0.0  ;;  %v9271_v2 = vmax.f32 %v17423_v52, 0.0  ;;  %9326 = vst.msk [vmem:[%s18028_s7 + $0x30] sm:$0xff] %vm90_vm0, %v9262_v46  ;;  %9327 = vst.msk [vmem:[%s18028_s7 + $0x38] sm:$0xff] %vm90_vm0, %v9263_v63  ;;  %v9272_v28 = vmax.f32 %v17439_v6, 0.0 }
 0xc87   :  { %v9273_v27 = vmax.f32 %v17443_v29, 0.0  ;;  %v9274_v17 = vmax.f32 %v17447_v47, 0.0  ;;  %v9275_v0 = vmax.f32 %v17451_v34, 0.0  ;;  %9328 = vst.msk [vmem:[%s18028_s7 + $0x40] sm:$0xff] %vm90_vm0, %v9264_v41  ;;  %9329 = vst.msk [vmem:[%s18028_s7 + $0x48] sm:$0xff] %vm90_vm0, %v9265_v55  ;;  %v9276_v10 = vmax.f32 %v17464_v12, 0.0 }
 0xc88   :  { %9330 = vst.msk [vmem:[%s18028_s7 + $0x50] sm:$0xff] %vm90_vm0, %v9266_v42  ;;  %9331 = vst.msk [vmem:[%s18028_s7 + $0x58] sm:$0xff] %vm90_vm0, %v9267_v58  ;;  %v9277_v4 = vmax.f32 %v17468_v13, 0.0  ;;  %v9278_v60 = vmax.f32 %v17472_v36, 0.0  ;;  %v9279_v37 = vmax.f32 %v17476_v56, 0.0  ;;  %v9280_v30 = vmax.f32 %v17489_v22, 0.0 }
 0xc89   :  { %9332 = vst.msk [vmem:[%s18028_s7 + $0x60] sm:$0xff] %vm90_vm0, %v9268_v57  ;;  %9333 = vst.msk [vmem:[%s18028_s7 + $0x68] sm:$0xff] %vm90_vm0, %v9269_v59  ;;  %v9281_v52 = vmax.f32 %v17493_v32, 0.0  ;;  %v9282_v6 = vmax.f32 %v17497_v1, 0.0  ;;  %v9283_v29 = vmax.f32 %v17501_v35, 0.0  ;;  %v9284_v47 = vmax.f32 %v17514_v9, 0.0 }
 0xc8a   :  { %9334 = vst.msk [vmem:[%s18028_s7 + $0x70] sm:$0xff] %vm90_vm0, %v9270_v21  ;;  %9335 = vst.msk [vmem:[%s18028_s7 + $0x78] sm:$0xff] %vm90_vm0, %v9271_v2  ;;  %v9285_v34 = vmax.f32 %v17518_v62, 0.0  ;;  %v9286_v12 = vmax.f32 %v17522_v50, 0.0  ;;  %v18502_v13 = vld [vmem:[#allocation13_spill] sm:$0xff]  ;;  %v9288_v56 = vmax.f32 %v17539_v49, 0.0 }
 0xc8b   :  { %9336 = vst.msk [vmem:[%s18028_s7 + $0x80] sm:$0xff] %vm90_vm0, %v9272_v28  ;;  %9337 = vst.msk [vmem:[%s18028_s7 + $0x88] sm:$0xff] %vm90_vm0, %v9273_v27  ;;  %v9287_v36 = vmax.f32 %v18502_v13, 0.0  ;;  %v18503_v22 = vld [vmem:[#allocation10_spill] sm:$0xff]  ;;  %v18504_v1 = vld [vmem:[#allocation15_spill] sm:$0xff]  ;;  %v9293_v11 = vmax.f32 %v18507_v26, 0.0 }
 0xc8c   :  { %9338 = vst.msk [vmem:[%s18028_s7 + $0x90] sm:$0xff] %vm90_vm0, %v9274_v17  ;;  %9339 = vst.msk [vmem:[%s18028_s7 + $0x98] sm:$0xff] %vm90_vm0, %v9275_v0  ;;  %v9289_v32 = vmax.f32 %v18503_v22, 0.0  ;;  %v9290_v35 = vmax.f32 %v18504_v1, 0.0  ;;  %v18505_v9 = vld [vmem:[#allocation12_spill] sm:$0xff]  ;;  %v18506_v50 = vld [vmem:[#allocation17_spill] sm:$0xff] }
 0xc8d   :  { %9340 = vst.msk [vmem:[%s18028_s7 + $0xa0] sm:$0xff] %vm90_vm0, %v9276_v10  ;;  %9341 = vst.msk [vmem:[%s18028_s7 + $0xa8] sm:$0xff] %vm90_vm0, %v9277_v4  ;;  %v9291_v62 = vmax.f32 %v18505_v9, 0.0  ;;  %v9292_v49 = vmax.f32 %v18506_v50, 0.0  ;;  %v9294_v43 = vmax.f32 %v18508_v31, 0.0  ;;  %v9295_v54 = vmax.f32 %v18509_v45, 0.0 }
 0xc8e   :  { %9342 = vst.msk [vmem:[%s18028_s7 + $0xb0] sm:$0xff] %vm90_vm0, %v9278_v60  ;;  %9343 = vst.msk [vmem:[%s18028_s7 + $0xb8] sm:$0xff] %vm90_vm0, %v9279_v37  ;;  %v9296_v53 = vmax.f32 %v18510_v23, 0.0  ;;  %v9297_v61 = vmax.f32 %v18511_v48, 0.0  ;;  %v9298_v20 = vmax.f32 %v18512_v44, 0.0  ;;  %v18513_v46 = vld [vmem:[#allocation24_spill] sm:$0xff] }
 0xc8f   :  { %9344 = vst.msk [vmem:[%s18028_s7 + $0xc0] sm:$0xff] %vm90_vm0, %v9280_v30  ;;  %9345 = vst.msk [vmem:[%s18028_s7 + $0xc8] sm:$0xff] %vm90_vm0, %v9281_v52  ;;  %v9299_v63 = vmax.f32 %v18513_v46, 0.0  ;;  %v18514_v41 = vld [vmem:[#allocation23_spill] sm:$0xff]  ;;  %v18515_v42 = vld [vmem:[#allocation28_spill] sm:$0xff]  ;;  %v9304_v28 = vmax.f32 %v17639_v3, 0.0 }
 0xc90   :  { %9346 = vst.msk [vmem:[%s18028_s7 + $0xd0] sm:$0xff] %vm90_vm0, %v9282_v6  ;;  %9347 = vst.msk [vmem:[%s18028_s7 + $0xd8] sm:$0xff] %vm90_vm0, %v9283_v29  ;;  %v9300_v55 = vmax.f32 %v18514_v41, 0.0  ;;  %v9301_v58 = vmax.f32 %v18515_v42, 0.0  ;;  %v18516_v57 = vld [vmem:[#allocation25_spill] sm:$0xff]  ;;  %v9305_v27 = vmax.f32 %v17643_v39, 0.0 }
 0xc91   :  { %9348 = vst.msk [vmem:[%s18028_s7 + $0xe0] sm:$0xff] %vm90_vm0, %v9284_v47  ;;  %9349 = vst.msk [vmem:[%s18028_s7 + $0xe8] sm:$0xff] %vm90_vm0, %v9285_v34  ;;  %v9302_v59 = vmax.f32 %v18516_v57, 0.0  ;;  %v18517_v21 = vld [vmem:[#allocation29_spill] sm:$0xff]  ;;  %v9306_v17 = vmax.f32 %v17647_v25, 0.0  ;;  %v9307_v0 = vmax.f32 %v17651_v51, 0.0 }
 0xc92   :  { %9350 = vst.msk [vmem:[%s18028_s7 + $0xf0] sm:$0xff] %vm90_vm0, %v9286_v12  ;;  %9351 = vst.msk [vmem:[%s18028_s7 + $0xf8] sm:$0xff] %vm90_vm0, %v9287_v36  ;;  %v9303_v2 = vmax.f32 %v18517_v21, 0.0  ;;  %v9308_v51 = vmax.f32 %v17655_v8, 0.0  ;;  %v9309_v3 = vmax.f32 %v17659_v15, 0.0  ;;  %v9310_v39 = vmax.f32 %v17663_v38, 0.0 }
 0xc93   :  { %9352 = vst.msk [vmem:[%s18028_s7 + $0x100] sm:$0xff] %vm90_vm0, %v9288_v56  ;;  %9353 = vst.msk [vmem:[%s18028_s7 + $0x108] sm:$0xff] %vm90_vm0, %v9289_v32  ;;  %v9311_v25 = vmax.f32 %v17667_v7, 0.0  ;;  %v9312_v8 = vmax.f32 %v17671_v14, 0.0  ;;  %v9313_v15 = vmax.f32 %v17675_v24, 0.0  ;;  %v9314_v38 = vmax.f32 %v17679_v5, 0.0 }
 0xc94   :  { %9354 = vst.msk [vmem:[%s18028_s7 + $0x110] sm:$0xff] %vm90_vm0, %v9290_v35  ;;  %9355 = vst.msk [vmem:[%s18028_s7 + $0x118] sm:$0xff] %vm90_vm0, %v9291_v62  ;;  %v9315_v7 = vmax.f32 %v17683_v16, 0.0  ;;  %v9316_v14 = vmax.f32 %v17687_v33, 0.0  ;;  %v9317_v24 = vmax.f32 %v17691_v18, 0.0  ;;  %v9318_v5 = vmax.f32 %v17695_v19, 0.0 }
 0xc95   :  { %9356 = vst.msk [vmem:[%s18028_s7 + $0x120] sm:$0xff] %vm90_vm0, %v9292_v49  ;;  %9357 = vst.msk [vmem:[%s18028_s7 + $0x128] sm:$0xff] %vm90_vm0, %v9293_v11  ;;  %v9319_v16 = vmax.f32 %v17699_v40, 0.0 }
 0xc96   :  { %9358 = vst.msk [vmem:[%s18028_s7 + $0x130] sm:$0xff] %vm90_vm0, %v9294_v43  ;;  %9359 = vst.msk [vmem:[%s18028_s7 + $0x138] sm:$0xff] %vm90_vm0, %v9295_v54 }
 0xc97   :  { %9360 = vst.msk [vmem:[%s18028_s7 + $0x140] sm:$0xff] %vm90_vm0, %v9296_v53  ;;  %9361 = vst.msk [vmem:[%s18028_s7 + $0x148] sm:$0xff] %vm90_vm0, %v9297_v61 }
 0xc98   :  { %9362 = vst.msk [vmem:[%s18028_s7 + $0x150] sm:$0xff] %vm90_vm0, %v9298_v20  ;;  %9363 = vst.msk [vmem:[%s18028_s7 + $0x158] sm:$0xff] %vm90_vm0, %v9299_v63 }
 0xc99   :  { %9364 = vst.msk [vmem:[%s18028_s7 + $0x160] sm:$0xff] %vm90_vm0, %v9300_v55  ;;  %9365 = vst.msk [vmem:[%s18028_s7 + $0x168] sm:$0xff] %vm90_vm0, %v9301_v58 }
 0xc9a   :  { %9366 = vst.msk [vmem:[%s18028_s7 + $0x170] sm:$0xff] %vm90_vm0, %v9302_v59  ;;  %9367 = vst.msk [vmem:[%s18028_s7 + $0x178] sm:$0xff] %vm90_vm0, %v9303_v2 }
 0xc9b   :  { %9368 = vst.msk [vmem:[%s18028_s7 + $0x180] sm:$0xff] %vm90_vm0, %v9304_v28  ;;  %9369 = vst.msk [vmem:[%s18028_s7 + $0x188] sm:$0xff] %vm90_vm0, %v9305_v27 }
 0xc9c   :  { %9370 = vst.msk [vmem:[%s18028_s7 + $0x190] sm:$0xff] %vm90_vm0, %v9306_v17  ;;  %9371 = vst.msk [vmem:[%s18028_s7 + $0x198] sm:$0xff] %vm90_vm0, %v9307_v0 }
 0xc9d   :  { %9372 = vst.msk [vmem:[%s18028_s7 + $0x1a0] sm:$0xff] %vm90_vm0, %v9308_v51  ;;  %9373 = vst.msk [vmem:[%s18028_s7 + $0x1a8] sm:$0xff] %vm90_vm0, %v9309_v3 }
 0xc9e   :  { %9374 = vst.msk [vmem:[%s18028_s7 + $0x1b0] sm:$0xff] %vm90_vm0, %v9310_v39  ;;  %9375 = vst.msk [vmem:[%s18028_s7 + $0x1b8] sm:$0xff] %vm90_vm0, %v9311_v25 }
 0xc9f   :  { %9376 = vst.msk [vmem:[%s18028_s7 + $0x1c0] sm:$0xff] %vm90_vm0, %v9312_v8  ;;  %9377 = vst.msk [vmem:[%s18028_s7 + $0x1c8] sm:$0xff] %vm90_vm0, %v9313_v15 }
 0xca0   :  { %9378 = vst.msk [vmem:[%s18028_s7 + $0x1d0] sm:$0xff] %vm90_vm0, %v9314_v38  ;;  %9379 = vst.msk [vmem:[%s18028_s7 + $0x1d8] sm:$0xff] %vm90_vm0, %v9315_v7 }
 0xca1   :  { %9380 = vst.msk [vmem:[%s18028_s7 + $0x1e0] sm:$0xff] %vm90_vm0, %v9316_v14  ;;  %9381 = vst.msk [vmem:[%s18028_s7 + $0x1e8] sm:$0xff] %vm90_vm0, %v9317_v24 }
 0xca2   :  { %9382 = vst.msk [vmem:[%s18028_s7 + $0x1f0] sm:$0xff] %vm90_vm0, %v9318_v5  ;;  %9383 = vst.msk [vmem:[%s18028_s7 + $0x1f8] sm:$0xff] %vm90_vm0, %v9319_v16 }

</bundles_post_ra>
